<compile_context>
chip_gen: v7x
topology: tpu7x:2x2x1
jax: 0.10.0
libtpu: 0.0.40
codegen_flags: <defaults>
</compile_context>

<pallas_src>
import functools

import jax
import jax.numpy as jnp
from jax.experimental import pallas as pl
from jax.experimental.pallas import tpu as pltpu

_BN_EPS = 1e-5
_VMEM_LIMIT = 32 * 1024 * 1024  # safe on v5e/v6e (128 MiB phys) and v7x (64 MiB phys)


# ----------------------------- Pallas kernels ------------------------------ #

def _mm_bn_relu_kernel(x_ref, w_ref, sc_ref, sh_ref, o_ref):
    """o = relu((x @ w) * scale + shift); f32 accumulate/epilogue, bf16 store."""
    acc = jnp.dot(x_ref[...], w_ref[...], preferred_element_type=jnp.float32)
    acc = acc * sc_ref[...] + sh_ref[...]
    o_ref[...] = jnp.maximum(acc, 0.0).astype(o_ref.dtype)


def _ffc_conv_kernel(x_ref, t_ref, fu_ref, wl_ref, wg_ref, ws2_ref, sc_ref, sh_ref,
                     *rest, h, w, in_cl, has_residual):
    """Fused FFC block tail for one batch image.

    In-kernel im2col: 9 shifted windows of the reflect-padded VMEM tile (no HBM patches).
    Zero-free split:  local cols  = [all-channel taps] @ [l2l ; g2l]
                      global cols = [local-channel taps] @ l2g + (t + fu) @ st_conv2
    Epilogue: f32 eval-BN affine + ReLU (+ residual), bf16 store.
    """
    o_ref = rest[-1]
    x = x_ref[0]                                   # (h+2, w+2, cin) bf16, reflect-padded
    x_loc = x[:, :, :in_cl]
    x_glb = x[:, :, in_cl:]

    # K order: [9 local-channel taps | 9 global-channel taps], (kh, kw) major, channel minor.
    taps = []
    for part in (x_loc, x_glb):
        for kh in range(3):
            for kw in range(3):
                taps.append(part[kh:kh + h, kw:kw + w, :])
    p3 = jnp.concatenate(taps, axis=-1)            # (h, w, 9*cin) bf16
    p_all = p3.reshape(h * w, p3.shape[-1])        # layout-trivial collapse (h folds into sublanes)
    p_loc = p_all[:, : 9 * in_cl]

    acc_l = jnp.dot(p_all, wl_ref[...], preferred_element_type=jnp.float32)
    st_mid = (t_ref[...].astype(jnp.float32)
              + fu_ref[...].astype(jnp.float32)).astype(jnp.bfloat16)
    acc_g = jnp.dot(p_loc, wg_ref[...], preferred_element_type=jnp.float32)
    acc_g = acc_g + jnp.dot(st_mid, ws2_ref[...], preferred_element_type=jnp.float32)

    acc = jnp.concatenate([acc_l, acc_g], axis=-1)              # (h*w, cout) f32
    acc = jnp.maximum(acc * sc_ref[...] + sh_ref[...], 0.0)     # eval-BN + ReLU
    if has_residual:
        acc = acc + rest[0][...].astype(jnp.float32)            # FFCResnetBlock identity add
    o_ref[...] = acc.astype(o_ref.dtype)


# ------------------------------ kernel wrappers ----------------------------- #

def _cost(flops, bytes_accessed):
    return pl.CostEstimate(flops=int(flops), transcendentals=0,
                           bytes_accessed=int(bytes_accessed))


def mm_bn_relu(x, w, scale, shift):
    """M-tiled 1x1-conv matmul with fused eval-BN affine + ReLU.  bf16 in/out, f32 epilogue."""
    m, k = x.shape
    c = w.shape[1]
    tm = 256 if m >= 512 else 128           # multiple of 16 (bf16 sublanes); >=2 grid steps
    m_pad = -(-m // tm) * tm                # pad M up to a tile multiple (no full-extent fallback)
    x = x.astype(jnp.bfloat16)
    if m_pad != m:
        x = jnp.pad(x, ((0, m_pad - m), (0, 0)))
    out = pl.pallas_call(
        _mm_bn_relu_kernel,
        out_shape=jax.ShapeDtypeStruct((m_pad, c), jnp.bfloat16),
        grid_spec=pltpu.PrefetchScalarGridSpec(
            num_scalar_prefetch=0,
            grid=(m_pad // tm,),
            in_specs=[
                pl.BlockSpec((tm, k), lambda i: (i, 0)),
                pl.BlockSpec((k, c), lambda i: (0, 0)),
                pl.BlockSpec((1, c), lambda i: (0, 0)),
                pl.BlockSpec((1, c), lambda i: (0, 0)),
            ],
            out_specs=pl.BlockSpec((tm, c), lambda i: (i, 0)),
        ),
        compiler_params=pltpu.CompilerParams(
            dimension_semantics=("parallel",), vmem_limit_bytes=_VMEM_LIMIT),
        cost_estimate=_cost(2 * m_pad * k * c,
                            2 * (m_pad * k + k * c + m_pad * c) + 8 * c),
    )(x, w, scale, shift)
    return out[:m] if m_pad != m else out


def ffc_conv_fused(xpad, t, fu, w_loc, w_l2g, w_st2, scale, shift, residual, *, h, w, in_cl):
    """Fused FFC tail: in-kernel 3x3 im2col + local/global convs + SpectralTransform conv2
    + BN + ReLU (+ residual).  Grid over batch: one reflect-padded image tile per step."""
    n, _, _, cin = xpad.shape
    m_b = h * w
    out_cl = w_loc.shape[1]
    out_cg = w_l2g.shape[1]
    cg2 = w_st2.shape[0]
    cout = out_cl + out_cg
    has_residual = residual is not None

    in_specs = [
        pl.BlockSpec((1, h + 2, w + 2, cin), lambda b: (b, 0, 0, 0)),  # padded image tile
        pl.BlockSpec((m_b, cg2), lambda b: (b, 0)),                    # t (SpectralTransform conv1)
        pl.BlockSpec((m_b, cg2), lambda b: (b, 0)),                    # fu (FourierUnit output)
        pl.BlockSpec((9 * cin, out_cl), lambda b: (0, 0)),             # [l2l ; g2l] (resident)
        pl.BlockSpec((9 * in_cl, out_cg), lambda b: (0, 0)),           # l2g (no zero rows)
        pl.BlockSpec((cg2, out_cg), lambda b: (0, 0)),                 # SpectralTransform conv2
        pl.BlockSpec((1, cout), lambda b: (0, 0)),                     # BN scale
        pl.BlockSpec((1, cout), lambda b: (0, 0)),                     # BN shift
    ]
    args = [xpad, t, fu, w_loc, w_l2g, w_st2, scale, shift]
    if has_residual:
        in_specs.append(pl.BlockSpec((m_b, cout), lambda b: (b, 0)))
        args.append(residual)

    flops = 2 * n * m_b * (9 * cin * out_cl + 9 * in_cl * out_cg + cg2 * out_cg)
    bytes_acc = 2 * (n * (h + 2) * (w + 2) * cin + 2 * n * m_b * cg2 + n * m_b * cout
                     + 9 * cin * out_cl + 9 * in_cl * out_cg + cg2 * out_cg
                     + (n * m_b * cout if has_residual else 0)) + 8 * cout

    kernel = functools.partial(_ffc_conv_kernel, h=h, w=w, in_cl=in_cl,
                               has_residual=has_residual)
    return pl.pallas_call(
        kernel,
        out_shape=jax.ShapeDtypeStruct((n * m_b, cout), jnp.bfloat16),
        grid_spec=pltpu.PrefetchScalarGridSpec(
            num_scalar_prefetch=0,
            grid=(n,),
            in_specs=in_specs,
            out_specs=pl.BlockSpec((m_b, cout), lambda b: (b, 0)),
        ),
        compiler_params=pltpu.CompilerParams(
            dimension_semantics=("parallel",), vmem_limit_bytes=_VMEM_LIMIT),
        cost_estimate=_cost(flops, bytes_acc),
    )(*args)


# --------------------------- parameter construction ------------------------ #

def _init_ffc_bn_act(key, cin, cout):
    """One FFC_BN_ACT block (ratio_gin = ratio_gout = 0.5, enable_lfu = False)."""
    in_cl, in_cg = cin // 2, cin - cin // 2
    out_cl, out_cg = cout // 2, cout - cout // 2
    cg2 = out_cg // 2  # SpectralTransform hidden width
    ks = jax.random.split(key, 12)
    std = 0.1
    return {
        "w_l2l": std * jax.random.normal(ks[0], (3, 3, in_cl, out_cl), jnp.float32),
        "w_g2l": std * jax.random.normal(ks[1], (3, 3, in_cg, out_cl), jnp.float32),
        "w_l2g": std * jax.random.normal(ks[2], (3, 3, in_cl, out_cg), jnp.float32),
        "bn_l_g": 1.0 + 0.1 * jax.random.normal(ks[3], (out_cl,), jnp.float32),
        "bn_l_b": 0.1 * jax.random.normal(ks[4], (out_cl,), jnp.float32),
        "bn_g_g": 1.0 + 0.1 * jax.random.normal(ks[5], (out_cg,), jnp.float32),
        "bn_g_b": 0.1 * jax.random.normal(ks[6], (out_cg,), jnp.float32),
        "w_st1": std * jax.random.normal(ks[7], (in_cg, cg2), jnp.float32),
        "bn_st1_g": 1.0 + 0.1 * jax.random.normal(ks[8], (cg2,), jnp.float32),
        "bn_st1_b": jnp.zeros((cg2,), jnp.float32),
        "w_fu": std * jax.random.normal(ks[9], (2 * cg2, 2 * cg2), jnp.float32),
        "bn_fu_g": 1.0 + 0.1 * jax.random.normal(ks[10], (2 * cg2,), jnp.float32),
        "bn_fu_b": jnp.zeros((2 * cg2,), jnp.float32),
        "w_st2": std * jax.random.normal(ks[11], (cg2, out_cg), jnp.float32),
    }


def init_params(key, input_nc, output_nc):
    k1, k2, k3, k4 = jax.random.split(key, 4)
    return {
        "initial": _init_ffc_bn_act(k1, input_nc, input_nc),
        "rb_conv1": _init_ffc_bn_act(k2, input_nc, input_nc),
        "rb_conv2": _init_ffc_bn_act(k3, input_nc, input_nc),
        "final": _init_ffc_bn_act(k4, input_nc, output_nc),
    }


def _bn_fold(gamma, beta):
    # eval-mode BN with running_mean = 0, running_var = 1 (reconstruction assumption)
    return gamma / jnp.sqrt(1.0 + _BN_EPS), beta


def _prepare_block(p):
    """Fold BN, flatten/pack conv weights (no structural zeros), cast to bf16.  Runs once."""
    in_cl = p["w_l2l"].shape[2]
    in_cg = p["w_g2l"].shape[2]
    out_cl = p["w_l2l"].shape[3]
    out_cg = p["w_l2g"].shape[3]

    # Row order matches the in-kernel im2col: (kh, kw) tap-major, channel minor,
    # local channels first then global channels.
    w_loc = jnp.concatenate([p["w_l2l"].reshape(9 * in_cl, out_cl),
                             p["w_g2l"].reshape(9 * in_cg, out_cl)], axis=0)
    w_l2g = p["w_l2g"].reshape(9 * in_cl, out_cg)

    sc_l, sh_l = _bn_fold(p["bn_l_g"], p["bn_l_b"])
    sc_g, sh_g = _bn_fold(p["bn_g_g"], p["bn_g_b"])
    sc_s1, sh_s1 = _bn_fold(p["bn_st1_g"], p["bn_st1_b"])
    sc_fu, sh_fu = _bn_fold(p["bn_fu_g"], p["bn_fu_b"])

    return {
        "w_loc": w_loc.astype(jnp.bfloat16),
        "w_l2g": w_l2g.astype(jnp.bfloat16),
        "w_st2": p["w_st2"].astype(jnp.bfloat16),
        "conv_scale": jnp.concatenate([sc_l, sc_g]).reshape(1, -1).astype(jnp.float32),
        "conv_shift": jnp.concatenate([sh_l, sh_g]).reshape(1, -1).astype(jnp.float32),
        "w_st1": p["w_st1"].astype(jnp.bfloat16),
        "st1_scale": sc_s1.reshape(1, -1).astype(jnp.float32),
        "st1_shift": sh_s1.reshape(1, -1).astype(jnp.float32),
        # FourierUnit 1x1 conv uses channel order [all real | all imag]; the interleave is a
        # one-time weight-layout convention (weights are random-init), not a per-forward shuffle.
        "w_fu": p["w_fu"].astype(jnp.bfloat16),
        "fu_scale": sc_fu.reshape(1, -1).astype(jnp.float32),
        "fu_shift": sh_fu.reshape(1, -1).astype(jnp.float32),
    }


def prepare_params(params):
    return {name: _prepare_block(p) for name, p in params.items()}


# -------------------------------- forward ---------------------------------- #

def _ffc_bn_act(prep, x_cat, residual=None):
    """One FFC_BN_ACT block on the concatenated [local | global] NHWC bf16 tensor."""
    n, h, w, cin = x_cat.shape
    m = n * h * w
    in_cg = prep["w_st1"].shape[0]
    in_cl = cin - in_cg
    cg2 = prep["w_st1"].shape[1]
    cout = prep["conv_scale"].shape[1]

    x_cat = x_cat.astype(jnp.bfloat16)

    # ----- SpectralTransform conv1 + BN + ReLU (global branch) -----
    x_g = x_cat[..., in_cl:].reshape(m, in_cg)
    t = mm_bn_relu(x_g, prep["w_st1"], prep["st1_scale"], prep["st1_shift"])      # (m, cg2) bf16

    # ----- FourierUnit: rfft2 -> 1x1 conv + BN + ReLU (Pallas) -> irfft2 -----
    # TODO(synk): torch.fft.rfftn/irfftn have no Pallas TPU primitive; FFTs stay as XLA ops.
    t4 = t.reshape(n, h, w, cg2).astype(jnp.float32)
    z = jnp.fft.rfft2(t4, axes=(1, 2), norm="ortho")                              # (n, h, wh, cg2)
    wh = z.shape[2]
    zr = jnp.concatenate([z.real, z.imag], axis=-1).reshape(n * h * wh, 2 * cg2)
    u = mm_bn_relu(zr, prep["w_fu"], prep["fu_scale"], prep["fu_shift"])          # bf16
    u = u.reshape(n, h, wh, 2 * cg2)
    u_c = u[..., :cg2].astype(jnp.float32) + 1j * u[..., cg2:].astype(jnp.float32)
    fu = jnp.fft.irfft2(u_c, s=(h, w), axes=(1, 2), norm="ortho")
    fu = fu.reshape(m, cg2).astype(jnp.bfloat16)

    # ----- fused 3x3 convs + SpectralTransform conv2 + BN + ReLU (+ residual) -----
    xp = jnp.pad(x_cat, ((0, 0), (1, 1), (1, 1), (0, 0)), mode="reflect")         # bf16, ~1.3x bytes
    res2 = residual.reshape(m, cout).astype(jnp.bfloat16) if residual is not None else None
    y = ffc_conv_fused(xp, t, fu, prep["w_loc"], prep["w_l2g"], prep["w_st2"],
                       prep["conv_scale"], prep["conv_shift"], res2,
                       h=h, w=w, in_cl=in_cl)
    return y.reshape(n, h, w, cout)


def my_ffc_resblock(prep, x_nchw):
    """Forward of myFFCResblock.  x_nchw: (N, C, H, W) -> (N, output_nc, H, W)."""
    x = jnp.transpose(x_nchw, (0, 2, 3, 1)).astype(jnp.bfloat16)   # NCHW -> NHWC [local|global]
    x = _ffc_bn_act(prep["initial"], x)
    # the SAME FFCResnetBlock module is applied twice in the reference forward
    for _ in range(2):
        identity = x
        x = _ffc_bn_act(prep["rb_conv1"], x)
        x = _ffc_bn_act(prep["rb_conv2"], x, residual=identity)    # identity add fused post-ReLU
    # torch.cat([x_l, x_g], 1) + `final` (re-split at same boundary) == feed concatenated tensor
    x = _ffc_bn_act(prep["final"], x)
    return jnp.transpose(x, (0, 3, 1, 2)).astype(jnp.float32)      # back to NCHW, f32 interface


# ---------------------------------- main ------------------------------------ #

if __name__ == "__main__":
    key = jax.random.PRNGKey(0)
    pkey, xkey = jax.random.split(key)

    N, C, H, W = 2, 8, 16, 16          # input_nc = output_nc = 8
    params = init_params(pkey, C, C)
    prep = prepare_params(params)      # fold BN, pack weights, cast bf16 -- once
    x = jax.random.normal(xkey, (N, C, H, W), jnp.float32)

    fwd = jax.jit(my_ffc_resblock)
    out = fwd(prep, x)
    jax.block_until_ready(out)
    assert out.shape == (N, C, H, W), out.shape
    assert bool(jnp.all(jnp.isfinite(out)))
    print("KERNEL_OK")
</pallas_src>

<mosaic_0001>
module attributes {stable_mosaic.version = 11 : i64} {
  func.func @_mm_bn_relu_kernel(%arg0: i32, %arg1: memref<256x4xbf16, #tpu.memory_space<vmem>>, %arg2: memref<4x2xbf16, #tpu.memory_space<vmem>>, %arg3: memref<1x2xf32, #tpu.memory_space<vmem>>, %arg4: memref<1x2xf32, #tpu.memory_space<vmem>>, %arg5: memref<256x2xbf16, #tpu.memory_space<vmem>>) attributes {dimension_semantics = [#tpu.dimension_semantics<parallel>], iteration_bounds = array<i64: 2>, scalar_prefetch = 0 : i64, scratch_operands = 0 : i64, tpu.core_type = #tpu.core_type<tc>, window_params = [{transform_indices = @transform_0, window_bounds = array<i64: 256, 4>}, {pipeline_mode = #tpu.pipeline_mode<synchronous>, transform_indices = @transform_1, window_bounds = array<i64: 4, 2>}, {pipeline_mode = #tpu.pipeline_mode<synchronous>, transform_indices = @transform_2, window_bounds = array<i64: 1, 2>}, {pipeline_mode = #tpu.pipeline_mode<synchronous>, transform_indices = @transform_3, window_bounds = array<i64: 1, 2>}, {transform_indices = @transform_4, window_bounds = array<i64: 256, 2>}]} {
    %c0 = arith.constant 0 : index
    %c0_0 = arith.constant 0 : index
    %0 = vector.load %arg1[%c0, %c0_0] : memref<256x4xbf16, #tpu.memory_space<vmem>>, vector<256x4xbf16>
    %c0_1 = arith.constant 0 : index
    %c0_2 = arith.constant 0 : index
    %1 = vector.load %arg2[%c0_1, %c0_2] : memref<4x2xbf16, #tpu.memory_space<vmem>>, vector<4x2xbf16>
    %cst = arith.constant dense<0.000000e+00> : vector<256x2xf32>
    %2 = tpu.matmul %0, %1, %cst {dimension_numbers = #tpu.dot_dimension_numbers<[1], [0], [0], [1], [0, 0, 1, 1], [], []>} : vector<256x4xbf16>, vector<4x2xbf16>, vector<256x2xf32> -> vector<256x2xf32>
    %c0_3 = arith.constant 0 : index
    %c0_4 = arith.constant 0 : index
    %3 = vector.load %arg3[%c0_3, %c0_4] : memref<1x2xf32, #tpu.memory_space<vmem>>, vector<1x2xf32>
    %4 = vector.broadcast %3 : vector<1x2xf32> to vector<256x2xf32>
    %5 = arith.mulf %2, %4 : vector<256x2xf32>
    %c0_5 = arith.constant 0 : index
    %c0_6 = arith.constant 0 : index
    %6 = vector.load %arg4[%c0_5, %c0_6] : memref<1x2xf32, #tpu.memory_space<vmem>>, vector<1x2xf32>
    %7 = vector.broadcast %6 : vector<1x2xf32> to vector<256x2xf32>
    %8 = arith.addf %5, %7 : vector<256x2xf32>
    %cst_7 = arith.constant 0.000000e+00 : f32
    %9 = vector.broadcast %cst_7 : f32 to vector<256x2xf32>
    %10 = arith.maximumf %8, %9 : vector<256x2xf32>
    %11 = arith.truncf %10 : vector<256x2xf32> to vector<256x2xbf16>
    %c0_8 = arith.constant 0 : index
    %c0_9 = arith.constant 0 : index
    %12 = vector.load %arg5[%c0_8, %c0_9] : memref<256x2xbf16, #tpu.memory_space<vmem>>, vector<256x2xbf16>
    tpu.vector_store %arg5[%c0_8, %c0_9], %11 {strides = array<i32>} : memref<256x2xbf16, #tpu.memory_space<vmem>>, vector<256x2xbf16>,
    return
  }
  func.func @transform_0(%arg0: i32) -> (i32, i32) {
    %c0_i32 = arith.constant 0 : i32
    %c0_i32_0 = arith.constant 0 : i32
    return %arg0, %c0_i32 : i32, i32
  }
  func.func @transform_1(%arg0: i32) -> (i32, i32) {
    %c0_i32 = arith.constant 0 : i32
    %c0_i32_0 = arith.constant 0 : i32
    %c0_i32_1 = arith.constant 0 : i32
    return %c0_i32, %c0_i32_0 : i32, i32
  }
  func.func @transform_2(%arg0: i32) -> (i32, i32) {
    %c0_i32 = arith.constant 0 : i32
    %c0_i32_0 = arith.constant 0 : i32
    %c0_i32_1 = arith.constant 0 : i32
    return %c0_i32, %c0_i32_0 : i32, i32
  }
  func.func @transform_3(%arg0: i32) -> (i32, i32) {
    %c0_i32 = arith.constant 0 : i32
    %c0_i32_0 = arith.constant 0 : i32
    %c0_i32_1 = arith.constant 0 : i32
    return %c0_i32, %c0_i32_0 : i32, i32
  }
  func.func @transform_4(%arg0: i32) -> (i32, i32) {
    %c0_i32 = arith.constant 0 : i32
    %c0_i32_0 = arith.constant 0 : i32
    return %arg0, %c0_i32 : i32, i32
  }
}

module attributes {stable_mosaic.version = 11 : i64} {
  func.func @_mm_bn_relu_kernel(%arg0: i32, %arg1: memref<128x4xbf16, #tpu.memory_space<vmem>>, %arg2: memref<4x4xbf16, #tpu.memory_space<vmem>>, %arg3: memref<1x4xf32, #tpu.memory_space<vmem>>, %arg4: memref<1x4xf32, #tpu.memory_space<vmem>>, %arg5: memref<128x4xbf16, #tpu.memory_space<vmem>>) attributes {dimension_semantics = [#tpu.dimension_semantics<parallel>], iteration_bounds = array<i64: 3>, scalar_prefetch = 0 : i64, scratch_operands = 0 : i64, tpu.core_type = #tpu.core_type<tc>, window_params = [{transform_indices = @transform_0, window_bounds = array<i64: 128, 4>}, {pipeline_mode = #tpu.pipeline_mode<synchronous>, transform_indices = @transform_1, window_bounds = array<i64: 4, 4>}, {pipeline_mode = #tpu.pipeline_mode<synchronous>, transform_indices = @transform_2, window_bounds = array<i64: 1, 4>}, {pipeline_mode = #tpu.pipeline_mode<synchronous>, transform_indices = @transform_3, window_bounds = array<i64: 1, 4>}, {transform_indices = @transform_4, window_bounds = array<i64: 128, 4>}]} {
    %c0 = arith.constant 0 : index
    %c0_0 = arith.constant 0 : index
    %0 = vector.load %arg1[%c0, %c0_0] : memref<128x4xbf16, #tpu.memory_space<vmem>>, vector<128x4xbf16>
    %c0_1 = arith.constant 0 : index
    %c0_2 = arith.constant 0 : index
    %1 = vector.load %arg2[%c0_1, %c0_2] : memref<4x4xbf16, #tpu.memory_space<vmem>>, vector<4x4xbf16>
    %cst = arith.constant dense<0.000000e+00> : vector<128x4xf32>
    %2 = tpu.matmul %0, %1, %cst {dimension_numbers = #tpu.dot_dimension_numbers<[1], [0], [0], [1], [0, 0, 1, 1], [], []>} : vector<128x4xbf16>, vector<4x4xbf16>, vector<128x4xf32> -> vector<128x4xf32>
    %c0_3 = arith.constant 0 : index
    %c0_4 = arith.constant 0 : index
    %3 = vector.load %arg3[%c0_3, %c0_4] : memref<1x4xf32, #tpu.memory_space<vmem>>, vector<1x4xf32>
    %4 = vector.broadcast %3 : vector<1x4xf32> to vector<128x4xf32>
    %5 = arith.mulf %2, %4 : vector<128x4xf32>
    %c0_5 = arith.constant 0 : index
    %c0_6 = arith.constant 0 : index
    %6 = vector.load %arg4[%c0_5, %c0_6] : memref<1x4xf32, #tpu.memory_space<vmem>>, vector<1x4xf32>
    %7 = vector.broadcast %6 : vector<1x4xf32> to vector<128x4xf32>
    %8 = arith.addf %5, %7 : vector<128x4xf32>
    %cst_7 = arith.constant 0.000000e+00 : f32
    %9 = vector.broadcast %cst_7 : f32 to vector<128x4xf32>
    %10 = arith.maximumf %8, %9 : vector<128x4xf32>
    %11 = arith.truncf %10 : vector<128x4xf32> to vector<128x4xbf16>
    %c0_8 = arith.constant 0 : index
    %c0_9 = arith.constant 0 : index
    %12 = vector.load %arg5[%c0_8, %c0_9] : memref<128x4xbf16, #tpu.memory_space<vmem>>, vector<128x4xbf16>
    tpu.vector_store %arg5[%c0_8, %c0_9], %11 {strides = array<i32>} : memref<128x4xbf16, #tpu.memory_space<vmem>>, vector<128x4xbf16>,
    return
  }
  func.func @transform_0(%arg0: i32) -> (i32, i32) {
    %c0_i32 = arith.constant 0 : i32
    %c0_i32_0 = arith.constant 0 : i32
    return %arg0, %c0_i32 : i32, i32
  }
  func.func @transform_1(%arg0: i32) -> (i32, i32) {
    %c0_i32 = arith.constant 0 : i32
    %c0_i32_0 = arith.constant 0 : i32
    %c0_i32_1 = arith.constant 0 : i32
    return %c0_i32, %c0_i32_0 : i32, i32
  }
  func.func @transform_2(%arg0: i32) -> (i32, i32) {
    %c0_i32 = arith.constant 0 : i32
    %c0_i32_0 = arith.constant 0 : i32
    %c0_i32_1 = arith.constant 0 : i32
    return %c0_i32, %c0_i32_0 : i32, i32
  }
  func.func @transform_3(%arg0: i32) -> (i32, i32) {
    %c0_i32 = arith.constant 0 : i32
    %c0_i32_0 = arith.constant 0 : i32
    %c0_i32_1 = arith.constant 0 : i32
    return %c0_i32, %c0_i32_0 : i32, i32
  }
  func.func @transform_4(%arg0: i32) -> (i32, i32) {
    %c0_i32 = arith.constant 0 : i32
    %c0_i32_0 = arith.constant 0 : i32
    return %arg0, %c0_i32 : i32, i32
  }
}

module attributes {stable_mosaic.version = 11 : i64} {
  func.func @_ffc_conv_kernel(%arg0: i32, %arg1: memref<1x18x18x8xbf16, #tpu.memory_space<vmem>>, %arg2: memref<256x2xbf16, #tpu.memory_space<vmem>>, %arg3: memref<256x2xbf16, #tpu.memory_space<vmem>>, %arg4: memref<72x4xbf16, #tpu.memory_space<vmem>>, %arg5: memref<36x4xbf16, #tpu.memory_space<vmem>>, %arg6: memref<2x4xbf16, #tpu.memory_space<vmem>>, %arg7: memref<1x8xf32, #tpu.memory_space<vmem>>, %arg8: memref<1x8xf32, #tpu.memory_space<vmem>>, %arg9: memref<256x8xbf16, #tpu.memory_space<vmem>>, %arg10: memref<256x8xbf16, #tpu.memory_space<vmem>>) attributes {dimension_semantics = [#tpu.dimension_semantics<parallel>], iteration_bounds = array<i64: 2>, scalar_prefetch = 0 : i64, scratch_operands = 0 : i64, tpu.core_type = #tpu.core_type<tc>, window_params = [{transform_indices = @transform_0, window_bounds = array<i64: 1, 18, 18, 8>}, {transform_indices = @transform_1, window_bounds = array<i64: 256, 2>}, {transform_indices = @transform_2, window_bounds = array<i64: 256, 2>}, {pipeline_mode = #tpu.pipeline_mode<synchronous>, transform_indices = @transform_3, window_bounds = array<i64: 72, 4>}, {pipeline_mode = #tpu.pipeline_mode<synchronous>, transform_indices = @transform_4, window_bounds = array<i64: 36, 4>}, {pipeline_mode = #tpu.pipeline_mode<synchronous>, transform_indices = @transform_5, window_bounds = array<i64: 2, 4>}, {pipeline_mode = #tpu.pipeline_mode<synchronous>, transform_indices = @transform_6, window_bounds = array<i64: 1, 8>}, {pipeline_mode = #tpu.pipeline_mode<synchronous>, transform_indices = @transform_7, window_bounds = array<i64: 1, 8>}, {transform_indices = @transform_8, window_bounds = array<i64: 256, 8>}, {transform_indices = @transform_9, window_bounds = array<i64: 256, 8>}]} {
    %c0 = arith.constant 0 : index
    %c0_0 = arith.constant 0 : index
    %c0_1 = arith.constant 0 : index
    %c0_2 = arith.constant 0 : index
    %0 = vector.load %arg1[%c0, %c0_0, %c0_1, %c0_2] : memref<1x18x18x8xbf16, #tpu.memory_space<vmem>>, vector<1x18x18x8xbf16>
    %1 = vector.shape_cast %0 : vector<1x18x18x8xbf16> to vector<18x18x8xbf16>
    %2 = vector.extract_strided_slice %1 {offsets = [0, 0, 0], sizes = [18, 18, 4], strides = [1, 1, 1]} : vector<18x18x8xbf16> to vector<18x18x4xbf16>
    %3 = vector.extract_strided_slice %1 {offsets = [0, 0, 4], sizes = [18, 18, 4], strides = [1, 1, 1]} : vector<18x18x8xbf16> to vector<18x18x4xbf16>
    %4 = vector.extract_strided_slice %2 {offsets = [0, 0, 0], sizes = [16, 16, 4], strides = [1, 1, 1]} : vector<18x18x4xbf16> to vector<16x16x4xbf16>
    %5 = vector.extract_strided_slice %2 {offsets = [0, 1, 0], sizes = [16, 16, 4], strides = [1, 1, 1]} : vector<18x18x4xbf16> to vector<16x16x4xbf16>
    %6 = vector.extract_strided_slice %2 {offsets = [0, 2, 0], sizes = [16, 16, 4], strides = [1, 1, 1]} : vector<18x18x4xbf16> to vector<16x16x4xbf16>
    %7 = vector.extract_strided_slice %2 {offsets = [1, 0, 0], sizes = [16, 16, 4], strides = [1, 1, 1]} : vector<18x18x4xbf16> to vector<16x16x4xbf16>
    %8 = vector.extract_strided_slice %2 {offsets = [1, 1, 0], sizes = [16, 16, 4], strides = [1, 1, 1]} : vector<18x18x4xbf16> to vector<16x16x4xbf16>
    %9 = vector.extract_strided_slice %2 {offsets = [1, 2, 0], sizes = [16, 16, 4], strides = [1, 1, 1]} : vector<18x18x4xbf16> to vector<16x16x4xbf16>
    %10 = vector.extract_strided_slice %2 {offsets = [2, 0, 0], sizes = [16, 16, 4], strides = [1, 1, 1]} : vector<18x18x4xbf16> to vector<16x16x4xbf16>
    %11 = vector.extract_strided_slice %2 {offsets = [2, 1, 0], sizes = [16, 16, 4], strides = [1, 1, 1]} : vector<18x18x4xbf16> to vector<16x16x4xbf16>
    %12 = vector.extract_strided_slice %2 {offsets = [2, 2, 0], sizes = [16, 16, 4], strides = [1, 1, 1]} : vector<18x18x4xbf16> to vector<16x16x4xbf16>
    %13 = vector.extract_strided_slice %3 {offsets = [0, 0, 0], sizes = [16, 16, 4], strides = [1, 1, 1]} : vector<18x18x4xbf16> to vector<16x16x4xbf16>
    %14 = vector.extract_strided_slice %3 {offsets = [0, 1, 0], sizes = [16, 16, 4], strides = [1, 1, 1]} : vector<18x18x4xbf16> to vector<16x16x4xbf16>
    %15 = vector.extract_strided_slice %3 {offsets = [0, 2, 0], sizes = [16, 16, 4], strides = [1, 1, 1]} : vector<18x18x4xbf16> to vector<16x16x4xbf16>
    %16 = vector.extract_strided_slice %3 {offsets = [1, 0, 0], sizes = [16, 16, 4], strides = [1, 1, 1]} : vector<18x18x4xbf16> to vector<16x16x4xbf16>
    %17 = vector.extract_strided_slice %3 {offsets = [1, 1, 0], sizes = [16, 16, 4], strides = [1, 1, 1]} : vector<18x18x4xbf16> to vector<16x16x4xbf16>
    %18 = vector.extract_strided_slice %3 {offsets = [1, 2, 0], sizes = [16, 16, 4], strides = [1, 1, 1]} : vector<18x18x4xbf16> to vector<16x16x4xbf16>
    %19 = vector.extract_strided_slice %3 {offsets = [2, 0, 0], sizes = [16, 16, 4], strides = [1, 1, 1]} : vector<18x18x4xbf16> to vector<16x16x4xbf16>
    %20 = vector.extract_strided_slice %3 {offsets = [2, 1, 0], sizes = [16, 16, 4], strides = [1, 1, 1]} : vector<18x18x4xbf16> to vector<16x16x4xbf16>
    %21 = vector.extract_strided_slice %3 {offsets = [2, 2, 0], sizes = [16, 16, 4], strides = [1, 1, 1]} : vector<18x18x4xbf16> to vector<16x16x4xbf16>
    %22 = tpu.concatenate %4, %5, %6, %7, %8, %9, %10, %11, %12, %13, %14, %15, %16, %17, %18, %19 in 2 : vector<16x16x4xbf16>, vector<16x16x4xbf16>, vector<16x16x4xbf16>, vector<16x16x4xbf16>, vector<16x16x4xbf16>, vector<16x16x4xbf16>, vector<16x16x4xbf16>, vector<16x16x4xbf16>, vector<16x16x4xbf16>, vector<16x16x4xbf16>, vector<16x16x4xbf16>, vector<16x16x4xbf16>, vector<16x16x4xbf16>, vector<16x16x4xbf16>, vector<16x16x4xbf16>, vector<16x16x4xbf16> -> vector<16x16x64xbf16>
    %23 = tpu.concatenate %20, %21 in 2 : vector<16x16x4xbf16>, vector<16x16x4xbf16> -> vector<16x16x8xbf16>
    %24 = tpu.concatenate %22, %23 in 2 : vector<16x16x64xbf16>, vector<16x16x8xbf16> -> vector<16x16x72xbf16>
    %25 = vector.shape_cast %24 : vector<16x16x72xbf16> to vector<256x72xbf16>
    %26 = vector.extract_strided_slice %25 {offsets = [0, 0], sizes = [256, 36], strides = [1, 1]} : vector<256x72xbf16> to vector<256x36xbf16>
    %c0_3 = arith.constant 0 : index
    %c0_4 = arith.constant 0 : index
    %27 = vector.load %arg4[%c0_3, %c0_4] : memref<72x4xbf16, #tpu.memory_space<vmem>>, vector<72x4xbf16>
    %cst = arith.constant dense<0.000000e+00> : vector<256x4xf32>
    %28 = tpu.matmul %25, %27, %cst {dimension_numbers = #tpu.dot_dimension_numbers<[1], [0], [0], [1], [0, 0, 1, 1], [], []>} : vector<256x72xbf16>, vector<72x4xbf16>, vector<256x4xf32> -> vector<256x4xf32>
    %c0_5 = arith.constant 0 : index
    %c0_6 = arith.constant 0 : index
    %29 = vector.load %arg2[%c0_5, %c0_6] : memref<256x2xbf16, #tpu.memory_space<vmem>>, vector<256x2xbf16>
    %30 = arith.extf %29 : vector<256x2xbf16> to vector<256x2xf32>
    %c0_7 = arith.constant 0 : index
    %c0_8 = arith.constant 0 : index
    %31 = vector.load %arg3[%c0_7, %c0_8] : memref<256x2xbf16, #tpu.memory_space<vmem>>, vector<256x2xbf16>
    %32 = arith.extf %31 : vector<256x2xbf16> to vector<256x2xf32>
    %33 = arith.addf %30, %32 : vector<256x2xf32>
    %34 = arith.truncf %33 : vector<256x2xf32> to vector<256x2xbf16>
    %c0_9 = arith.constant 0 : index
    %c0_10 = arith.constant 0 : index
    %35 = vector.load %arg5[%c0_9, %c0_10] : memref<36x4xbf16, #tpu.memory_space<vmem>>, vector<36x4xbf16>
    %cst_11 = arith.constant dense<0.000000e+00> : vector<256x4xf32>
    %36 = tpu.matmul %26, %35, %cst_11 {dimension_numbers = #tpu.dot_dimension_numbers<[1], [0], [0], [1], [0, 0, 1, 1], [], []>} : vector<256x36xbf16>, vector<36x4xbf16>, vector<256x4xf32> -> vector<256x4xf32>
    %c0_12 = arith.constant 0 : index
    %c0_13 = arith.constant 0 : index
    %37 = vector.load %arg6[%c0_12, %c0_13] : memref<2x4xbf16, #tpu.memory_space<vmem>>, vector<2x4xbf16>
    %cst_14 = arith.constant dense<0.000000e+00> : vector<256x4xf32>
    %38 = tpu.matmul %34, %37, %cst_14 {dimension_numbers = #tpu.dot_dimension_numbers<[1], [0], [0], [1], [0, 0, 1, 1], [], []>} : vector<256x2xbf16>, vector<2x4xbf16>, vector<256x4xf32> -> vector<256x4xf32>
    %39 = arith.addf %36, %38 : vector<256x4xf32>
    %40 = tpu.concatenate %28, %39 in 1 : vector<256x4xf32>, vector<256x4xf32> -> vector<256x8xf32>
    %c0_15 = arith.constant 0 : index
    %c0_16 = arith.constant 0 : index
    %41 = vector.load %arg7[%c0_15, %c0_16] : memref<1x8xf32, #tpu.memory_space<vmem>>, vector<1x8xf32>
    %42 = vector.broadcast %41 : vector<1x8xf32> to vector<256x8xf32>
    %43 = arith.mulf %40, %42 : vector<256x8xf32>
    %c0_17 = arith.constant 0 : index
    %c0_18 = arith.constant 0 : index
    %44 = vector.load %arg8[%c0_17, %c0_18] : memref<1x8xf32, #tpu.memory_space<vmem>>, vector<1x8xf32>
    %45 = vector.broadcast %44 : vector<1x8xf32> to vector<256x8xf32>
    %46 = arith.addf %43, %45 : vector<256x8xf32>
    %cst_19 = arith.constant 0.000000e+00 : f32
    %47 = vector.broadcast %cst_19 : f32 to vector<256x8xf32>
    %48 = arith.maximumf %46, %47 : vector<256x8xf32>
    %c0_20 = arith.constant 0 : index
    %c0_21 = arith.constant 0 : index
    %49 = vector.load %arg9[%c0_20, %c0_21] : memref<256x8xbf16, #tpu.memory_space<vmem>>, vector<256x8xbf16>
    %50 = arith.extf %49 : vector<256x8xbf16> to vector<256x8xf32>
    %51 = arith.addf %48, %50 : vector<256x8xf32>
    %52 = arith.truncf %51 : vector<256x8xf32> to vector<256x8xbf16>
    %c0_22 = arith.constant 0 : index
    %c0_23 = arith.constant 0 : index
    %53 = vector.load %arg10[%c0_22, %c0_23] : memref<256x8xbf16, #tpu.memory_space<vmem>>, vector<256x8xbf16>
    tpu.vector_store %arg10[%c0_22, %c0_23], %52 {strides = array<i32>} : memref<256x8xbf16, #tpu.memory_space<vmem>>, vector<256x8xbf16>,
    return
  }
  func.func @transform_0(%arg0: i32) -> (i32, i32, i32, i32) {
    %c0_i32 = arith.constant 0 : i32
    %c0_i32_0 = arith.constant 0 : i32
    %c0_i32_1 = arith.constant 0 : i32
    %c0_i32_2 = arith.constant 0 : i32
    return %arg0, %c0_i32, %c0_i32_0, %c0_i32_1 : i32, i32, i32, i32
  }
  func.func @transform_1(%arg0: i32) -> (i32, i32) {
    %c0_i32 = arith.constant 0 : i32
    %c0_i32_0 = arith.constant 0 : i32
    return %arg0, %c0_i32 : i32, i32
  }
  func.func @transform_2(%arg0: i32) -> (i32, i32) {
    %c0_i32 = arith.constant 0 : i32
    %c0_i32_0 = arith.constant 0 : i32
    return %arg0, %c0_i32 : i32, i32
  }
  func.func @transform_3(%arg0: i32) -> (i32, i32) {
    %c0_i32 = arith.constant 0 : i32
    %c0_i32_0 = arith.constant 0 : i32
    %c0_i32_1 = arith.constant 0 : i32
    return %c0_i32, %c0_i32_0 : i32, i32
  }
  func.func @transform_4(%arg0: i32) -> (i32, i32) {
    %c0_i32 = arith.constant 0 : i32
    %c0_i32_0 = arith.constant 0 : i32
    %c0_i32_1 = arith.constant 0 : i32
    return %c0_i32, %c0_i32_0 : i32, i32
  }
  func.func @transform_5(%arg0: i32) -> (i32, i32) {
    %c0_i32 = arith.constant 0 : i32
    %c0_i32_0 = arith.constant 0 : i32
    %c0_i32_1 = arith.constant 0 : i32
    return %c0_i32, %c0_i32_0 : i32, i32
  }
  func.func @transform_6(%arg0: i32) -> (i32, i32) {
    %c0_i32 = arith.constant 0 : i32
    %c0_i32_0 = arith.constant 0 : i32
    %c0_i32_1 = arith.constant 0 : i32
    return %c0_i32, %c0_i32_0 : i32, i32
  }
  func.func @transform_7(%arg0: i32) -> (i32, i32) {
    %c0_i32 = arith.constant 0 : i32
    %c0_i32_0 = arith.constant 0 : i32
    %c0_i32_1 = arith.constant 0 : i32
    return %c0_i32, %c0_i32_0 : i32, i32
  }
  func.func @transform_8(%arg0: i32) -> (i32, i32) {
    %c0_i32 = arith.constant 0 : i32
    %c0_i32_0 = arith.constant 0 : i32
    return %arg0, %c0_i32 : i32, i32
  }
  func.func @transform_9(%arg0: i32) -> (i32, i32) {
    %c0_i32 = arith.constant 0 : i32
    %c0_i32_0 = arith.constant 0 : i32
    return %arg0, %c0_i32 : i32, i32
  }
}

module attributes {stable_mosaic.version = 11 : i64} {
  func.func @_ffc_conv_kernel(%arg0: i32, %arg1: memref<1x18x18x8xbf16, #tpu.memory_space<vmem>>, %arg2: memref<256x2xbf16, #tpu.memory_space<vmem>>, %arg3: memref<256x2xbf16, #tpu.memory_space<vmem>>, %arg4: memref<72x4xbf16, #tpu.memory_space<vmem>>, %arg5: memref<36x4xbf16, #tpu.memory_space<vmem>>, %arg6: memref<2x4xbf16, #tpu.memory_space<vmem>>, %arg7: memref<1x8xf32, #tpu.memory_space<vmem>>, %arg8: memref<1x8xf32, #tpu.memory_space<vmem>>, %arg9: memref<256x8xbf16, #tpu.memory_space<vmem>>) attributes {dimension_semantics = [#tpu.dimension_semantics<parallel>], iteration_bounds = array<i64: 2>, scalar_prefetch = 0 : i64, scratch_operands = 0 : i64, tpu.core_type = #tpu.core_type<tc>, window_params = [{transform_indices = @transform_0, window_bounds = array<i64: 1, 18, 18, 8>}, {transform_indices = @transform_1, window_bounds = array<i64: 256, 2>}, {transform_indices = @transform_2, window_bounds = array<i64: 256, 2>}, {pipeline_mode = #tpu.pipeline_mode<synchronous>, transform_indices = @transform_3, window_bounds = array<i64: 72, 4>}, {pipeline_mode = #tpu.pipeline_mode<synchronous>, transform_indices = @transform_4, window_bounds = array<i64: 36, 4>}, {pipeline_mode = #tpu.pipeline_mode<synchronous>, transform_indices = @transform_5, window_bounds = array<i64: 2, 4>}, {pipeline_mode = #tpu.pipeline_mode<synchronous>, transform_indices = @transform_6, window_bounds = array<i64: 1, 8>}, {pipeline_mode = #tpu.pipeline_mode<synchronous>, transform_indices = @transform_7, window_bounds = array<i64: 1, 8>}, {transform_indices = @transform_8, window_bounds = array<i64: 256, 8>}]} {
    %c0 = arith.constant 0 : index
    %c0_0 = arith.constant 0 : index
    %c0_1 = arith.constant 0 : index
    %c0_2 = arith.constant 0 : index
    %0 = vector.load %arg1[%c0, %c0_0, %c0_1, %c0_2] : memref<1x18x18x8xbf16, #tpu.memory_space<vmem>>, vector<1x18x18x8xbf16>
    %1 = vector.shape_cast %0 : vector<1x18x18x8xbf16> to vector<18x18x8xbf16>
    %2 = vector.extract_strided_slice %1 {offsets = [0, 0, 0], sizes = [18, 18, 4], strides = [1, 1, 1]} : vector<18x18x8xbf16> to vector<18x18x4xbf16>
    %3 = vector.extract_strided_slice %1 {offsets = [0, 0, 4], sizes = [18, 18, 4], strides = [1, 1, 1]} : vector<18x18x8xbf16> to vector<18x18x4xbf16>
    %4 = vector.extract_strided_slice %2 {offsets = [0, 0, 0], sizes = [16, 16, 4], strides = [1, 1, 1]} : vector<18x18x4xbf16> to vector<16x16x4xbf16>
    %5 = vector.extract_strided_slice %2 {offsets = [0, 1, 0], sizes = [16, 16, 4], strides = [1, 1, 1]} : vector<18x18x4xbf16> to vector<16x16x4xbf16>
    %6 = vector.extract_strided_slice %2 {offsets = [0, 2, 0], sizes = [16, 16, 4], strides = [1, 1, 1]} : vector<18x18x4xbf16> to vector<16x16x4xbf16>
    %7 = vector.extract_strided_slice %2 {offsets = [1, 0, 0], sizes = [16, 16, 4], strides = [1, 1, 1]} : vector<18x18x4xbf16> to vector<16x16x4xbf16>
    %8 = vector.extract_strided_slice %2 {offsets = [1, 1, 0], sizes = [16, 16, 4], strides = [1, 1, 1]} : vector<18x18x4xbf16> to vector<16x16x4xbf16>
    %9 = vector.extract_strided_slice %2 {offsets = [1, 2, 0], sizes = [16, 16, 4], strides = [1, 1, 1]} : vector<18x18x4xbf16> to vector<16x16x4xbf16>
    %10 = vector.extract_strided_slice %2 {offsets = [2, 0, 0], sizes = [16, 16, 4], strides = [1, 1, 1]} : vector<18x18x4xbf16> to vector<16x16x4xbf16>
    %11 = vector.extract_strided_slice %2 {offsets = [2, 1, 0], sizes = [16, 16, 4], strides = [1, 1, 1]} : vector<18x18x4xbf16> to vector<16x16x4xbf16>
    %12 = vector.extract_strided_slice %2 {offsets = [2, 2, 0], sizes = [16, 16, 4], strides = [1, 1, 1]} : vector<18x18x4xbf16> to vector<16x16x4xbf16>
    %13 = vector.extract_strided_slice %3 {offsets = [0, 0, 0], sizes = [16, 16, 4], strides = [1, 1, 1]} : vector<18x18x4xbf16> to vector<16x16x4xbf16>
    %14 = vector.extract_strided_slice %3 {offsets = [0, 1, 0], sizes = [16, 16, 4], strides = [1, 1, 1]} : vector<18x18x4xbf16> to vector<16x16x4xbf16>
    %15 = vector.extract_strided_slice %3 {offsets = [0, 2, 0], sizes = [16, 16, 4], strides = [1, 1, 1]} : vector<18x18x4xbf16> to vector<16x16x4xbf16>
    %16 = vector.extract_strided_slice %3 {offsets = [1, 0, 0], sizes = [16, 16, 4], strides = [1, 1, 1]} : vector<18x18x4xbf16> to vector<16x16x4xbf16>
    %17 = vector.extract_strided_slice %3 {offsets = [1, 1, 0], sizes = [16, 16, 4], strides = [1, 1, 1]} : vector<18x18x4xbf16> to vector<16x16x4xbf16>
    %18 = vector.extract_strided_slice %3 {offsets = [1, 2, 0], sizes = [16, 16, 4], strides = [1, 1, 1]} : vector<18x18x4xbf16> to vector<16x16x4xbf16>
    %19 = vector.extract_strided_slice %3 {offsets = [2, 0, 0], sizes = [16, 16, 4], strides = [1, 1, 1]} : vector<18x18x4xbf16> to vector<16x16x4xbf16>
    %20 = vector.extract_strided_slice %3 {offsets = [2, 1, 0], sizes = [16, 16, 4], strides = [1, 1, 1]} : vector<18x18x4xbf16> to vector<16x16x4xbf16>
    %21 = vector.extract_strided_slice %3 {offsets = [2, 2, 0], sizes = [16, 16, 4], strides = [1, 1, 1]} : vector<18x18x4xbf16> to vector<16x16x4xbf16>
    %22 = tpu.concatenate %4, %5, %6, %7, %8, %9, %10, %11, %12, %13, %14, %15, %16, %17, %18, %19 in 2 : vector<16x16x4xbf16>, vector<16x16x4xbf16>, vector<16x16x4xbf16>, vector<16x16x4xbf16>, vector<16x16x4xbf16>, vector<16x16x4xbf16>, vector<16x16x4xbf16>, vector<16x16x4xbf16>, vector<16x16x4xbf16>, vector<16x16x4xbf16>, vector<16x16x4xbf16>, vector<16x16x4xbf16>, vector<16x16x4xbf16>, vector<16x16x4xbf16>, vector<16x16x4xbf16>, vector<16x16x4xbf16> -> vector<16x16x64xbf16>
    %23 = tpu.concatenate %20, %21 in 2 : vector<16x16x4xbf16>, vector<16x16x4xbf16> -> vector<16x16x8xbf16>
    %24 = tpu.concatenate %22, %23 in 2 : vector<16x16x64xbf16>, vector<16x16x8xbf16> -> vector<16x16x72xbf16>
    %25 = vector.shape_cast %24 : vector<16x16x72xbf16> to vector<256x72xbf16>
    %26 = vector.extract_strided_slice %25 {offsets = [0, 0], sizes = [256, 36], strides = [1, 1]} : vector<256x72xbf16> to vector<256x36xbf16>
    %c0_3 = arith.constant 0 : index
    %c0_4 = arith.constant 0 : index
    %27 = vector.load %arg4[%c0_3, %c0_4] : memref<72x4xbf16, #tpu.memory_space<vmem>>, vector<72x4xbf16>
    %cst = arith.constant dense<0.000000e+00> : vector<256x4xf32>
    %28 = tpu.matmul %25, %27, %cst {dimension_numbers = #tpu.dot_dimension_numbers<[1], [0], [0], [1], [0, 0, 1, 1], [], []>} : vector<256x72xbf16>, vector<72x4xbf16>, vector<256x4xf32> -> vector<256x4xf32>
    %c0_5 = arith.constant 0 : index
    %c0_6 = arith.constant 0 : index
    %29 = vector.load %arg2[%c0_5, %c0_6] : memref<256x2xbf16, #tpu.memory_space<vmem>>, vector<256x2xbf16>
    %30 = arith.extf %29 : vector<256x2xbf16> to vector<256x2xf32>
    %c0_7 = arith.constant 0 : index
    %c0_8 = arith.constant 0 : index
    %31 = vector.load %arg3[%c0_7, %c0_8] : memref<256x2xbf16, #tpu.memory_space<vmem>>, vector<256x2xbf16>
    %32 = arith.extf %31 : vector<256x2xbf16> to vector<256x2xf32>
    %33 = arith.addf %30, %32 : vector<256x2xf32>
    %34 = arith.truncf %33 : vector<256x2xf32> to vector<256x2xbf16>
    %c0_9 = arith.constant 0 : index
    %c0_10 = arith.constant 0 : index
    %35 = vector.load %arg5[%c0_9, %c0_10] : memref<36x4xbf16, #tpu.memory_space<vmem>>, vector<36x4xbf16>
    %cst_11 = arith.constant dense<0.000000e+00> : vector<256x4xf32>
    %36 = tpu.matmul %26, %35, %cst_11 {dimension_numbers = #tpu.dot_dimension_numbers<[1], [0], [0], [1], [0, 0, 1, 1], [], []>} : vector<256x36xbf16>, vector<36x4xbf16>, vector<256x4xf32> -> vector<256x4xf32>
    %c0_12 = arith.constant 0 : index
    %c0_13 = arith.constant 0 : index
    %37 = vector.load %arg6[%c0_12, %c0_13] : memref<2x4xbf16, #tpu.memory_space<vmem>>, vector<2x4xbf16>
    %cst_14 = arith.constant dense<0.000000e+00> : vector<256x4xf32>
    %38 = tpu.matmul %34, %37, %cst_14 {dimension_numbers = #tpu.dot_dimension_numbers<[1], [0], [0], [1], [0, 0, 1, 1], [], []>} : vector<256x2xbf16>, vector<2x4xbf16>, vector<256x4xf32> -> vector<256x4xf32>
    %39 = arith.addf %36, %38 : vector<256x4xf32>
    %40 = tpu.concatenate %28, %39 in 1 : vector<256x4xf32>, vector<256x4xf32> -> vector<256x8xf32>
    %c0_15 = arith.constant 0 : index
    %c0_16 = arith.constant 0 : index
    %41 = vector.load %arg7[%c0_15, %c0_16] : memref<1x8xf32, #tpu.memory_space<vmem>>, vector<1x8xf32>
    %42 = vector.broadcast %41 : vector<1x8xf32> to vector<256x8xf32>
    %43 = arith.mulf %40, %42 : vector<256x8xf32>
    %c0_17 = arith.constant 0 : index
    %c0_18 = arith.constant 0 : index
    %44 = vector.load %arg8[%c0_17, %c0_18] : memref<1x8xf32, #tpu.memory_space<vmem>>, vector<1x8xf32>
    %45 = vector.broadcast %44 : vector<1x8xf32> to vector<256x8xf32>
    %46 = arith.addf %43, %45 : vector<256x8xf32>
    %cst_19 = arith.constant 0.000000e+00 : f32
    %47 = vector.broadcast %cst_19 : f32 to vector<256x8xf32>
    %48 = arith.maximumf %46, %47 : vector<256x8xf32>
    %49 = arith.truncf %48 : vector<256x8xf32> to vector<256x8xbf16>
    %c0_20 = arith.constant 0 : index
    %c0_21 = arith.constant 0 : index
    %50 = vector.load %arg9[%c0_20, %c0_21] : memref<256x8xbf16, #tpu.memory_space<vmem>>, vector<256x8xbf16>
    tpu.vector_store %arg9[%c0_20, %c0_21], %49 {strides = array<i32>} : memref<256x8xbf16, #tpu.memory_space<vmem>>, vector<256x8xbf16>,
    return
  }
  func.func @transform_0(%arg0: i32) -> (i32, i32, i32, i32) {
    %c0_i32 = arith.constant 0 : i32
    %c0_i32_0 = arith.constant 0 : i32
    %c0_i32_1 = arith.constant 0 : i32
    %c0_i32_2 = arith.constant 0 : i32
    return %arg0, %c0_i32, %c0_i32_0, %c0_i32_1 : i32, i32, i32, i32
  }
  func.func @transform_1(%arg0: i32) -> (i32, i32) {
    %c0_i32 = arith.constant 0 : i32
    %c0_i32_0 = arith.constant 0 : i32
    return %arg0, %c0_i32 : i32, i32
  }
  func.func @transform_2(%arg0: i32) -> (i32, i32) {
    %c0_i32 = arith.constant 0 : i32
    %c0_i32_0 = arith.constant 0 : i32
    return %arg0, %c0_i32 : i32, i32
  }
  func.func @transform_3(%arg0: i32) -> (i32, i32) {
    %c0_i32 = arith.constant 0 : i32
    %c0_i32_0 = arith.constant 0 : i32
    %c0_i32_1 = arith.constant 0 : i32
    return %c0_i32, %c0_i32_0 : i32, i32
  }
  func.func @transform_4(%arg0: i32) -> (i32, i32) {
    %c0_i32 = arith.constant 0 : i32
    %c0_i32_0 = arith.constant 0 : i32
    %c0_i32_1 = arith.constant 0 : i32
    return %c0_i32, %c0_i32_0 : i32, i32
  }
  func.func @transform_5(%arg0: i32) -> (i32, i32) {
    %c0_i32 = arith.constant 0 : i32
    %c0_i32_0 = arith.constant 0 : i32
    %c0_i32_1 = arith.constant 0 : i32
    return %c0_i32, %c0_i32_0 : i32, i32
  }
  func.func @transform_6(%arg0: i32) -> (i32, i32) {
    %c0_i32 = arith.constant 0 : i32
    %c0_i32_0 = arith.constant 0 : i32
    %c0_i32_1 = arith.constant 0 : i32
    return %c0_i32, %c0_i32_0 : i32, i32
  }
  func.func @transform_7(%arg0: i32) -> (i32, i32) {
    %c0_i32 = arith.constant 0 : i32
    %c0_i32_0 = arith.constant 0 : i32
    %c0_i32_1 = arith.constant 0 : i32
    return %c0_i32, %c0_i32_0 : i32, i32
  }
  func.func @transform_8(%arg0: i32) -> (i32, i32) {
    %c0_i32 = arith.constant 0 : i32
    %c0_i32_0 = arith.constant 0 : i32
    return %arg0, %c0_i32 : i32, i32
  }
}

</mosaic_0001>

<bundles_post_ra>
// kernel: my_ffc_resblock.19
= control target key start
LH: loop header
LB: loop body
LE: loop exit
PB: predicated region body
PF: predicated region fallthrough
CT: control target
= control target key end

     0   :  { %s725_s15 = smov 0   ;;  %s836_s0 = inlined_call_operand.vmem [shape: bf16[384,4], index: 0, kind: input, shape index: {}]   ;;  %s837_s1 = inlined_call_operand.vmem [shape: bf16[4,4], index: 1, kind: input, shape index: {}]   ;;  %s838_s2 = inlined_call_operand.vmem [shape: f32[1,4], index: 2, kind: input, shape index: {}]   ;;  %s839_s3 = inlined_call_operand.vmem [shape: f32[1,4], index: 3, kind: input, shape index: {}]   ;;  %s840_s4 = inlined_call_operand.vmem [shape: bf16[384,4], index: 4, kind: output, shape index: {}]  }
   0x1 LB: > { %s584_s16 = sadd.s32 4294967295, %s698_s15   ;;  %p588_p0 = scmp.ge.s32.totalorder %s698_s15, 1  ;;  %s698_s15 = sphi %s725_s15, %s14_s15  }
   0x2   : > { %p163_p1 = scmp.lt.s32.totalorder %s698_s15, 4 }
   0x4   : > { %p164_p2 = pnand %p588_p0, %p163_p1 }
   0x5   : > { %v218_v0 = vld [vmem:[%s837_s1] sm:$0x3] (!%p164_p2)  ;;  %vm284_vm0 = vcmask (!%p164_p2), 1041408   ;;  %s589_s19 = sshll.u32 (!%p164_p2), %s584_s16, 4  ;;  %vm259_vm1 = vcmask (!%p164_p2), 31744   ;;  %vm511_vm2 = vcmask (!%p164_p2), 27648  }
   0x6   : > { %167 = sbr.rel (%p164_p2) target bundleno = 252 (0xfc), region = 36  ;;  %674 = vmatprep.subr.msk.bf16.mxu0 (!%p164_p2), %vm284_vm0, %v218_v0  ;;  %675 = vmatprep.subr.msk.bf16.mxu1 (!%p164_p2), %vm284_vm0, %v218_v0  ;;  %v286_v1 = vsel (!%p164_p2), %vm284_vm0, %v218_v0, 0  ;;  %p190_p3 = scmp.lt.s32.totalorder (!%p164_p2), %s589_s19, 47  ;;  %v755_v10 = vld [vmem:[%s838_s2] ss:$0 sm:$0xff] (!%p164_p2) }
   0x7   : > { %655 = vmatpush3.bf16.msra.mxu0 (!%p164_p2), %v286_v1  ;;  %673 = vmatpush3.bf16.msra.mxu1 (!%p164_p2), %v286_v1  ;;  %v760_v12 = vld [vmem:[%s839_s3] ss:$0 sm:$0xff] (!%p164_p2) }
   0xd   : > { %s842_s19 = smov (!%p190_p3, %s589_s19), 47 }
   0xe   : > { %s590_s20 = sshll.u32 %s842_s19, 2 }
   0xf   : > { %s193_s23 = scalar_lea.vmem %s836_s0, %s590_s20  ;;  %s780_s30 = scalar_lea.vmem %s840_s4, %s590_s20 }
  0x10   : > { %v684_v2 = vld [vmem:[%s193_s23] sm:$0xff]   ;;  %v686_v4 = vld [vmem:[%s193_s23 + $0x8] sm:$0xff]   ;;  %v688_v6 = vld [vmem:[%s193_s23 + $0x10] sm:$0xff]  }
  0x11   : > { %v685_v3 = vld [vmem:[%s193_s23 + $0x20] sm:$0xff]   ;;  %656 = vmatprep.mubr.msk.bf16.mxu0 %vm259_vm1, %v684_v2  ;;  %v687_v5 = vld [vmem:[%s193_s23 + $0x28] sm:$0xff]   ;;  %v689_v7 = vld [vmem:[%s193_s23 + $0x30] sm:$0xff]  }
  0x12   : > { %664 = vmatprep.mubr.msk.bf16.mxu1 %vm259_vm1, %v685_v3  ;;  %657 = vmatmul.mubr.msk.bf16.vlgmr.msra.gmra.mrb[0].mxu0 %vm259_vm1, %v686_v4  ;;  %v690_v8 = vld [vmem:[%s193_s23 + $0x18] sm:$0xff]  }
  0x13   : > { %665 = vmatmul.mubr.msk.bf16.vlgmr.msra.gmra.mrb[0].mxu1 %vm259_vm1, %v687_v5  ;;  %660 = vmatprep.mubr.msk.bf16.mxu0 %vm259_vm1, %v688_v6  ;;  %v691_v9 = vld [vmem:[%s193_s23 + $0x38] sm:$0xff]  }
  0x14   : > { %668 = vmatprep.mubr.msk.bf16.mxu1 %vm259_vm1, %v689_v7 }
  0x1a   : > { %661 = vmatmul.mubr.msk.bf16.gmra.mrb[4].mxu0 %vm259_vm1, %v690_v8 }
  0x1b   : > { %669 = vmatmul.mubr.msk.bf16.gmra.mrb[4].mxu1 %vm259_vm1, %v691_v9 }
  0xe5   : > { %v658_v11 = vpop.f32.mrb[0].mxu0 }
  0xe6   : > { %v394_v13 = vmul.f32 %v658_v11, %v755_v10  ;;  %v666_v14 = vpop.f32.mrb[0].mxu1  ;;  %v322_v15 = vpop.f32.mrb[1].mxu0 }
  0xe7   : > { %v402_v16 = vmul.f32 %v666_v14, %v755_v10  ;;  %v392_v17 = vmul.f32 %v755_v10, %v322_v15  ;;  %v354_v18 = vpop.f32.mrb[1].mxu1  ;;  %v659_v19 = vpop.f32.mrb[2].mxu0 }
  0xe8   : > { %v417_v20 = vadd.f32 %v760_v12, %v394_v13  ;;  %v400_v21 = vmul.f32 %v755_v10, %v354_v18  ;;  %v395_v22 = vmul.f32 %v659_v19, %v755_v10  ;;  %v667_v23 = vpop.f32.mrb[2].mxu1  ;;  %v325_v24 = vpop.f32.mrb[3].mxu0 }
  0xe9   : > { %v425_v25 = vadd.f32 %v760_v12, %v402_v16  ;;  %v415_v26 = vadd.f32 %v760_v12, %v392_v17  ;;  %v403_v27 = vmul.f32 %v667_v23, %v755_v10  ;;  %v393_v28 = vmul.f32 %v755_v10, %v325_v24  ;;  %v357_v29 = vpop.f32.mrb[3].mxu1 }
  0xea   : > { %v433_v30 = vmax.f32 %v417_v20, 0.0  ;;  %v423_v31 = vadd.f32 %v760_v12, %v400_v21  ;;  %v418_v32 = vadd.f32 %v760_v12, %v395_v22  ;;  %v401_v33 = vmul.f32 %v755_v10, %v357_v29 }
  0xeb   : > { %v441_v34 = vmax.f32 %v425_v25, 0.0  ;;  %v431_v35 = vmax.f32 %v415_v26, 0.0  ;;  %v426_v36 = vadd.f32 %v760_v12, %v403_v27  ;;  %v416_v37 = vadd.f32 %v760_v12, %v393_v28 }
  0xec   : > { %v631_v38 = vpack.c.bf16 %v433_v30, %v433_v30  ;;  %v439_v39 = vmax.f32 %v423_v31, 0.0  ;;  %v434_v40 = vmax.f32 %v418_v32, 0.0  ;;  %v424_v41 = vadd.f32 %v760_v12, %v401_v33 }
  0xed   : > { %v639_v42 = vpack.c.bf16 %v441_v34, %v441_v34  ;;  %v629_v43 = vpack.c.bf16 %v431_v35, %v431_v35  ;;  %v442_v44 = vmax.f32 %v426_v36, 0.0  ;;  %v432_v45 = vmax.f32 %v416_v37, 0.0  ;;  %v662_v46 = vpop.f32.mrb[4].mxu0 }
  0xee   : > { %514 = vst.msk [vmem:[%s780_s30 + $0x8] sm:$0xf] %vm511_vm2, %v631_v38  ;;  %v637_v47 = vpack.c.bf16 %v439_v39, %v439_v39  ;;  %v632_v48 = vpack.c.bf16 %v434_v40, %v434_v40  ;;  %v440_v49 = vmax.f32 %v424_v41, 0.0  ;;  %v398_v50 = vmul.f32 %v662_v46, %v755_v10  ;;  %v670_v51 = vpop.f32.mrb[4].mxu1  ;;  %v338_v52 = vpop.f32.mrb[5].mxu0 }
  0xef   : > { %522 = vst.msk [vmem:[%s780_s30 + $0x28] sm:$0xf] %vm511_vm2, %v639_v42  ;;  %512 = vst.msk [vmem:[%s780_s30] sm:$0xf] %vm511_vm2, %v629_v43  ;;  %v640_v53 = vpack.c.bf16 %v442_v44, %v442_v44  ;;  %v630_v54 = vpack.c.bf16 %v432_v45, %v432_v45  ;;  %v406_v55 = vmul.f32 %v670_v51, %v755_v10  ;;  %v370_v57 = vpop.f32.mrb[5].mxu1  ;;  %v663_v58 = vpop.f32.mrb[6].mxu0 }
  0xf0   : > { %v396_v56 = vmul.f32 %v755_v10, %v338_v52  ;;  %520 = vst.msk [vmem:[%s780_s30 + $0x20] sm:$0xf] %vm511_vm2, %v637_v47  ;;  %515 = vst.msk [vmem:[%s780_s30 + $0xc] sm:$0xf] %vm511_vm2, %v632_v48  ;;  %v638_v59 = vpack.c.bf16 %v440_v49, %v440_v49  ;;  %v421_v60 = vadd.f32 %v760_v12, %v398_v50  ;;  %v671_v63 = vpop.f32.mrb[6].mxu1  ;;  %v341_v0 = vpop.f32.mrb[7].mxu0 }
  0xf1   : > { %v404_v61 = vmul.f32 %v755_v10, %v370_v57  ;;  %v399_v62 = vmul.f32 %v663_v58, %v755_v10  ;;  %523 = vst.msk [vmem:[%s780_s30 + $0x2c] sm:$0xf] %vm511_vm2, %v640_v53  ;;  %513 = vst.msk [vmem:[%s780_s30 + $0x4] sm:$0xf] %vm511_vm2, %v630_v54  ;;  %v429_v1 = vadd.f32 %v760_v12, %v406_v55  ;;  %v373_v5 = vpop.f32.mrb[7].mxu1 }
  0xf2   : > { %v419_v2 = vadd.f32 %v760_v12, %v396_v56  ;;  %v407_v3 = vmul.f32 %v671_v63, %v755_v10  ;;  %v397_v4 = vmul.f32 %v755_v10, %v341_v0  ;;  %521 = vst.msk [vmem:[%s780_s30 + $0x24] sm:$0xf] %vm511_vm2, %v638_v59  ;;  %v437_v6 = vmax.f32 %v421_v60, 0.0 }
  0xf3   : > { %v427_v7 = vadd.f32 %v760_v12, %v404_v61  ;;  %v422_v8 = vadd.f32 %v760_v12, %v399_v62  ;;  %v405_v9 = vmul.f32 %v755_v10, %v373_v5  ;;  %v445_v11 = vmax.f32 %v429_v1, 0.0 }
  0xf4   : > { %v435_v13 = vmax.f32 %v419_v2, 0.0  ;;  %v430_v14 = vadd.f32 %v760_v12, %v407_v3  ;;  %v420_v15 = vadd.f32 %v760_v12, %v397_v4  ;;  %v635_v16 = vpack.c.bf16 %v437_v6, %v437_v6 }
  0xf5   : > { %v443_v17 = vmax.f32 %v427_v7, 0.0  ;;  %v438_v18 = vmax.f32 %v422_v8, 0.0  ;;  %v428_v19 = vadd.f32 %v760_v12, %v405_v9  ;;  %v643_v20 = vpack.c.bf16 %v445_v11, %v445_v11 }
  0xf6   : > { %v633_v21 = vpack.c.bf16 %v435_v13, %v435_v13  ;;  %v446_v10 = vmax.f32 %v430_v14, 0.0  ;;  %v436_v22 = vmax.f32 %v420_v15, 0.0  ;;  %518 = vst.msk [vmem:[%s780_s30 + $0x18] sm:$0xf] %vm511_vm2, %v635_v16 }
  0xf7   : > { %v641_v23 = vpack.c.bf16 %v443_v17, %v443_v17  ;;  %v636_v24 = vpack.c.bf16 %v438_v18, %v438_v18  ;;  %v444_v25 = vmax.f32 %v428_v19, 0.0  ;;  %526 = vst.msk [vmem:[%s780_s30 + $0x38] sm:$0xf] %vm511_vm2, %v643_v20 }
  0xf8   : > { %516 = vst.msk [vmem:[%s780_s30 + $0x10] sm:$0xf] %vm511_vm2, %v633_v21  ;;  %v644_v26 = vpack.c.bf16 %v446_v10, %v446_v10  ;;  %v634_v27 = vpack.c.bf16 %v436_v22, %v436_v22 }
  0xf9   : > { %524 = vst.msk [vmem:[%s780_s30 + $0x30] sm:$0xf] %vm511_vm2, %v641_v23  ;;  %519 = vst.msk [vmem:[%s780_s30 + $0x1c] sm:$0xf] %vm511_vm2, %v636_v24  ;;  %v642_v12 = vpack.c.bf16 %v444_v25, %v444_v25 }
  0xfa   : > { %527 = vst.msk [vmem:[%s780_s30 + $0x3c] sm:$0xf] %vm511_vm2, %v644_v26  ;;  %517 = vst.msk [vmem:[%s780_s30 + $0x14] sm:$0xf] %vm511_vm2, %v634_v27 }
  0xfb   : > { %525 = vst.msk [vmem:[%s780_s30 + $0x34] sm:$0xf] %vm511_vm2, %v642_v12 }
  0xfc PF: > { %s14_s15 = sadd.s32 1, %s698_s15  }
  0xfd   : > { %p11_p4 = scmp.ge.s32.totalorder %s14_s15, 5  }
  0xff   :  { %13 = sbr.rel (!%p11_p4) target bundleno = 1 (0x1), region = 66 }

// kernel: my_ffc_resblock.18
= control target key start
LH: loop header
LB: loop body
LE: loop exit
PB: predicated region body
PF: predicated region fallthrough
CT: control target
= control target key end

     0   :  { %s1077_s15 = smov 0   ;;  %s1278_s0 = inlined_call_operand.vmem [shape: bf16[512,4], index: 0, kind: input, shape index: {}]   ;;  %s1279_s1 = inlined_call_operand.vmem [shape: bf16[4,2], index: 1, kind: input, shape index: {}]   ;;  %s1280_s2 = inlined_call_operand.vmem [shape: f32[1,2], index: 2, kind: input, shape index: {}]   ;;  %s1281_s3 = inlined_call_operand.vmem [shape: f32[1,2], index: 3, kind: input, shape index: {}]   ;;  %s1282_s4 = inlined_call_operand.vmem [shape: bf16[512,2], index: 4, kind: output, shape index: {}]  }
   0x1 LB: > { %s856_s16 = sadd.s32 4294967295, %s1050_s15   ;;  %p860_p0 = scmp.ge.s32.totalorder %s1050_s15, 1  ;;  %s1050_s15 = sphi %s1077_s15, %s14_s15  }
   0x2   : > { %p163_p1 = scmp.lt.s32.totalorder %s1050_s15, 3 }
   0x4   : > { %p164_p2 = pnand %p860_p0, %p163_p1 }
   0x5   : > { %v234_v0 = vld [vmem:[%s1279_s1] sm:$0x3] (!%p164_p2)  ;;  %vm364_vm0 = vcmask (!%p164_p2), 1041408   ;;  %s861_s19 = sshll.u32 (!%p164_p2), %s856_s16, 5  ;;  %vm315_vm1 = vcmask (!%p164_p2), 31744   ;;  %vm767_vm2 = vcmask (!%p164_p2), 11264  }
   0x6   : > { %167 = sbr.rel (%p164_p2) target bundleno = 269 (0x10d), region = 36  ;;  %1018 = vmatprep.subr.msk.bf16.mxu0 (!%p164_p2), %vm364_vm0, %v234_v0  ;;  %1019 = vmatprep.subr.msk.bf16.mxu1 (!%p164_p2), %vm364_vm0, %v234_v0  ;;  %v366_v1 = vsel (!%p164_p2), %vm364_vm0, %v234_v0, 0  ;;  %p190_p3 = scmp.lt.s32.totalorder (!%p164_p2), %s861_s19, 63  ;;  %v1133_v18 = vld [vmem:[%s1280_s2] ss:$0 sm:$0xff] (!%p164_p2) }
   0x7   : > { %983 = vmatpush3.bf16.msra.mxu0 (!%p164_p2), %v366_v1  ;;  %1017 = vmatpush3.bf16.msra.mxu1 (!%p164_p2), %v366_v1  ;;  %v1138_v20 = vld [vmem:[%s1281_s3] ss:$0 sm:$0xff] (!%p164_p2) }
   0xd   : > { %s1284_s19 = smov (!%p190_p3, %s861_s19), 63 }
   0xe   : > { %s862_s20 = sshll.u32 %s1284_s19, 2 }
   0xf   : > { %s1096_s23 = scalar_lea.vmem %s1278_s0, %s862_s20  ;;  %s1158_s30 = scalar_lea.vmem %s1282_s4, %s862_s20 }
  0x10   : > { %v1028_v2 = vld [vmem:[%s1096_s23] sm:$0xff]   ;;  %v1030_v4 = vld [vmem:[%s1096_s23 + $0x8] sm:$0xff]   ;;  %v1032_v6 = vld [vmem:[%s1096_s23 + $0x10] sm:$0xff]  }
  0x11   : > { %v1029_v3 = vld [vmem:[%s1096_s23 + $0x40] sm:$0xff]   ;;  %984 = vmatprep.mubr.msk.bf16.mxu0 %vm315_vm1, %v1028_v2  ;;  %v1031_v5 = vld [vmem:[%s1096_s23 + $0x48] sm:$0xff]   ;;  %v1033_v7 = vld [vmem:[%s1096_s23 + $0x50] sm:$0xff]  }
  0x12   : > { %1000 = vmatprep.mubr.msk.bf16.mxu1 %vm315_vm1, %v1029_v3  ;;  %985 = vmatmul.mubr.msk.bf16.vlgmr.msra.gmra.mrb[0].mxu0 %vm315_vm1, %v1030_v4  ;;  %v1034_v8 = vld [vmem:[%s1096_s23 + $0x18] sm:$0xff]   ;;  %v1036_v10 = vld [vmem:[%s1096_s23 + $0x20] sm:$0xff]   ;;  %v1038_v12 = vld [vmem:[%s1096_s23 + $0x28] sm:$0xff]  }
  0x13   : > { %1001 = vmatmul.mubr.msk.bf16.vlgmr.msra.gmra.mrb[0].mxu1 %vm315_vm1, %v1031_v5  ;;  %988 = vmatprep.mubr.msk.bf16.mxu0 %vm315_vm1, %v1032_v6  ;;  %v1035_v9 = vld [vmem:[%s1096_s23 + $0x58] sm:$0xff]   ;;  %v1037_v11 = vld [vmem:[%s1096_s23 + $0x60] sm:$0xff]   ;;  %v1039_v13 = vld [vmem:[%s1096_s23 + $0x68] sm:$0xff]  }
  0x14   : > { %1004 = vmatprep.mubr.msk.bf16.mxu1 %vm315_vm1, %v1033_v7  ;;  %v1040_v14 = vld [vmem:[%s1096_s23 + $0x30] sm:$0xff]   ;;  %v1042_v16 = vld [vmem:[%s1096_s23 + $0x38] sm:$0xff]  }
  0x15   : > { %v1041_v15 = vld [vmem:[%s1096_s23 + $0x70] sm:$0xff]   ;;  %v1043_v17 = vld [vmem:[%s1096_s23 + $0x78] sm:$0xff]  }
  0x1a   : > { %989 = vmatmul.mubr.msk.bf16.gmra.mrb[4].mxu0 %vm315_vm1, %v1034_v8 }
  0x1b   : > { %1005 = vmatmul.mubr.msk.bf16.gmra.mrb[4].mxu1 %vm315_vm1, %v1035_v9  ;;  %992 = vmatprep.mubr.msk.bf16.mxu0 %vm315_vm1, %v1036_v10 }
  0x1c   : > { %1008 = vmatprep.mubr.msk.bf16.mxu1 %vm315_vm1, %v1037_v11 }
  0x22   : > { %993 = vmatmul.mubr.msk.bf16.gmra.mrb[8].mxu0 %vm315_vm1, %v1038_v12 }
  0x23   : > { %1009 = vmatmul.mubr.msk.bf16.gmra.mrb[8].mxu1 %vm315_vm1, %v1039_v13  ;;  %996 = vmatprep.mubr.msk.bf16.mxu0 %vm315_vm1, %v1040_v14 }
  0x24   : > { %1012 = vmatprep.mubr.msk.bf16.mxu1 %vm315_vm1, %v1041_v15 }
  0x2a   : > { %997 = vmatmul.mubr.msk.bf16.gmra.mrb[12].mxu0 %vm315_vm1, %v1042_v16 }
  0x2b   : > { %1013 = vmatmul.mubr.msk.bf16.gmra.mrb[12].mxu1 %vm315_vm1, %v1043_v17 }
  0xe5   : > { %v986_v19 = vpop.f32.mrb[0].mxu0 }
  0xe6   : > { %v538_v21 = vmul.f32 %v986_v19, %v1133_v18  ;;  %v1002_v22 = vpop.f32.mrb[0].mxu1  ;;  %v402_v23 = vpop.f32.mrb[1].mxu0 }
  0xe7   : > { %v554_v24 = vmul.f32 %v1002_v22, %v1133_v18  ;;  %v536_v25 = vmul.f32 %v1133_v18, %v402_v23  ;;  %v466_v26 = vpop.f32.mrb[1].mxu1  ;;  %v987_v27 = vpop.f32.mrb[2].mxu0 }
  0xe8   : > { %v577_v28 = vadd.f32 %v1138_v20, %v538_v21  ;;  %v552_v29 = vmul.f32 %v1133_v18, %v466_v26  ;;  %v539_v30 = vmul.f32 %v987_v27, %v1133_v18  ;;  %v1003_v31 = vpop.f32.mrb[2].mxu1  ;;  %v405_v32 = vpop.f32.mrb[3].mxu0 }
  0xe9   : > { %v593_v33 = vadd.f32 %v1138_v20, %v554_v24  ;;  %v575_v34 = vadd.f32 %v1138_v20, %v536_v25  ;;  %v555_v35 = vmul.f32 %v1003_v31, %v1133_v18  ;;  %v537_v36 = vmul.f32 %v1133_v18, %v405_v32  ;;  %v469_v37 = vpop.f32.mrb[3].mxu1 }
  0xea   : > { %v609_v38 = vmax.f32 %v577_v28, 0.0  ;;  %v591_v39 = vadd.f32 %v1138_v20, %v552_v29  ;;  %v578_v40 = vadd.f32 %v1138_v20, %v539_v30  ;;  %v553_v41 = vmul.f32 %v1133_v18, %v469_v37 }
  0xeb   : > { %v625_v42 = vmax.f32 %v593_v33, 0.0  ;;  %v607_v43 = vmax.f32 %v575_v34, 0.0  ;;  %v594_v44 = vadd.f32 %v1138_v20, %v555_v35  ;;  %v576_v45 = vadd.f32 %v1138_v20, %v537_v36 }
  0xec   : > { %v935_v46 = vpack.c.bf16 %v609_v38, %v609_v38  ;;  %v623_v47 = vmax.f32 %v591_v39, 0.0  ;;  %v610_v48 = vmax.f32 %v578_v40, 0.0  ;;  %v592_v49 = vadd.f32 %v1138_v20, %v553_v41 }
  0xed   : > { %v951_v50 = vpack.c.bf16 %v625_v42, %v625_v42  ;;  %v933_v51 = vpack.c.bf16 %v607_v43, %v607_v43  ;;  %v626_v52 = vmax.f32 %v594_v44, 0.0  ;;  %v608_v53 = vmax.f32 %v576_v45, 0.0  ;;  %v990_v54 = vpop.f32.mrb[4].mxu0 }
  0xee   : > { %770 = vst.msk [vmem:[%s1158_s30 + $0x8] sm:$0xf] %vm767_vm2, %v935_v46  ;;  %v949_v55 = vpack.c.bf16 %v623_v47, %v623_v47  ;;  %v936_v56 = vpack.c.bf16 %v610_v48, %v610_v48  ;;  %v624_v57 = vmax.f32 %v592_v49, 0.0  ;;  %v542_v58 = vmul.f32 %v990_v54, %v1133_v18  ;;  %v1006_v59 = vpop.f32.mrb[4].mxu1  ;;  %v418_v60 = vpop.f32.mrb[5].mxu0 }
  0xef   : > { %786 = vst.msk [vmem:[%s1158_s30 + $0x48] sm:$0xf] %vm767_vm2, %v951_v50  ;;  %768 = vst.msk [vmem:[%s1158_s30] sm:$0xf] %vm767_vm2, %v933_v51  ;;  %v952_v61 = vpack.c.bf16 %v626_v52, %v626_v52  ;;  %v934_v62 = vpack.c.bf16 %v608_v53, %v608_v53  ;;  %v558_v63 = vmul.f32 %v1006_v59, %v1133_v18  ;;  %v482_v1 = vpop.f32.mrb[5].mxu1  ;;  %v991_v2 = vpop.f32.mrb[6].mxu0 }
  0xf0   : > { %v540_v0 = vmul.f32 %v1133_v18, %v418_v60  ;;  %784 = vst.msk [vmem:[%s1158_s30 + $0x40] sm:$0xf] %vm767_vm2, %v949_v55  ;;  %771 = vst.msk [vmem:[%s1158_s30 + $0xc] sm:$0xf] %vm767_vm2, %v936_v56  ;;  %v950_v3 = vpack.c.bf16 %v624_v57, %v624_v57  ;;  %v581_v4 = vadd.f32 %v1138_v20, %v542_v58  ;;  %v1007_v7 = vpop.f32.mrb[6].mxu1  ;;  %v421_v8 = vpop.f32.mrb[7].mxu0 }
  0xf1   : > { %v556_v5 = vmul.f32 %v1133_v18, %v482_v1  ;;  %v543_v6 = vmul.f32 %v991_v2, %v1133_v18  ;;  %787 = vst.msk [vmem:[%s1158_s30 + $0x4c] sm:$0xf] %vm767_vm2, %v952_v61  ;;  %769 = vst.msk [vmem:[%s1158_s30 + $0x4] sm:$0xf] %vm767_vm2, %v934_v62  ;;  %v597_v9 = vadd.f32 %v1138_v20, %v558_v63  ;;  %v485_v13 = vpop.f32.mrb[7].mxu1 }
  0xf2   : > { %v579_v10 = vadd.f32 %v1138_v20, %v540_v0  ;;  %v559_v11 = vmul.f32 %v1007_v7, %v1133_v18  ;;  %v541_v12 = vmul.f32 %v1133_v18, %v421_v8  ;;  %785 = vst.msk [vmem:[%s1158_s30 + $0x44] sm:$0xf] %vm767_vm2, %v950_v3  ;;  %v613_v14 = vmax.f32 %v581_v4, 0.0 }
  0xf3   : > { %v595_v15 = vadd.f32 %v1138_v20, %v556_v5  ;;  %v582_v16 = vadd.f32 %v1138_v20, %v543_v6  ;;  %v557_v17 = vmul.f32 %v1133_v18, %v485_v13  ;;  %v629_v19 = vmax.f32 %v597_v9, 0.0 }
  0xf4   : > { %v611_v21 = vmax.f32 %v579_v10, 0.0  ;;  %v598_v22 = vadd.f32 %v1138_v20, %v559_v11  ;;  %v580_v23 = vadd.f32 %v1138_v20, %v541_v12  ;;  %v939_v24 = vpack.c.bf16 %v613_v14, %v613_v14 }
  0xf5   : > { %v627_v25 = vmax.f32 %v595_v15, 0.0  ;;  %v614_v26 = vmax.f32 %v582_v16, 0.0  ;;  %v596_v27 = vadd.f32 %v1138_v20, %v557_v17  ;;  %v955_v28 = vpack.c.bf16 %v629_v19, %v629_v19  ;;  %v994_v32 = vpop.f32.mrb[8].mxu0 }
  0xf6   : > { %v937_v29 = vpack.c.bf16 %v611_v21, %v611_v21  ;;  %v630_v30 = vmax.f32 %v598_v22, 0.0  ;;  %v612_v31 = vmax.f32 %v580_v23, 0.0  ;;  %774 = vst.msk [vmem:[%s1158_s30 + $0x18] sm:$0xf] %vm767_vm2, %v939_v24  ;;  %v546_v36 = vmul.f32 %v994_v32, %v1133_v18  ;;  %v1010_v37 = vpop.f32.mrb[8].mxu1  ;;  %v434_v38 = vpop.f32.mrb[9].mxu0 }
  0xf7   : > { %v953_v33 = vpack.c.bf16 %v627_v25, %v627_v25  ;;  %v940_v34 = vpack.c.bf16 %v614_v26, %v614_v26  ;;  %v628_v35 = vmax.f32 %v596_v27, 0.0  ;;  %790 = vst.msk [vmem:[%s1158_s30 + $0x58] sm:$0xf] %vm767_vm2, %v955_v28  ;;  %v562_v41 = vmul.f32 %v1010_v37, %v1133_v18  ;;  %v498_v43 = vpop.f32.mrb[9].mxu1  ;;  %v995_v44 = vpop.f32.mrb[10].mxu0 }
  0xf8   : > { %772 = vst.msk [vmem:[%s1158_s30 + $0x10] sm:$0xf] %vm767_vm2, %v937_v29  ;;  %v956_v39 = vpack.c.bf16 %v630_v30, %v630_v30  ;;  %v938_v40 = vpack.c.bf16 %v612_v31, %v612_v31  ;;  %v544_v42 = vmul.f32 %v1133_v18, %v434_v38  ;;  %v585_v46 = vadd.f32 %v1138_v20, %v546_v36  ;;  %v1011_v49 = vpop.f32.mrb[10].mxu1  ;;  %v437_v50 = vpop.f32.mrb[11].mxu0 }
  0xf9   : > { %788 = vst.msk [vmem:[%s1158_s30 + $0x50] sm:$0xf] %vm767_vm2, %v953_v33  ;;  %775 = vst.msk [vmem:[%s1158_s30 + $0x1c] sm:$0xf] %vm767_vm2, %v940_v34  ;;  %v954_v45 = vpack.c.bf16 %v628_v35, %v628_v35  ;;  %v560_v47 = vmul.f32 %v1133_v18, %v498_v43  ;;  %v547_v48 = vmul.f32 %v995_v44, %v1133_v18  ;;  %v501_v55 = vpop.f32.mrb[11].mxu1 }
  0xfa   : > { %791 = vst.msk [vmem:[%s1158_s30 + $0x5c] sm:$0xf] %vm767_vm2, %v956_v39  ;;  %773 = vst.msk [vmem:[%s1158_s30 + $0x14] sm:$0xf] %vm767_vm2, %v938_v40  ;;  %v601_v51 = vadd.f32 %v1138_v20, %v562_v41  ;;  %v583_v52 = vadd.f32 %v1138_v20, %v544_v42  ;;  %v563_v53 = vmul.f32 %v1011_v49, %v1133_v18  ;;  %v617_v56 = vmax.f32 %v585_v46, 0.0 }
  0xfb   : > { %v545_v54 = vmul.f32 %v1133_v18, %v437_v50  ;;  %789 = vst.msk [vmem:[%s1158_s30 + $0x54] sm:$0xf] %vm767_vm2, %v954_v45  ;;  %v599_v57 = vadd.f32 %v1138_v20, %v560_v47  ;;  %v586_v58 = vadd.f32 %v1138_v20, %v547_v48  ;;  %v561_v59 = vmul.f32 %v1133_v18, %v501_v55 }
  0xfc   : > { %v633_v60 = vmax.f32 %v601_v51, 0.0  ;;  %v615_v61 = vmax.f32 %v583_v52, 0.0  ;;  %v602_v62 = vadd.f32 %v1138_v20, %v563_v53  ;;  %v943_v0 = vpack.c.bf16 %v617_v56, %v617_v56 }
  0xfd   : > { %v584_v63 = vadd.f32 %v1138_v20, %v545_v54  ;;  %v631_v1 = vmax.f32 %v599_v57, 0.0  ;;  %v618_v2 = vmax.f32 %v586_v58, 0.0  ;;  %v600_v3 = vadd.f32 %v1138_v20, %v561_v59  ;;  %v998_v8 = vpop.f32.mrb[12].mxu0 }
  0xfe   : > { %v959_v4 = vpack.c.bf16 %v633_v60, %v633_v60  ;;  %v941_v5 = vpack.c.bf16 %v615_v61, %v615_v61  ;;  %v634_v6 = vmax.f32 %v602_v62, 0.0  ;;  %778 = vst.msk [vmem:[%s1158_s30 + $0x28] sm:$0xf] %vm767_vm2, %v943_v0  ;;  %v550_v12 = vmul.f32 %v998_v8, %v1133_v18  ;;  %v1014_v13 = vpop.f32.mrb[12].mxu1  ;;  %v450_v14 = vpop.f32.mrb[13].mxu0 }
  0xff   : > { %v616_v7 = vmax.f32 %v584_v63, 0.0  ;;  %v957_v9 = vpack.c.bf16 %v631_v1, %v631_v1  ;;  %v944_v10 = vpack.c.bf16 %v618_v2, %v618_v2  ;;  %v632_v11 = vmax.f32 %v600_v3, 0.0  ;;  %v514_v21 = vpop.f32.mrb[13].mxu1  ;;  %v999_v22 = vpop.f32.mrb[14].mxu0 }
 0x100   : > { %794 = vst.msk [vmem:[%s1158_s30 + $0x68] sm:$0xf] %vm767_vm2, %v959_v4  ;;  %776 = vst.msk [vmem:[%s1158_s30 + $0x20] sm:$0xf] %vm767_vm2, %v941_v5  ;;  %v960_v15 = vpack.c.bf16 %v634_v6, %v634_v6  ;;  %v566_v17 = vmul.f32 %v1014_v13, %v1133_v18  ;;  %v548_v19 = vmul.f32 %v1133_v18, %v450_v14  ;;  %v1015_v27 = vpop.f32.mrb[14].mxu1  ;;  %v453_v28 = vpop.f32.mrb[15].mxu0 }
 0x101   : > { %v942_v16 = vpack.c.bf16 %v616_v7, %v616_v7  ;;  %792 = vst.msk [vmem:[%s1158_s30 + $0x60] sm:$0xf] %vm767_vm2, %v957_v9  ;;  %779 = vst.msk [vmem:[%s1158_s30 + $0x2c] sm:$0xf] %vm767_vm2, %v944_v10  ;;  %v958_v23 = vpack.c.bf16 %v632_v11, %v632_v11  ;;  %v589_v24 = vadd.f32 %v1138_v20, %v550_v12  ;;  %v517_v33 = vpop.f32.mrb[15].mxu1 }
 0x102   : > { %v564_v25 = vmul.f32 %v1133_v18, %v514_v21  ;;  %v551_v26 = vmul.f32 %v999_v22, %v1133_v18  ;;  %795 = vst.msk [vmem:[%s1158_s30 + $0x6c] sm:$0xf] %vm767_vm2, %v960_v15  ;;  %v605_v29 = vadd.f32 %v1138_v20, %v566_v17  ;;  %v587_v30 = vadd.f32 %v1138_v20, %v548_v19 }
 0x103   : > { %777 = vst.msk [vmem:[%s1158_s30 + $0x24] sm:$0xf] %vm767_vm2, %v942_v16  ;;  %v567_v31 = vmul.f32 %v1015_v27, %v1133_v18  ;;  %v549_v32 = vmul.f32 %v1133_v18, %v453_v28  ;;  %793 = vst.msk [vmem:[%s1158_s30 + $0x64] sm:$0xf] %vm767_vm2, %v958_v23  ;;  %v621_v34 = vmax.f32 %v589_v24, 0.0  ;;  %v565_v37 = vmul.f32 %v1133_v18, %v517_v33 }
 0x104   : > { %v603_v35 = vadd.f32 %v1138_v20, %v564_v25  ;;  %v590_v36 = vadd.f32 %v1138_v20, %v551_v26  ;;  %v637_v38 = vmax.f32 %v605_v29, 0.0  ;;  %v619_v39 = vmax.f32 %v587_v30, 0.0 }
 0x105   : > { %v606_v40 = vadd.f32 %v1138_v20, %v567_v31  ;;  %v588_v41 = vadd.f32 %v1138_v20, %v549_v32  ;;  %v947_v42 = vpack.c.bf16 %v621_v34, %v621_v34  ;;  %v604_v45 = vadd.f32 %v1138_v20, %v565_v37 }
 0x106   : > { %v635_v43 = vmax.f32 %v603_v35, 0.0  ;;  %v622_v44 = vmax.f32 %v590_v36, 0.0  ;;  %v963_v46 = vpack.c.bf16 %v637_v38, %v637_v38  ;;  %v945_v47 = vpack.c.bf16 %v619_v39, %v619_v39 }
 0x107   : > { %v638_v18 = vmax.f32 %v606_v40, 0.0  ;;  %v620_v48 = vmax.f32 %v588_v41, 0.0  ;;  %782 = vst.msk [vmem:[%s1158_s30 + $0x38] sm:$0xf] %vm767_vm2, %v947_v42  ;;  %v636_v51 = vmax.f32 %v604_v45, 0.0 }
 0x108   : > { %v961_v49 = vpack.c.bf16 %v635_v43, %v635_v43  ;;  %v948_v50 = vpack.c.bf16 %v622_v44, %v622_v44  ;;  %798 = vst.msk [vmem:[%s1158_s30 + $0x78] sm:$0xf] %vm767_vm2, %v963_v46  ;;  %780 = vst.msk [vmem:[%s1158_s30 + $0x30] sm:$0xf] %vm767_vm2, %v945_v47 }
 0x109   : > { %v964_v52 = vpack.c.bf16 %v638_v18, %v638_v18  ;;  %v946_v53 = vpack.c.bf16 %v620_v48, %v620_v48  ;;  %v962_v20 = vpack.c.bf16 %v636_v51, %v636_v51 }
 0x10a   : > { %796 = vst.msk [vmem:[%s1158_s30 + $0x70] sm:$0xf] %vm767_vm2, %v961_v49  ;;  %783 = vst.msk [vmem:[%s1158_s30 + $0x3c] sm:$0xf] %vm767_vm2, %v948_v50 }
 0x10b   : > { %799 = vst.msk [vmem:[%s1158_s30 + $0x7c] sm:$0xf] %vm767_vm2, %v964_v52  ;;  %781 = vst.msk [vmem:[%s1158_s30 + $0x34] sm:$0xf] %vm767_vm2, %v946_v53 }
 0x10c   : > { %797 = vst.msk [vmem:[%s1158_s30 + $0x74] sm:$0xf] %vm767_vm2, %v962_v20 }
 0x10d PF: > { %s14_s15 = sadd.s32 1, %s1050_s15  }
 0x10e   : > { %p11_p4 = scmp.ge.s32.totalorder %s14_s15, 4  }
 0x110   :  { %13 = sbr.rel (!%p11_p4) target bundleno = 1 (0x1), region = 66 }

// kernel: reverse.13
= control target key start
LH: loop header
LB: loop body
LE: loop exit
PB: predicated region body
PF: predicated region fallthrough
CT: control target
= control target key end

     0   :  { %v55_v3 = vlaneseq  ;;  %v48_v5 = vld [vmem:[#allocation0 + $0x7] ss:$-1 sm:$0xff]  ;;  %v62_v6 = vld [vmem:[#allocation0 + $0x17] ss:$-1 sm:$0xff]  ;;  %s197_s0 = inlined_call_operand.vmem [shape: f32[2,2,16,7], index: 0, kind: input, shape index: {}]   ;;  %s198_s1 = inlined_call_operand.vmem [shape: f32[2,2,16,7], index: 1, kind: output, shape index: {}]  }
   0x1   :  { %v36_v0 = vld [vmem:[%s197_s0] sm:$0xff]  ;;  %v38_v1 = vld [vmem:[%s197_s0 + $0x8] sm:$0xff]  ;;  %v40_v2 = vld [vmem:[%s197_s0 + $0x10] sm:$0xff]  ;;  %v49_v7 = vrot.slane %v48_v5, 1  ;;  %v63_v8 = vrot.slane %v62_v6, 1 }
   0x2   :  { %37 = vst [vmem:[#allocation0 + $0x8] sm:$0xff] %v36_v0  ;;  %39 = vst [vmem:[#allocation0 + $0x18] sm:$0xff] %v38_v1  ;;  %v42_v4 = vld [vmem:[%s197_s0 + $0x18] sm:$0xff]  ;;  %v76_v9 = vld [vmem:[#allocation0 + $0x27] ss:$-1 sm:$0xff]  ;;  %v56_v10 = vshrl.u32 %v55_v3, 7 }
   0x3   :  { %41 = vst [vmem:[#allocation0 + $0x28] sm:$0xff] %v40_v2  ;;  %43 = vst [vmem:[#allocation0 + $0x38] sm:$0xff] %v42_v4  ;;  %v77_v11 = vrot.slane %v76_v9, 1  ;;  %v90_v12 = vld [vmem:[#allocation0 + $0x37] ss:$-1 sm:$0xff] }
   0x4   :  { %50 = vst [vmem:[#allocation1] sm:$0xff] %v49_v7  ;;  %64 = vst [vmem:[#allocation1 + $0x8] sm:$0xff] %v63_v8  ;;  %v91_v13 = vrot.slane %v90_v12, 1  ;;  %vm57_vm0 = vcmp.lt.s32.totalorder %v56_v10, 7 }
   0x5   :  { %78 = vst [vmem:[#allocation1 + $0x10] sm:$0xff] %v77_v11 }
   0x6   :  { %92 = vst [vmem:[#allocation1 + $0x18] sm:$0xff] %v91_v13 }
   0x9   :  { %v53_v14 = vld [vmem:[#allocation0 + $0xf] ss:$-1 sm:$0xff]  ;;  %v67_v15 = vld [vmem:[#allocation0 + $0x1f] ss:$-1 sm:$0xff] }
   0xa   :  { %v81_v16 = vld [vmem:[#allocation0 + $0x2f] ss:$-1 sm:$0xff]  ;;  %v54_v17 = vrot.slane %v53_v14, 1  ;;  %v68_v18 = vrot.slane %v67_v15, 1  ;;  %v95_v20 = vld [vmem:[#allocation0 + $0x3f] ss:$-1 sm:$0xff] }
   0xb   :  { %v82_v19 = vrot.slane %v81_v16, 1  ;;  %v96_v21 = vrot.slane %v95_v20, 1 }
   0xc   :  { %58 = vst.msk [vmem:[#allocation1] sm:$0xff] %vm57_vm0, %v54_v17  ;;  %72 = vst.msk [vmem:[#allocation1 + $0x8] sm:$0xff] %vm57_vm0, %v68_v18 }
   0xd   :  { %86 = vst.msk [vmem:[#allocation1 + $0x10] sm:$0xff] %vm57_vm0, %v82_v19  ;;  %100 = vst.msk [vmem:[#allocation1 + $0x18] sm:$0xff] %vm57_vm0, %v96_v21 }
  0x13   :  { %v134_v22 = vld [vmem:[#allocation1] sm:$0xff]  ;;  %v136_v23 = vld [vmem:[#allocation1 + $0x8] sm:$0xff] }
  0x14   :  { %v138_v24 = vld [vmem:[#allocation1 + $0x10] sm:$0xff]  ;;  %135 = vst [vmem:[%s198_s1] sm:$0xff] %v134_v22  ;;  %137 = vst [vmem:[%s198_s1 + $0x8] sm:$0xff] %v136_v23  ;;  %v140_v25 = vld [vmem:[#allocation1 + $0x18] sm:$0xff] }
  0x15   :  { %139 = vst [vmem:[%s198_s1 + $0x10] sm:$0xff] %v138_v24  ;;  %141 = vst [vmem:[%s198_s1 + $0x18] sm:$0xff] %v140_v25 }

// kernel: my_ffc_resblock.26
= control target key start
LH: loop header
LB: loop body
LE: loop exit
PB: predicated region body
PF: predicated region fallthrough
CT: control target
= control target key end

     0   :  { %s4521_s30 = smov 0   ;;  %s6815_s0 = inlined_call_operand.vmem [shape: bf16[2,18,18,8], index: 0, kind: input, shape index: {}]   ;;  %s6816_s1 = inlined_call_operand.vmem [shape: bf16[512,2], index: 1, kind: input, shape index: {}]   ;;  %s6817_s2 = inlined_call_operand.vmem [shape: bf16[512,2], index: 2, kind: input, shape index: {}]   ;;  %s6818_s3 = inlined_call_operand.vmem [shape: bf16[72,4], index: 3, kind: input, shape index: {}]   ;;  %s6819_s4 = inlined_call_operand.vmem [shape: bf16[36,4], index: 4, kind: input, shape index: {}]   ;;  %s6820_s5 = inlined_call_operand.vmem [shape: bf16[2,4], index: 5, kind: input, shape index: {}]   ;;  %s6821_s6 = inlined_call_operand.vmem [shape: f32[1,8], index: 6, kind: input, shape index: {}]   ;;  %s6822_s7 = inlined_call_operand.vmem [shape: f32[1,8], index: 7, kind: input, shape index: {}]   ;;  %s6823_s8 = inlined_call_operand.vmem [shape: bf16[512,8], index: 8, kind: input, shape index: {}]   ;;  %s6824_s9 = inlined_call_operand.vmem [shape: bf16[512,8], index: 9, kind: output, shape index: {}]  }
   0x1 LB: > { %s4527_s10 = sadd.s32 4294967295, %s4453_s30   ;;  %p3728_p0 = scmp.ge.s32.totalorder %s4453_s30, 1  ;;  %s4453_s30 = sphi %s4521_s30, %s19_s30  }
   0x2   : > { %p320_p1 = scmp.lt.s32.totalorder %s4453_s30, 3 }
   0x4   : > { %p321_p2 = pnand %p3728_p0, %p320_p1 }
   0x6   : > { %324 = sbr.rel (%p321_p2) target bundleno = 1143 (0x477), region = 56 }
   0xd   : > { %p371_p3 = scmp.lt.s32.totalorder %s4527_s10, 1  ;;  %vm583_vm0 = vsmask.f32 7424  ;;  %s4455_s16 = smov 4   ;;  %vm6868_vm1 = vcmask 1046528   ;;  %vm1351_vm2 = vcmask 31744  }
   0xe   : > { %s4456_s17 = smov 8   ;;  %s4457_s18 = smov 12   ;;  %vm1384_vm3 = vcmask 64512   ;;  %vm1417_vm4 = vcmask 97280   ;;  %vm1450_vm5 = vcmask 130048   ;;  %vm2728_vm6 = vcmask 1040384  }
   0xf   : > { %s372_s11 = scalar_select %p371_p3, %s4527_s10, 1  ;;  %vm6867_vm7 = vcmask 15360   ;;  %vm2332_vm8 = vcmask 1043456   ;;  %vm2940_vm9 = vcmask 1041408   ;;  %vm1483_vm10 = vcmask 162816  }
  0x10   : > { %s4458_s19 = smov 16   ;;  %s4459_s20 = smov 20   ;;  %vm1516_vm11 = vcmask 195584   ;;  %vm1549_vm12 = vcmask 228352   ;;  %vm6871_vm13 = vcmask 261120   ;;  %vm1615_vm14 = vcmask 293888  }
  0x11   : > { %s4344_s12 = smul.u32 216, %s372_s11  ;;  %s4460_s21 = smov 124   ;;  %vm1648_vm15 = vcmask 326656  }
  0x12   : > { %s4461_s22 = smov 24   ;;  %s4462_s23 = smov 28  }
  0x13   : > { %s4536_s15 = scalar_lea.vmem %s6815_s0, %s4344_s12  ;;  %s3730_s24 = sshll.u32 %s4527_s10, 5 }
  0x14   : > { %v4539_v0 = vld [vmem:[%s4536_s15 + $0x18] sm:$0xff]   ;;  %v4542_v1 = vld [vmem:[%s4536_s15 + $0x20] ss:$0 sps:$4 sm:$0x11]   ;;  %v4557_v12 = vld [vmem:[%s4536_s15 + $0x24] sm:$0xff]   ;;  %p377_p4 = scmp.lt.s32.totalorder %s3730_s24, 63 }
  0x15   : > { %v4545_v2 = vld [vmem:[%s4536_s15] sm:$0xff]   ;;  %v609_v3 = vshrl.u32 %v4539_v0, 16  ;;  %v611_v4 = vshll.u32 %v4539_v0, 16  ;;  %v616_v5 = vshll.u32 %v4542_v1, 16  ;;  %v621_v17 = vshrl.u32 %v4557_v12, 16  ;;  %v4565_v19 = vld [vmem:[%s4536_s15 + $0xc] sm:$0xff]  }
  0x16   : > { %6872 = vst [vmem:[#allocation2_spill] sm:$0xff] %v4545_v2  ;;  %v4551_v6 = vld [vmem:[%s4536_s15 + $0x8] ss:$0 sps:$4 sm:$0x11]   ;;  %v585_v7 = vshrl.u32 %v4545_v2, 16  ;;  %v587_v8 = vshll.u32 %v4545_v2, 16 }
  0x17   : > { %v613_v9 = vrot.slane %v611_v4, 1  ;;  %v618_v10 = vrot.slane %v616_v5, 1  ;;  %v592_v11 = vshll.u32 %v4551_v6, 16  ;;  %v4560_v14 = vld [vmem:[%s4536_s15 + $0x2c] ss:$0 sps:$4 sm:$0x11]  }
  0x18   : > { %v589_v13 = vrot.slane %v587_v8, 1  ;;  %v623_v18 = vshll.u32 %v4557_v12, 16  ;;  %v628_v21 = vshll.u32 %v4560_v14, 16  ;;  %v4569_v22 = vld [vmem:[%s4536_s15 + $0x14] ss:$0 sps:$4 sm:$0x11]  }
  0x19   : > { %v614_v15 = vor.u32 %v613_v9, %v609_v3  ;;  %v594_v16 = vrot.slane %v592_v11, 1  ;;  %v597_v25 = vshrl.u32 %v4565_v19, 16  ;;  %v599_v26 = vshll.u32 %v4565_v19, 16  ;;  %v4577_v27 = vld [vmem:[%s4536_s15 + $0x3c] sm:$0xff]   ;;  %v4593_v37 = vld [vmem:[%s4536_s15 + $0x30] sm:$0xff]   ;;  %v4613_v49 = vld [vmem:[%s4536_s15 + $0x48] sm:$0xff]  }
  0x1a   : > { %v590_v20 = vor.u32 %v589_v13, %v585_v7  ;;  %v625_v24 = vrot.slane %v623_v18, 1  ;;  %v630_v29 = vrot.slane %v628_v21, 1  ;;  %v604_v30 = vshll.u32 %v4569_v22, 16  ;;  %v4588_v33 = vld [vmem:[%s4536_s15 + $0x44] ss:$0 sps:$4 sm:$0x11]  }
  0x1b   : > { %v4572_v23 = vsel %vm583_vm0, %v614_v15, %v618_v10  ;;  %v601_v32 = vrot.slane %v599_v26, 1  ;;  %v645_v34 = vshrl.u32 %v4577_v27, 16  ;;  %v647_v35 = vshll.u32 %v4577_v27, 16  ;;  %v4602_v42 = vld [vmem:[%s4536_s15 + $0x38] ss:$0 sps:$4 sm:$0x11]  }
  0x1c   : > { %780 = vrot.lane.b32.xlu1 %v4572_v23, %s4455_s16  ;;  %v4582_v28 = vsel %vm583_vm0, %v590_v20, %v594_v16  ;;  %v626_v31 = vor.u32 %v625_v24, %v621_v17  ;;  %v606_v36 = vrot.slane %v604_v30, 1  ;;  %v652_v41 = vshll.u32 %v4588_v33, 16  ;;  %v4607_v45 = vld [vmem:[%s4536_s15 + $0x54] sm:$0xff]   ;;  %v4619_v52 = vld [vmem:[%s4536_s15 + $0x5c] ss:$0 sps:$4 sm:$0x11]  }
  0x1d   : > { %6873 = vst [vmem:[#allocation3_spill] sm:$0xff] %v4582_v28  ;;  %776 = vrot.lane.b32.xlu0 %v4582_v28, %s4455_s16  ;;  %v602_v39 = vor.u32 %v601_v32, %v597_v25  ;;  %v649_v40 = vrot.slane %v647_v35, 1  ;;  %v633_v43 = vshrl.u32 %v4593_v37, 16  ;;  %v635_v44 = vshll.u32 %v4593_v37, 16  ;;  %v4632_v61 = vld [vmem:[%s4536_s15 + $0x6c] sm:$0xff]   ;;  %v4653_v20 = vld [vmem:[%s4536_s15 + $0x60] sm:$0xff]  }
  0x1e   : > { %v4596_v38 = vsel %vm583_vm0, %v626_v31, %v630_v29  ;;  %v654_v48 = vrot.slane %v652_v41, 1  ;;  %v640_v51 = vshll.u32 %v4602_v42, 16  ;;  %v669_v53 = vshrl.u32 %v4607_v45, 16  ;;  %v4635_v63 = vld [vmem:[%s4536_s15 + $0x50] ss:$0 sps:$4 sm:$0x11]  }
  0x1f   : > { %v4610_v46 = vsel %vm583_vm0, %v602_v39, %v606_v36  ;;  %v650_v47 = vor.u32 %v649_v40, %v645_v34  ;;  %v637_v50 = vrot.slane %v635_v44, 1  ;;  %v671_v55 = vshll.u32 %v4607_v45, 16  ;;  %v4644_v9 = vld [vmem:[%s4536_s15 + $0x74] ss:$0 sps:$4 sm:$0x11]   ;;  %v4661_v24 = vld [vmem:[%s4536_s15 + $0x84] sm:$0xff]  }
  0x20   : > { %782 = vrot.lane.b32.xlu1 %v4596_v38, %s4455_s16  ;;  %v657_v56 = vshrl.u32 %v4613_v49, 16  ;;  %v642_v58 = vrot.slane %v640_v51, 1  ;;  %v676_v59 = vshll.u32 %v4619_v52, 16  ;;  %v659_v60 = vshll.u32 %v4613_v49, 16  ;;  %v4680_v40 = vld [vmem:[%s4536_s15 + $0x78] sm:$0xff]   ;;  %s7061_s24 = smov (!%p377_p4, %s3730_s24), 63 }
  0x21   : > { %778 = vrot.lane.b32.xlu0 %v4610_v46, %s4455_s16  ;;  %v4623_v54 = vsel %vm583_vm0, %v650_v47, %v654_v48  ;;  %v638_v57 = vor.u32 %v637_v50, %v633_v43  ;;  %v673_v62 = vrot.slane %v671_v55, 1  ;;  %v664_v8 = vshll.u32 %v4635_v63, 16  ;;  %v4658_v21 = vld [vmem:[%s4536_s15 + $0x68] ss:$0 sps:$4 sm:$0x11]   ;;  %s5170_s25 = sshll.u32 %s7061_s24, 2 }
  0x22   : > { %v678_v4 = vrot.slane %v676_v59, 1  ;;  %v661_v5 = vrot.slane %v659_v60, 1  ;;  %v693_v10 = vshrl.u32 %v4632_v61, 16  ;;  %v695_v11 = vshll.u32 %v4632_v61, 16  ;;  %s5176_s28 = scalar_lea.vmem %s6816_s1, %s5170_s25  ;;  %s5182_s11 = scalar_lea.vmem %s6817_s2, %s5170_s25 }
  0x23   : > { %v4638_v3 = vsel %vm583_vm0, %v638_v57, %v642_v58  ;;  %v674_v7 = vor.u32 %v673_v62, %v669_v53  ;;  %v666_v16 = vrot.slane %v664_v8, 1  ;;  %v700_v18 = vshll.u32 %v4644_v9, 16  ;;  %v4672_v34 = vld [vmem:[%s4536_s15 + $0x8c] ss:$0 sps:$4 sm:$0x11]   ;;  %v4691_v53 = vld [vmem:[%s4536_s15 + $0x9c] sm:$0xff]  }
  0x24   : > { %786 = vrot.lane.b32.xlu1 %v4623_v54, %s4455_s16  ;;  %v662_v13 = vor.u32 %v661_v5, %v657_v56  ;;  %v697_v17 = vrot.slane %v695_v11, 1  ;;  %v681_v30 = vshrl.u32 %v4653_v20, 16  ;;  %v683_v31 = vshll.u32 %v4653_v20, 16  ;;  %v4686_v47 = vld [vmem:[%s4536_s15 + $0x80] ss:$0 sps:$4 sm:$0x11]  }
  0x25   : > { %784 = vrot.lane.b32.xlu0 %v4638_v3, %s4455_s16  ;;  %v4649_v15 = vsel %vm583_vm0, %v674_v7, %v678_v4  ;;  %v702_v29 = vrot.slane %v700_v18, 1  ;;  %v688_v32 = vshll.u32 %v4658_v21, 16  ;;  %v717_v35 = vshrl.u32 %v4661_v24, 16  ;;  %v4695_v60 = vld [vmem:[%s4536_s15 + $0xa4] ss:$0 sps:$4 sm:$0x11]  }
  0x26   : > { %v4664_v25 = vsel %vm583_vm0, %v662_v13, %v666_v16  ;;  %v698_v26 = vor.u32 %v697_v17, %v693_v10  ;;  %v719_v39 = vshll.u32 %v4661_v24, 16  ;;  %v685_v41 = vrot.slane %v683_v31, 1  ;;  %v4703_v8 = vld [vmem:[%s4536_s15 + $0x90] sm:$0xff]   ;;  %v4714_v17 = vld [vmem:[%s4536_s15 + $0x98] ss:$0 sps:$4 sm:$0x11]  }
  0x27   : > { %v690_v43 = vrot.slane %v688_v32, 1  ;;  %v724_v44 = vshll.u32 %v4672_v34, 16  ;;  %v705_v50 = vshrl.u32 %v4680_v40, 16  ;;  %v707_v51 = vshll.u32 %v4680_v40, 16  ;;  %6877 = vst [vmem:[#allocation7_spill] sm:$0xff] %v4714_v17  ;;  %s4463_s12 = smov 32  }
  0x28   : > { %790 = vrot.lane.b32.xlu1 %v4649_v15, %s4455_s16  ;;  %v4676_v36 = vsel %vm583_vm0, %v698_v26, %v702_v29  ;;  %v721_v48 = vrot.slane %v719_v39, 1  ;;  %v686_v55 = vor.u32 %v685_v41, %v681_v30  ;;  %v712_v57 = vshll.u32 %v4686_v47, 16  ;;  %v4719_v29 = vld [vmem:[%s4536_s15 + $0xb4] sm:$0xff]   ;;  %s4468_s27 = smov 52   ;;  %s4469_s29 = smov 56  }
  0x29   : > { %788 = vrot.lane.b32.xlu0 %v4664_v25, %s4455_s16  ;;  %6874 = vst [vmem:[#allocation4_spill] sm:$0xff] %v4676_v36  ;;  %v726_v56 = vrot.slane %v724_v44, 1  ;;  %v709_v59 = vrot.slane %v707_v51, 1  ;;  %v741_v62 = vshrl.u32 %v4691_v53, 16  ;;  %v743_v4 = vshll.u32 %v4691_v53, 16  ;;  %s4470_s24 = smov 64  }
  0x2a   : > { %v722_v58 = vor.u32 %v721_v48, %v717_v35  ;;  %v4700_v5 = vsel %vm583_vm0, %v686_v55, %v690_v43  ;;  %v714_v7 = vrot.slane %v712_v57, 1  ;;  %v748_v16 = vshll.u32 %v4695_v60, 16  ;;  %v4725_v35 = vld [vmem:[%s4536_s15 + $0xa8] sm:$0xff]   ;;  %v4729_v43 = vld [vmem:[%s4536_s15 + $0xbc] ss:$0 sps:$4 sm:$0x11]  }
  0x2b   : > { %6875 = vst [vmem:[#allocation5_spill] sm:$0xff] %v4700_v5  ;;  %v710_v11 = vor.u32 %v709_v59, %v705_v50  ;;  %v745_v13 = vrot.slane %v743_v4, 1  ;;  %v729_v18 = vshrl.u32 %v4703_v8, 16  ;;  %v731_v26 = vshll.u32 %v4703_v8, 16 }
  0x2c   : > { %794 = vrot.lane.b32.xlu1 %v4676_v36, %s4455_s16  ;;  %v4708_v10 = vsel %vm583_vm0, %v722_v58, %v726_v56  ;;  %v750_v32 = vrot.slane %v748_v16, 1  ;;  %v736_v41 = vshll.u32 %v4714_v17, 16  ;;  %v765_v44 = vshrl.u32 %v4719_v29, 16 }
  0x2d   : > { %792 = vrot.lane.b32.xlu0 %v4700_v5, %s4455_s16  ;;  %6876 = vst [vmem:[#allocation6_spill] sm:$0xff] %v4708_v10  ;;  %v4722_v30 = vsel %vm583_vm0, %v710_v11, %v714_v7  ;;  %v746_v31 = vor.u32 %v745_v13, %v741_v62  ;;  %v733_v39 = vrot.slane %v731_v26, 1  ;;  %v767_v50 = vshll.u32 %v4719_v29, 16  ;;  %v4744_v62 = vld [vmem:[%s4536_s15 + $0xb0] ss:$0 sps:$4 sm:$0x11]  }
  0x2e   : > { %6878 = vst [vmem:[#allocation8_spill] sm:$0xff] %v4722_v30  ;;  %v753_v51 = vshrl.u32 %v4725_v35, 16  ;;  %v738_v56 = vrot.slane %v736_v41, 1  ;;  %v772_v57 = vshll.u32 %v4729_v43, 16  ;;  %v755_v58 = vshll.u32 %v4725_v35, 16 }
  0x2f   : > { %v4735_v48 = vsel %vm583_vm0, %v746_v31, %v750_v32  ;;  %v734_v55 = vor.u32 %v733_v39, %v729_v18  ;;  %v769_v59 = vrot.slane %v767_v50, 1  ;;  %v812_v13 = vrot.slane %v4565_v19, 1 }
  0x30   : > { %798 = vrot.lane.b32.xlu1 %v4708_v10, %s4455_s16  ;;  %6879 = vst [vmem:[#allocation9_spill] sm:$0xff] %v4735_v48  ;;  %v774_v7 = vrot.slane %v772_v57, 1  ;;  %v757_v11 = vrot.slane %v755_v58, 1  ;;  %v760_v18 = vshll.u32 %v4744_v62, 16  ;;  %v813_v26 = vrot.slane %v4569_v22, 1 }
  0x31   : > { %796 = vrot.lane.b32.xlu0 %v4722_v30, %s4455_s16  ;;  %v4747_v4 = vsel %vm583_vm0, %v734_v55, %v738_v56  ;;  %v770_v16 = vor.u32 %v769_v59, %v765_v44  ;;  %v809_v41 = vrot.slane %v4545_v2, 1  ;;  %v810_v50 = vrot.slane %v4551_v6, 1 }
  0x32   : > { %6880 = vst [vmem:[#allocation10_spill] sm:$0xff] %v4747_v4  ;;  %v758_v31 = vor.u32 %v757_v11, %v753_v51  ;;  %v762_v39 = vrot.slane %v760_v18, 1  ;;  %v4765_v44 = vsel %vm6868_vm1, %v812_v13, %v813_v26  ;;  %v818_v22 = vrot.slane %v4557_v12, 1 }
  0x33   : > { %v4755_v32 = vsel %vm583_vm0, %v770_v16, %v774_v7  ;;  %v819_v51 = vrot.slane %v4560_v14, 1  ;;  %v4772_v56 = vsel %vm6868_vm1, %v809_v41, %v810_v50  ;;  %v815_v6 = vrot.slane %v4539_v0, 1 }
  0x34   : > { %802 = vrot.lane.b32.xlu1 %v4735_v48, %s4455_s16  ;;  %6881 = vst [vmem:[#allocation11_spill] sm:$0xff] %v4755_v32  ;;  %v4762_v55 = vsel %vm583_vm0, %v758_v31, %v762_v39  ;;  %6883 = vst [vmem:[#allocation13_spill] sm:$0xff] %v4772_v56  ;;  %v816_v57 = vrot.slane %v4542_v1, 1  ;;  %v824_v59 = vrot.slane %v4577_v27, 1  ;;  %v825_v7 = vrot.slane %v4588_v33, 1 }
  0x35   : > { %800 = vrot.lane.b32.xlu0 %v4747_v4, %s4455_s16  ;;  %6882 = vst [vmem:[#allocation12_spill] sm:$0xff] %v4762_v55  ;;  %v4779_v58 = vsel %vm6868_vm1, %v818_v22, %v819_v51  ;;  %v821_v13 = vrot.slane %v4593_v37, 1  ;;  %v822_v16 = vrot.slane %v4602_v42, 1  ;;  %v830_v26 = vrot.slane %v4607_v45, 1 }
  0x36   : > { %v4786_v11 = vsel %vm6868_vm1, %v815_v6, %v816_v57  ;;  %v4793_v18 = vsel %vm6868_vm1, %v824_v59, %v825_v7  ;;  %v831_v31 = vrot.slane %v4619_v52, 1  ;;  %v827_v41 = vrot.slane %v4613_v49, 1 }
  0x37   : > { %v4800_v39 = vsel %vm6868_vm1, %v821_v13, %v822_v16  ;;  %v828_v50 = vrot.slane %v4635_v63, 1  ;;  %v836_v51 = vrot.slane %v4632_v61, 1  ;;  %v837_v6 = vrot.slane %v4644_v9, 1 }
  0x38   : > { %806 = vrot.lane.b32.xlu1 %v4755_v32, %s4455_s16  ;;  %v4807_v22 = vsel %vm6868_vm1, %v830_v26, %v831_v31  ;;  %v833_v59 = vrot.slane %v4653_v20, 1  ;;  %v834_v7 = vrot.slane %v4658_v21, 1  ;;  %v842_v16 = vrot.slane %v4661_v24, 1 }
  0x39   : > { %804 = vrot.lane.b32.xlu0 %v4762_v55, %s4455_s16  ;;  %6884 = vst [vmem:[#allocation14_spill] sm:$0xff] %v4807_v22  ;;  %v4814_v57 = vsel %vm6868_vm1, %v827_v41, %v828_v50  ;;  %v4821_v13 = vsel %vm6868_vm1, %v836_v51, %v837_v6  ;;  %v843_v26 = vrot.slane %v4672_v34, 1  ;;  %v839_v41 = vrot.slane %v4680_v40, 1 }
  0x3a   : > { %6885 = vst [vmem:[#allocation15_spill] sm:$0xff] %v4814_v57  ;;  %6886 = vst [vmem:[#allocation16_spill] sm:$0xff] %v4821_v13  ;;  %v4828_v31 = vsel %vm6868_vm1, %v833_v59, %v834_v7  ;;  %v840_v50 = vrot.slane %v4686_v47, 1  ;;  %v848_v6 = vrot.slane %v4691_v53, 1  ;;  %v845_v7 = vrot.slane %v4703_v8, 1 }
  0x3b   : > { %6887 = vst [vmem:[#allocation17_spill] sm:$0xff] %v4828_v31  ;;  %v4835_v51 = vsel %vm6868_vm1, %v842_v16, %v843_v26  ;;  %v846_v28 = vrot.slane %v4714_v17, 1  ;;  %v854_v26 = vrot.slane %v4719_v29, 1  ;;  %v855_v2 = vrot.slane %v4729_v43, 1 }
  0x3c   : > { %859 = vrot.lane.b32.xlu1 %v4765_v44, %s4456_s17  ;;  %6888 = vst [vmem:[#allocation18_spill] sm:$0xff] %v4835_v51  ;;  %v4842_v59 = vsel %vm6868_vm1, %v839_v41, %v840_v50  ;;  %v851_v50 = vrot.slane %v4725_v35, 1  ;;  %v852_v17 = vrot.slane %v4744_v62, 1 }
  0x3d   : > { %857 = vrot.lane.b32.xlu0 %v4772_v56, %s4456_s17  ;;  %v849_v56 = vrot.slane %v4695_v60, 1  ;;  %6889 = vst [vmem:[#allocation19_spill] sm:$0xff] %v4842_v59  ;;  %v4856_v41 = vsel %vm6868_vm1, %v845_v7, %v846_v28  ;;  %v4912_v7 = vld [vmem:[%s4536_s15 + $0xc8] ss:$0 sps:$4 sm:$0x11]  }
  0x3e   : > { %6891 = vst [vmem:[#allocation21_spill] sm:$0xff] %v4856_v41 }
  0x3f   : > { %v4849_v16 = vsel %vm6868_vm1, %v848_v6, %v849_v56  ;;  %v4863_v56 = vsel %vm6868_vm1, %v854_v26, %v855_v2  ;;  %v4868_v6 = vsel %vm6868_vm1, %v851_v50, %v852_v17  ;;  %v4888_v2 = vld [vmem:[%s4536_s15 + $0xc0] sm:$0xff]   ;;  %vm1813_vm1 = vcmask 490496  }
  0x40   : > { %863 = vrot.lane.b32.xlu1 %v4779_v58, %s4456_s17  ;;  %6890 = vst [vmem:[#allocation20_spill] sm:$0xff] %v4849_v16  ;;  %6892 = vst [vmem:[#allocation22_spill] sm:$0xff] %v4863_v56  ;;  %v932_v26 = vshll.u32 %v4888_v2, 16 }
  0x41   : > { %861 = vrot.lane.b32.xlu0 %v4786_v11, %s4456_s17  ;;  %6893 = vst [vmem:[#allocation23_spill] sm:$0xff] %v4868_v6 }
  0x44   : > { %867 = vrot.lane.b32.xlu1 %v4793_v18, %s4456_s17 }
  0x45   : > { %865 = vrot.lane.b32.xlu0 %v4800_v39, %s4456_s17 }
  0x48   : > { %871 = vrot.lane.b32.xlu1 %v4807_v22, %s4456_s17 }
  0x49   : > { %869 = vrot.lane.b32.xlu0 %v4814_v57, %s4456_s17 }
  0x4c   : > { %875 = vrot.lane.b32.xlu1 %v4821_v13, %s4456_s17 }
  0x4d   : > { %873 = vrot.lane.b32.xlu0 %v4828_v31, %s4456_s17 }
  0x50   : > { %879 = vrot.lane.b32.xlu1 %v4835_v51, %s4456_s17 }
  0x51   : > { %877 = vrot.lane.b32.xlu0 %v4842_v59, %s4456_s17 }
  0x54   : > { %883 = vrot.lane.b32.xlu1 %v4849_v16, %s4456_s17  ;;  %v937_v16 = vshll.u32 %v4912_v7, 16 }
  0x55   : > { %881 = vrot.lane.b32.xlu0 %v4856_v41, %s4456_s17 }
  0x58   : > { %887 = vrot.lane.b32.xlu1 %v4863_v56, %s4456_s17  ;;  %v930_v56 = vshrl.u32 %v4888_v2, 16 }
  0x59   : > { %885 = vrot.lane.b32.xlu0 %v4868_v6, %s4456_s17  ;;  %v934_v6 = vrot.slane %v932_v26, 1  ;;  %s4464_s17 = smov 36  }
  0x5b   : > { %v935_v51 = vor.u32 %v934_v6, %v930_v56 }
  0x5c   : > { %896 = vrot.lane.b32.xlu1 %v4539_v0, %s4457_s18 }
  0x5d   : > { %894 = vrot.lane.b32.xlu0 %v4565_v19, %s4457_s18 }
  0x60   : > { %900 = vrot.lane.b32.xlu1 %v4593_v37, %s4457_s18 }
  0x61   : > { %898 = vrot.lane.b32.xlu0 %v4557_v12, %s4457_s18 }
  0x64   : > { %904 = vrot.lane.b32.xlu1 %v4613_v49, %s4457_s18 }
  0x65   : > { %902 = vrot.lane.b32.xlu0 %v4577_v27, %s4457_s18 }
  0x68   : > { %908 = vrot.lane.b32.xlu1 %v4653_v20, %s4457_s18 }
  0x69   : > { %906 = vrot.lane.b32.xlu0 %v4607_v45, %s4457_s18 }
  0x6c   : > { %912 = vrot.lane.b32.xlu1 %v4680_v40, %s4457_s18 }
  0x6d   : > { %910 = vrot.lane.b32.xlu0 %v4632_v61, %s4457_s18 }
  0x70   : > { %916 = vrot.lane.b32.xlu1 %v4703_v8, %s4457_s18 }
  0x71   : > { %914 = vrot.lane.b32.xlu0 %v4661_v24, %s4457_s18 }
  0x74   : > { %920 = vrot.lane.b32.xlu1 %v4725_v35, %s4457_s18 }
  0x75   : > { %918 = vrot.lane.b32.xlu0 %v4691_v53, %s4457_s18 }
  0x78   : > { %924 = vrot.lane.b32.xlu1 %v4888_v2, %s4457_s18 }
  0x79   : > { %922 = vrot.lane.b32.xlu0 %v4719_v29, %s4457_s18  ;;  %s4465_s18 = smov 40  }
  0x7c   : > { %943 = vrot.lane.b32.xlu1 %v4572_v23, %s4458_s19 }
  0x7d   : > { %941 = vrot.lane.b32.xlu0 %v4610_v46, %s4458_s19 }
  0x80   : > { %947 = vrot.lane.b32.xlu1 %v4638_v3, %s4458_s19 }
  0x81   : > { %945 = vrot.lane.b32.xlu0 %v4596_v38, %s4458_s19 }
  0x84   : > { %951 = vrot.lane.b32.xlu1 %v4664_v25, %s4458_s19 }
  0x85   : > { %949 = vrot.lane.b32.xlu0 %v4623_v54, %s4458_s19 }
  0x88   : > { %955 = vrot.lane.b32.xlu1 %v4700_v5, %s4458_s19 }
  0x89   : > { %953 = vrot.lane.b32.xlu0 %v4649_v15, %s4458_s19 }
  0x8c   : > { %959 = vrot.lane.b32.xlu1 %v4722_v30, %s4458_s19 }
  0x8d   : > { %957 = vrot.lane.b32.xlu0 %v4676_v36, %s4458_s19 }
  0x8e   : > { %v4907_v28 = vpop.permute.xlu1 %780 }
  0x8f   : > { %6894 = vst [vmem:[#allocation24_spill] sm:$0xff] %v4907_v28  ;;  %v4909_v17 = vpop.permute.xlu0 %776 }
  0x90   : > { %6895 = vst [vmem:[#allocation25_spill] sm:$0xff] %v4909_v17  ;;  %963 = vrot.lane.b32.xlu1 %v4747_v4, %s4458_s19  ;;  %v939_v17 = vrot.slane %v937_v16, 1 }
  0x91   : > { %961 = vrot.lane.b32.xlu0 %v4708_v10, %s4458_s19 }
  0x92   : > { %v4919_v50 = vpop.permute.xlu1 %782  ;;  %v4938_v26 = vsel %vm583_vm0, %v935_v51, %v939_v17 }
  0x93   : > { %6896 = vst [vmem:[#allocation26_spill] sm:$0xff] %v4919_v50  ;;  %v4925_v41 = vpop.permute.xlu0 %778  ;;  %6898 = vst [vmem:[#allocation28_spill] sm:$0xff] %v4938_v26 }
  0x94   : > { %6897 = vst [vmem:[#allocation27_spill] sm:$0xff] %v4925_v41  ;;  %967 = vrot.lane.b32.xlu1 %v4762_v55, %s4458_s19 }
  0x95   : > { %965 = vrot.lane.b32.xlu0 %v4735_v48, %s4458_s19 }
  0x96   : > { %v4929_v28 = vpop.permute.xlu1 %786 }
  0x97   : > { %v4933_v50 = vpop.permute.xlu0 %784 }
  0x98   : > { %971 = vrot.lane.b32.xlu1 %v4938_v26, %s4458_s19 }
  0x99   : > { %969 = vrot.lane.b32.xlu0 %v4755_v32, %s4458_s19  ;;  %s4466_s19 = smov 44  }
  0x9a   : > { %v4942_v30 = vpop.permute.xlu1 %790 }
  0x9b   : > { %v4946_v16 = vpop.permute.xlu0 %788 }
  0x9c   : > { %978 = vrot.lane.b32.xlu1 %v4786_v11, %s4459_s20 }
  0x9d   : > { %976 = vrot.lane.b32.xlu0 %v4765_v44, %s4459_s20 }
  0x9e   : > { %v4950_v56 = vpop.permute.xlu1 %794 }
  0x9f   : > { %v4956_v51 = vpop.permute.xlu0 %792 }
  0xa0   : > { %982 = vrot.lane.b32.xlu1 %v4800_v39, %s4459_s20 }
  0xa1   : > { %980 = vrot.lane.b32.xlu0 %v4779_v58, %s4459_s20 }
  0xa2   : > { %v4960_v6 = vpop.permute.xlu1 %798 }
  0xa3   : > { %v4964_v17 = vpop.permute.xlu0 %796 }
  0xa4   : > { %986 = vrot.lane.b32.xlu1 %v4814_v57, %s4459_s20 }
  0xa5   : > { %984 = vrot.lane.b32.xlu0 %v4793_v18, %s4459_s20 }
  0xa6   : > { %v4968_v26 = vpop.permute.xlu1 %802 }
  0xa7   : > { %v4972_v55 = vpop.permute.xlu0 %800 }
  0xa8   : > { %990 = vrot.lane.b32.xlu1 %v4828_v31, %s4459_s20 }
  0xa9   : > { %988 = vrot.lane.b32.xlu0 %v4807_v22, %s4459_s20 }
  0xaa   : > { %v4978_v32 = vpop.permute.xlu1 %806 }
  0xab   : > { %v4980_v4 = vpop.permute.xlu0 %804 }
  0xac   : > { %994 = vrot.lane.b32.xlu1 %v4842_v59, %s4459_s20 }
  0xad   : > { %992 = vrot.lane.b32.xlu0 %v4821_v13, %s4459_s20 }
  0xae   : > { %v4986_v48 = vpop.permute.xlu1 %859 }
  0xaf   : > { %6899 = vst [vmem:[#allocation29_spill] sm:$0xff] %v4986_v48  ;;  %v4988_v10 = vpop.permute.xlu0 %857 }
  0xb0   : > { %6900 = vst [vmem:[#allocation30_spill] sm:$0xff] %v4988_v10  ;;  %1850 = vrot.lane.b32.xlu1 %v4557_v12, %s4460_s21 }
  0xb1   : > { %1846 = vrot.lane.b32.xlu0 %v4539_v0, %s4460_s21 }
  0xb2   : > { %v4994_v41 = vpop.permute.xlu1 %863 }
  0xb3   : > { %6901 = vst [vmem:[#allocation31_spill] sm:$0xff] %v4994_v41  ;;  %v4996_v31 = vpop.permute.xlu0 %861 }
  0xb4   : > { %6902 = vst [vmem:[#allocation32_spill] sm:$0xff] %v4996_v31  ;;  %1852 = vrot.lane.b32.xlu1 %v4560_v14, %s4460_s21 }
  0xb5   : > { %1848 = vrot.lane.b32.xlu0 %v4542_v1, %s4460_s21 }
  0xb6   : > { %v868_v59 = vpop.permute.xlu1 %867 }
  0xb7   : > { %v866_v48 = vpop.permute.xlu0 %865 }
  0xb8   : > { %1858 = vrot.lane.b32.xlu1 %v4577_v27, %s4460_s21 }
  0xb9   : > { %1854 = vrot.lane.b32.xlu0 %v4593_v37, %s4460_s21 }
  0xba   : > { %v872_v10 = vpop.permute.xlu1 %871 }
  0xbb   : > { %v870_v13 = vpop.permute.xlu0 %869 }
  0xbc   : > { %1860 = vrot.lane.b32.xlu1 %v4588_v33, %s4460_s21 }
  0xbd   : > { %1856 = vrot.lane.b32.xlu0 %v4602_v42, %s4460_s21 }
  0xbe   : > { %v876_v14 = vpop.permute.xlu1 %875 }
  0xbf   : > { %v874_v31 = vpop.permute.xlu0 %873 }
  0xc0   : > { %1866 = vrot.lane.b32.xlu1 %v4607_v45, %s4460_s21 }
  0xc1   : > { %1862 = vrot.lane.b32.xlu0 %v4613_v49, %s4460_s21 }
  0xc2   : > { %v880_v1 = vpop.permute.xlu1 %879 }
  0xc3   : > { %v878_v41 = vpop.permute.xlu0 %877 }
  0xc4   : > { %1868 = vrot.lane.b32.xlu1 %v4619_v52, %s4460_s21 }
  0xc5   : > { %1864 = vrot.lane.b32.xlu0 %v4635_v63, %s4460_s21 }
  0xc6   : > { %v884_v33 = vpop.permute.xlu1 %883 }
  0xc7   : > { %v5018_v5 = vpop.permute.xlu0 %881 }
  0xc8   : > { %1874 = vrot.lane.b32.xlu1 %v4632_v61, %s4460_s21 }
  0xc9   : > { %1870 = vrot.lane.b32.xlu0 %v4653_v20, %s4460_s21 }
  0xca   : > { %v5024_v42 = vpop.permute.xlu1 %887 }
  0xcb   : > { %v5026_v36 = vpop.permute.xlu0 %885 }
  0xcc   : > { %1876 = vrot.lane.b32.xlu1 %v4644_v9, %s4460_s21  ;;  %v1363_v9 = vsel %vm1351_vm2, %v4577_v27, %v4929_v28  ;;  %v1367_v27 = vsel %vm1351_vm2, %v4607_v45, %v4942_v30  ;;  %v1371_v45 = vsel %vm1351_vm2, %v4632_v61, %v4950_v56  ;;  %v1375_v61 = vsel %vm1351_vm2, %v4661_v24, %v4960_v6 }
  0xcd   : > { %1872 = vrot.lane.b32.xlu0 %v4658_v21, %s4460_s21  ;;  %v1396_v21 = vsel %vm1384_vm3, %v1363_v9, %v868_v59  ;;  %v1400_v59 = vsel %vm1384_vm3, %v1367_v27, %v872_v10  ;;  %v1404_v30 = vsel %vm1384_vm3, %v1371_v45, %v876_v14  ;;  %v1408_v14 = vsel %vm1384_vm3, %v1375_v61, %v880_v1  ;;  %v6908_v61 = vld [vmem:[#allocation2_spill] sm:$0xff] }
  0xce   : > { %v5032_v52 = vpop.permute.xlu1 %896 }
  0xcf   : > { %6903 = vst [vmem:[#allocation33_spill] sm:$0xff] %v5032_v52  ;;  %v5034_v63 = vpop.permute.xlu0 %894 }
  0xd0   : > { %6904 = vst [vmem:[#allocation34_spill] sm:$0xff] %v5034_v63  ;;  %1882 = vrot.lane.b32.xlu1 %v4661_v24, %s4460_s21  ;;  %v1379_v24 = vsel %vm1351_vm2, %v4691_v53, %v4968_v26 }
  0xd1   : > { %1878 = vrot.lane.b32.xlu0 %v4680_v40, %s4460_s21  ;;  %v1412_v1 = vsel %vm1384_vm3, %v1379_v24, %v884_v33  ;;  %v4404_v24 = vld [vmem:[%s4536_s15 + $0xd4] ss:$0 sps:$4 sm:$0x11]  }
  0xd2   : > { %v5040_v57 = vpop.permute.xlu1 %900 }
  0xd3   : > { %6905 = vst [vmem:[#allocation35_spill] sm:$0xff] %v5040_v57  ;;  %v5042_v22 = vpop.permute.xlu0 %898  ;;  %v1361_v57 = vsel %vm1351_vm2, %v4593_v37, %v4933_v50 }
  0xd4   : > { %6906 = vst [vmem:[#allocation36_spill] sm:$0xff] %v5042_v22  ;;  %1884 = vrot.lane.b32.xlu1 %v4672_v34, %s4460_s21  ;;  %v1394_v34 = vsel %vm1384_vm3, %v1361_v57, %v866_v48  ;;  %v1365_v48 = vsel %vm1351_vm2, %v4613_v49, %v4946_v16  ;;  %v6907_v49 = vld [vmem:[#allocation7_spill] sm:$0xff] }
  0xd5   : > { %1880 = vrot.lane.b32.xlu0 %v4686_v47, %s4460_s21  ;;  %v1398_v28 = vsel %vm1384_vm3, %v1365_v48, %v870_v13  ;;  %v1369_v13 = vsel %vm1351_vm2, %v4653_v20, %v4956_v51  ;;  %v4096_v48 = vld [vmem:[%s5176_s28 + $0x38] sm:$0xff]  }
  0xd6   : > { %v905_v63 = vpop.permute.xlu1 %904 }
  0xd7   : > { %v5056_v22 = vsel %vm1417_vm4, %v1396_v21, %v905_v63  ;;  %v903_v52 = vpop.permute.xlu0 %902 }
  0xd8   : > { %1890 = vrot.lane.b32.xlu1 %v4691_v53, %s4460_s21  ;;  %v5065_v47 = vsel %vm1417_vm4, %v1394_v34, %v903_v52  ;;  %v4110_v34 = vld [vmem:[%s5182_s11 + $0x30] sm:$0xff]  }
  0xd9   : > { %1886 = vrot.lane.b32.xlu0 %v4703_v8, %s4460_s21  ;;  %v3989_v45 = vunpack.c.h.bf16 %v4110_v34 }
  0xda   : > { %v909_v37 = vpop.permute.xlu1 %908 }
  0xdb   : > { %v5074_v57 = vsel %vm1417_vm4, %v1400_v59, %v909_v37  ;;  %v907_v50 = vpop.permute.xlu0 %906  ;;  %v3988_v37 = vunpack.c.l.bf16 %v4110_v34 }
  0xdc   : > { %1892 = vrot.lane.b32.xlu1 %v4695_v60, %s4460_s21  ;;  %v5083_v10 = vsel %vm1417_vm4, %v1398_v28, %v907_v50  ;;  %v1402_v60 = vsel %vm1384_vm3, %v1369_v13, %v874_v31  ;;  %v1373_v31 = vsel %vm1351_vm2, %v4680_v40, %v4964_v17  ;;  %v4111_v28 = vld [vmem:[%s5182_s11 + $0x38] sm:$0xff]   ;;  %v5201_v13 = vld [vmem:[%s6820_s5] sm:$0x1] }
  0xdd   : > { %1888 = vrot.lane.b32.xlu0 %v6907_v49, %s4460_s21  ;;  %v1406_v9 = vsel %vm1384_vm3, %v1373_v31, %v878_v41  ;;  %v1377_v41 = vsel %vm1351_vm2, %v4703_v8, %v4972_v55  ;;  %v1381_v55 = vsel %vm1351_vm2, %v4725_v35, %v4980_v4  ;;  %v3929_v49 = vunpack.c.h.bf16 %v4096_v48  ;;  %4342 = vmatprep.subr.msk.bf16.mxu1 %vm2728_vm6, %v5201_v13 }
  0xde   : > { %v913_v16 = vpop.permute.xlu1 %912 }
  0xdf   : > { %v5092_v52 = vsel %vm1417_vm4, %v1404_v30, %v913_v16  ;;  %v911_v63 = vpop.permute.xlu0 %910  ;;  %v3928_v30 = vunpack.c.l.bf16 %v4096_v48  ;;  %v3992_v16 = vunpack.c.l.bf16 %v4111_v28 }
  0xe0   : > { %1898 = vrot.lane.b32.xlu1 %v4719_v29, %s4460_s21  ;;  %v5101_v56 = vsel %vm1417_vm4, %v1402_v60, %v911_v63 }
  0xe1   : > { %1894 = vrot.lane.b32.xlu0 %v4725_v35, %s4460_s21  ;;  %v4403_v35 = vld [vmem:[%s4536_s15 + $0xcc] sm:$0xff]   ;;  %v2639_v31 = vadd.f32 %v3992_v16, %v3928_v30 }
  0xe2   : > { %v917_v20 = vpop.permute.xlu1 %916 }
  0xe3   : > { %v5110_v51 = vsel %vm1417_vm4, %v1408_v14, %v917_v20  ;;  %v915_v21 = vpop.permute.xlu0 %914  ;;  %v5209_v14 = vsel %vm2728_vm6, %v5201_v13, 0  ;;  %v3993_v20 = vunpack.c.h.bf16 %v4111_v28 }
  0xe4   : > { %1900 = vrot.lane.b32.xlu1 %v4729_v43, %s4460_s21  ;;  %v5119_v6 = vsel %vm1417_vm4, %v1406_v9, %v915_v21  ;;  %v1410_v43 = vsel %vm1384_vm3, %v1377_v41, %v5018_v5  ;;  %4307 = vmatpush3.bf16.msra.mxu1 %v5209_v14 }
  0xe5   : > { %1896 = vrot.lane.b32.xlu0 %v4744_v62, %s4460_s21  ;;  %v1383_v62 = vsel %vm1351_vm2, %v4719_v29, %v4978_v32  ;;  %v1414_v29 = vsel %vm1384_vm3, %v1381_v55, %v5026_v36 }
  0xe6   : > { %v921_v40 = vpop.permute.xlu1 %920  ;;  %v1416_v8 = vsel %vm1384_vm3, %v1383_v62, %v5024_v42  ;;  %v4095_v42 = vld [vmem:[%s5176_s28 + $0x30] sm:$0xff]   ;;  %v4112_v62 = vld [vmem:[%s5182_s11 + $0x40] sm:$0xff]  }
  0xe7   : > { %v5128_v17 = vsel %vm1417_vm4, %v1412_v1, %v921_v40  ;;  %v919_v53 = vpop.permute.xlu0 %918  ;;  %v3924_v27 = vunpack.c.l.bf16 %v4095_v42  ;;  %v3925_v59 = vunpack.c.h.bf16 %v4095_v42  ;;  %v2640_v40 = vadd.f32 %v3993_v20, %v3929_v49  ;;  %v6914_v49 = vld [vmem:[#allocation3_spill] sm:$0xff] }
  0xe8   : > { %1902 = vrot.lane.b32.xlu1 %v4888_v2, %s4460_s21  ;;  %v5138_v26 = vsel %vm1417_vm4, %v1410_v43, %v919_v53  ;;  %v4097_v53 = vld [vmem:[%s5176_s28 + $0x40] sm:$0xff]  }
  0xe9   : > { %1013 = vrot.lane.b32.xlu0 %v4539_v0, %s4461_s22  ;;  %v2637_v60 = vadd.f32 %v3988_v37, %v3924_v27  ;;  %v3933_v55 = vunpack.c.h.bf16 %v4097_v53 }
  0xea   : > { %v925_v5 = vpop.permute.xlu1 %924 }
  0xeb   : > { %v5148_v2 = vsel %vm1417_vm4, %v1416_v8, %v925_v5  ;;  %v923_v32 = vpop.permute.xlu0 %922  ;;  %v3932_v5 = vunpack.c.l.bf16 %v4097_v53 }
  0xec   : > { %1060 = vrot.lane.b32.xlu1 %v4572_v23, %s4462_s23  ;;  %v5155_v33 = vsel %vm1417_vm4, %v1414_v29, %v923_v32  ;;  %v3996_v29 = vunpack.c.l.bf16 %v4112_v62  ;;  %v4098_v32 = vld [vmem:[%s5176_s28 + $0x48] sm:$0xff]  }
  0xed   : > { %1015 = vrot.lane.b32.xlu0 %v4557_v12, %s4461_s22  ;;  %v3936_v42 = vunpack.c.l.bf16 %v4098_v32  ;;  %v3937_v34 = vunpack.c.h.bf16 %v4098_v32 }
  0xee   : > { %v5160_v0 = vpop.permute.xlu1 %943 }
  0xef   : > { %v5163_v4 = vpop.permute.xlu0 %941 }
  0xf0   : > { %1062 = vrot.lane.b32.xlu1 %v4596_v38, %s4462_s23 }
  0xf1   : > { %1906 = vrot.lane.b32.xlu0 %v4403_v35, %s4460_s21  ;;  %v4113_v35 = vld [vmem:[%s5182_s11 + $0x48] sm:$0xff]  }
  0xf2   : > { %v5168_v36 = vpop.permute.xlu1 %947  ;;  %v4000_v27 = vunpack.c.l.bf16 %v4113_v35  ;;  %v4001_v37 = vunpack.c.h.bf16 %v4113_v35  ;;  %v5271_v35 = vld [vmem:[%s4536_s15 + $0x18] sm:$0xff]  }
  0xf3   : > { %v5184_v12 = vpop.permute.xlu0 %945 }
  0xf4   : > { %1904 = vrot.lane.b32.xlu1 %v4912_v7, %s4460_s21  ;;  %v2644_v30 = vadd.f32 %v4001_v37, %v3937_v34  ;;  %v5280_v34 = vld [vmem:[%s4536_s15 + $0xc] sm:$0xff]  }
  0xf5   : > { %1095 = vrot.lane.b32.xlu0 %v4786_v11, %s4463_s12 }
  0xf6   : > { %v952_v50 = vpop.permute.xlu1 %951 }
  0xf7   : > { %v5196_v7 = vsel %vm1450_vm5, %v5056_v22, %v952_v50  ;;  %v950_v63 = vpop.permute.xlu0 %949  ;;  %v2638_v22 = vadd.f32 %v3989_v45, %v3925_v59  ;;  %v2643_v50 = vadd.f32 %v4000_v27, %v3936_v42 }
  0xf8   : > { %1127 = vrot.lane.b32.xlu1 %v6908_v61, %s4463_s12  ;;  %v5213_v9 = vsel %vm1450_vm5, %v5065_v47, %v950_v63  ;;  %v2664_v47 = vpack.c.bf16 %v2640_v40, %v2639_v31  ;;  %v6917_v40 = vld [vmem:[#allocation13_spill] sm:$0xff] }
  0xf9   : > { %6909 = vst [vmem:[#allocation7_spill] sm:$0xff] %v5213_v9  ;;  %1097 = vrot.lane.b32.xlu0 %v4779_v58, %s4463_s12  ;;  %v2663_v1 = vpack.c.bf16 %v2638_v22, %v2637_v60  ;;  %v2666_v63 = vpack.c.bf16 %v2644_v30, %v2643_v50  ;;  %v4114_v22 = vld [vmem:[%s5182_s11 + $0x50] sm:$0xff]   ;;  %v4116_v30 = vld [vmem:[%s5182_s11 + $0x60] sm:$0xff]   ;;  %v6949_v9 = vld [vmem:[#allocation33_spill] sm:$0xff] }
  0xfa   : > { %v956_v21 = vpop.permute.xlu1 %955  ;;  %v5289_v50 = vld [vmem:[%s4536_s15 + $0x30] sm:$0xff]  }
  0xfb   : > { %v5221_v41 = vsel %vm1450_vm5, %v5074_v57, %v956_v21  ;;  %v954_v43 = vpop.permute.xlu0 %953  ;;  %4248 = vmatprep.mubr.msk.bf16.mxu1 %vm6867_vm7, %v2663_v1  ;;  %v4115_v1 = vld [vmem:[%s5182_s11 + $0x58] sm:$0xff]  }
  0xfc   : > { %6910 = vst [vmem:[#allocation2_spill] sm:$0xff] %v5221_v41  ;;  %1129 = vrot.lane.b32.xlu1 %v4565_v19, %s4463_s12  ;;  %v5230_v8 = vsel %vm1450_vm5, %v5083_v10, %v954_v43  ;;  %4249 = vmatmul.mubr.msk.bf16.vlgmr.msra.gmra.mrb[0].mxu1 %vm6867_vm7, %v2664_v47  ;;  %v3997_v19 = vunpack.c.h.bf16 %v4112_v62  ;;  %v2641_v10 = vadd.f32 %v3996_v29, %v3932_v5  ;;  %v4005_v47 = vunpack.c.h.bf16 %v4114_v22 }
  0xfd   : > { %6911 = vst [vmem:[#allocation37_spill] sm:$0xff] %v5230_v8  ;;  %1908 = vrot.lane.b32.xlu0 %v4404_v24, %s4460_s21  ;;  %v4004_v24 = vunpack.c.l.bf16 %v4114_v22  ;;  %v4008_v5 = vunpack.c.l.bf16 %v4115_v1  ;;  %v4009_v29 = vunpack.c.h.bf16 %v4115_v1  ;;  %s4467_s21 = smov 48   ;;  %v4405_v22 = vld [vmem:[%s6818_s3] sm:$0xff]  }
  0xfe   : > { %v960_v57 = vpop.permute.xlu1 %959  ;;  %v2642_v28 = vadd.f32 %v3997_v19, %v3933_v55  ;;  %4192 = vmatprep.subr.bf16.mxu0 %v4405_v22 }
  0xff   : > { %v5238_v59 = vsel %vm1450_vm5, %v5092_v52, %v960_v57  ;;  %v958_v48 = vpop.permute.xlu0 %957  ;;  %4193 = vmatpush3.bf16.msra.mxu0 %v4405_v22 }
 0x100   : > { %6912 = vst [vmem:[#allocation38_spill] sm:$0xff] %v5238_v59  ;;  %1161 = vrot.lane.b32.xlu1 %v4610_v46, %s4464_s17  ;;  %v5244_v45 = vsel %vm1450_vm5, %v5101_v56, %v958_v48  ;;  %v2665_v16 = vpack.c.bf16 %v2642_v28, %v2641_v10  ;;  %v4099_v56 = vld [vmem:[%s5176_s28 + $0x50] sm:$0xff]  }
 0x101   : > { %6913 = vst [vmem:[#allocation39_spill] sm:$0xff] %v5244_v45  ;;  %1159 = vrot.lane.b32.xlu0 %v6914_v49, %s4464_s17  ;;  %v3940_v31 = vunpack.c.l.bf16 %v4099_v56  ;;  %v3941_v21 = vunpack.c.h.bf16 %v4099_v56 }
 0x102   : > { %v964_v52 = vpop.permute.xlu1 %963  ;;  %4252 = vmatprep.mubr.msk.bf16.mxu1 %vm6867_vm7, %v2665_v16 }
 0x103   : > { %v5250_v60 = vsel %vm1450_vm5, %v5110_v51, %v964_v52  ;;  %v962_v61 = vpop.permute.xlu0 %961  ;;  %v4100_v51 = vld [vmem:[%s5176_s28 + $0x58] sm:$0xff]   ;;  %v2645_v55 = vadd.f32 %v4004_v24, %v3940_v31  ;;  %v2646_v57 = vadd.f32 %v4005_v47, %v3941_v21  ;;  %v4013_v31 = vunpack.c.h.bf16 %v4116_v30 }
 0x104   : > { %6915 = vst [vmem:[#allocation3_spill] sm:$0xff] %v5250_v60  ;;  %1193 = vrot.lane.b32.xlu1 %v4765_v44, %s4465_s18  ;;  %v5259_v20 = vsel %vm1450_vm5, %v5119_v6, %v962_v61  ;;  %4253 = vmatmul.mubr.msk.bf16.gmra.mrb[4].mxu1 %vm6867_vm7, %v2666_v63  ;;  %v3944_v53 = vunpack.c.l.bf16 %v4100_v51  ;;  %v3945_v62 = vunpack.c.h.bf16 %v4100_v51  ;;  %v4012_v63 = vunpack.c.l.bf16 %v4116_v30  ;;  %v4117_v61 = vld [vmem:[%s5182_s11 + $0x68] sm:$0xff]   ;;  %v4408_v30 = vld [vmem:[%s6819_s4] sm:$0xff]  }
 0x105   : > { %6916 = vst [vmem:[#allocation40_spill] sm:$0xff] %v5259_v20  ;;  %1191 = vrot.lane.b32.xlu0 %v6917_v40, %s4465_s18  ;;  %v2667_v10 = vpack.c.bf16 %v2646_v57, %v2645_v55  ;;  %v4016_v24 = vunpack.c.l.bf16 %v4117_v61  ;;  %v4017_v1 = vunpack.c.h.bf16 %v4117_v61  ;;  %4268 = vmatprep.subr.bf16.mxu1 %v4408_v30 }
 0x106   : > { %v968_v43 = vpop.permute.xlu1 %967  ;;  %v2647_v19 = vadd.f32 %v4008_v5, %v3944_v53  ;;  %v4406_v5 = vld [vmem:[%s6818_s3 + $0x8] sm:$0xff]   ;;  %4269 = vmatpush3.bf16.msra.mxu1 %v4408_v30 }
 0x107   : > { %v5268_v6 = vsel %vm1450_vm5, %v5128_v17, %v968_v43  ;;  %v966_v32 = vpop.permute.xlu0 %965  ;;  %v2648_v17 = vadd.f32 %v4009_v29, %v3945_v62  ;;  %4256 = vmatprep.mubr.msk.bf16.mxu1 %vm6867_vm7, %v2667_v10  ;;  %v4103_v29 = vld [vmem:[%s5176_s28 + $0x70] sm:$0xff]   ;;  %4194 = vmatprep.subr.bf16.mxu0 %v4406_v5  ;;  %v4119_v10 = vld [vmem:[%s5182_s11 + $0x78] sm:$0xff]  }
 0x108   : > { %6918 = vst [vmem:[#allocation13_spill] sm:$0xff] %v5268_v6  ;;  %1225 = vrot.lane.b32.xlu1 %v5271_v35, %s4466_s19  ;;  %v5277_v42 = vsel %vm1450_vm5, %v5138_v26, %v966_v32  ;;  %v4101_v26 = vld [vmem:[%s5176_s28 + $0x60] sm:$0xff]   ;;  %v4118_v32 = vld [vmem:[%s5182_s11 + $0x70] sm:$0xff]   ;;  %v3956_v57 = vunpack.c.l.bf16 %v4103_v29  ;;  %4195 = vmatpush3.bf16.msra.mxu0 %v4406_v5  ;;  %v4025_v22 = vunpack.c.h.bf16 %v4119_v10 }
 0x109   : > { %6919 = vst [vmem:[#allocation41_spill] sm:$0xff] %v5277_v42  ;;  %1223 = vrot.lane.b32.xlu0 %v5280_v34, %s4466_s19  ;;  %v2668_v48 = vpack.c.bf16 %v2648_v17, %v2647_v19  ;;  %v3948_v52 = vunpack.c.l.bf16 %v4101_v26  ;;  %v3949_v16 = vunpack.c.h.bf16 %v4101_v26  ;;  %v3957_v19 = vunpack.c.h.bf16 %v4103_v29  ;;  %v4407_v26 = vld [vmem:[%s6818_s3 + $0x10] sm:$0xff]  }
 0x10a   : > { %v972_v27 = vpop.permute.xlu1 %971  ;;  %v4020_v17 = vunpack.c.l.bf16 %v4118_v32  ;;  %4196 = vmatprep.subr.bf16.mxu0 %v4407_v26  ;;  %v4412_v29 = vld [vmem:[%s6819_s4 + $0x10] ss:$0 sps:$4 sm:$0x33]  }
 0x10b   : > { %v5286_v37 = vsel %vm1450_vm5, %v5148_v2, %v972_v27  ;;  %v970_v28 = vpop.permute.xlu0 %969  ;;  %v4102_v2 = vld [vmem:[%s5176_s28 + $0x68] sm:$0xff]   ;;  %v2649_v51 = vadd.f32 %v4012_v63, %v3948_v52  ;;  %v4104_v27 = vld [vmem:[%s5176_s28 + $0x78] sm:$0xff]   ;;  %v4021_v52 = vunpack.c.h.bf16 %v4118_v32 }
 0x10c   : > { %6920 = vst [vmem:[#allocation42_spill] sm:$0xff] %v5286_v37  ;;  %1017 = vrot.lane.b32.xlu1 %v5289_v50, %s4461_s22  ;;  %v5298_v49 = vsel %vm1450_vm5, %v5155_v33, %v970_v28  ;;  %4257 = vmatmul.mubr.msk.bf16.gmra.mrb[8].mxu1 %vm6867_vm7, %v2668_v48  ;;  %v3952_v33 = vunpack.c.l.bf16 %v4102_v2  ;;  %v3953_v21 = vunpack.c.h.bf16 %v4102_v2  ;;  %v5331_v48 = vld [vmem:[%s4536_s15 + $0x3c] sm:$0xff]   ;;  %v3961_v63 = vunpack.c.h.bf16 %v4104_v27 }
 0x10d   : > { %6921 = vst [vmem:[#allocation43_spill] sm:$0xff] %v5298_v49  ;;  %1255 = vrot.lane.b32.xlu0 %v4610_v46, %s4467_s21  ;;  %v2650_v46 = vadd.f32 %v4013_v31, %v3949_v16  ;;  %v3960_v16 = vunpack.c.l.bf16 %v4104_v27  ;;  %v4024_v2 = vunpack.c.l.bf16 %v4119_v10  ;;  %v2653_v61 = vadd.f32 %v4020_v17, %v3956_v57  ;;  %4197 = vmatpush3.bf16.msra.mxu0 %v4407_v26  ;;  %v5377_v17 = vld [vmem:[%s4536_s15 + $0x24] sm:$0xff]   ;;  %v4418_v26 = vld [vmem:[%s4536_s15 + $0x2c] ss:$0 sps:$4 sm:$0x11]  }
 0x10e   : > { %v5304_v56 = vpop.permute.xlu1 %978  ;;  %v2651_v43 = vadd.f32 %v4016_v24, %v3952_v33  ;;  %v2652_v47 = vadd.f32 %v4017_v1, %v3953_v21  ;;  %v2654_v33 = vadd.f32 %v4021_v52, %v3957_v19  ;;  %v2656_v24 = vadd.f32 %v4025_v22, %v3961_v63 }
 0x10f   : > { %v5310_v40 = vpop.permute.xlu0 %976  ;;  %v2669_v62 = vpack.c.bf16 %v2650_v46, %v2649_v51  ;;  %v2655_v21 = vadd.f32 %v4024_v2, %v3960_v16  ;;  %v4409_v46 = vld [vmem:[%s6818_s3 + $0x18] sm:$0xff]   ;;  %v2942_v19 = vsel %vm2940_vm9, %v4412_v29, 0  ;;  %v1912_v30 = vshrl.u32 %v4418_v26, 16 }
 0x110   : > { %1287 = vrot.lane.b32.xlu1 %v4765_v44, %s4468_s27  ;;  %v2670_v55 = vpack.c.bf16 %v2652_v47, %v2651_v43  ;;  %v2671_v1 = vpack.c.bf16 %v2654_v33, %v2653_v61  ;;  %v4410_v43 = vld [vmem:[%s6819_s4 + $0x8] sm:$0xff]   ;;  %4198 = vmatprep.subr.bf16.mxu0 %v4409_v46  ;;  %v4419_v61 = vld [vmem:[%s4536_s15 + $0x20] ss:$0 sps:$4 sm:$0x11]  }
 0x111   : > { %1257 = vrot.lane.b32.xlu0 %v4572_v23, %s4467_s21  ;;  %4260 = vmatprep.mubr.msk.bf16.mxu1 %vm6867_vm7, %v2669_v62  ;;  %v2672_v47 = vpack.c.bf16 %v2656_v24, %v2655_v21  ;;  %v1910_v22 = vshrl.u32 %v4419_v61, 16 }
 0x112   : > { %v5316_v53 = vpop.permute.xlu1 %982  ;;  %4270 = vmatprep.subr.bf16.mxu1 %v4410_v43  ;;  %4199 = vmatpush3.bf16.msra.mxu0 %v4409_v46 }
 0x113   : > { %v5321_v44 = vpop.permute.xlu0 %980  ;;  %4271 = vmatpush3.bf16.msra.mxu1 %v4410_v43 }
 0x114   : > { %1064 = vrot.lane.b32.xlu1 %v4638_v3, %s4462_s23  ;;  %4261 = vmatmul.mubr.msk.bf16.gmra.mrb[12].mxu1 %vm6867_vm7, %v2670_v55  ;;  %v4411_v55 = vld [vmem:[%s6818_s3 + $0x20] ss:$0 sps:$4 sm:$0xff]  }
 0x115   : > { %1019 = vrot.lane.b32.xlu0 %v5331_v48, %s4461_s22  ;;  %4264 = vmatprep.mubr.msk.bf16.mxu1 %vm6867_vm7, %v2671_v1  ;;  %v2334_v57 = vsel %vm2332_vm8, %v4411_v55, 0 }
 0x116   : > { %v5335_v28 = vpop.permute.xlu1 %986  ;;  %4340 = vmatprep.subr.msk.bf16.mxu0 %vm2332_vm8, %v4411_v55  ;;  %4343 = vmatprep.subr.msk.bf16.mxu1 %vm2940_vm9, %v4412_v29  ;;  %vm6870_vm8 = vcmask 392192   ;;  %vm1747_vm9 = vcmask 424960  }
 0x117   : > { %v5344_v31 = vpop.permute.xlu0 %984  ;;  %4201 = vmatpush3.bf16.msra.mxu0 %v2334_v57  ;;  %4273 = vmatpush3.bf16.msra.mxu1 %v2942_v19 }
 0x118   : > { %6922 = vst [vmem:[#allocation44_spill] sm:$0xff] %v5344_v31  ;;  %1319 = vrot.lane.b32.xlu1 %v5271_v35, %s4469_s29  ;;  %4341 = vmatprep.subr.msk.bf16.mxu0 %vm2728_vm6, %v5201_v13  ;;  %v6950_v31 = vld [vmem:[#allocation34_spill] sm:$0xff]  ;;  %vm6869_vm6 = vcmask 359424  }
 0x119   : > { %1289 = vrot.lane.b32.xlu0 %v4786_v11, %s4468_s27 }
 0x11a   : > { %v5350_v51 = vpop.permute.xlu1 %990 }
 0x11b   : > { %6923 = vst [vmem:[#allocation45_spill] sm:$0xff] %v5350_v51  ;;  %v5358_v62 = vpop.permute.xlu0 %988 }
 0x11c   : > { %6924 = vst [vmem:[#allocation46_spill] sm:$0xff] %v5358_v62  ;;  %1099 = vrot.lane.b32.xlu1 %v4800_v39, %s4463_s12  ;;  %4265 = vmatmul.mubr.msk.bf16.gmra.mrb[16].mxu1 %vm6867_vm7, %v2672_v47  ;;  %vm1780_vm7 = vcmask 457728  }
 0x11d   : > { %1066 = vrot.lane.b32.xlu0 %v4623_v54, %s4462_s23 }
 0x11e   : > { %v5365_v5 = vpop.permute.xlu1 %994 }
 0x11f   : > { %6925 = vst [vmem:[#allocation47_spill] sm:$0xff] %v5365_v5  ;;  %v5374_v32 = vpop.permute.xlu0 %992  ;;  %v4427_v5 = vld [vmem:[%s4536_s15 + $0x50] ss:$0 sps:$4 sm:$0x11]  }
 0x120   : > { %6926 = vst [vmem:[#allocation48_spill] sm:$0xff] %v5374_v32 }
 0x121   : > { %1321 = vrot.lane.b32.xlu0 %v5377_v17, %s4469_s29 }
 0x122   : > { %v1851_v27 = vpop.permute.xlu1 %1850 }
 0x123   : > { %v1950_v10 = vsel %vm1351_vm2, %v1851_v27, %v4596_v38  ;;  %v1847_v63 = vpop.permute.xlu0 %1846 }
 0x124   : > { %v2048_v52 = vshrl.u32 %v1950_v10, 16  ;;  %v2050_v16 = vshll.u32 %v1950_v10, 16  ;;  %v1944_v2 = vsel %vm1351_vm2, %v1847_v63, %v4572_v23 }
 0x125   : > { %v2040_v21 = vshll.u32 %v1944_v2, 16  ;;  %1101 = vrot.lane.b32.xlu0 %v4793_v18, %s4463_s12  ;;  %v2038_v13 = vshrl.u32 %v1944_v2, 16 }
 0x126   : > { %v2052_v33 = vrot.slane %v2050_v16, 1  ;;  %v1853_v24 = vpop.permute.xlu1 %1852 }
 0x127   : > { %v1953_v1 = vsel %vm1351_vm2, %v1853_v24, %v1912_v30  ;;  %v2042_v43 = vrot.slane %v2040_v21, 1  ;;  %v1849_v55 = vpop.permute.xlu0 %1848 }
 0x128   : > { %v2053_v46 = vor.u32 %v2052_v33, %v2048_v52  ;;  %v2054_v47 = vshll.u32 %v1953_v1, 16  ;;  %v1947_v29 = vsel %vm1351_vm2, %v1849_v55, %v1910_v22  ;;  %v5445_v55 = vld [vmem:[%s4536_s15 + $0x48] sm:$0xff]  }
 0x129   : > { %v2044_v19 = vshll.u32 %v1947_v29, 16  ;;  %v2043_v10 = vor.u32 %v2042_v43, %v2038_v13 }
 0x12a   : > { %v2056_v57 = vrot.slane %v2054_v47, 1  ;;  %v1859_v27 = vpop.permute.xlu1 %1858  ;;  %v5438_v47 = vld [vmem:[%s4536_s15 + $0x54] sm:$0xff]  }
 0x12b   : > { %v2046_v26 = vrot.slane %v2044_v19, 1  ;;  %v1855_v16 = vpop.permute.xlu0 %1854  ;;  %v1962_v13 = vsel %vm1351_vm2, %v1859_v27, %v4623_v54 }
 0x12c   : > { %v2057_v63 = vsel %vm583_vm0, %v2053_v46, %v2056_v57  ;;  %v4422_v57 = vld [vmem:[%s4536_s15 + $0x44] ss:$0 sps:$4 sm:$0x11]   ;;  %v2070_v37 = vshll.u32 %v1962_v13, 16 }
 0x12d   : > { %2200 = vrot.lane.b32.xlu0 %v2057_v63, %s4470_s24  ;;  %v2047_v30 = vsel %vm583_vm0, %v2043_v10, %v2046_v26  ;;  %v1916_v19 = vshrl.u32 %v4422_v57, 16  ;;  %v1956_v26 = vsel %vm1351_vm2, %v1855_v16, %v4638_v3  ;;  %v4423_v63 = vld [vmem:[%s4536_s15 + $0x38] ss:$0 sps:$4 sm:$0x11]   ;;  %v2068_v16 = vshrl.u32 %v1962_v13, 16 }
 0x12e   : > { %v1861_v52 = vpop.permute.xlu1 %1860  ;;  %2198 = vrot.lane.b32.xlu1 %v2047_v30, %s4470_s24  ;;  %v1914_v30 = vshrl.u32 %v4423_v63, 16  ;;  %v2060_v57 = vshll.u32 %v1956_v26, 16  ;;  %v2072_v63 = vrot.slane %v2070_v37, 1  ;;  %v6933_v37 = vld [vmem:[#allocation14_spill] sm:$0xff] }
 0x12f   : > { %v1857_v61 = vpop.permute.xlu0 %1856  ;;  %v1965_v27 = vsel %vm1351_vm2, %v1861_v52, %v1916_v19  ;;  %v2058_v52 = vshrl.u32 %v1956_v26, 16  ;;  %v6935_v26 = vld [vmem:[#allocation15_spill] sm:$0xff] }
 0x130   : > { %v1959_v60 = vsel %vm1351_vm2, %v1857_v61, %v1914_v30  ;;  %v2074_v42 = vshll.u32 %v1965_v27, 16  ;;  %v2062_v19 = vrot.slane %v2060_v57, 1  ;;  %v2073_v61 = vor.u32 %v2072_v63, %v2068_v16 }
 0x131   : > { %1163 = vrot.lane.b32.xlu0 %v4572_v23, %s4464_s17  ;;  %v2064_v6 = vshll.u32 %v1959_v60, 16 }
 0x132   : > { %v5399_v2 = vpop.permute.xlu1 %1866  ;;  %1131 = vrot.lane.b32.xlu1 %v5271_v35, %s4463_s12  ;;  %v2076_v30 = vrot.slane %v2074_v42, 1  ;;  %v2063_v13 = vor.u32 %v2062_v19, %v2058_v52 }
 0x133   : > { %v5403_v22 = vpop.permute.xlu0 %1862  ;;  %v2066_v27 = vrot.slane %v2064_v6, 1 }
 0x134   : > { %v2077_v57 = vsel %vm583_vm0, %v2073_v61, %v2076_v30 }
 0x135   : > { %1195 = vrot.lane.b32.xlu0 %v4786_v11, %s4465_s18  ;;  %v2067_v42 = vsel %vm583_vm0, %v2063_v13, %v2066_v27  ;;  %v5540_v27 = vld [vmem:[%s4536_s15 + $0x6c] sm:$0xff]  }
 0x136   : > { %v5407_v33 = vpop.permute.xlu1 %1868  ;;  %1133 = vrot.lane.b32.xlu1 %v5377_v17, %s4463_s12 }
 0x137   : > { %v5411_v21 = vpop.permute.xlu0 %1864 }
 0x139   : > { %1227 = vrot.lane.b32.xlu0 %v5377_v17, %s4466_s19 }
 0x13a   : > { %v5415_v23 = vpop.permute.xlu1 %1874  ;;  %1165 = vrot.lane.b32.xlu1 %v4596_v38, %s4464_s17 }
 0x13b   : > { %v5419_v24 = vpop.permute.xlu0 %1870 }
 0x13d   : > { %1259 = vrot.lane.b32.xlu0 %v4596_v38, %s4467_s21 }
 0x13e   : > { %v5423_v11 = vpop.permute.xlu1 %1876  ;;  %1197 = vrot.lane.b32.xlu1 %v4779_v58, %s4465_s18 }
 0x13f   : > { %v5427_v1 = vpop.permute.xlu0 %1872 }
 0x141   : > { %1261 = vrot.lane.b32.xlu0 %v4638_v3, %s4467_s21 }
 0x142   : > { %v5431_v46 = vpop.permute.xlu1 %1882  ;;  %1229 = vrot.lane.b32.xlu1 %v5289_v50, %s4466_s19 }
 0x143   : > { %v5435_v43 = vpop.permute.xlu0 %1878 }
 0x145   : > { %1023 = vrot.lane.b32.xlu0 %v5438_v47, %s4461_s22 }
 0x146   : > { %v5442_v38 = vpop.permute.xlu1 %1884  ;;  %1021 = vrot.lane.b32.xlu1 %v5445_v55, %s4461_s22 }
 0x147   : > { %v5449_v29 = vpop.permute.xlu0 %1880 }
 0x149   : > { %1293 = vrot.lane.b32.xlu0 %v4800_v39, %s4468_s27 }
 0x14a   : > { %v5456_v10 = vpop.permute.xlu1 %1890  ;;  %1291 = vrot.lane.b32.xlu1 %v4779_v58, %s4468_s27 }
 0x14b   : > { %6927 = vst [vmem:[#allocation49_spill] sm:$0xff] %v5456_v10  ;;  %v5463_v49 = vpop.permute.xlu0 %1886  ;;  %v6944_v10 = vld [vmem:[#allocation17_spill] sm:$0xff] }
 0x14c   : > { %6928 = vst [vmem:[#allocation50_spill] sm:$0xff] %v5463_v49 }
 0x14d   : > { %1070 = vrot.lane.b32.xlu0 %v4649_v15, %s4462_s23 }
 0x14e   : > { %v5468_v20 = vpop.permute.xlu1 %1892  ;;  %1068 = vrot.lane.b32.xlu1 %v4664_v25, %s4462_s23 }
 0x14f   : > { %6929 = vst [vmem:[#allocation51_spill] sm:$0xff] %v5468_v20  ;;  %v5473_v58 = vpop.permute.xlu0 %1888 }
 0x150   : > { %6930 = vst [vmem:[#allocation52_spill] sm:$0xff] %v5473_v58 }
 0x151   : > { %1325 = vrot.lane.b32.xlu0 %v5331_v48, %s4469_s29 }
 0x152   : > { %v5477_v45 = vpop.permute.xlu1 %1898  ;;  %1323 = vrot.lane.b32.xlu1 %v5289_v50, %s4469_s29 }
 0x153   : > { %6931 = vst [vmem:[#allocation53_spill] sm:$0xff] %v5477_v45  ;;  %v5481_v32 = vpop.permute.xlu0 %1894 }
 0x154   : > { %6932 = vst [vmem:[#allocation54_spill] sm:$0xff] %v5481_v32 }
 0x155   : > { %1105 = vrot.lane.b32.xlu0 %v6933_v37, %s4463_s12 }
 0x156   : > { %v5485_v59 = vpop.permute.xlu1 %1900  ;;  %1103 = vrot.lane.b32.xlu1 %v6935_v26, %s4463_s12 }
 0x157   : > { %6934 = vst [vmem:[#allocation14_spill] sm:$0xff] %v5485_v59  ;;  %v5489_v60 = vpop.permute.xlu0 %1896 }
 0x158   : > { %6936 = vst [vmem:[#allocation15_spill] sm:$0xff] %v5489_v60  ;;  %v1918_v60 = vshrl.u32 %v4427_v5, 16  ;;  %v6942_v5 = vld [vmem:[#allocation5_spill] sm:$0xff] }
 0x159   : > { %2204 = vrot.lane.b32.xlu0 %v2077_v57, %s4470_s24 }
 0x15a   : > { %v5494_v16 = vpop.permute.xlu1 %1902  ;;  %2202 = vrot.lane.b32.xlu1 %v2067_v42, %s4470_s24 }
 0x15b   : > { %6937 = vst [vmem:[#allocation55_spill] sm:$0xff] %v5494_v16  ;;  %v5497_v63 = vpop.permute.xlu0 %1013  ;;  %v1968_v16 = vsel %vm1351_vm2, %v5403_v22, %v4664_v25  ;;  %v1971_v22 = vsel %vm1351_vm2, %v5411_v21, %v1918_v60 }
 0x15c   : > { %v2080_v8 = vshll.u32 %v1968_v16, 16  ;;  %v2084_v58 = vshll.u32 %v1971_v22, 16 }
 0x15d   : > { %1167 = vrot.lane.b32.xlu0 %v4638_v3, %s4464_s17 }
 0x15e   : > { %v5501_v6 = vpop.permute.xlu1 %1060  ;;  %1135 = vrot.lane.b32.xlu1 %v5289_v50, %s4463_s12 }
 0x15f   : > { %v5505_v52 = vpop.permute.xlu0 %1015 }
 0x161   : > { %1199 = vrot.lane.b32.xlu0 %v4800_v39, %s4465_s18 }
 0x162   : > { %v5509_v19 = vpop.permute.xlu1 %1062  ;;  %1137 = vrot.lane.b32.xlu1 %v5331_v48, %s4463_s12 }
 0x163   : > { %v5513_v61 = vpop.permute.xlu0 %1906 }
 0x164   : > { %6938 = vst [vmem:[#allocation56_spill] sm:$0xff] %v5513_v61  ;;  %v1974_v61 = vsel %vm1351_vm2, %v5399_v2, %v4649_v15 }
 0x165   : > { %1231 = vrot.lane.b32.xlu0 %v5331_v48, %s4466_s19  ;;  %v2090_v59 = vshll.u32 %v1974_v61, 16  ;;  %v2088_v62 = vshrl.u32 %v1974_v61, 16 }
 0x166   : > { %v5517_v3 = vpop.permute.xlu1 %1904  ;;  %1169 = vrot.lane.b32.xlu1 %v4623_v54, %s4464_s17 }
 0x167   : > { %6939 = vst [vmem:[#allocation57_spill] sm:$0xff] %v5517_v3  ;;  %v5521_v50 = vpop.permute.xlu0 %1095  ;;  %v4426_v3 = vld [vmem:[%s4536_s15 + $0x5c] ss:$0 sps:$4 sm:$0x11]  }
 0x169   : > { %1263 = vrot.lane.b32.xlu0 %v4623_v54, %s4467_s21  ;;  %v5545_v54 = vld [vmem:[%s4536_s15 + $0x60] sm:$0xff]  }
 0x16a   : > { %v5525_v39 = vpop.permute.xlu1 %1127  ;;  %1201 = vrot.lane.b32.xlu1 %v4793_v18, %s4465_s18 }
 0x16b   : > { %v5529_v30 = vpop.permute.xlu0 %1097 }
 0x16d   : > { %1265 = vrot.lane.b32.xlu0 %v4664_v25, %s4467_s21 }
 0x16e   : > { %v5533_v48 = vpop.permute.xlu1 %1129  ;;  %1233 = vrot.lane.b32.xlu1 %v5445_v55, %s4466_s19 }
 0x16f   : > { %v5537_v13 = vpop.permute.xlu0 %1908 }
 0x170   : > { %6940 = vst [vmem:[#allocation58_spill] sm:$0xff] %v5537_v13  ;;  %v1920_v13 = vshrl.u32 %v4426_v3, 16  ;;  %v6941_v3 = vld [vmem:[#allocation4_spill] sm:$0xff] }
 0x171   : > { %1027 = vrot.lane.b32.xlu0 %v5540_v27, %s4461_s22 }
 0x172   : > { %1025 = vrot.lane.b32.xlu1 %v5545_v54, %s4461_s22  ;;  %v5549_v57 = vpop.permute.xlu1 %1161  ;;  %v1977_v2 = vsel %vm1351_vm2, %v5407_v33, %v1920_v13  ;;  %v2078_v33 = vshrl.u32 %v1968_v16, 16  ;;  %v2082_v13 = vrot.slane %v2080_v8, 1 }
 0x173   : > { %v5551_v42 = vpop.permute.xlu0 %1159  ;;  %v2094_v41 = vshll.u32 %v1977_v2, 16  ;;  %v2086_v2 = vrot.slane %v2084_v58, 1 }
 0x174   : > { %v2083_v61 = vor.u32 %v2082_v13, %v2078_v33 }
 0x175   : > { %1297 = vrot.lane.b32.xlu0 %v6935_v26, %s4468_s27  ;;  %v2096_v60 = vrot.slane %v2094_v41, 1 }
 0x176   : > { %1295 = vrot.lane.b32.xlu1 %v4793_v18, %s4468_s27  ;;  %v5569_v45 = vpop.permute.xlu1 %1193  ;;  %v2092_v18 = vrot.slane %v2090_v59, 1  ;;  %v6943_v59 = vld [vmem:[#allocation16_spill] sm:$0xff]  ;;  %v2087_v41 = vsel %vm583_vm0, %v2083_v61, %v2086_v2  ;;  %v6947_v2 = vld [vmem:[#allocation29_spill] sm:$0xff] }
 0x177   : > { %v5565_v32 = vpop.permute.xlu0 %1191 }
 0x178   : > { %v2093_v21 = vor.u32 %v2092_v18, %v2088_v62 }
 0x179   : > { %1074 = vrot.lane.b32.xlu0 %v6941_v3, %s4462_s23 }
 0x17a   : > { %1072 = vrot.lane.b32.xlu1 %v6942_v5, %s4462_s23  ;;  %v5581_v20 = vpop.permute.xlu1 %1225  ;;  %v2097_v8 = vsel %vm583_vm0, %v2093_v21, %v2096_v60  ;;  %v4428_v60 = vld [vmem:[%s4536_s15] sm:$0xff]  }
 0x17b   : > { %v5577_v51 = vpop.permute.xlu0 %1223 }
 0x17d   : > { %1329 = vrot.lane.b32.xlu0 %v5438_v47, %s4469_s29 }
 0x17e   : > { %1327 = vrot.lane.b32.xlu1 %v5445_v55, %s4469_s29  ;;  %v5594_v22 = vpop.permute.xlu1 %1017 }
 0x17f   : > { %v5585_v49 = vpop.permute.xlu0 %1255 }
 0x181   : > { %1109 = vrot.lane.b32.xlu0 %v6943_v59, %s4463_s12 }
 0x182   : > { %1107 = vrot.lane.b32.xlu1 %v6944_v10, %s4463_s12  ;;  %v5603_v58 = vpop.permute.xlu1 %1287 }
 0x183   : > { %v5591_v16 = vpop.permute.xlu0 %1257 }
 0x185   : > { %2208 = vrot.lane.b32.xlu0 %v2097_v8, %s4470_s24  ;;  %v6948_v8 = vld [vmem:[#allocation30_spill] sm:$0xff] }
 0x186   : > { %2206 = vrot.lane.b32.xlu1 %v2087_v41, %s4470_s24  ;;  %v5613_v13 = vpop.permute.xlu1 %1064 }
 0x187   : > { %v5599_v62 = vpop.permute.xlu0 %1019 }
 0x189   : > { %1171 = vrot.lane.b32.xlu0 %v4664_v25, %s4464_s17  ;;  %v6945_v25 = vld [vmem:[#allocation27_spill] sm:$0xff] }
 0x18a   : > { %1139 = vrot.lane.b32.xlu1 %v5445_v55, %s4463_s12  ;;  %v1355_v21 = vsel %vm1351_vm2, %v5280_v34, %v6945_v25  ;;  %v6946_v55 = vld [vmem:[#allocation25_spill] sm:$0xff] }
 0x18b   : > { %v1290_v18 = vpop.permute.xlu0 %1289  ;;  %v1353_v61 = vsel %vm1351_vm2, %v4428_v60, %v6946_v55 }
 0x18c   : > { %v1386_v41 = vsel %vm1384_vm3, %v1353_v61, %v6948_v8 }
 0x18d   : > { %1203 = vrot.lane.b32.xlu0 %v6935_v26, %s4465_s18  ;;  %v1388_v26 = vsel %vm1384_vm3, %v1355_v21, %v6947_v2  ;;  %v1419_v34 = vsel %vm1417_vm4, %v1386_v41, %v6950_v31  ;;  %v5680_v2 = vld [vmem:[%s4536_s15 + $0x84] sm:$0xff]  }
 0x18e   : > { %1141 = vrot.lane.b32.xlu1 %v5438_v47, %s4463_s12  ;;  %v1452_v21 = vsel %vm1450_vm5, %v1419_v34, %v5163_v4 }
 0x18f   : > { %v5611_v33 = vpop.permute.xlu0 %1066 }
 0x191   : > { %1235 = vrot.lane.b32.xlu0 %v5438_v47, %s4466_s19  ;;  %v1421_v47 = vsel %vm1417_vm4, %v1388_v26, %v6949_v9  ;;  %v1485_v9 = vsel %vm1483_vm10, %v1452_v21, %v5310_v40  ;;  %v5692_v26 = vld [vmem:[%s4536_s15 + $0x78] sm:$0xff]  }
 0x192   : > { %1173 = vrot.lane.b32.xlu1 %v4649_v15, %s4464_s17  ;;  %v1454_v25 = vsel %vm1450_vm5, %v1421_v47, %v5160_v0  ;;  %v1320_v0 = vpop.permute.xlu1 %1319 }
 0x193   : > { %v1322_v60 = vpop.permute.xlu0 %1321  ;;  %v1487_v55 = vsel %vm1483_vm10, %v1454_v25, %v5304_v56 }
 0x194   : > { %v1520_v31 = vsel %vm1516_vm11, %v1487_v55, %v5505_v52 }
 0x195   : > { %1267 = vrot.lane.b32.xlu0 %v4649_v15, %s4467_s21  ;;  %v1518_v15 = vsel %vm1516_vm11, %v1485_v9, %v5497_v63  ;;  %v1553_v4 = vsel %vm1549_vm12, %v1520_v31, %v5509_v19 }
 0x196   : > { %1205 = vrot.lane.b32.xlu1 %v6933_v37, %s4465_s18  ;;  %v1551_v56 = vsel %vm1549_vm12, %v1518_v15, %v5501_v6  ;;  %v1586_v40 = vsel %vm6871_vm13, %v1553_v4, %v5529_v30  ;;  %v6952_v4 = vld [vmem:[#allocation8_spill] sm:$0xff] }
 0x197   : > { %v1584_v52 = vsel %vm6871_vm13, %v1551_v56, %v5521_v50  ;;  %v1619_v63 = vsel %vm1615_vm14, %v1586_v40, %v5533_v48  ;;  %v5665_v61 = vpop.permute.xlu0 %1101 }
 0x198   : > { %v1617_v19 = vsel %vm1615_vm14, %v1584_v52, %v5525_v39  ;;  %v1652_v6 = vsel %vm1648_vm15, %v1619_v63, %v5549_v57  ;;  %v5677_v57 = vpop.permute.xlu1 %1099 }
 0x199   : > { %1269 = vrot.lane.b32.xlu0 %v6942_v5, %s4467_s21  ;;  %v1650_v30 = vsel %vm1648_vm15, %v1617_v19, %v5551_v42  ;;  %v1685_v50 = vsel %vm6869_vm6, %v1652_v6, %v5569_v45 }
 0x19a   : > { %1237 = vrot.lane.b32.xlu1 %v5545_v54, %s4466_s19  ;;  %v1683_v48 = vsel %vm6869_vm6, %v1650_v30, %v5565_v32  ;;  %v1718_v39 = vsel %vm6870_vm8, %v1685_v50, %v5581_v20  ;;  %vm2230_vm6 = vcmask 523264  }
 0x19b   : > { %v1716_v42 = vsel %vm6870_vm8, %v1683_v48, %v5577_v51  ;;  %v1751_v45 = vsel %vm1747_vm9, %v1718_v39, %v5591_v16  ;;  %vm2299_vm8 = vcmask 588800   ;;  %v1986_v16 = vsel %vm1351_vm2, %v5415_v23, %v6941_v3  ;;  %v6953_v39 = vld [vmem:[#allocation18_spill] sm:$0xff] }
 0x19c   : > { %v1749_v20 = vsel %vm1747_vm9, %v1716_v42, %v5585_v49  ;;  %v1784_v32 = vsel %vm1780_vm7, %v1751_v45, %v1290_v18  ;;  %v4431_v49 = vld [vmem:[%s4536_s15 + $0x74] ss:$0 sps:$4 sm:$0x11]   ;;  %v2110_v9 = vshll.u32 %v1986_v16, 16  ;;  %v2108_v40 = vshrl.u32 %v1986_v16, 16 }
 0x19d   : > { %1031 = vrot.lane.b32.xlu0 %v5680_v2, %s4461_s22  ;;  %v1782_v51 = vsel %vm1780_vm7, %v1749_v20, %v5603_v58  ;;  %v1817_v41 = vsel %vm1813_vm1, %v1784_v32, %v1322_v60  ;;  %v1924_v47 = vshrl.u32 %v4431_v49, 16  ;;  %v1980_v58 = vsel %vm1351_vm2, %v5419_v24, %v6942_v5  ;;  %v4432_v60 = vld [vmem:[%s4536_s15 + $0x68] ss:$0 sps:$4 sm:$0x11]  }
 0x19e   : > { %1029 = vrot.lane.b32.xlu1 %v5692_v26, %s4461_s22  ;;  %v1815_v18 = vsel %vm1813_vm1, %v1782_v51, %v1320_v0  ;;  %v1922_v55 = vshrl.u32 %v4432_v60, 16  ;;  %v6951_v0 = vld [vmem:[#allocation6_spill] sm:$0xff]  ;;  %v2098_v19 = vshrl.u32 %v1980_v58, 16  ;;  %v6954_v20 = vld [vmem:[#allocation19_spill] sm:$0xff] }
 0x19f   : > { %v2201_v8 = vpop.permute.xlu0 %2200  ;;  %v1989_v31 = vsel %vm1351_vm2, %v5423_v11, %v1924_v47  ;;  %v2112_v11 = vrot.slane %v2110_v9, 1 }
 0x1a0   : > { %v2199_v34 = vpop.permute.xlu1 %2198  ;;  %v2234_v25 = vsel %vm2230_vm6, %v1817_v41, %v2201_v8  ;;  %v1983_v15 = vsel %vm1351_vm2, %v5427_v1, %v1922_v55  ;;  %v2114_v52 = vshll.u32 %v1989_v31, 16  ;;  %v6959_v31 = vld [vmem:[#allocation35_spill] sm:$0xff] }
 0x1a1   : > { %1301 = vrot.lane.b32.xlu0 %v6944_v10, %s4468_s27  ;;  %v2232_v21 = vsel %vm2230_vm6, %v1815_v18, %v2199_v34  ;;  %v2104_v30 = vshll.u32 %v1983_v15, 16  ;;  %v2113_v1 = vor.u32 %v2112_v11, %v2108_v40  ;;  %v6960_v15 = vld [vmem:[#allocation36_spill] sm:$0xff] }
 0x1a2   : > { %1299 = vrot.lane.b32.xlu1 %v6933_v37, %s4468_s27  ;;  %4202 = vmatprep.mubr.msk.bf16.mxu0 %vm2299_vm8, %v2232_v21  ;;  %v2100_v37 = vshll.u32 %v1980_v58, 16  ;;  %v2116_v50 = vrot.slane %v2114_v52, 1  ;;  %v6956_v58 = vld [vmem:[#allocation24_spill] sm:$0xff] }
 0x1a3   : > { %v5715_v23 = vpop.permute.xlu0 %1163  ;;  %4274 = vmatprep.mubr.msk.bf16.mxu1 %vm1615_vm14, %v2232_v21  ;;  %4203 = vmatmul.mubr.msk.bf16.vlgmr.msra.gmra.mrb[0].mxu0 %vm2299_vm8, %v2234_v25  ;;  %v2106_v45 = vrot.slane %v2104_v30, 1 }
 0x1a4   : > { %4275 = vmatmul.mubr.msk.bf16.vlgmr.msra.gmra.mrb[20].mxu1 %vm1615_vm14, %v2234_v25  ;;  %v5722_v24 = vpop.permute.xlu1 %1131  ;;  %4235 = vmatpush3.bf16.msra.mxu0 %v5209_v14  ;;  %v2102_v6 = vrot.slane %v2100_v37, 1  ;;  %v2117_v8 = vsel %vm583_vm0, %v2113_v1, %v2116_v50  ;;  %v6955_v25 = vld [vmem:[#allocation26_spill] sm:$0xff] }
 0x1a5   : > { %1078 = vrot.lane.b32.xlu0 %v6951_v0, %s4462_s23  ;;  %v1359_v21 = vsel %vm1351_vm2, %v5377_v17, %v6955_v25 }
 0x1a6   : > { %1076 = vrot.lane.b32.xlu1 %v6952_v4, %s4462_s23  ;;  %v2103_v42 = vor.u32 %v2102_v6, %v2098_v19 }
 0x1a7   : > { %v5731_v56 = vpop.permute.xlu0 %1195 }
 0x1a8   : > { %v1134_v63 = vpop.permute.xlu1 %1133  ;;  %v2107_v41 = vsel %vm583_vm0, %v2103_v42, %v2106_v45 }
 0x1a9   : > { %1333 = vrot.lane.b32.xlu0 %v5540_v27, %s4469_s29 }
 0x1aa   : > { %1331 = vrot.lane.b32.xlu1 %v5545_v54, %s4469_s29 }
 0x1ab   : > { %v1228_v14 = vpop.permute.xlu0 %1227 }
 0x1ac   : > { %v1166_v48 = vpop.permute.xlu1 %1165 }
 0x1ad   : > { %1113 = vrot.lane.b32.xlu0 %v6953_v39, %s4463_s12 }
 0x1ae   : > { %1111 = vrot.lane.b32.xlu1 %v6954_v20, %s4463_s12 }
 0x1af   : > { %v1260_v32 = vpop.permute.xlu0 %1259 }
 0x1b0   : > { %v1198_v51 = vpop.permute.xlu1 %1197 }
 0x1b1   : > { %2212 = vrot.lane.b32.xlu0 %v2117_v8, %s4470_s24 }
 0x1b2   : > { %2210 = vrot.lane.b32.xlu1 %v2107_v41, %s4470_s24 }
 0x1b3   : > { %v1262_v16 = vpop.permute.xlu0 %1261 }
 0x1b4   : > { %v1230_v49 = vpop.permute.xlu1 %1229 }
 0x1b5   : > { %1175 = vrot.lane.b32.xlu0 %v6942_v5, %s4464_s17  ;;  %v1357_v5 = vsel %vm1351_vm2, %v5271_v35, %v6956_v58  ;;  %v5834_v58 = vld [vmem:[%s4536_s15 + $0x9c] sm:$0xff]  }
 0x1b6   : > { %1143 = vrot.lane.b32.xlu1 %v5545_v54, %s4463_s12  ;;  %v6957_v54 = vld [vmem:[#allocation31_spill] sm:$0xff] }
 0x1b7   : > { %v5749_v47 = vpop.permute.xlu0 %1023  ;;  %v1392_v60 = vsel %vm1384_vm3, %v1359_v21, %v6957_v54 }
 0x1b8   : > { %v5751_v18 = vpop.permute.xlu1 %1021  ;;  %v1425_v37 = vsel %vm1417_vm4, %v1392_v60, %v6959_v31 }
 0x1b9   : > { %1207 = vrot.lane.b32.xlu0 %v6944_v10, %s4465_s18  ;;  %v6958_v10 = vld [vmem:[#allocation32_spill] sm:$0xff]  ;;  %v1458_v40 = vsel %vm1450_vm5, %v1425_v37, %v5168_v36 }
 0x1ba   : > { %1145 = vrot.lane.b32.xlu1 %v5540_v27, %s4463_s12  ;;  %v1390_v9 = vsel %vm1384_vm3, %v1357_v5, %v6958_v10  ;;  %v1491_v11 = vsel %vm1483_vm10, %v1458_v40, %v5316_v53  ;;  %vm6962_vm3 = vcmask 359424   ;;  %v4435_v5 = vld [vmem:[%s4536_s15 + $0x8c] ss:$0 sps:$4 sm:$0x11]  }
 0x1bb   : > { %v1294_v34 = vpop.permute.xlu0 %1293  ;;  %v1423_v17 = vsel %vm1417_vm4, %v1390_v9, %v6960_v15  ;;  %v1524_v19 = vsel %vm1516_vm11, %v1491_v11, %v5599_v62  ;;  %vm6963_vm4 = vcmask 392192   ;;  %v1928_v54 = vshrl.u32 %v4435_v5, 16  ;;  %v4436_v10 = vld [vmem:[%s4536_s15 + $0x80] ss:$0 sps:$4 sm:$0x11]  }
 0x1bc   : > { %v1292_v55 = vpop.permute.xlu1 %1291  ;;  %v1926_v9 = vshrl.u32 %v4436_v10, 16 }
 0x1bd   : > { %1239 = vrot.lane.b32.xlu0 %v5540_v27, %s4466_s19  ;;  %v1456_v27 = vsel %vm1450_vm5, %v1423_v17, %v5184_v12  ;;  %v1557_v12 = vsel %vm1549_vm12, %v1524_v19, %v5611_v33  ;;  %vm6964_vm5 = vmmov %vm6962_vm3  ;;  %v2001_v37 = vsel %vm1351_vm2, %v5442_v38, %v1928_v54  ;;  %v6966_v17 = vld [vmem:[#allocation9_spill] sm:$0xff] }
 0x1be   : > { %1177 = vrot.lane.b32.xlu1 %v6941_v3, %s4464_s17  ;;  %v1489_v52 = vsel %vm1483_vm10, %v1456_v27, %v5321_v44  ;;  %v1590_v44 = vsel %vm6871_vm13, %v1557_v12, %v5665_v61  ;;  %v1995_v27 = vsel %vm1351_vm2, %v5449_v29, %v1926_v9  ;;  %v2134_v19 = vshll.u32 %v2001_v37, 16 }
 0x1bf   : > { %v5777_v35 = vpop.permute.xlu0 %1070  ;;  %v1522_v36 = vsel %vm1516_vm11, %v1489_v52, %v5594_v22  ;;  %v1623_v1 = vsel %vm1615_vm14, %v1590_v44, %v1134_v63 }
 0x1c0   : > { %v5787_v6 = vpop.permute.xlu1 %1068  ;;  %v1555_v53 = vsel %vm1549_vm12, %v1522_v36, %v5613_v13  ;;  %v1656_v33 = vsel %vm1648_vm15, %v1623_v1, %v1166_v48  ;;  %v6961_v13 = vld [vmem:[#allocation21_spill] sm:$0xff]  ;;  %v2136_v29 = vrot.slane %v2134_v19, 1  ;;  %v6968_v1 = vld [vmem:[#allocation20_spill] sm:$0xff] }
 0x1c1   : > { %1241 = vrot.lane.b32.xlu0 %v5692_v26, %s4466_s19  ;;  %v1588_v30 = vsel %vm6871_vm13, %v1555_v53, %v5677_v57  ;;  %v1689_v61 = vsel %vm6962_vm3, %v1656_v33, %v1198_v51  ;;  %vm6965_vm3 = vmmov %vm6963_vm4  ;;  %v2124_v53 = vshll.u32 %v1995_v27, 16  ;;  %v5965_v19 = vld [vmem:[%s4536_s15 + $0xb4] sm:$0xff]  }
 0x1c2   : > { %1209 = vrot.lane.b32.xlu1 %v6943_v59, %s4465_s18  ;;  %v1621_v22 = vsel %vm1615_vm14, %v1588_v30, %v5722_v24  ;;  %v1722_v42 = vsel %vm6963_vm4, %v1689_v61, %v1230_v49  ;;  %vm6971_vm4 = vmmov %vm6964_vm5 }
 0x1c3   : > { %v1326_v62 = vpop.permute.xlu0 %1325  ;;  %v1654_v57 = vsel %vm1648_vm15, %v1621_v22, %v5715_v23  ;;  %v1755_v8 = vsel %vm1747_vm9, %v1722_v42, %v1262_v16  ;;  %v2126_v33 = vrot.slane %v2124_v53, 1  ;;  %v4439_v53 = vld [vmem:[%s4536_s15 + $0xa4] ss:$0 sps:$4 sm:$0x11]  }
 0x1c4   : > { %v1324_v50 = vpop.permute.xlu1 %1323  ;;  %v1687_v24 = vsel %vm6964_vm5, %v1654_v57, %v5731_v56  ;;  %v1788_v41 = vsel %vm1780_vm7, %v1755_v8, %v1294_v34  ;;  %v1998_v34 = vsel %vm1351_vm2, %v5431_v46, %v6951_v0  ;;  %vm6972_vm5 = vmmov %vm6965_vm3 }
 0x1c5   : > { %998 = vrot.lane.b32.xlu0 %v6961_v13, %s4459_s20  ;;  %v1720_v48 = vsel %vm6965_vm3, %v1687_v24, %v1228_v14  ;;  %v1821_v49 = vsel %vm1813_vm1, %v1788_v41, %v1326_v62  ;;  %v2130_v46 = vshll.u32 %v1998_v34, 16  ;;  %v2128_v52 = vshrl.u32 %v1998_v34, 16  ;;  %vm6973_vm3 = vmmov %vm6971_vm4 }
 0x1c6   : > { %996 = vrot.lane.b32.xlu1 %v6953_v39, %s4459_s20  ;;  %v1753_v51 = vsel %vm1747_vm9, %v1720_v48, %v1260_v32 }
 0x1c7   : > { %v5813_v45 = vpop.permute.xlu0 %1105  ;;  %v1786_v56 = vsel %vm1780_vm7, %v1753_v51, %v1292_v55  ;;  %v1992_v55 = vsel %vm1351_vm2, %v5435_v43, %v6952_v4  ;;  %v6967_v43 = vld [vmem:[#allocation10_spill] sm:$0xff] }
 0x1c8   : > { %v5819_v63 = vpop.permute.xlu1 %1103  ;;  %v1819_v25 = vsel %vm1813_vm1, %v1786_v56, %v1324_v50  ;;  %v2120_v40 = vshll.u32 %v1992_v55, 16  ;;  %v2118_v38 = vshrl.u32 %v1992_v55, 16  ;;  %v6969_v56 = vld [vmem:[#allocation44_spill] sm:$0xff] }
 0x1c9   : > { %1273 = vrot.lane.b32.xlu0 %v6952_v4, %s4467_s21 }
 0x1ca   : > { %1271 = vrot.lane.b32.xlu1 %v6941_v3, %s4467_s21  ;;  %v5840_v3 = vld [vmem:[%s4536_s15 + $0x90] sm:$0xff]   ;;  %v2122_v12 = vrot.slane %v2120_v40, 1 }
 0x1cb   : > { %v2205_v23 = vpop.permute.xlu0 %2204 }
 0x1cc   : > { %v2203_v21 = vpop.permute.xlu1 %2202  ;;  %v2238_v14 = vsel %vm2230_vm6, %v1821_v49, %v2205_v23  ;;  %v2123_v22 = vor.u32 %v2122_v12, %v2118_v38  ;;  %v1495_v23 = vsel %vm1483_vm10, %v5196_v7, %v5335_v28  ;;  %v6970_v49 = vld [vmem:[#allocation7_spill] sm:$0xff]  ;;  %v6976_v38 = vld [vmem:[#allocation49_spill] sm:$0xff] }
 0x1cd   : > { %1035 = vrot.lane.b32.xlu0 %v5834_v58, %s4461_s22  ;;  %v2236_v32 = vsel %vm2230_vm6, %v1819_v25, %v2203_v21  ;;  %v2010_v12 = vsel %vm1351_vm2, %v6976_v38, %v6966_v17 }
 0x1ce   : > { %1033 = vrot.lane.b32.xlu1 %v5840_v3, %s4461_s22  ;;  %4206 = vmatprep.mubr.msk.bf16.mxu0 %vm2299_vm8, %v2236_v32  ;;  %v2127_v57 = vsel %vm583_vm0, %v2123_v22, %v2126_v33  ;;  %v4440_v22 = vld [vmem:[%s4536_s15 + $0x98] ss:$0 sps:$4 sm:$0x11]  }
 0x1cf   : > { %v5845_v16 = vpop.permute.xlu0 %1167  ;;  %4278 = vmatprep.mubr.msk.bf16.mxu1 %vm1615_vm14, %v2236_v32  ;;  %4207 = vmatmul.mubr.msk.bf16.gmra.mrb[4].mxu0 %vm2299_vm8, %v2238_v14  ;;  %v1930_v33 = vshrl.u32 %v4440_v22, 16 }
 0x1d0   : > { %4279 = vmatmul.mubr.msk.bf16.gmra.mrb[24].mxu1 %vm1615_vm14, %v2238_v14  ;;  %v1136_v60 = vpop.permute.xlu1 %1135 }
 0x1d1   : > { %1305 = vrot.lane.b32.xlu0 %v6954_v20, %s4468_s27 }
 0x1d2   : > { %1303 = vrot.lane.b32.xlu1 %v6943_v59, %s4468_s27  ;;  %v2132_v59 = vrot.slane %v2130_v46, 1 }
 0x1d3   : > { %v5862_v31 = vpop.permute.xlu0 %1199 }
 0x1d4   : > { %v1138_v15 = vpop.permute.xlu1 %1137  ;;  %v2133_v62 = vor.u32 %v2132_v59, %v2128_v52 }
 0x1d5   : > { %1082 = vrot.lane.b32.xlu0 %v6966_v17, %s4462_s23 }
 0x1d6   : > { %1080 = vrot.lane.b32.xlu1 %v6967_v43, %s4462_s23  ;;  %v2137_v61 = vsel %vm583_vm0, %v2133_v62, %v2136_v29  ;;  %v6977_v29 = vld [vmem:[#allocation50_spill] sm:$0xff] }
 0x1d7   : > { %v1232_v11 = vpop.permute.xlu0 %1231 }
 0x1d8   : > { %v1170_v36 = vpop.permute.xlu1 %1169 }
 0x1d9   : > { %1337 = vrot.lane.b32.xlu0 %v5680_v2, %s4469_s29 }
 0x1da   : > { %1335 = vrot.lane.b32.xlu1 %v5692_v26, %s4469_s29 }
 0x1db   : > { %v1264_v44 = vpop.permute.xlu0 %1263 }
 0x1dc   : > { %v1202_v30 = vpop.permute.xlu1 %1201 }
 0x1dd   : > { %1117 = vrot.lane.b32.xlu0 %v6968_v1, %s4463_s12 }
 0x1de   : > { %1115 = vrot.lane.b32.xlu1 %v6961_v13, %s4463_s12 }
 0x1df   : > { %v1266_v50 = vpop.permute.xlu0 %1265 }
 0x1e0   : > { %v1234_v42 = vpop.permute.xlu1 %1233 }
 0x1e1   : > { %2216 = vrot.lane.b32.xlu0 %v2137_v61, %s4470_s24  ;;  %v2150_v61 = vshll.u32 %v2010_v12, 16 }
 0x1e2   : > { %2214 = vrot.lane.b32.xlu1 %v2127_v57, %s4470_s24 }
 0x1e3   : > { %v5884_v24 = vpop.permute.xlu0 %1027 }
 0x1e4   : > { %v5886_v48 = vpop.permute.xlu1 %1025 }
 0x1e5   : > { %1179 = vrot.lane.b32.xlu0 %v6952_v4, %s4464_s17  ;;  %v1493_v4 = vsel %vm1483_vm10, %v6970_v49, %v6969_v56  ;;  %v6980_v56 = vld [vmem:[#allocation52_spill] sm:$0xff] }
 0x1e6   : > { %1147 = vrot.lane.b32.xlu1 %v5692_v26, %s4463_s12  ;;  %v1528_v26 = vsel %vm1516_vm11, %v1495_v23, %v5749_v47  ;;  %v2007_v49 = vsel %vm1351_vm2, %v6980_v56, %v1930_v33 }
 0x1e7   : > { %v1298_v8 = vpop.permute.xlu0 %1297  ;;  %v1561_v21 = vsel %vm1549_vm12, %v1528_v26, %v5777_v35 }
 0x1e8   : > { %v1296_v51 = vpop.permute.xlu1 %1295  ;;  %v1594_v28 = vsel %vm6871_vm13, %v1561_v21, %v5813_v45 }
 0x1e9   : > { %1211 = vrot.lane.b32.xlu0 %v6954_v20, %s4465_s18  ;;  %v1526_v20 = vsel %vm1516_vm11, %v1493_v4, %v5751_v18  ;;  %v6981_v4 = vld [vmem:[#allocation12_spill] sm:$0xff] }
 0x1ea   : > { %1149 = vrot.lane.b32.xlu1 %v5680_v2, %s4463_s12  ;;  %v1559_v7 = vsel %vm1549_vm12, %v1526_v20, %v5787_v6  ;;  %v2148_v20 = vshrl.u32 %v2010_v12, 16 }
 0x1eb   : > { %v5896_v41 = vpop.permute.xlu0 %1074  ;;  %v1592_v14 = vsel %vm6871_vm13, %v1559_v7, %v5819_v63  ;;  %vm6975_vm13 = vmmov %vm6972_vm5 }
 0x1ec   : > { %v5906_v25 = vpop.permute.xlu1 %1072  ;;  %v1625_v18 = vsel %vm1615_vm14, %v1592_v14, %v1136_v60  ;;  %v6974_v60 = vld [vmem:[#allocation23_spill] sm:$0xff]  ;;  %v2144_v14 = vshll.u32 %v2007_v49, 16 }
 0x1ed   : > { %1243 = vrot.lane.b32.xlu0 %v5680_v2, %s4466_s19  ;;  %v1627_v2 = vsel %vm1615_vm14, %v1594_v28, %v1138_v15  ;;  %v1658_v63 = vsel %vm1648_vm15, %v1625_v18, %v5845_v16 }
 0x1ee   : > { %1181 = vrot.lane.b32.xlu1 %v6951_v0, %s4464_s17  ;;  %v1660_v32 = vsel %vm1648_vm15, %v1627_v2, %v1170_v36  ;;  %v1691_v5 = vsel %vm6973_vm3, %v1658_v63, %v5862_v31  ;;  %v5970_v36 = vld [vmem:[%s4536_s15 + $0xa8] sm:$0xff]   ;;  %v2146_v63 = vrot.slane %v2144_v14, 1 }
 0x1ef   : > { %v1330_v47 = vpop.permute.xlu0 %1329  ;;  %v1693_v6 = vsel %vm6971_vm4, %v1660_v32, %v1202_v30  ;;  %v1724_v55 = vsel %vm6975_vm13, %v1691_v5, %v1232_v11  ;;  %v2004_v30 = vsel %vm1351_vm2, %v6977_v29, %v6967_v43  ;;  %vm6987_vm13 = vcmask 261120  }
 0x1f0   : > { %v1328_v35 = vpop.permute.xlu1 %1327  ;;  %v1726_v45 = vsel %vm6972_vm5, %v1693_v6, %v1234_v42  ;;  %v1757_v9 = vsel %vm1747_vm9, %v1724_v55, %v1264_v44  ;;  %v1932_v44 = vshrl.u32 %v4439_v53, 16  ;;  %v6978_v42 = vld [vmem:[#allocation51_spill] sm:$0xff]  ;;  %v2140_v23 = vshll.u32 %v2004_v30, 16  ;;  %v6982_v6 = vld [vmem:[#allocation22_spill] sm:$0xff]  ;;  %vm6988_vm4 = vmmov %vm6987_vm13 }
 0x1f1   : > { %1245 = vrot.lane.b32.xlu0 %v5840_v3, %s4466_s19  ;;  %v1759_v10 = vsel %vm1747_vm9, %v1726_v45, %v1266_v50  ;;  %v1790_v31 = vsel %vm1780_vm7, %v1757_v9, %v1296_v51  ;;  %v6979_v51 = vld [vmem:[#allocation11_spill] sm:$0xff]  ;;  %v2138_v28 = vshrl.u32 %v2004_v30, 16  ;;  %vm6989_vm5 = vmmov %vm6973_vm3  ;;  %vm6990_vm3 = vcmask 392192  }
 0x1f2   : > { %1213 = vrot.lane.b32.xlu1 %v6953_v39, %s4465_s18  ;;  %v1792_v46 = vsel %vm1780_vm7, %v1759_v10, %v1298_v8  ;;  %v1823_v15 = vsel %vm1813_vm1, %v1790_v31, %v1328_v35  ;;  %v2013_v57 = vsel %vm1351_vm2, %v6978_v42, %v1932_v44 }
 0x1f3   : > { %v5931_v34 = vpop.permute.xlu0 %1109  ;;  %v1825_v37 = vsel %vm1813_vm1, %v1792_v46, %v1330_v47  ;;  %v2154_v21 = vshll.u32 %v2013_v57, 16  ;;  %v2142_v47 = vrot.slane %v2140_v23, 1 }
 0x1f4   : > { %v5937_v54 = vpop.permute.xlu1 %1107 }
 0x1f5   : > { %1002 = vrot.lane.b32.xlu0 %v6974_v60, %s4459_s20  ;;  %v2156_v32 = vrot.slane %v2154_v21, 1  ;;  %v2143_v45 = vor.u32 %v2142_v47, %v2138_v28  ;;  %v6095_v47 = vld [vmem:[%s4536_s15 + $0xcc] sm:$0xff]  }
 0x1f6   : > { %1000 = vrot.lane.b32.xlu1 %v6968_v1, %s4459_s20  ;;  %v1051_v14 = vshll.u32 %v6095_v47, 16 }
 0x1f7   : > { %v2209_v16 = vpop.permute.xlu0 %2208  ;;  %v2147_v9 = vsel %vm583_vm0, %v2143_v45, %v2146_v63  ;;  %v6111_v45 = vld [vmem:[%s4536_s15 + $0xd4] ss:$0 sps:$4 sm:$0x11]  }
 0x1f8   : > { %v2207_v40 = vpop.permute.xlu1 %2206  ;;  %v2242_v27 = vsel %vm2230_vm6, %v1825_v37, %v2209_v16  ;;  %v6983_v37 = vld [vmem:[#allocation45_spill] sm:$0xff]  ;;  %v1056_v63 = vshll.u32 %v6111_v45, 16 }
 0x1f9   : > { %1277 = vrot.lane.b32.xlu0 %v6967_v43, %s4467_s21  ;;  %v2240_v11 = vsel %vm2230_vm6, %v1823_v15, %v2207_v40  ;;  %v6984_v15 = vld [vmem:[#allocation2_spill] sm:$0xff] }
 0x1fa   : > { %1275 = vrot.lane.b32.xlu1 %v6951_v0, %s4467_s21  ;;  %4210 = vmatprep.mubr.msk.bf16.mxu0 %vm2299_vm8, %v2240_v11  ;;  %v1499_v40 = vsel %vm1483_vm10, %v6984_v15, %v6983_v37  ;;  %v4445_v15 = vld [vmem:[%s4536_s15 + $0xbc] ss:$0 sps:$4 sm:$0x11]  }
 0x1fb   : > { %v5957_v52 = vpop.permute.xlu0 %1171  ;;  %4282 = vmatprep.mubr.msk.bf16.mxu1 %vm1615_vm14, %v2240_v11  ;;  %4211 = vmatmul.mubr.msk.bf16.gmra.mrb[8].mxu0 %vm2299_vm8, %v2242_v27  ;;  %v6986_v11 = vld [vmem:[#allocation37_spill] sm:$0xff]  ;;  %v1532_v12 = vsel %vm1516_vm11, %v1499_v40, %v5884_v24  ;;  %v1936_v40 = vshrl.u32 %v4445_v15, 16  ;;  %v7001_v15 = vld [vmem:[#allocation38_spill] sm:$0xff] }
 0x1fc   : > { %4283 = vmatmul.mubr.msk.bf16.gmra.mrb[28].mxu1 %vm1615_vm14, %v2242_v27  ;;  %v5962_v59 = vpop.permute.xlu1 %1139  ;;  %v6985_v27 = vld [vmem:[#allocation46_spill] sm:$0xff] }
 0x1fd   : > { %1039 = vrot.lane.b32.xlu0 %v5965_v19, %s4461_s22  ;;  %v1497_v38 = vsel %vm1483_vm10, %v6986_v11, %v6985_v27  ;;  %v6995_v11 = vld [vmem:[#allocation54_spill] sm:$0xff] }
 0x1fe   : > { %1037 = vrot.lane.b32.xlu1 %v5970_v36, %s4461_s22 }
 0x1ff   : > { %v5974_v0 = vpop.permute.xlu0 %1203 }
 0x200   : > { %v1142_v62 = vpop.permute.xlu1 %1141 }
 0x201   : > { %1309 = vrot.lane.b32.xlu0 %v6961_v13, %s4468_s27 }
 0x202   : > { %1307 = vrot.lane.b32.xlu1 %v6953_v39, %s4468_s27  ;;  %v2152_v39 = vrot.slane %v2150_v61, 1  ;;  %v6056_v61 = vld [vmem:[%s4536_s15 + $0xc8] ss:$0 sps:$4 sm:$0x11]  }
 0x203   : > { %v5988_v50 = vpop.permute.xlu0 %1235 }
 0x204   : > { %v1174_v8 = vpop.permute.xlu1 %1173  ;;  %v2153_v18 = vor.u32 %v2152_v39, %v2148_v20 }
 0x205   : > { %1086 = vrot.lane.b32.xlu0 %v6979_v51, %s4462_s23 }
 0x206   : > { %1084 = vrot.lane.b32.xlu1 %v6981_v4, %s4462_s23  ;;  %v2157_v55 = vsel %vm583_vm0, %v2153_v18, %v2156_v32  ;;  %v1049_v32 = vshrl.u32 %v6095_v47, 16 }
 0x207   : > { %v1268_v26 = vpop.permute.xlu0 %1267 }
 0x208   : > { %v1206_v7 = vpop.permute.xlu1 %1205 }
 0x209   : > { %1341 = vrot.lane.b32.xlu0 %v5834_v58, %s4469_s29 }
 0x20a   : > { %1339 = vrot.lane.b32.xlu1 %v5840_v3, %s4469_s29 }
 0x20b   : > { %v1270_v2 = vpop.permute.xlu0 %1269 }
 0x20c   : > { %v1238_v35 = vpop.permute.xlu1 %1237 }
 0x20d   : > { %1121 = vrot.lane.b32.xlu0 %v6982_v6, %s4463_s12 }
 0x20e   : > { %1119 = vrot.lane.b32.xlu1 %v6974_v60, %s4463_s12 }
 0x20f   : > { %v6006_v5 = vpop.permute.xlu0 %1031 }
 0x210   : > { %v6009_v10 = vpop.permute.xlu1 %1029 }
 0x211   : > { %2220 = vrot.lane.b32.xlu0 %v2157_v55, %s4470_s24 }
 0x212   : > { %2218 = vrot.lane.b32.xlu1 %v2147_v9, %s4470_s24 }
 0x213   : > { %v1302_v46 = vpop.permute.xlu0 %1301 }
 0x214   : > { %v1300_v16 = vpop.permute.xlu1 %1299 }
 0x215   : > { %1183 = vrot.lane.b32.xlu0 %v6967_v43, %s4464_s17  ;;  %v1565_v43 = vsel %vm1549_vm12, %v1532_v12, %v5896_v41  ;;  %v4446_v12 = vld [vmem:[%s4536_s15 + $0xb0] ss:$0 sps:$4 sm:$0x11]  }
 0x216   : > { %1151 = vrot.lane.b32.xlu1 %v5840_v3, %s4463_s12  ;;  %v1530_v3 = vsel %vm1516_vm11, %v1497_v38, %v5886_v48  ;;  %v1598_v29 = vsel %vm6987_vm13, %v1565_v43, %v5931_v34  ;;  %v6052_v34 = vld [vmem:[%s4536_s15 + $0xc0] sm:$0xff]   ;;  %vm6991_vm13 = vmmov %vm6989_vm5  ;;  %v2016_v38 = vsel %vm1351_vm2, %v6995_v11, %v6981_v4  ;;  %v7002_v11 = vld [vmem:[#allocation48_spill] sm:$0xff] }
 0x217   : > { %v6018_v31 = vpop.permute.xlu0 %1078  ;;  %v1563_v44 = vsel %vm1549_vm12, %v1530_v3, %v5906_v25  ;;  %v1631_v30 = vsel %vm1615_vm14, %v1598_v29, %v1142_v62  ;;  %v973_v33 = vrot.slane %v6052_v34, 1  ;;  %v1934_v3 = vshrl.u32 %v4446_v12, 16 }
 0x218   : > { %v6028_v53 = vpop.permute.xlu1 %1076  ;;  %v1664_v41 = vsel %vm1648_vm15, %v1631_v30, %v1174_v8 }
 0x219   : > { %1215 = vrot.lane.b32.xlu0 %v6961_v13, %s4465_s18  ;;  %v1596_v13 = vsel %vm6988_vm4, %v1563_v44, %v5937_v54  ;;  %v1697_v25 = vsel %vm6989_vm5, %v1664_v41, %v1206_v7  ;;  %v974_v54 = vrot.slane %v6056_v61, 1  ;;  %vm6992_vm4 = vmmov %vm6990_vm3  ;;  %vm6993_vm5 = vcmask 1046528  }
 0x21a   : > { %1153 = vrot.lane.b32.xlu1 %v5834_v58, %s4463_s12  ;;  %v1629_v48 = vsel %vm1615_vm14, %v1596_v13, %v5962_v59  ;;  %v1730_v62 = vsel %vm6990_vm3, %v1697_v25, %v1238_v35  ;;  %v1053_v35 = vrot.slane %v1051_v14, 1  ;;  %v1092_v41 = vrot.slane %v6095_v47, 1  ;;  %v6997_v25 = vld [vmem:[#allocation15_spill] sm:$0xff]  ;;  %vm6999_vm3 = vmmov %vm6993_vm5 }
 0x21b   : > { %v1334_v24 = vpop.permute.xlu0 %1333  ;;  %v1763_v23 = vsel %vm1747_vm9, %v1730_v62, %v1270_v2  ;;  %v6076_v56 = vsel %vm6993_vm5, %v973_v33, %v974_v54  ;;  %v6998_v33 = vld [vmem:[#allocation28_spill] sm:$0xff]  ;;  %vm7007_vm5 = vcmask 359424  }
 0x21c   : > { %v1332_v22 = vpop.permute.xlu1 %1331 }
 0x21d   : > { %1247 = vrot.lane.b32.xlu0 %v5834_v58, %s4466_s19  ;;  %v1662_v58 = vsel %vm1648_vm15, %v1629_v48, %v5957_v52  ;;  %v1796_v52 = vsel %vm1780_vm7, %v1763_v23, %v1302_v46  ;;  %v1058_v46 = vrot.slane %v1056_v63, 1  ;;  %v2160_v48 = vshll.u32 %v2016_v38, 16 }
 0x21e   : > { %1185 = vrot.lane.b32.xlu1 %v6966_v17, %s4464_s17  ;;  %v1695_v42 = vsel %vm6991_vm13, %v1662_v58, %v5974_v0  ;;  %v1829_v39 = vsel %vm1813_vm1, %v1796_v52, %v1334_v24  ;;  %v6996_v24 = vld [vmem:[#allocation14_spill] sm:$0xff]  ;;  %v2158_v23 = vshrl.u32 %v2016_v38, 16  ;;  %v7003_v38 = vld [vmem:[#allocation39_spill] sm:$0xff]  ;;  %vm7004_vm13 = vcmask 261120  }
 0x21f   : > { %v6062_v59 = vpop.permute.xlu0 %1113  ;;  %v1728_v8 = vsel %vm6992_vm4, %v1695_v42, %v5988_v50  ;;  %v2025_v13 = vsel %vm1351_vm2, %v6996_v24, %v1936_v40  ;;  %v1501_v12 = vsel %vm1483_vm10, %v7003_v38, %v7002_v11  ;;  %vm7005_vm4 = vmmov %vm7004_vm13 }
 0x220   : > { %v6068_v57 = vpop.permute.xlu1 %1111  ;;  %v1761_v49 = vsel %vm1747_vm9, %v1728_v8, %v1268_v26  ;;  %v2174_v42 = vshll.u32 %v2025_v13, 16 }
 0x221   : > { %1249 = vrot.lane.b32.xlu0 %v5970_v36, %s4466_s19  ;;  %v1794_v20 = vsel %vm1780_vm7, %v1761_v49, %v1300_v16  ;;  %v6994_v16 = vld [vmem:[#allocation53_spill] sm:$0xff]  ;;  %v2162_v49 = vrot.slane %v2160_v48, 1 }
 0x222   : > { %1217 = vrot.lane.b32.xlu1 %v6968_v1, %s4465_s18  ;;  %v1827_v50 = vsel %vm1813_vm1, %v1794_v20, %v1332_v22  ;;  %v2022_v37 = vsel %vm1351_vm2, %v6994_v16, %v6979_v51  ;;  %v1093_v22 = vrot.slane %v6111_v45, 1 }
 0x223   : > { %v2213_v0 = vpop.permute.xlu0 %2212  ;;  %v2170_v44 = vshll.u32 %v2022_v37, 16  ;;  %v2168_v62 = vshrl.u32 %v2022_v37, 16  ;;  %v7000_v37 = vld [vmem:[#allocation47_spill] sm:$0xff] }
 0x224   : > { %v2211_v21 = vpop.permute.xlu1 %2210  ;;  %v2246_v7 = vsel %vm2230_vm6, %v1829_v39, %v2213_v0  ;;  %v1094_v0 = vsel %vm6999_vm3, %v1092_v41, %v1093_v22  ;;  %v1503_v40 = vsel %vm1483_vm10, %v7001_v15, %v7000_v37  ;;  %v1938_v41 = vshrl.u32 %v6056_v61, 16  ;;  %vm7009_vm3 = vmmov %vm7007_vm5 }
 0x225   : > { %1006 = vrot.lane.b32.xlu0 %v6076_v56, %s4459_s20  ;;  %v2244_v26 = vsel %vm2230_vm6, %v1827_v50, %v2211_v21  ;;  %v2172_v58 = vrot.slane %v2170_v44, 1  ;;  %v2176_v50 = vrot.slane %v2174_v42, 1 }
 0x226   : > { %1004 = vrot.lane.b32.xlu1 %v6982_v6, %s4459_s20  ;;  %4214 = vmatprep.mubr.msk.bf16.mxu0 %vm2299_vm8, %v2244_v26 }
 0x227   : > { %v6092_v28 = vpop.permute.xlu0 %1175  ;;  %4286 = vmatprep.mubr.msk.bf16.mxu1 %vm1615_vm14, %v2244_v26  ;;  %4215 = vmatmul.mubr.msk.bf16.gmra.mrb[12].mxu0 %vm2299_vm8, %v2246_v7  ;;  %v2173_v39 = vor.u32 %v2172_v58, %v2168_v62 }
 0x228   : > { %4287 = vmatmul.mubr.msk.bf16.gmra.mrb[0].mxu1 %vm1615_vm14, %v2246_v7  ;;  %v6101_v2 = vpop.permute.xlu1 %1143  ;;  %v2163_v7 = vor.u32 %v2162_v49, %v2158_v23 }
 0x229   : > { %1281 = vrot.lane.b32.xlu0 %v6981_v4, %s4467_s21 }
 0x22a   : > { %1279 = vrot.lane.b32.xlu1 %v6966_v17, %s4467_s21  ;;  %v1054_v17 = vor.u32 %v1053_v35, %v1049_v32  ;;  %v2177_v32 = vsel %vm583_vm0, %v2173_v39, %v2176_v50  ;;  %v7012_v50 = vld [vmem:[#allocation56_spill] sm:$0xff] }
 0x22b   : > { %v6107_v18 = vpop.permute.xlu0 %1207 }
 0x22c   : > { %v6114_v55 = vpop.permute.xlu1 %1145  ;;  %v6139_v29 = vsel %vm583_vm0, %v1054_v17, %v1058_v46 }
 0x22d   : > { %1043 = vrot.lane.b32.xlu0 %v6095_v47, %s4461_s22 }
 0x22e   : > { %1041 = vrot.lane.b32.xlu1 %v6052_v34, %s4461_s22  ;;  %s6586_s22 = scalar_lea.vmem %s6823_s8, %s5170_s25 }
 0x22f   : > { %v6120_v9 = vpop.permute.xlu0 %1239 }
 0x230   : > { %v6126_v27 = vpop.permute.xlu1 %1177 }
 0x231   : > { %1313 = vrot.lane.b32.xlu0 %v6974_v60, %s4468_s27 }
 0x232   : > { %1311 = vrot.lane.b32.xlu1 %v6968_v1, %s4468_s27  ;;  %v2019_v1 = vsel %vm1351_vm2, %v6997_v25, %v1934_v3  ;;  %v1536_v3 = vsel %vm1516_vm11, %v1503_v40, %v6006_v5 }
 0x233   : > { %v6136_v43 = vpop.permute.xlu0 %1241  ;;  %v2164_v52 = vshll.u32 %v2019_v1, 16  ;;  %v7008_v1 = vld [vmem:[#allocation57_spill] sm:$0xff] }
 0x234   : > { %v1210_v30 = vpop.permute.xlu1 %1209 }
 0x235   : > { %1090 = vrot.lane.b32.xlu0 %v6139_v29, %s4462_s23  ;;  %v2166_v26 = vrot.slane %v2164_v52, 1 }
 0x236   : > { %1088 = vrot.lane.b32.xlu1 %v6998_v33, %s4462_s23 }
 0x237   : > { %v6151_v54 = vpop.permute.xlu0 %998  ;;  %v2167_v63 = vsel %vm583_vm0, %v2163_v7, %v2166_v26  ;;  %v1940_v7 = vshrl.u32 %v6111_v45, 16 }
 0x238   : > { %v6153_v8 = vpop.permute.xlu1 %996 }
 0x239   : > { %1345 = vrot.lane.b32.xlu0 %v5965_v19, %s4469_s29 }
 0x23a   : > { %1343 = vrot.lane.b32.xlu1 %v5970_v36, %s4469_s29 }
 0x23b   : > { %v1274_v20 = vpop.permute.xlu0 %1273 }
 0x23c   : > { %v1272_v21 = vpop.permute.xlu1 %1271 }
 0x23d   : > { %1125 = vrot.lane.b32.xlu0 %v1094_v0, %s4463_s12 }
 0x23e   : > { %1123 = vrot.lane.b32.xlu1 %v6076_v56, %s4463_s12 }
 0x23f   : > { %v6163_v14 = vpop.permute.xlu0 %1035 }
 0x240   : > { %v6166_v35 = vpop.permute.xlu1 %1033 }
 0x241   : > { %2224 = vrot.lane.b32.xlu0 %v2177_v32, %s4470_s24 }
 0x242   : > { %2222 = vrot.lane.b32.xlu1 %v2167_v63, %s4470_s24 }
 0x243   : > { %v1306_v17 = vpop.permute.xlu0 %1305 }
 0x244   : > { %v1304_v46 = vpop.permute.xlu1 %1303 }
 0x245   : > { %1187 = vrot.lane.b32.xlu0 %v6981_v4, %s4464_s17  ;;  %v1569_v4 = vsel %vm1549_vm12, %v1536_v3, %v6018_v31 }
 0x246   : > { %1155 = vrot.lane.b32.xlu1 %v5970_v36, %s4463_s12  ;;  %v1534_v36 = vsel %vm1516_vm11, %v1501_v12, %v6009_v10  ;;  %v1602_v13 = vsel %vm7004_vm13, %v1569_v4, %v6062_v59  ;;  %v7006_v10 = vld [vmem:[#allocation55_spill] sm:$0xff]  ;;  %vm7010_vm13 = vcmask 392192  }
 0x247   : > { %v6175_v16 = vpop.permute.xlu0 %1082  ;;  %v1567_v24 = vsel %vm1549_vm12, %v1534_v36, %v6028_v53  ;;  %v2028_v31 = vsel %vm1351_vm2, %v7006_v10, %v6998_v33 }
 0x248   : > { %v6185_v44 = vpop.permute.xlu1 %1080  ;;  %v1600_v48 = vsel %vm7005_vm4, %v1567_v24, %v6068_v57  ;;  %v2180_v25 = vshll.u32 %v2028_v31, 16  ;;  %vm7011_vm4 = vmmov %vm7010_vm13 }
 0x249   : > { %1219 = vrot.lane.b32.xlu0 %v6974_v60, %s4465_s18  ;;  %v1635_v60 = vsel %vm1615_vm14, %v1602_v13, %v6114_v55  ;;  %v1633_v53 = vsel %vm1615_vm14, %v1600_v48, %v6101_v2  ;;  %v2031_v2 = vsel %vm1351_vm2, %v7008_v1, %v1938_v41 }
 0x24a   : > { %1157 = vrot.lane.b32.xlu1 %v5965_v19, %s4463_s12  ;;  %v1668_v59 = vsel %vm1648_vm15, %v1635_v60, %v6126_v27  ;;  %v1666_v61 = vsel %vm1648_vm15, %v1633_v53, %v6092_v28  ;;  %v2178_v28 = vshrl.u32 %v2028_v31, 16  ;;  %v2184_v49 = vshll.u32 %v2031_v2, 16 }
 0x24b   : > { %v1338_v5 = vpop.permute.xlu0 %1337  ;;  %v1701_v57 = vsel %vm7007_vm5, %v1668_v59, %v1210_v30  ;;  %v1699_v27 = vsel %vm7009_vm3, %v1666_v61, %v6107_v18  ;;  %v7016_v61 = vld [vmem:[#allocation3_spill] sm:$0xff] }
 0x24c   : > { %v1336_v22 = vpop.permute.xlu1 %1335  ;;  %v1732_v30 = vsel %vm7011_vm4, %v1699_v27, %v6120_v9  ;;  %v2186_v63 = vrot.slane %v2184_v49, 1  ;;  %v1507_v1 = vsel %vm1483_vm10, %v7016_v61, %v6151_v54 }
 0x24d   : > { %1251 = vrot.lane.b32.xlu0 %v5965_v19, %s4466_s19  ;;  %v1734_v19 = vsel %vm7010_vm13, %v1701_v57, %v6136_v43  ;;  %v1765_v42 = vsel %vm1747_vm9, %v1732_v30, %v1272_v21  ;;  %v2182_v43 = vrot.slane %v2180_v25, 1  ;;  %v2034_v21 = vsel %vm1351_vm2, %v7012_v50, %v6139_v29  ;;  %v7013_v29 = vld [vmem:[#allocation58_spill] sm:$0xff]  ;;  %vm7020_vm13 = vmmov %vm7009_vm3 }
 0x24e   : > { %1189 = vrot.lane.b32.xlu1 %v6979_v51, %s4464_s17  ;;  %v1767_v58 = vsel %vm1747_vm9, %v1734_v19, %v1274_v20  ;;  %v1798_v52 = vsel %vm1780_vm7, %v1765_v42, %v1304_v46  ;;  %v2190_v45 = vshll.u32 %v2034_v21, 16  ;;  %v2188_v40 = vshrl.u32 %v2034_v21, 16  ;;  %v7017_v19 = vld [vmem:[#allocation40_spill] sm:$0xff] }
 0x24f   : > { %v6216_v55 = vpop.permute.xlu0 %1117  ;;  %v1800_v23 = vsel %vm1780_vm7, %v1767_v58, %v1306_v17  ;;  %v1831_v0 = vsel %vm1813_vm1, %v1798_v52, %v1336_v22  ;;  %v2183_v32 = vor.u32 %v2182_v43, %v2178_v28  ;;  %v2037_v17 = vsel %vm1351_vm2, %v7013_v29, %v1940_v7 }
 0x250   : > { %v6226_v62 = vpop.permute.xlu1 %1115  ;;  %v2192_v11 = vrot.slane %v2190_v45, 1  ;;  %v2194_v38 = vshll.u32 %v2037_v17, 16  ;;  %v1505_v30 = vsel %vm1483_vm10, %v7017_v19, %v6153_v8  ;;  %v1540_v58 = vsel %vm1516_vm11, %v1507_v1, %v6163_v14 }
 0x251   : > { %1283 = vrot.lane.b32.xlu0 %v6979_v51, %s4467_s21  ;;  %v1833_v51 = vsel %vm1813_vm1, %v1800_v23, %v1338_v5  ;;  %v2187_v37 = vsel %vm583_vm0, %v2183_v32, %v2186_v63  ;;  %v7014_v5 = vld [vmem:[#allocation13_spill] sm:$0xff]  ;;  %v1538_v23 = vsel %vm1516_vm11, %v1505_v30, %v6166_v35  ;;  %v1573_v54 = vsel %vm1549_vm12, %v1540_v58, %v6175_v16 }
 0x252   : > { %1221 = vrot.lane.b32.xlu1 %v6982_v6, %s4465_s18  ;;  %v2193_v3 = vor.u32 %v2192_v11, %v2188_v40  ;;  %v2196_v36 = vrot.slane %v2194_v38, 1  ;;  %v1571_v8 = vsel %vm1549_vm12, %v1538_v23, %v6185_v44  ;;  %s6619_s18 = scalar_lea.vmem %s6824_s9, %s5170_s25 }
 0x253   : > { %v2217_v18 = vpop.permute.xlu0 %2216 }
 0x254   : > { %v2215_v9 = vpop.permute.xlu1 %2214  ;;  %v2250_v20 = vsel %vm2230_vm6, %v1833_v51, %v2217_v18  ;;  %v2197_v24 = vsel %vm583_vm0, %v2193_v3, %v2196_v36  ;;  %vm7018_vm0 = vcmask 261120  }
 0x255   : > { %1315 = vrot.lane.b32.xlu0 %v6982_v6, %s4468_s27  ;;  %v2248_v39 = vsel %vm2230_vm6, %v1831_v0, %v2215_v9  ;;  %v1606_v14 = vsel %vm7018_vm0, %v1573_v54, %v6216_v55  ;;  %vm7019_vm5 = vmmov %vm7018_vm0 }
 0x256   : > { %1253 = vrot.lane.b32.xlu1 %v6052_v34, %s4466_s19  ;;  %4218 = vmatprep.mubr.msk.bf16.mxu0 %vm2299_vm8, %v2248_v39  ;;  %v1604_v35 = vsel %vm7019_vm5, %v1571_v8, %v6226_v62  ;;  %vm7021_vm0 = vmmov %vm7011_vm4 }
 0x257   : > { %v6251_v26 = vpop.permute.xlu0 %1179  ;;  %4290 = vmatprep.mubr.msk.bf16.mxu1 %vm1615_vm14, %v2248_v39  ;;  %4219 = vmatmul.mubr.msk.bf16.gmra.mrb[16].mxu0 %vm2299_vm8, %v2250_v20 }
 0x258   : > { %4291 = vmatmul.mubr.msk.bf16.gmra.mrb[4].mxu1 %vm1615_vm14, %v2250_v20  ;;  %v1148_v6 = vpop.permute.xlu1 %1147 }
 0x259   : > { %1347 = vrot.lane.b32.xlu0 %v6052_v34, %s4469_s29  ;;  %v1637_v0 = vsel %vm1615_vm14, %v1604_v35, %v1148_v6 }
 0x25a   : > { %1285 = vrot.lane.b32.xlu1 %v6998_v33, %s4467_s21  ;;  %v1670_v55 = vsel %vm1648_vm15, %v1637_v0, %v6251_v26 }
 0x25b   : > { %v1212_v46 = vpop.permute.xlu0 %1211 }
 0x25c   : > { %v1150_v15 = vpop.permute.xlu1 %1149  ;;  %v1703_v50 = vsel %vm7020_vm13, %v1670_v55, %v1212_v46 }
 0x25d   : > { %2226 = vrot.lane.b32.xlu0 %v2187_v37, %s4470_s24  ;;  %v1639_v51 = vsel %vm1615_vm14, %v1606_v14, %v1150_v15 }
 0x25e   : > { %1317 = vrot.lane.b32.xlu1 %v6076_v56, %s4468_s27  ;;  %v7015_v56 = vld [vmem:[#allocation41_spill] sm:$0xff] }
 0x25f   : > { %v1244_v34 = vpop.permute.xlu0 %1243 }
 0x260   : > { %v1182_v12 = vpop.permute.xlu1 %1181  ;;  %v1736_v62 = vsel %vm7021_vm0, %v1703_v50, %v1244_v34 }
 0x261   : > { %v1672_v9 = vsel %vm1648_vm15, %v1639_v51, %v1182_v12 }
 0x262   : > { %1349 = vrot.lane.b32.xlu1 %v6095_v47, %s4469_s29 }
 0x263   : > { %v1246_v33 = vpop.permute.xlu0 %1245 }
 0x264   : > { %v1214_v4 = vpop.permute.xlu1 %1213 }
 0x265   : > { %v1705_v44 = vsel %vm7009_vm3, %v1672_v9, %v1214_v4  ;;  %vm7022_vm3 = vmmov %vm7019_vm5 }
 0x266   : > { %2228 = vrot.lane.b32.xlu1 %v2197_v24, %s4470_s24  ;;  %v1738_v21 = vsel %vm7011_vm4, %v1705_v44, %v1246_v33  ;;  %vm7023_vm4 = vmmov %vm7020_vm13 }
 0x267   : > { %v1003_v13 = vpop.permute.xlu0 %1002 }
 0x268   : > { %v6272_v48 = vsel %vm1483_vm10, %v7014_v5, %v1003_v13  ;;  %v1001_v60 = vpop.permute.xlu1 %1000 }
 0x269   : > { %v6276_v10 = vsel %vm1483_vm10, %v7015_v56, %v1001_v60 }
 0x26b   : > { %v1278_v31 = vpop.permute.xlu0 %1277 }
 0x26c   : > { %v1276_v41 = vpop.permute.xlu1 %1275  ;;  %v1771_v32 = vsel %vm1747_vm9, %v1738_v21, %v1278_v31 }
 0x26d   : > { %v1769_v63 = vsel %vm1747_vm9, %v1736_v62, %v1276_v41 }
 0x26f   : > { %v6278_v53 = vpop.permute.xlu0 %1039 }
 0x270   : > { %v6280_v47 = vpop.permute.xlu1 %1037  ;;  %v1544_v51 = vsel %vm1516_vm11, %v6272_v48, %v6278_v53 }
 0x271   : > { %v1542_v8 = vsel %vm1516_vm11, %v6276_v10, %v6280_v47 }
 0x273   : > { %v1310_v59 = vpop.permute.xlu0 %1309 }
 0x274   : > { %v1308_v22 = vpop.permute.xlu1 %1307  ;;  %v1804_v6 = vsel %vm1780_vm7, %v1771_v32, %v1310_v59 }
 0x275   : > { %v1802_v45 = vsel %vm1780_vm7, %v1769_v63, %v1308_v22 }
 0x276   : > { %v6282_v57 = vpop.f32.mrb[0].mxu0 }
 0x277   : > { %v6284_v25 = vpop.permute.xlu0 %1086  ;;  %v6289_v2 = vpop.f32.mrb[20].mxu1 }
 0x278   : > { %v6291_v27 = vpop.f32.mrb[1].mxu0  ;;  %v6298_v28 = vpop.f32.mrb[21].mxu1  ;;  %v1577_v0 = vsel %vm1549_vm12, %v1544_v51, %v6284_v25  ;;  %v3899_v51 = vld [vmem:[%s5176_s28] sm:$0xff]  }
 0x279   : > { %v6300_v42 = vpop.permute.xlu1 %1084  ;;  %v6306_v18 = vpop.f32.mrb[2].mxu0 }
 0x27a   : > { %v6308_v43 = vpop.f32.mrb[22].mxu1  ;;  %v6314_v49 = vpop.f32.mrb[3].mxu0  ;;  %v1575_v14 = vsel %vm1549_vm12, %v1542_v8, %v6300_v42 }
 0x27b   : > { %v6316_v52 = vpop.f32.mrb[23].mxu1  ;;  %v1342_v16 = vpop.permute.xlu0 %1341 }
 0x27c   : > { %v1837_v29 = vsel %vm1813_vm1, %v1804_v6, %v1342_v16 }
 0x27d   : > { %v1340_v20 = vpop.permute.xlu1 %1339 }
 0x27e   : > { %v1835_v26 = vsel %vm1813_vm1, %v1802_v45, %v1340_v20 }
 0x27f   : > { %v1122_v39 = vpop.permute.xlu0 %1121 }
 0x280   : > { %v1610_v44 = vsel %vm7022_vm3, %v1577_v0, %v1122_v39  ;;  %v3963_v0 = vld [vmem:[%s5182_s11] sm:$0xff]  }
 0x281   : > { %v1120_v7 = vpop.permute.xlu1 %1119 }
 0x282   : > { %v1608_v16 = vsel %vm7019_vm5, %v1575_v14, %v1120_v7  ;;  %vm7024_vm5 = vmmov %vm7021_vm0 }
 0x283   : > { %v2221_v17 = vpop.permute.xlu0 %2220 }
 0x284   : > { %v2254_v46 = vsel %vm2230_vm6, %v1837_v29, %v2221_v17 }
 0x285   : > { %v2219_v37 = vpop.permute.xlu1 %2218 }
 0x286   : > { %v2252_v15 = vsel %vm2230_vm6, %v1835_v26, %v2219_v37 }
 0x287   : > { %4222 = vmatprep.mubr.msk.bf16.mxu0 %vm2299_vm8, %v2252_v15  ;;  %4294 = vmatprep.mubr.msk.bf16.mxu1 %vm1615_vm14, %v2252_v15  ;;  %v1184_v40 = vpop.permute.xlu0 %1183 }
 0x288   : > { %4223 = vmatmul.mubr.msk.bf16.gmra.mrb[20].mxu0 %vm2299_vm8, %v2254_v46  ;;  %4295 = vmatmul.mubr.msk.bf16.gmra.mrb[8].mxu1 %vm1615_vm14, %v2254_v46 }
 0x289   : > { %v1152_v11 = vpop.permute.xlu1 %1151 }
 0x28a   : > { %v1641_v9 = vsel %vm1615_vm14, %v1608_v16, %v1152_v11 }
 0x28b   : > { %v1216_v38 = vpop.permute.xlu0 %1215  ;;  %v1674_v42 = vsel %vm1648_vm15, %v1641_v9, %v1184_v40 }
 0x28c   : > { %v1707_v50 = vsel %vm7020_vm13, %v1674_v42, %v1216_v38  ;;  %vm7027_vm13 = vmmov %vm7023_vm4 }
 0x28d   : > { %v1154_v34 = vpop.permute.xlu1 %1153 }
 0x28e   : > { %v1643_v10 = vsel %vm1615_vm14, %v1610_v44, %v1154_v34 }
 0x28f   : > { %v1248_v12 = vpop.permute.xlu0 %1247 }
 0x290   : > { %v1740_v21 = vsel %vm7021_vm0, %v1707_v50, %v1248_v12 }
 0x291   : > { %v1186_v3 = vpop.permute.xlu1 %1185 }
 0x292   : > { %v1676_v55 = vsel %vm1648_vm15, %v1643_v10, %v1186_v3  ;;  %v7025_v3 = vld [vmem:[#allocation43_spill] sm:$0xff] }
 0x293   : > { %v1250_v36 = vpop.permute.xlu0 %1249 }
 0x295   : > { %v1218_v33 = vpop.permute.xlu1 %1217 }
 0x296   : > { %v1709_v48 = vsel %vm7023_vm4, %v1676_v55, %v1218_v33  ;;  %vm7028_vm4 = vmmov %vm7021_vm0 }
 0x297   : > { %v6341_v4 = vpop.permute.xlu0 %1006  ;;  %v1742_v62 = vsel %vm7024_vm5, %v1709_v48, %v1250_v36 }
 0x299   : > { %v1005_v24 = vpop.permute.xlu1 %1004 }
 0x29a   : > { %v1513_v36 = vsel %vm1483_vm10, %v7025_v3, %v1005_v24 }
 0x29b   : > { %v1282_v13 = vpop.permute.xlu0 %1281 }
 0x29c   : > { %v1775_v32 = vsel %vm1747_vm9, %v1742_v62, %v1282_v13 }
 0x29d   : > { %v1280_v5 = vpop.permute.xlu1 %1279 }
 0x29e   : > { %v1773_v25 = vsel %vm1747_vm9, %v1740_v21, %v1280_v5 }
 0x29f   : > { %v6343_v56 = vpop.permute.xlu0 %1043 }
 0x2a1   : > { %v1042_v60 = vpop.permute.xlu1 %1041 }
 0x2a2   : > { %v6345_v31 = vpop.f32.mrb[4].mxu0  ;;  %v1546_v13 = vsel %vm1516_vm11, %v1513_v36, %v1042_v60  ;;  %v4106_v36 = vld [vmem:[%s5182_s11 + $0x10] sm:$0xff]  }
 0x2a3   : > { %v6347_v41 = vpop.f32.mrb[24].mxu1  ;;  %v6349_v59 = vpop.f32.mrb[5].mxu0 }
 0x2a4   : > { %v6351_v22 = vpop.f32.mrb[25].mxu1  ;;  %v6353_v1 = vpop.f32.mrb[6].mxu0 }
 0x2a5   : > { %v1312_v61 = vpop.permute.xlu1 %1311  ;;  %v6355_v19 = vpop.f32.mrb[26].mxu1 }
 0x2a6   : > { %v1314_v30 = vpop.permute.xlu0 %1313  ;;  %v6357_v58 = vpop.f32.mrb[7].mxu0  ;;  %v1806_v39 = vsel %vm1780_vm7, %v1773_v25, %v1312_v61 }
 0x2a7   : > { %v6359_v23 = vpop.f32.mrb[27].mxu1  ;;  %v1808_v45 = vsel %vm1780_vm7, %v1775_v32, %v1314_v30 }
 0x2a9   : > { %v1089_v54 = vpop.permute.xlu1 %1088 }
 0x2aa   : > { %v6366_v35 = vpop.permute.xlu0 %1090  ;;  %v1579_v5 = vsel %vm1549_vm12, %v1546_v13, %v1089_v54  ;;  %v3900_v54 = vunpack.c.l.bf16 %v3899_v51 }
 0x2ad   : > { %v1344_v20 = vpop.permute.xlu1 %1343 }
 0x2ae   : > { %v1346_v47 = vpop.permute.xlu0 %1345  ;;  %v1839_v63 = vsel %vm1813_vm1, %v1806_v39, %v1344_v20  ;;  %v7026_v20 = vld [vmem:[#allocation42_spill] sm:$0xff] }
 0x2af   : > { %v1841_v17 = vsel %vm1813_vm1, %v1808_v45, %v1346_v47  ;;  %v1515_v24 = vsel %vm1483_vm10, %v7026_v20, %v6341_v4  ;;  %v3901_v47 = vunpack.c.h.bf16 %v3899_v51  ;;  %v3965_v4 = vunpack.c.h.bf16 %v3963_v0  ;;  %vm7029_vm10 = vmmov %vm7022_vm3  ;;  %v4090_v45 = vld [vmem:[%s5176_s28 + $0x8] sm:$0xff]  }
 0x2b0   : > { %v1548_v42 = vsel %vm1516_vm11, %v1515_v24, %v6343_v56  ;;  %vm7030_vm11 = vmmov %vm7027_vm13  ;;  %v3904_v13 = vunpack.c.l.bf16 %v4090_v45 }
 0x2b1   : > { %v1124_v53 = vpop.permute.xlu1 %1123  ;;  %v1581_v21 = vsel %vm1549_vm12, %v1548_v42, %v6366_v35  ;;  %v2626_v3 = vadd.f32 %v3965_v4, %v3901_v47  ;;  %vm7031_vm12 = vmmov %vm7021_vm0  ;;  %v4093_v4 = vld [vmem:[%s5176_s28 + $0x20] sm:$0xff]  }
 0x2b2   : > { %v1126_v7 = vpop.permute.xlu0 %1125  ;;  %v1612_v30 = vsel %vm7022_vm3, %v1579_v5, %v1124_v53  ;;  %v3964_v53 = vunpack.c.l.bf16 %v3963_v0  ;;  %v3905_v5 = vunpack.c.h.bf16 %v4090_v45 }
 0x2b3   : > { %v1614_v56 = vsel %vm7029_vm10, %v1581_v21, %v1126_v7  ;;  %v4108_v21 = vld [vmem:[%s5182_s11 + $0x20] sm:$0xff]  }
 0x2b5   : > { %v2223_v6 = vpop.permute.xlu1 %2222 }
 0x2b6   : > { %v2256_v29 = vsel %vm2230_vm6, %v1839_v63, %v2223_v6  ;;  %v2225_v26 = vpop.permute.xlu0 %2224 }
 0x2b7   : > { %4226 = vmatprep.mubr.msk.bf16.mxu0 %vm2299_vm8, %v2256_v29  ;;  %4298 = vmatprep.mubr.msk.bf16.mxu1 %vm1615_vm14, %v2256_v29  ;;  %v2258_v37 = vsel %vm2230_vm6, %v1841_v17, %v2225_v26 }
 0x2b8   : > { %4227 = vmatmul.mubr.msk.bf16.gmra.mrb[24].mxu0 %vm2299_vm8, %v2258_v37  ;;  %4299 = vmatmul.mubr.msk.bf16.gmra.mrb[12].mxu1 %vm1615_vm14, %v2258_v37  ;;  %v4105_v37 = vld [vmem:[%s5182_s11 + $0x8] sm:$0xff]  }
 0x2b9   : > { %v1156_v46 = vpop.permute.xlu1 %1155 }
 0x2ba   : > { %v1188_v15 = vpop.permute.xlu0 %1187  ;;  %v1645_v8 = vsel %vm1615_vm14, %v1612_v30, %v1156_v46  ;;  %v4091_v46 = vld [vmem:[%s5176_s28 + $0x10] sm:$0xff]  }
 0x2bb   : > { %v1678_v9 = vsel %vm1648_vm15, %v1645_v8, %v1188_v15  ;;  %v3968_v8 = vunpack.c.l.bf16 %v4105_v37  ;;  %v3909_v0 = vunpack.c.h.bf16 %v4091_v46 }
 0x2bd   : > { %v1158_v40 = vpop.permute.xlu1 %1157 }
 0x2be   : > { %v1220_v11 = vpop.permute.xlu0 %1219  ;;  %v1647_v29 = vsel %vm1615_vm14, %v1614_v56, %v1158_v40 }
 0x2bf   : > { %v1711_v44 = vsel %vm7027_vm13, %v1678_v9, %v1220_v11  ;;  %v3972_v9 = vunpack.c.l.bf16 %v4106_v36 }
 0x2c1   : > { %v1190_v38 = vpop.permute.xlu1 %1189 }
 0x2c2   : > { %v1252_v34 = vpop.permute.xlu0 %1251  ;;  %v1680_v15 = vsel %vm1648_vm15, %v1647_v29, %v1190_v38  ;;  %v3969_v38 = vunpack.c.h.bf16 %v4105_v37  ;;  %vm7032_vm15 = vcmask 15360   ;;  %v3980_v37 = vunpack.c.l.bf16 %v4108_v21 }
 0x2c3   : > { %v1744_v55 = vsel %vm7028_vm4, %v1711_v44, %v1252_v34  ;;  %v2625_v34 = vadd.f32 %v3964_v53, %v3900_v54  ;;  %v2627_v54 = vadd.f32 %v3968_v8, %v3904_v13  ;;  %v4107_v53 = vld [vmem:[%s5182_s11 + $0x18] sm:$0xff]  }
 0x2c4   : > { %v3976_v56 = vunpack.c.l.bf16 %v4107_v53 }
 0x2c5   : > { %v1222_v12 = vpop.permute.xlu1 %1221  ;;  %v2657_v24 = vpack.c.bf16 %v2626_v3, %v2625_v34 }
 0x2c6   : > { %v1284_v33 = vpop.permute.xlu0 %1283 }
 0x2c7   : > { %v1777_v25 = vsel %vm1747_vm9, %v1744_v55, %v1284_v33  ;;  %v1713_v33 = vsel %vm7030_vm11, %v1680_v15, %v1222_v12  ;;  %v3973_v12 = vunpack.c.h.bf16 %v4106_v36  ;;  %v4092_v55 = vld [vmem:[%s5176_s28 + $0x18] sm:$0xff]   ;;  %v4094_v36 = vld [vmem:[%s5176_s28 + $0x28] sm:$0xff]  }
 0x2c8   : > { %v3920_v13 = vunpack.c.l.bf16 %v4094_v36 }
 0x2c9   : > { %v1254_v61 = vpop.permute.xlu1 %1253  ;;  %v2630_v42 = vadd.f32 %v3973_v12, %v3909_v0 }
 0x2ca   : > { %v1316_v14 = vpop.permute.xlu0 %1315  ;;  %v1746_v30 = vsel %vm7031_vm12, %v1713_v33, %v1254_v61  ;;  %v4109_v33 = vld [vmem:[%s5182_s11 + $0x28] sm:$0xff]  }
 0x2cb   : > { %v1810_v32 = vsel %vm1780_vm7, %v1777_v25, %v1316_v14  ;;  %v3908_v14 = vunpack.c.l.bf16 %v4091_v46  ;;  %v3912_v25 = vunpack.c.l.bf16 %v4092_v55  ;;  %v3981_v46 = vunpack.c.h.bf16 %v4108_v21 }
 0x2cc   : > { %v3985_v8 = vunpack.c.h.bf16 %v4109_v33 }
 0x2cd   : > { %v1286_v16 = vpop.permute.xlu1 %1285  ;;  %v2629_v47 = vadd.f32 %v3972_v9, %v3908_v14  ;;  %v2631_v15 = vadd.f32 %v3976_v56, %v3912_v25 }
 0x2ce   : > { %v1348_v60 = vpop.permute.xlu0 %1347  ;;  %v6408_v10 = vpop.f32.mrb[8].mxu0  ;;  %v1779_v51 = vsel %vm1747_vm9, %v1746_v30, %v1286_v16  ;;  %v2628_v16 = vadd.f32 %v3969_v38, %v3905_v5  ;;  %v3921_v5 = vunpack.c.h.bf16 %v4094_v36  ;;  %v3984_v30 = vunpack.c.l.bf16 %v4109_v33 }
 0x2cf   : > { %v6413_v50 = vpop.f32.mrb[28].mxu1  ;;  %v6415_v48 = vpop.f32.mrb[9].mxu0  ;;  %v1843_v17 = vsel %vm1813_vm1, %v1810_v32, %v1348_v60  ;;  %v3977_v32 = vunpack.c.h.bf16 %v4107_v53  ;;  %v2659_v29 = vpack.c.bf16 %v2630_v42, %v2629_v47  ;;  %vm3599_vm9 = vcmask 60416  }
 0x2d0   : > { %v6420_v62 = vpop.f32.mrb[29].mxu1  ;;  %v6424_v63 = vpop.f32.mrb[10].mxu0  ;;  %v2658_v45 = vpack.c.bf16 %v2628_v16, %v2627_v54  ;;  %v2635_v14 = vadd.f32 %v3984_v30, %v3920_v13 }
 0x2d1   : > { %v1318_v39 = vpop.permute.xlu1 %1317  ;;  %v6426_v6 = vpop.f32.mrb[30].mxu1 }
 0x2d2   : > { %v2227_v35 = vpop.permute.xlu0 %2226  ;;  %v6431_v26 = vpop.f32.mrb[11].mxu0  ;;  %v1812_v20 = vsel %vm1780_vm7, %v1779_v51, %v1318_v39  ;;  %v3913_v39 = vunpack.c.h.bf16 %v4092_v55  ;;  %v2636_v51 = vadd.f32 %v3985_v8, %v3921_v5 }
 0x2d3   : > { %v2260_v7 = vsel %vm2230_vm6, %v1843_v17, %v2227_v35  ;;  %v6437_v11 = vpop.f32.mrb[31].mxu1  ;;  %v3916_v17 = vunpack.c.l.bf16 %v4093_v4  ;;  %v3917_v35 = vunpack.c.h.bf16 %v4093_v4 }
 0x2d4   : > { %4230 = vmatprep.mubr.msk.bf16.mxu0 %vm2299_vm8, %v2260_v7  ;;  %4302 = vmatprep.mubr.msk.bf16.mxu1 %vm1615_vm14, %v2260_v7  ;;  %v2632_v7 = vadd.f32 %v3977_v32, %v3913_v39  ;;  %v2662_v0 = vpack.c.bf16 %v2636_v51, %v2635_v14 }
 0x2d5   : > { %v1350_v40 = vpop.permute.xlu1 %1349  ;;  %v2633_v34 = vadd.f32 %v3980_v37, %v3916_v17  ;;  %v2634_v3 = vadd.f32 %v3981_v46, %v3917_v35 }
 0x2d6   : > { %v1845_v44 = vsel %vm1813_vm1, %v1812_v20, %v1350_v40  ;;  %vm7033_vm1 = vmmov %vm7032_vm15  ;;  %v2660_v40 = vpack.c.bf16 %v2632_v7, %v2631_v15 }
 0x2d7   : > { %vm7034_vm7 = vmmov %vm7033_vm1  ;;  %v2661_v38 = vpack.c.bf16 %v2634_v3, %v2633_v34 }
 0x2d9   : > { %v2229_v60 = vpop.permute.xlu1 %2228 }
 0x2da   : > { %v2262_v61 = vsel %vm2230_vm6, %v1845_v44, %v2229_v60  ;;  %vm7036_vm6 = vmmov %vm7033_vm1 }
 0x2db   : > { %4231 = vmatmul.mubr.msk.bf16.gmra.mrb[28].mxu0 %vm2299_vm8, %v2262_v61  ;;  %4303 = vmatmul.mubr.msk.bf16.gmra.mrb[16].mxu1 %vm1615_vm14, %v2262_v61  ;;  %vm7035_vm14 = vmmov %vm7033_vm1 }
 0x2dc   : > { %4236 = vmatprep.mubr.msk.bf16.mxu0 %vm7032_vm15, %v2657_v24  ;;  %vm7037_vm8 = vmmov %vm7033_vm1 }
 0x2e3   : > { %4237 = vmatmul.mubr.msk.bf16.vlgmr.msra.gmra.mrb[32].mxu0 %vm7033_vm1, %v2658_v45 }
 0x2e4   : > { %4240 = vmatprep.mubr.msk.bf16.mxu0 %vm7034_vm7, %v2659_v29 }
 0x2eb   : > { %4241 = vmatmul.mubr.msk.bf16.gmra.mrb[36].mxu0 %vm7035_vm14, %v2660_v40 }
 0x2ec   : > { %4244 = vmatprep.mubr.msk.bf16.mxu0 %vm7036_vm6, %v2661_v38 }
 0x2f3   : > { %4245 = vmatmul.mubr.msk.bf16.gmra.mrb[40].mxu0 %vm7037_vm8, %v2662_v0 }
 0x2fa   : > { %v6462_v9 = vpop.f32.mrb[12].mxu0 }
 0x2fb   : > { %v6464_v12 = vpop.f32.mrb[0].mxu1  ;;  %v6466_v20 = vpop.f32.mrb[13].mxu0 }
 0x2fc   : > { %v6468_v24 = vpop.f32.mrb[1].mxu1  ;;  %v6470_v44 = vpop.f32.mrb[14].mxu0 }
 0x2fd   : > { %v6472_v60 = vpop.f32.mrb[2].mxu1  ;;  %v6474_v61 = vpop.f32.mrb[15].mxu0 }
 0x2fe   : > { %v6476_v54 = vpop.f32.mrb[3].mxu1 }
 0x32a   : > { %v6478_v16 = vpop.f32.mrb[16].mxu0 }
 0x32b   : > { %v6480_v47 = vpop.f32.mrb[4].mxu1  ;;  %v6482_v42 = vpop.f32.mrb[17].mxu0 }
 0x32c   : > { %v6484_v55 = vpop.f32.mrb[5].mxu1  ;;  %v6486_v53 = vpop.f32.mrb[18].mxu0 }
 0x32d   : > { %v6488_v4 = vpop.f32.mrb[6].mxu1  ;;  %v6490_v21 = vpop.f32.mrb[19].mxu0 }
 0x32e   : > { %v6492_v25 = vpop.f32.mrb[7].mxu1 }
 0x35b   : > { %v6494_v39 = vpop.f32.mrb[20].mxu0  ;;  %v6496_v56 = vpop.f32.mrb[8].mxu1 }
 0x35c   : > { %7038 = vst [vmem:[#allocation4_spill] sm:$0xff] %v6494_v39  ;;  %v6498_v32 = vpop.f32.mrb[21].mxu0  ;;  %v6500_v45 = vpop.f32.mrb[9].mxu1 }
 0x35d   : > { %v6502_v29 = vpop.f32.mrb[22].mxu0  ;;  %v6504_v17 = vpop.f32.mrb[10].mxu1 }
 0x35e   : > { %7039 = vst [vmem:[#allocation5_spill] sm:$0xff] %v6502_v29  ;;  %v6506_v35 = vpop.f32.mrb[23].mxu0  ;;  %v3061_v37 = vpop.f32.mrb[11].mxu1 }
 0x35f   : > { %7040 = vst [vmem:[#allocation16_spill] sm:$0xff] %v6506_v35 }
 0x38b   : > { %v6508_v46 = vpop.f32.mrb[24].mxu0  ;;  %v6510_v15 = vpop.f32.mrb[12].mxu1 }
 0x38c   : > { %7041 = vst [vmem:[#allocation17_spill] sm:$0xff] %v6508_v46  ;;  %v6512_v7 = vpop.f32.mrb[25].mxu0  ;;  %v3074_v34 = vpop.f32.mrb[13].mxu1 }
 0x38d   : > { %7042 = vst [vmem:[#allocation27_spill] sm:$0xff] %v6512_v7  ;;  %v6514_v3 = vpop.f32.mrb[26].mxu0  ;;  %v4301_v36 = vpop.f32.mrb[14].mxu1 }
 0x38e   : > { %7043 = vst [vmem:[#allocation25_spill] sm:$0xff] %v6514_v3  ;;  %v6516_v33 = vpop.f32.mrb[27].mxu0  ;;  %v3077_v40 = vpop.f32.mrb[15].mxu1 }
 0x38f   : > { %7044 = vst [vmem:[#allocation29_spill] sm:$0xff] %v6516_v33 }
 0x3ae   : > { %v6518_v13 = vpop.f32.mrb[28].mxu0  ;;  %v4304_v5 = vpop.f32.mrb[16].mxu1 }
 0x3af   : > { %7045 = vst [vmem:[#allocation30_spill] sm:$0xff] %v6518_v13  ;;  %v6520_v30 = vpop.f32.mrb[29].mxu0  ;;  %v3090_v8 = vpop.f32.mrb[17].mxu1 }
 0x3b0   : > { %7046 = vst [vmem:[#allocation33_spill] sm:$0xff] %v6520_v30  ;;  %v6522_v38 = vpop.f32.mrb[30].mxu0  ;;  %v4305_v14 = vpop.f32.mrb[18].mxu1 }
 0x3b1   : > { %7047 = vst [vmem:[#allocation34_spill] sm:$0xff] %v6522_v38  ;;  %v6524_v51 = vpop.f32.mrb[31].mxu0  ;;  %v3093_v0 = vpop.f32.mrb[19].mxu1 }
 0x3b2   : > { %7048 = vst [vmem:[#allocation6_spill] sm:$0xff] %v6524_v51 }
 0x3b6   : > { %v4238_v46 = vpop.f32.mrb[32].mxu0 }
 0x3b7   : > { %v2987_v7 = vadd.f32 %v6289_v2, %v4238_v46  ;;  %v2766_v3 = vpop.f32.mrb[33].mxu0 }
 0x3b8   : > { %v2979_v29 = vadd.f32 %v6298_v28, %v2766_v3  ;;  %v4239_v33 = vpop.f32.mrb[34].mxu0 }
 0x3b9   : > { %v2990_v39 = vadd.f32 %v6308_v43, %v4239_v33  ;;  %v2769_v13 = vpop.f32.mrb[35].mxu0 }
 0x3ba   : > { %v2982_v35 = vadd.f32 %v6316_v52, %v2769_v13  ;;  %3137 = vrot.lane.b32.xlu0 %v2979_v29, %s4455_s16 }
 0x3bc   : > { %3139 = vrot.lane.b32.xlu1 %v2982_v35, %s4455_s16 }
 0x3be   : > { %3141 = vrot.lane.b32.xlu0 %v2987_v7, %s4455_s16  ;;  %v4242_v38 = vpop.f32.mrb[36].mxu0 }
 0x3bf   : > { %v3003_v51 = vadd.f32 %v6347_v41, %v4242_v38  ;;  %v2782_v30 = vpop.f32.mrb[37].mxu0 }
 0x3c0   : > { %v2995_v2 = vadd.f32 %v6351_v22, %v2782_v30  ;;  %3143 = vrot.lane.b32.xlu1 %v2990_v39, %s4455_s16  ;;  %v4243_v28 = vpop.f32.mrb[38].mxu0 }
 0x3c1   : > { %v3006_v43 = vadd.f32 %v6355_v19, %v4243_v28  ;;  %v2785_v46 = vpop.f32.mrb[39].mxu0 }
 0x3c2   : > { %v2998_v52 = vadd.f32 %v6359_v23, %v2785_v46  ;;  %3145 = vrot.lane.b32.xlu0 %v2995_v2, %s4455_s16 }
 0x3c4   : > { %3147 = vrot.lane.b32.xlu1 %v2998_v52, %s4455_s16 }
 0x3c6   : > { %3149 = vrot.lane.b32.xlu0 %v3003_v51, %s4455_s16  ;;  %v4246_v29 = vpop.f32.mrb[40].mxu0  ;;  %v4121_v51 = vld [vmem:[%s6586_s22 + $0x10] sm:$0xff]  }
 0x3c7   : > { %v3019_v41 = vadd.f32 %v6413_v50, %v4246_v29  ;;  %v2798_v35 = vpop.f32.mrb[41].mxu0  ;;  %v6591_v50 = vld [vmem:[%s6821_s6] ss:$0 sm:$0xff]  ;;  %v4122_v29 = vld [vmem:[%s6586_s22 + $0x18] sm:$0xff]  }
 0x3c8   : > { %v3011_v22 = vadd.f32 %v6420_v62, %v2798_v35  ;;  %3151 = vrot.lane.b32.xlu1 %v3006_v43, %s4455_s16  ;;  %v4247_v39 = vpop.f32.mrb[42].mxu0  ;;  %v4036_v35 = vunpack.c.l.bf16 %v4121_v51 }
 0x3c9   : > { %v3022_v19 = vadd.f32 %v6426_v6, %v4247_v39  ;;  %v2801_v7 = vpop.f32.mrb[43].mxu0  ;;  %v6596_v6 = vld [vmem:[%s6822_s7] ss:$0 sm:$0xff]  ;;  %v4037_v39 = vunpack.c.h.bf16 %v4121_v51 }
 0x3ca   : > { %v3014_v23 = vadd.f32 %v6437_v11, %v2801_v7  ;;  %3153 = vrot.lane.b32.xlu0 %v3011_v22, %s4455_s16  ;;  %v4027_v11 = vld [vmem:[%s6586_s22] sm:$0xff]  }
 0x3cc   : > { %3155 = vrot.lane.b32.xlu1 %v3014_v23, %s4455_s16 }
 0x3ce   : > { %3157 = vrot.lane.b32.xlu0 %v3019_v41, %s4455_s16 }
 0x3d0   : > { %3159 = vrot.lane.b32.xlu1 %v3022_v19, %s4455_s16 }
 0x3d2   : > { %3161 = vrot.lane.b32.xlu0 %v6468_v24, %s4455_s16 }
 0x3d4   : > { %3163 = vrot.lane.b32.xlu1 %v6476_v54, %s4455_s16 }
 0x3d6   : > { %3165 = vrot.lane.b32.xlu0 %v6464_v12, %s4455_s16 }
 0x3d8   : > { %3167 = vrot.lane.b32.xlu1 %v6472_v60, %s4455_s16 }
 0x3da   : > { %3169 = vrot.lane.b32.xlu0 %v6484_v55, %s4455_s16 }
 0x3dc   : > { %3171 = vrot.lane.b32.xlu1 %v6492_v25, %s4455_s16  ;;  %v4120_v25 = vld [vmem:[%s6586_s22 + $0x8] sm:$0xff]  }
 0x3de   : > { %3173 = vrot.lane.b32.xlu0 %v6480_v47, %s4455_s16  ;;  %v4028_v47 = vunpack.c.l.bf16 %v4027_v11 }
 0x3e0   : > { %3175 = vrot.lane.b32.xlu1 %v6488_v4, %s4455_s16 }
 0x3e2   : > { %3177 = vrot.lane.b32.xlu0 %v6500_v45, %s4455_s16 }
 0x3e4   : > { %3179 = vrot.lane.b32.xlu1 %v3061_v37, %s4455_s16  ;;  %v4029_v37 = vunpack.c.h.bf16 %v4027_v11 }
 0x3e6   : > { %3181 = vrot.lane.b32.xlu0 %v6496_v56, %s4455_s16 }
 0x3e8   : > { %3183 = vrot.lane.b32.xlu1 %v6504_v17, %s4455_s16 }
 0x3ea   : > { %3185 = vrot.lane.b32.xlu0 %v3074_v34, %s4455_s16 }
 0x3ec   : > { %3187 = vrot.lane.b32.xlu1 %v3077_v40, %s4455_s16 }
 0x3ee   : > { %3189 = vrot.lane.b32.xlu0 %v6510_v15, %s4455_s16 }
 0x3f0   : > { %3191 = vrot.lane.b32.xlu1 %v4301_v36, %s4455_s16 }
 0x3f2   : > { %3193 = vrot.lane.b32.xlu0 %v3090_v8, %s4455_s16 }
 0x3f4   : > { %3195 = vrot.lane.b32.xlu1 %v3093_v0, %s4455_s16 }
 0x3f6   : > { %3197 = vrot.lane.b32.xlu0 %v4304_v5, %s4455_s16 }
 0x3f8   : > { %3199 = vrot.lane.b32.xlu1 %v4305_v14, %s4455_s16 }
 0x42c   : > { %v3138_v62 = vpop.permute.xlu0 %3137 }
 0x42d   : > { %v3233_v12 = vsel %vm1351_vm2, %v6291_v27, %v3138_v62 }
 0x42e   : > { %v3272_v24 = vmul.f32 %v6591_v50, %v3233_v12  ;;  %v3140_v60 = vpop.permute.xlu1 %3139 }
 0x42f   : > { %v3234_v54 = vsel %vm1351_vm2, %v6314_v49, %v3140_v60  ;;  %v4032_v49 = vunpack.c.l.bf16 %v4120_v25 }
 0x430   : > { %v3311_v55 = vadd.f32 %v6596_v6, %v3272_v24  ;;  %v3273_v4 = vmul.f32 %v6591_v50, %v3234_v54  ;;  %v3142_v56 = vpop.permute.xlu0 %3141  ;;  %v4040_v24 = vunpack.c.l.bf16 %v4122_v29 }
 0x431   : > { %v3235_v45 = vsel %vm1351_vm2, %v6282_v57, %v3142_v56  ;;  %v4033_v57 = vunpack.c.h.bf16 %v4120_v25 }
 0x432   : > { %v3343_v17 = vmax.f32 %v3311_v55, 0.0  ;;  %v3312_v27 = vadd.f32 %v6596_v6, %v3273_v4  ;;  %v3274_v15 = vmul.f32 %v6591_v50, %v3235_v45  ;;  %v3144_v34 = vpop.permute.xlu1 %3143  ;;  %v4123_v4 = vld [vmem:[%s6586_s22 + $0x20] sm:$0xff]   ;;  %v4041_v45 = vunpack.c.h.bf16 %v4122_v29  ;;  %v4125_v29 = vld [vmem:[%s6586_s22 + $0x30] sm:$0xff]  }
 0x433   : > { %v3236_v3 = vsel %vm1351_vm2, %v6306_v18, %v3144_v34 }
 0x434   : > { %v3439_v36 = vadd.f32 %v4028_v47, %v3343_v17  ;;  %v3344_v33 = vmax.f32 %v3312_v27, 0.0  ;;  %v3313_v40 = vadd.f32 %v6596_v6, %v3274_v15  ;;  %v3275_v13 = vmul.f32 %v6591_v50, %v3236_v3  ;;  %v3146_v5 = vpop.permute.xlu0 %3145 }
 0x435   : > { %v3237_v30 = vsel %vm1351_vm2, %v6349_v59, %v3146_v5  ;;  %v4044_v3 = vunpack.c.l.bf16 %v4123_v4  ;;  %v4124_v5 = vld [vmem:[%s6586_s22 + $0x28] sm:$0xff]  }
 0x436   : > { %v3866_v18 = vpack.c.bf16 %v3439_v36, %v3439_v36  ;;  %v3440_v8 = vadd.f32 %v4029_v37, %v3344_v33  ;;  %v3345_v38 = vmax.f32 %v3313_v40, 0.0  ;;  %v3314_v14 = vadd.f32 %v6596_v6, %v3275_v13  ;;  %v3148_v0 = vpop.permute.xlu1 %3147 }
 0x437   : > { %v3276_v2 = vmul.f32 %v6591_v50, %v3237_v30  ;;  %v3238_v28 = vsel %vm1351_vm2, %v6357_v58, %v3148_v0  ;;  %v4045_v0 = vunpack.c.h.bf16 %v4123_v4 }
 0x438   : > { %3600 = vst.msk [vmem:[%s6619_s18] sm:$0xf] %vm3599_vm9, %v3866_v18  ;;  %v3867_v43 = vpack.c.bf16 %v3440_v8, %v3440_v8  ;;  %v3441_v46 = vadd.f32 %v4032_v49, %v3345_v38  ;;  %v3346_v52 = vmax.f32 %v3314_v14, 0.0  ;;  %v3277_v59 = vmul.f32 %v6591_v50, %v3238_v28  ;;  %v3150_v41 = vpop.permute.xlu0 %3149 }
 0x439   : > { %v3315_v22 = vadd.f32 %v6596_v6, %v3276_v2  ;;  %v3239_v19 = vsel %vm1351_vm2, %v6345_v31, %v3150_v41  ;;  %v4048_v28 = vunpack.c.l.bf16 %v4124_v5 }
 0x43a   : > { %3601 = vst.msk [vmem:[%s6619_s18 + $0x4] sm:$0xf] %vm3599_vm9, %v3867_v43  ;;  %v3868_v58 = vpack.c.bf16 %v3441_v46, %v3441_v46  ;;  %v3442_v7 = vadd.f32 %v4033_v57, %v3346_v52  ;;  %v3316_v23 = vadd.f32 %v6596_v6, %v3277_v59  ;;  %v3278_v62 = vmul.f32 %v6591_v50, %v3239_v19  ;;  %v3152_v11 = vpop.permute.xlu1 %3151 }
 0x43b   : > { %v3347_v12 = vmax.f32 %v3315_v22, 0.0  ;;  %v3240_v60 = vsel %vm1351_vm2, %v6353_v1, %v3152_v11  ;;  %v4049_v22 = vunpack.c.h.bf16 %v4124_v5  ;;  %v4052_v11 = vunpack.c.l.bf16 %v4125_v29 }
 0x43c   : > { %3602 = vst.msk [vmem:[%s6619_s18 + $0x8] sm:$0xf] %vm3599_vm9, %v3868_v58  ;;  %v3869_v54 = vpack.c.bf16 %v3442_v7, %v3442_v7  ;;  %v3348_v47 = vmax.f32 %v3316_v23, 0.0  ;;  %v3317_v31 = vadd.f32 %v6596_v6, %v3278_v62  ;;  %v3279_v55 = vmul.f32 %v6591_v50, %v3240_v60  ;;  %v3154_v25 = vpop.permute.xlu0 %3153 }
 0x43d   : > { %v3443_v56 = vadd.f32 %v4036_v35, %v3347_v12  ;;  %v3241_v17 = vsel %vm1351_vm2, %v6415_v48, %v3154_v25 }
 0x43e   : > { %3603 = vst.msk [vmem:[%s6619_s18 + $0xc] sm:$0xf] %vm3599_vm9, %v3869_v54  ;;  %v3444_v1 = vadd.f32 %v4037_v39, %v3348_v47  ;;  %v3349_v37 = vmax.f32 %v3317_v31, 0.0  ;;  %v3318_v27 = vadd.f32 %v6596_v6, %v3279_v55  ;;  %v3280_v15 = vmul.f32 %v6591_v50, %v3241_v17  ;;  %v3156_v34 = vpop.permute.xlu1 %3155  ;;  %v4126_v17 = vld [vmem:[%s6586_s22 + $0x38] sm:$0xff]  }
 0x43f   : > { %v3870_v49 = vpack.c.bf16 %v3443_v56, %v3443_v56  ;;  %v3242_v36 = vsel %vm1351_vm2, %v6431_v26, %v3156_v34  ;;  %v4053_v55 = vunpack.c.h.bf16 %v4125_v29 }
 0x440   : > { %v3871_v33 = vpack.c.bf16 %v3444_v1, %v3444_v1  ;;  %v3445_v40 = vadd.f32 %v4040_v24, %v3349_v37  ;;  %v3350_v13 = vmax.f32 %v3318_v27, 0.0  ;;  %v3319_v48 = vadd.f32 %v6596_v6, %v3280_v15  ;;  %v3158_v57 = vpop.permute.xlu0 %3157 }
 0x441   : > { %3604 = vst.msk [vmem:[%s6619_s18 + $0x10] sm:$0xf] %vm3599_vm9, %v3870_v49  ;;  %v3281_v30 = vmul.f32 %v6591_v50, %v3242_v36  ;;  %v3243_v18 = vsel %vm1351_vm2, %v6408_v10, %v3158_v57 }
 0x442   : > { %3605 = vst.msk [vmem:[%s6619_s18 + $0x14] sm:$0xf] %vm3599_vm9, %v3871_v33  ;;  %v3872_v8 = vpack.c.bf16 %v3445_v40, %v3445_v40  ;;  %v3446_v26 = vadd.f32 %v4041_v45, %v3350_v13  ;;  %v3351_v38 = vmax.f32 %v3319_v48, 0.0  ;;  %v3282_v14 = vmul.f32 %v6591_v50, %v3243_v18  ;;  %v3160_v51 = vpop.permute.xlu1 %3159 }
 0x443   : > { %v3320_v2 = vadd.f32 %v6596_v6, %v3281_v30  ;;  %v3244_v43 = vsel %vm1351_vm2, %v6424_v63, %v3160_v51  ;;  %v4056_v33 = vunpack.c.l.bf16 %v4126_v17  ;;  %v4057_v13 = vunpack.c.h.bf16 %v4126_v17 }
 0x444   : > { %3606 = vst.msk [vmem:[%s6619_s18 + $0x18] sm:$0xf] %vm3599_vm9, %v3872_v8  ;;  %v3873_v10 = vpack.c.bf16 %v3446_v26, %v3446_v26  ;;  %v3447_v46 = vadd.f32 %v4044_v3, %v3351_v38  ;;  %v3321_v52 = vadd.f32 %v6596_v6, %v3282_v14  ;;  %v3283_v59 = vmul.f32 %v6591_v50, %v3244_v43  ;;  %v3162_v41 = vpop.permute.xlu0 %3161  ;;  %v4127_v3 = vld [vmem:[%s6586_s22 + $0x40] sm:$0xff]  }
 0x445   : > { %v3352_v35 = vmax.f32 %v3320_v2, 0.0  ;;  %v3245_v39 = vsel %vm1351_vm2, %v6466_v20, %v3162_v41  ;;  %v4060_v26 = vunpack.c.l.bf16 %v4127_v3  ;;  %v4128_v2 = vld [vmem:[%s6586_s22 + $0x48] sm:$0xff]  }
 0x446   : > { %3607 = vst.msk [vmem:[%s6619_s18 + $0x1c] sm:$0xf] %vm3599_vm9, %v3873_v10  ;;  %v3874_v19 = vpack.c.bf16 %v3447_v46, %v3447_v46  ;;  %v3353_v63 = vmax.f32 %v3321_v52, 0.0  ;;  %v3322_v58 = vadd.f32 %v6596_v6, %v3283_v59  ;;  %v3284_v7 = vmul.f32 %v6591_v50, %v3245_v39  ;;  %v3164_v23 = vpop.permute.xlu1 %3163 }
 0x447   : > { %v3448_v62 = vadd.f32 %v4045_v0, %v3352_v35  ;;  %v3246_v12 = vsel %vm1351_vm2, %v6474_v61, %v3164_v23  ;;  %v4061_v10 = vunpack.c.h.bf16 %v4127_v3 }
 0x448   : > { %3608 = vst.msk [vmem:[%s6619_s18 + $0x20] sm:$0xf] %vm3599_vm9, %v3874_v19  ;;  %v3449_v24 = vadd.f32 %v4048_v28, %v3353_v63  ;;  %v3354_v20 = vmax.f32 %v3322_v58, 0.0  ;;  %v3323_v60 = vadd.f32 %v6596_v6, %v3284_v7  ;;  %v3285_v54 = vmul.f32 %v6591_v50, %v3246_v12  ;;  %v3166_v47 = vpop.permute.xlu0 %3165  ;;  %v4129_v7 = vld [vmem:[%s6586_s22 + $0x50] sm:$0xff]  }
 0x449   : > { %v3875_v31 = vpack.c.bf16 %v3448_v62, %v3448_v62  ;;  %v3247_v4 = vsel %vm1351_vm2, %v6462_v9, %v3166_v47 }
 0x44a   : > { %v3876_v25 = vpack.c.bf16 %v3449_v24, %v3449_v24  ;;  %v3450_v56 = vadd.f32 %v4049_v22, %v3354_v20  ;;  %v3355_v61 = vmax.f32 %v3323_v60, 0.0  ;;  %v3324_v45 = vadd.f32 %v6596_v6, %v3285_v54  ;;  %v3168_v1 = vpop.permute.xlu1 %3167 }
 0x44b   : > { %3609 = vst.msk [vmem:[%s6619_s18 + $0x24] sm:$0xf] %vm3599_vm9, %v3875_v31  ;;  %v3286_v37 = vmul.f32 %v6591_v50, %v3247_v4  ;;  %v3248_v27 = vsel %vm1351_vm2, %v6470_v44, %v3168_v1  ;;  %v4064_v22 = vunpack.c.l.bf16 %v4128_v2  ;;  %v4065_v54 = vunpack.c.h.bf16 %v4128_v2 }
 0x44c   : > { %3610 = vst.msk [vmem:[%s6619_s18 + $0x28] sm:$0xf] %vm3599_vm9, %v3876_v25  ;;  %v3877_v15 = vpack.c.bf16 %v3450_v56, %v3450_v56  ;;  %v3451_v34 = vadd.f32 %v4052_v11, %v3355_v61  ;;  %v3356_v9 = vmax.f32 %v3324_v45, 0.0  ;;  %v3287_v49 = vmul.f32 %v6591_v50, %v3248_v27  ;;  %v3170_v36 = vpop.permute.xlu0 %3169  ;;  %v4130_v45 = vld [vmem:[%s6586_s22 + $0x58] sm:$0xff]   ;;  %v7050_v27 = vld [vmem:[#allocation4_spill] sm:$0xff] }
 0x44d   : > { %v3325_v40 = vadd.f32 %v6596_v6, %v3286_v37  ;;  %v3249_v48 = vsel %vm1351_vm2, %v6482_v42, %v3170_v36  ;;  %v4068_v31 = vunpack.c.l.bf16 %v4129_v7  ;;  %v4069_v37 = vunpack.c.h.bf16 %v4129_v7 }
 0x44e   : > { %3611 = vst.msk [vmem:[%s6619_s18 + $0x2c] sm:$0xf] %vm3599_vm9, %v3877_v15  ;;  %v3878_v44 = vpack.c.bf16 %v3451_v34, %v3451_v34  ;;  %v3452_v5 = vadd.f32 %v4053_v55, %v3356_v9  ;;  %v3326_v57 = vadd.f32 %v6596_v6, %v3287_v49  ;;  %v3288_v30 = vmul.f32 %v6591_v50, %v3249_v48  ;;  %v3172_v18 = vpop.permute.xlu1 %3171  ;;  %v7049_v55 = vld [vmem:[#allocation16_spill] sm:$0xff] }
 0x44f   : > { %v3357_v8 = vmax.f32 %v3325_v40, 0.0  ;;  %v3250_v38 = vsel %vm1351_vm2, %v6490_v21, %v3172_v18  ;;  %v4072_v40 = vunpack.c.l.bf16 %v4130_v45 }
 0x450   : > { %3612 = vst.msk [vmem:[%s6619_s18 + $0x30] sm:$0xf] %vm3599_vm9, %v3878_v44  ;;  %v3879_v14 = vpack.c.bf16 %v3452_v5, %v3452_v5  ;;  %v3358_v51 = vmax.f32 %v3326_v57, 0.0  ;;  %v3327_v42 = vadd.f32 %v6596_v6, %v3288_v30  ;;  %v3289_v0 = vmul.f32 %v6591_v50, %v3250_v38  ;;  %v3174_v28 = vpop.permute.xlu0 %3173  ;;  %v7052_v38 = vld [vmem:[#allocation27_spill] sm:$0xff] }
 0x451   : > { %v3453_v43 = vadd.f32 %v4056_v33, %v3357_v8  ;;  %v3251_v46 = vsel %vm1351_vm2, %v6478_v16, %v3174_v28  ;;  %v4131_v28 = vld [vmem:[%s6586_s22 + $0x60] sm:$0xff]  }
 0x452   : > { %3613 = vst.msk [vmem:[%s6619_s18 + $0x34] sm:$0xf] %vm3599_vm9, %v3879_v14  ;;  %v3454_v21 = vadd.f32 %v4057_v13, %v3358_v51  ;;  %v3359_v52 = vmax.f32 %v3327_v42, 0.0  ;;  %v3328_v59 = vadd.f32 %v6596_v6, %v3289_v0  ;;  %v3290_v29 = vmul.f32 %v6591_v50, %v3251_v46  ;;  %v3176_v41 = vpop.permute.xlu1 %3175  ;;  %v7051_v13 = vld [vmem:[#allocation5_spill] sm:$0xff] }
 0x453   : > { %v3880_v35 = vpack.c.bf16 %v3453_v43, %v3453_v43  ;;  %v3252_v39 = vsel %vm1351_vm2, %v6486_v53, %v3176_v41  ;;  %v7053_v46 = vld [vmem:[#allocation29_spill] sm:$0xff] }
 0x454   : > { %v3881_v19 = vpack.c.bf16 %v3454_v21, %v3454_v21  ;;  %v3455_v63 = vadd.f32 %v4060_v26, %v3359_v52  ;;  %v3360_v58 = vmax.f32 %v3328_v59, 0.0  ;;  %v3329_v16 = vadd.f32 %v6596_v6, %v3290_v29  ;;  %v3178_v23 = vpop.permute.xlu0 %3177 }
 0x455   : > { %3614 = vst.msk [vmem:[%s6619_s18 + $0x38] sm:$0xf] %vm3599_vm9, %v3880_v35  ;;  %v3291_v62 = vmul.f32 %v6591_v50, %v3252_v39  ;;  %v3253_v11 = vsel %vm1351_vm2, %v6498_v32, %v3178_v23  ;;  %v4073_v26 = vunpack.c.h.bf16 %v4130_v45  ;;  %v4132_v35 = vld [vmem:[%s6586_s22 + $0x68] sm:$0xff]   ;;  %v4076_v39 = vunpack.c.l.bf16 %v4131_v28 }
 0x456   : > { %3615 = vst.msk [vmem:[%s6619_s18 + $0x3c] sm:$0xf] %vm3599_vm9, %v3881_v19  ;;  %v3882_v12 = vpack.c.bf16 %v3455_v63, %v3455_v63  ;;  %v3456_v53 = vadd.f32 %v4061_v10, %v3360_v58  ;;  %v3361_v24 = vmax.f32 %v3329_v16, 0.0  ;;  %v3292_v20 = vmul.f32 %v6591_v50, %v3253_v11  ;;  %v3180_v60 = vpop.permute.xlu1 %3179  ;;  %v7054_v58 = vld [vmem:[#allocation17_spill] sm:$0xff] }
 0x457   : > { %v3330_v47 = vadd.f32 %v6596_v6, %v3291_v62  ;;  %v3254_v4 = vsel %vm1351_vm2, %v7049_v55, %v3180_v60  ;;  %v4077_v63 = vunpack.c.h.bf16 %v4131_v28 }
 0x458   : > { %3616 = vst.msk [vmem:[%s6619_s18 + $0x40] sm:$0xf] %vm3599_vm9, %v3882_v12  ;;  %v3883_v32 = vpack.c.bf16 %v3456_v53, %v3456_v53  ;;  %v3457_v25 = vadd.f32 %v4064_v22, %v3361_v24  ;;  %v3331_v56 = vadd.f32 %v6596_v6, %v3292_v20  ;;  %v3293_v61 = vmul.f32 %v6591_v50, %v3254_v4  ;;  %v3182_v17 = vpop.permute.xlu0 %3181  ;;  %v7055_v20 = vld [vmem:[#allocation25_spill] sm:$0xff]  ;;  %v4133_v4 = vld [vmem:[%s6586_s22 + $0x70] sm:$0xff]  }
 0x459   : > { %v3362_v1 = vmax.f32 %v3330_v47, 0.0  ;;  %v3255_v15 = vsel %vm1351_vm2, %v7050_v27, %v3182_v17  ;;  %v4080_v24 = vunpack.c.l.bf16 %v4132_v35 }
 0x45a   : > { %3617 = vst.msk [vmem:[%s6619_s18 + $0x44] sm:$0xf] %vm3599_vm9, %v3883_v32  ;;  %v3884_v34 = vpack.c.bf16 %v3457_v25, %v3457_v25  ;;  %v3363_v9 = vmax.f32 %v3331_v56, 0.0  ;;  %v3332_v49 = vadd.f32 %v6596_v6, %v3293_v61  ;;  %v3294_v3 = vmul.f32 %v6591_v50, %v3255_v15  ;;  %v3184_v36 = vpop.permute.xlu1 %3183  ;;  %v7056_v61 = vld [vmem:[#allocation33_spill] sm:$0xff] }
 0x45b   : > { %v3458_v33 = vadd.f32 %v4065_v54, %v3362_v1  ;;  %v3256_v48 = vsel %vm1351_vm2, %v7051_v13, %v3184_v36  ;;  %v4081_v56 = vunpack.c.h.bf16 %v4132_v35 }
 0x45c   : > { %3618 = vst.msk [vmem:[%s6619_s18 + $0x48] sm:$0xf] %vm3599_vm9, %v3884_v34  ;;  %v3459_v44 = vadd.f32 %v4068_v31, %v3363_v9  ;;  %v3364_v5 = vmax.f32 %v3332_v49, 0.0  ;;  %v3333_v57 = vadd.f32 %v6596_v6, %v3294_v3  ;;  %v3295_v30 = vmul.f32 %v6591_v50, %v3256_v48  ;;  %v3186_v18 = vpop.permute.xlu0 %3185  ;;  %v7057_v49 = vld [vmem:[#allocation6_spill] sm:$0xff]  ;;  %v4134_v48 = vld [vmem:[%s6586_s22 + $0x78] sm:$0xff]  }
 0x45d   : > { %v3885_v8 = vpack.c.bf16 %v3458_v33, %v3458_v33  ;;  %v3257_v14 = vsel %vm1351_vm2, %v7052_v38, %v3186_v18  ;;  %v4084_v9 = vunpack.c.l.bf16 %v4133_v4 }
 0x45e   : > { %v3886_v51 = vpack.c.bf16 %v3459_v44, %v3459_v44  ;;  %v3460_v42 = vadd.f32 %v4069_v37, %v3364_v5  ;;  %v3365_v0 = vmax.f32 %v3333_v57, 0.0  ;;  %v3334_v2 = vadd.f32 %v6596_v6, %v3295_v30  ;;  %v3188_v43 = vpop.permute.xlu1 %3187  ;;  %v7058_v57 = vld [vmem:[#allocation30_spill] sm:$0xff] }
 0x45f   : > { %3619 = vst.msk [vmem:[%s6619_s18 + $0x4c] sm:$0xf] %vm3599_vm9, %v3885_v8  ;;  %v3296_v10 = vmul.f32 %v6591_v50, %v3257_v14  ;;  %v3258_v21 = vsel %vm1351_vm2, %v7053_v46, %v3188_v43 }
 0x460   : > { %3620 = vst.msk [vmem:[%s6619_s18 + $0x50] sm:$0xf] %vm3599_vm9, %v3886_v51  ;;  %v3887_v52 = vpack.c.bf16 %v3460_v42, %v3460_v42  ;;  %v3461_v59 = vadd.f32 %v4072_v40, %v3365_v0  ;;  %v3366_v29 = vmax.f32 %v3334_v2, 0.0  ;;  %v3297_v41 = vmul.f32 %v6591_v50, %v3258_v21  ;;  %v3190_v22 = vpop.permute.xlu0 %3189  ;;  %v7059_v2 = vld [vmem:[#allocation34_spill] sm:$0xff] }
 0x461   : > { %v3335_v19 = vadd.f32 %v6596_v6, %v3296_v10  ;;  %v3259_v16 = vsel %vm1351_vm2, %v7054_v58, %v3190_v22  ;;  %v4085_v51 = vunpack.c.h.bf16 %v4133_v4  ;;  %v4088_v0 = vunpack.c.l.bf16 %v4134_v48 }
 0x462   : > { %3621 = vst.msk [vmem:[%s6619_s18 + $0x54] sm:$0xf] %vm3599_vm9, %v3887_v52  ;;  %v3888_v7 = vpack.c.bf16 %v3461_v59, %v3461_v59  ;;  %v3462_v23 = vadd.f32 %v4073_v26, %v3366_v29  ;;  %v3336_v62 = vadd.f32 %v6596_v6, %v3297_v41  ;;  %v3298_v11 = vmul.f32 %v6591_v50, %v3259_v16  ;;  %v3192_v12 = vpop.permute.xlu1 %3191 }
 0x463   : > { %v3367_v53 = vmax.f32 %v3335_v19, 0.0  ;;  %v3260_v60 = vsel %vm1351_vm2, %v7055_v20, %v3192_v12  ;;  %v4089_v41 = vunpack.c.h.bf16 %v4134_v48 }
 0x464   : > { %3622 = vst.msk [vmem:[%s6619_s18 + $0x58] sm:$0xf] %vm3599_vm9, %v3888_v7  ;;  %v3889_v54 = vpack.c.bf16 %v3462_v23, %v3462_v23  ;;  %v3368_v47 = vmax.f32 %v3336_v62, 0.0  ;;  %v3337_v31 = vadd.f32 %v6596_v6, %v3298_v11  ;;  %v3299_v55 = vmul.f32 %v6591_v50, %v3260_v60  ;;  %v3194_v32 = vpop.permute.xlu0 %3193 }
 0x465   : > { %v3463_v25 = vadd.f32 %v4076_v39, %v3367_v53  ;;  %v3261_v45 = vsel %vm1351_vm2, %v7056_v61, %v3194_v32 }
 0x466   : > { %3623 = vst.msk [vmem:[%s6619_s18 + $0x5c] sm:$0xf] %vm3599_vm9, %v3889_v54  ;;  %v3464_v17 = vadd.f32 %v4077_v63, %v3368_v47  ;;  %v3369_v1 = vmax.f32 %v3337_v31, 0.0  ;;  %v3338_v37 = vadd.f32 %v6596_v6, %v3299_v55  ;;  %v3300_v27 = vmul.f32 %v6591_v50, %v3261_v45  ;;  %v3196_v15 = vpop.permute.xlu1 %3195 }
 0x467   : > { %v3890_v34 = vpack.c.bf16 %v3463_v25, %v3463_v25  ;;  %v3262_v3 = vsel %vm1351_vm2, %v7057_v49, %v3196_v15 }
 0x468   : > { %v3891_v36 = vpack.c.bf16 %v3464_v17, %v3464_v17  ;;  %v3465_v33 = vadd.f32 %v4080_v24, %v3369_v1  ;;  %v3370_v40 = vmax.f32 %v3338_v37, 0.0  ;;  %v3339_v13 = vadd.f32 %v6596_v6, %v3300_v27  ;;  %v3198_v44 = vpop.permute.xlu0 %3197 }
 0x469   : > { %3624 = vst.msk [vmem:[%s6619_s18 + $0x60] sm:$0xf] %vm3599_vm9, %v3890_v34  ;;  %v3301_v5 = vmul.f32 %v6591_v50, %v3262_v3  ;;  %v3263_v30 = vsel %vm1351_vm2, %v7058_v57, %v3198_v44 }
 0x46a   : > { %3625 = vst.msk [vmem:[%s6619_s18 + $0x64] sm:$0xf] %vm3599_vm9, %v3891_v36  ;;  %v3892_v18 = vpack.c.bf16 %v3465_v33, %v3465_v33  ;;  %v3466_v8 = vadd.f32 %v4081_v56, %v3370_v40  ;;  %v3371_v26 = vmax.f32 %v3339_v13, 0.0  ;;  %v3302_v38 = vmul.f32 %v6591_v50, %v3263_v30  ;;  %v3200_v14 = vpop.permute.xlu1 %3199 }
 0x46b   : > { %v3340_v42 = vadd.f32 %v6596_v6, %v3301_v5  ;;  %v3264_v28 = vsel %vm1351_vm2, %v7059_v2, %v3200_v14 }
 0x46c   : > { %3626 = vst.msk [vmem:[%s6619_s18 + $0x68] sm:$0xf] %vm3599_vm9, %v3892_v18  ;;  %v3893_v43 = vpack.c.bf16 %v3466_v8, %v3466_v8  ;;  %v3467_v10 = vadd.f32 %v4084_v9, %v3371_v26  ;;  %v3341_v46 = vadd.f32 %v6596_v6, %v3302_v38  ;;  %v3303_v21 = vmul.f32 %v6591_v50, %v3264_v28 }
 0x46d   : > { %v3372_v52 = vmax.f32 %v3340_v42, 0.0 }
 0x46e   : > { %3627 = vst.msk [vmem:[%s6619_s18 + $0x6c] sm:$0xf] %vm3599_vm9, %v3893_v43  ;;  %v3894_v59 = vpack.c.bf16 %v3467_v10, %v3467_v10  ;;  %v3373_v29 = vmax.f32 %v3341_v46, 0.0  ;;  %v3342_v35 = vadd.f32 %v6596_v6, %v3303_v21 }
 0x46f   : > { %v3468_v22 = vadd.f32 %v4085_v51, %v3372_v52 }
 0x470   : > { %3628 = vst.msk [vmem:[%s6619_s18 + $0x70] sm:$0xf] %vm3599_vm9, %v3894_v59  ;;  %v3469_v39 = vadd.f32 %v4088_v0, %v3373_v29  ;;  %v3374_v19 = vmax.f32 %v3342_v35, 0.0 }
 0x471   : > { %v3895_v63 = vpack.c.bf16 %v3468_v22, %v3468_v22 }
 0x472   : > { %v3896_v58 = vpack.c.bf16 %v3469_v39, %v3469_v39  ;;  %v3470_v16 = vadd.f32 %v4089_v41, %v3374_v19 }
 0x473   : > { %3629 = vst.msk [vmem:[%s6619_s18 + $0x74] sm:$0xf] %vm3599_vm9, %v3895_v63 }
 0x474   : > { %3630 = vst.msk [vmem:[%s6619_s18 + $0x78] sm:$0xf] %vm3599_vm9, %v3896_v58  ;;  %v3897_v50 = vpack.c.bf16 %v3470_v16, %v3470_v16 }
 0x476   : > { %3631 = vst.msk [vmem:[%s6619_s18 + $0x7c] sm:$0xf] %vm3599_vm9, %v3897_v50 }
 0x477 PF: > { %s19_s30 = sadd.s32 1, %s4453_s30  }
 0x478   : > { %p16_p5 = scmp.ge.s32.totalorder %s19_s30, 4  }
 0x47a   :  { %18 = sbr.rel (!%p16_p5) target bundleno = 1 (0x1), region = 95 }

// kernel: my_ffc_resblock.20
= control target key start
LH: loop header
LB: loop body
LE: loop exit
PB: predicated region body
PF: predicated region fallthrough
CT: control target
= control target key end

     0   :  { %s4278_s27 = smov 0   ;;  %s6547_s0 = inlined_call_operand.vmem [shape: bf16[2,18,18,8], index: 0, kind: input, shape index: {}]   ;;  %s6548_s1 = inlined_call_operand.vmem [shape: bf16[512,2], index: 1, kind: input, shape index: {}]   ;;  %s6549_s2 = inlined_call_operand.vmem [shape: bf16[512,2], index: 2, kind: input, shape index: {}]   ;;  %s6550_s3 = inlined_call_operand.vmem [shape: bf16[72,4], index: 3, kind: input, shape index: {}]   ;;  %s6551_s4 = inlined_call_operand.vmem [shape: bf16[36,4], index: 4, kind: input, shape index: {}]   ;;  %s6552_s5 = inlined_call_operand.vmem [shape: bf16[2,4], index: 5, kind: input, shape index: {}]   ;;  %s6553_s6 = inlined_call_operand.vmem [shape: f32[1,8], index: 6, kind: input, shape index: {}]   ;;  %s6554_s7 = inlined_call_operand.vmem [shape: f32[1,8], index: 7, kind: input, shape index: {}]   ;;  %s6555_s8 = inlined_call_operand.vmem [shape: bf16[512,8], index: 8, kind: output, shape index: {}]  }
   0x1 LB: > { %s4284_s28 = sadd.s32 4294967295, %s4215_s27   ;;  %p3571_p0 = scmp.ge.s32.totalorder %s4215_s27, 1  ;;  %s4215_s27 = sphi %s4278_s27, %s18_s27  }
   0x2   : > { %p284_p1 = scmp.lt.s32.totalorder %s4215_s27, 3 }
   0x4   : > { %p285_p2 = pnand %p3571_p0, %p284_p1 }
   0x6   : > { %288 = sbr.rel (%p285_p2) target bundleno = 1139 (0x473), region = 52 }
   0xd   : > { %p328_p3 = scmp.lt.s32.totalorder %s4284_s28, 1  ;;  %vm6602_vm0 = vsmask.f32 7424  ;;  %s4217_s12 = smov 4   ;;  %vm6599_vm1 = vcmask 1046528   ;;  %vm1302_vm2 = vcmask 31744  }
   0xe   : > { %s4218_s13 = smov 8   ;;  %s4219_s14 = smov 12   ;;  %vm1335_vm3 = vcmask 64512   ;;  %vm1368_vm4 = vcmask 97280   ;;  %vm1401_vm5 = vcmask 130048   ;;  %vm2679_vm6 = vcmask 1040384  }
   0xf   : > { %s329_s29 = scalar_select %p328_p3, %s4284_s28, 1  ;;  %vm6598_vm7 = vcmask 15360   ;;  %vm2283_vm8 = vcmask 1043456   ;;  %vm2891_vm9 = vcmask 1041408   ;;  %vm6600_vm10 = vcmask 162816  }
  0x10   : > { %s4220_s15 = smov 16   ;;  %s4221_s16 = smov 20   ;;  %vm6601_vm11 = vcmask 195584   ;;  %vm1500_vm12 = vcmask 228352   ;;  %vm1533_vm13 = vcmask 261120   ;;  %vm1566_vm14 = vcmask 293888  }
  0x11   : > { %s4106_s30 = smul.u32 216, %s329_s29  ;;  %s4222_s17 = smov 124   ;;  %vm1599_vm15 = vcmask 326656  }
  0x12   : > { %s4223_s18 = smov 24   ;;  %s3573_s19 = sshll.u32 %s4284_s28, 5 }
  0x13   : > { %s4293_s11 = scalar_lea.vmem %s6547_s0, %s4106_s30  ;;  %p334_p4 = scmp.lt.s32.totalorder %s3573_s19, 63 }
  0x14   : > { %v4296_v0 = vld [vmem:[%s4293_s11 + $0x18] sm:$0xff]   ;;  %v4299_v1 = vld [vmem:[%s4293_s11 + $0x20] ss:$0 sps:$4 sm:$0x11]   ;;  %v4314_v12 = vld [vmem:[%s4293_s11 + $0x24] sm:$0xff]   ;;  %s4224_s20 = smov 28  }
  0x15   : > { %v4302_v2 = vld [vmem:[%s4293_s11] sm:$0xff]   ;;  %v560_v3 = vshrl.u32 %v4296_v0, 16  ;;  %v562_v4 = vshll.u32 %v4296_v0, 16  ;;  %v567_v5 = vshll.u32 %v4299_v1, 16  ;;  %v572_v17 = vshrl.u32 %v4314_v12, 16  ;;  %v4322_v19 = vld [vmem:[%s4293_s11 + $0xc] sm:$0xff]  }
  0x16   : > { %6604 = vst [vmem:[#allocation2_spill] sm:$0xff] %v4302_v2  ;;  %v4308_v6 = vld [vmem:[%s4293_s11 + $0x8] ss:$0 sps:$4 sm:$0x11]   ;;  %v536_v7 = vshrl.u32 %v4302_v2, 16  ;;  %v538_v8 = vshll.u32 %v4302_v2, 16 }
  0x17   : > { %v564_v9 = vrot.slane %v562_v4, 1  ;;  %v569_v10 = vrot.slane %v567_v5, 1  ;;  %v543_v11 = vshll.u32 %v4308_v6, 16  ;;  %v4317_v14 = vld [vmem:[%s4293_s11 + $0x2c] ss:$0 sps:$4 sm:$0x11]  }
  0x18   : > { %v540_v13 = vrot.slane %v538_v8, 1  ;;  %v574_v18 = vshll.u32 %v4314_v12, 16  ;;  %v579_v21 = vshll.u32 %v4317_v14, 16  ;;  %v4326_v22 = vld [vmem:[%s4293_s11 + $0x14] ss:$0 sps:$4 sm:$0x11]  }
  0x19   : > { %v565_v15 = vor.u32 %v564_v9, %v560_v3  ;;  %v545_v16 = vrot.slane %v543_v11, 1  ;;  %v548_v25 = vshrl.u32 %v4322_v19, 16  ;;  %v550_v26 = vshll.u32 %v4322_v19, 16  ;;  %v4334_v27 = vld [vmem:[%s4293_s11 + $0x3c] sm:$0xff]   ;;  %v4350_v37 = vld [vmem:[%s4293_s11 + $0x30] sm:$0xff]   ;;  %v4370_v49 = vld [vmem:[%s4293_s11 + $0x48] sm:$0xff]  }
  0x1a   : > { %v541_v20 = vor.u32 %v540_v13, %v536_v7  ;;  %v576_v24 = vrot.slane %v574_v18, 1  ;;  %v581_v29 = vrot.slane %v579_v21, 1  ;;  %v555_v30 = vshll.u32 %v4326_v22, 16  ;;  %v4345_v33 = vld [vmem:[%s4293_s11 + $0x44] ss:$0 sps:$4 sm:$0x11]  }
  0x1b   : > { %v4329_v23 = vsel %vm6602_vm0, %v565_v15, %v569_v10  ;;  %v552_v32 = vrot.slane %v550_v26, 1  ;;  %v596_v34 = vshrl.u32 %v4334_v27, 16  ;;  %v598_v35 = vshll.u32 %v4334_v27, 16  ;;  %v4359_v42 = vld [vmem:[%s4293_s11 + $0x38] ss:$0 sps:$4 sm:$0x11]  }
  0x1c   : > { %731 = vrot.lane.b32.xlu1 %v4329_v23, %s4217_s12  ;;  %v4339_v28 = vsel %vm6602_vm0, %v541_v20, %v545_v16  ;;  %v577_v31 = vor.u32 %v576_v24, %v572_v17  ;;  %v557_v36 = vrot.slane %v555_v30, 1  ;;  %v603_v41 = vshll.u32 %v4345_v33, 16  ;;  %v4364_v45 = vld [vmem:[%s4293_s11 + $0x54] sm:$0xff]   ;;  %v4376_v52 = vld [vmem:[%s4293_s11 + $0x5c] ss:$0 sps:$4 sm:$0x11]  }
  0x1d   : > { %6605 = vst [vmem:[#allocation3_spill] sm:$0xff] %v4339_v28  ;;  %727 = vrot.lane.b32.xlu0 %v4339_v28, %s4217_s12  ;;  %v553_v39 = vor.u32 %v552_v32, %v548_v25  ;;  %v600_v40 = vrot.slane %v598_v35, 1  ;;  %v584_v43 = vshrl.u32 %v4350_v37, 16  ;;  %v586_v44 = vshll.u32 %v4350_v37, 16  ;;  %v4389_v61 = vld [vmem:[%s4293_s11 + $0x6c] sm:$0xff]   ;;  %v4410_v20 = vld [vmem:[%s4293_s11 + $0x60] sm:$0xff]  }
  0x1e   : > { %v4353_v38 = vsel %vm6602_vm0, %v577_v31, %v581_v29  ;;  %v605_v48 = vrot.slane %v603_v41, 1  ;;  %v591_v51 = vshll.u32 %v4359_v42, 16  ;;  %v620_v53 = vshrl.u32 %v4364_v45, 16  ;;  %v4392_v63 = vld [vmem:[%s4293_s11 + $0x50] ss:$0 sps:$4 sm:$0x11]  }
  0x1f   : > { %v4367_v46 = vsel %vm6602_vm0, %v553_v39, %v557_v36  ;;  %v601_v47 = vor.u32 %v600_v40, %v596_v34  ;;  %v588_v50 = vrot.slane %v586_v44, 1  ;;  %v622_v55 = vshll.u32 %v4364_v45, 16  ;;  %v4401_v9 = vld [vmem:[%s4293_s11 + $0x74] ss:$0 sps:$4 sm:$0x11]   ;;  %v4418_v24 = vld [vmem:[%s4293_s11 + $0x84] sm:$0xff]  }
  0x20   : > { %733 = vrot.lane.b32.xlu1 %v4353_v38, %s4217_s12  ;;  %v608_v56 = vshrl.u32 %v4370_v49, 16  ;;  %v593_v58 = vrot.slane %v591_v51, 1  ;;  %v627_v59 = vshll.u32 %v4376_v52, 16  ;;  %v610_v60 = vshll.u32 %v4370_v49, 16  ;;  %v4437_v40 = vld [vmem:[%s4293_s11 + $0x78] sm:$0xff]   ;;  %s6807_s19 = smov (!%p334_p4, %s3573_s19), 63 }
  0x21   : > { %729 = vrot.lane.b32.xlu0 %v4367_v46, %s4217_s12  ;;  %v4380_v54 = vsel %vm6602_vm0, %v601_v47, %v605_v48  ;;  %v589_v57 = vor.u32 %v588_v50, %v584_v43  ;;  %v624_v62 = vrot.slane %v622_v55, 1  ;;  %v615_v8 = vshll.u32 %v4392_v63, 16  ;;  %v4415_v21 = vld [vmem:[%s4293_s11 + $0x68] ss:$0 sps:$4 sm:$0x11]   ;;  %s4225_s21 = smov 32  }
  0x22   : > { %v629_v4 = vrot.slane %v627_v59, 1  ;;  %v612_v5 = vrot.slane %v610_v60, 1  ;;  %v644_v10 = vshrl.u32 %v4389_v61, 16  ;;  %v646_v11 = vshll.u32 %v4389_v61, 16  ;;  %s4931_s22 = sshll.u32 %s6807_s19, 2  ;;  %s4226_s10 = smov 36  }
  0x23   : > { %v4395_v3 = vsel %vm6602_vm0, %v589_v57, %v593_v58  ;;  %v625_v7 = vor.u32 %v624_v62, %v620_v53  ;;  %v617_v16 = vrot.slane %v615_v8, 1  ;;  %v651_v18 = vshll.u32 %v4401_v9, 16  ;;  %v4429_v34 = vld [vmem:[%s4293_s11 + $0x8c] ss:$0 sps:$4 sm:$0x11]   ;;  %v4448_v53 = vld [vmem:[%s4293_s11 + $0x9c] sm:$0xff]   ;;  %s4939_s25 = scalar_lea.vmem %s6548_s1, %s4931_s22  ;;  %s4945_s29 = scalar_lea.vmem %s6549_s2, %s4931_s22 }
  0x24   : > { %737 = vrot.lane.b32.xlu1 %v4380_v54, %s4217_s12  ;;  %v613_v13 = vor.u32 %v612_v5, %v608_v56  ;;  %v648_v17 = vrot.slane %v646_v11, 1  ;;  %v632_v30 = vshrl.u32 %v4410_v20, 16  ;;  %v634_v31 = vshll.u32 %v4410_v20, 16  ;;  %v4443_v47 = vld [vmem:[%s4293_s11 + $0x80] ss:$0 sps:$4 sm:$0x11]  }
  0x25   : > { %735 = vrot.lane.b32.xlu0 %v4395_v3, %s4217_s12  ;;  %v4406_v15 = vsel %vm6602_vm0, %v625_v7, %v629_v4  ;;  %v653_v29 = vrot.slane %v651_v18, 1  ;;  %v639_v32 = vshll.u32 %v4415_v21, 16  ;;  %v668_v35 = vshrl.u32 %v4418_v24, 16  ;;  %v4452_v60 = vld [vmem:[%s4293_s11 + $0xa4] ss:$0 sps:$4 sm:$0x11]  }
  0x26   : > { %v4421_v25 = vsel %vm6602_vm0, %v613_v13, %v617_v16  ;;  %v649_v26 = vor.u32 %v648_v17, %v644_v10  ;;  %v670_v39 = vshll.u32 %v4418_v24, 16  ;;  %v636_v41 = vrot.slane %v634_v31, 1  ;;  %6607 = vst [vmem:[#allocation5_spill] sm:$0xff] %v4452_v60  ;;  %v4460_v8 = vld [vmem:[%s4293_s11 + $0x90] sm:$0xff]   ;;  %s4230_s26 = smov 52   ;;  %s4231_s30 = smov 56  }
  0x27   : > { %v641_v43 = vrot.slane %v639_v32, 1  ;;  %v675_v44 = vshll.u32 %v4429_v34, 16  ;;  %v656_v50 = vshrl.u32 %v4437_v40, 16  ;;  %v658_v51 = vshll.u32 %v4437_v40, 16  ;;  %s4232_s24 = smov 64  }
  0x28   : > { %741 = vrot.lane.b32.xlu1 %v4406_v15, %s4217_s12  ;;  %v4433_v36 = vsel %vm6602_vm0, %v649_v26, %v653_v29  ;;  %v672_v48 = vrot.slane %v670_v39, 1  ;;  %v637_v55 = vor.u32 %v636_v41, %v632_v30  ;;  %v663_v57 = vshll.u32 %v4443_v47, 16  ;;  %v4471_v17 = vld [vmem:[%s4293_s11 + $0x98] ss:$0 sps:$4 sm:$0x11]  }
  0x29   : > { %739 = vrot.lane.b32.xlu0 %v4421_v25, %s4217_s12  ;;  %6606 = vst [vmem:[#allocation4_spill] sm:$0xff] %v4433_v36  ;;  %v677_v56 = vrot.slane %v675_v44, 1  ;;  %v660_v59 = vrot.slane %v658_v51, 1  ;;  %v692_v62 = vshrl.u32 %v4448_v53, 16  ;;  %v694_v4 = vshll.u32 %v4448_v53, 16  ;;  %v4476_v29 = vld [vmem:[%s4293_s11 + $0xb4] sm:$0xff]  }
  0x2a   : > { %v673_v58 = vor.u32 %v672_v48, %v668_v35  ;;  %v4457_v5 = vsel %vm6602_vm0, %v637_v55, %v641_v43  ;;  %v665_v7 = vrot.slane %v663_v57, 1  ;;  %v699_v16 = vshll.u32 %v4452_v60, 16  ;;  %v4482_v35 = vld [vmem:[%s4293_s11 + $0xa8] sm:$0xff]   ;;  %v4486_v43 = vld [vmem:[%s4293_s11 + $0xbc] ss:$0 sps:$4 sm:$0x11]  }
  0x2b   : > { %6608 = vst [vmem:[#allocation6_spill] sm:$0xff] %v4457_v5  ;;  %v661_v11 = vor.u32 %v660_v59, %v656_v50  ;;  %v696_v13 = vrot.slane %v694_v4, 1  ;;  %v680_v18 = vshrl.u32 %v4460_v8, 16  ;;  %v682_v26 = vshll.u32 %v4460_v8, 16 }
  0x2c   : > { %745 = vrot.lane.b32.xlu1 %v4433_v36, %s4217_s12  ;;  %v4465_v10 = vsel %vm6602_vm0, %v673_v58, %v677_v56  ;;  %v701_v32 = vrot.slane %v699_v16, 1  ;;  %v687_v41 = vshll.u32 %v4471_v17, 16  ;;  %v716_v44 = vshrl.u32 %v4476_v29, 16 }
  0x2d   : > { %743 = vrot.lane.b32.xlu0 %v4457_v5, %s4217_s12  ;;  %6609 = vst [vmem:[#allocation7_spill] sm:$0xff] %v4465_v10  ;;  %v4479_v30 = vsel %vm6602_vm0, %v661_v11, %v665_v7  ;;  %v697_v31 = vor.u32 %v696_v13, %v692_v62  ;;  %v684_v39 = vrot.slane %v682_v26, 1  ;;  %v718_v50 = vshll.u32 %v4476_v29, 16  ;;  %v4501_v62 = vld [vmem:[%s4293_s11 + $0xb0] ss:$0 sps:$4 sm:$0x11]  }
  0x2e   : > { %6610 = vst [vmem:[#allocation8_spill] sm:$0xff] %v4479_v30  ;;  %v704_v51 = vshrl.u32 %v4482_v35, 16  ;;  %v689_v56 = vrot.slane %v687_v41, 1  ;;  %v723_v57 = vshll.u32 %v4486_v43, 16  ;;  %v706_v58 = vshll.u32 %v4482_v35, 16 }
  0x2f   : > { %v4492_v48 = vsel %vm6602_vm0, %v697_v31, %v701_v32  ;;  %v685_v55 = vor.u32 %v684_v39, %v680_v18  ;;  %v720_v59 = vrot.slane %v718_v50, 1  ;;  %v763_v13 = vrot.slane %v4322_v19, 1 }
  0x30   : > { %749 = vrot.lane.b32.xlu1 %v4465_v10, %s4217_s12  ;;  %6611 = vst [vmem:[#allocation9_spill] sm:$0xff] %v4492_v48  ;;  %v725_v7 = vrot.slane %v723_v57, 1  ;;  %v708_v11 = vrot.slane %v706_v58, 1  ;;  %v711_v18 = vshll.u32 %v4501_v62, 16  ;;  %v764_v26 = vrot.slane %v4326_v22, 1 }
  0x31   : > { %747 = vrot.lane.b32.xlu0 %v4479_v30, %s4217_s12  ;;  %v4504_v4 = vsel %vm6602_vm0, %v685_v55, %v689_v56  ;;  %v721_v16 = vor.u32 %v720_v59, %v716_v44  ;;  %v760_v41 = vrot.slane %v4302_v2, 1  ;;  %v761_v50 = vrot.slane %v4308_v6, 1 }
  0x32   : > { %6612 = vst [vmem:[#allocation10_spill] sm:$0xff] %v4504_v4  ;;  %v709_v31 = vor.u32 %v708_v11, %v704_v51  ;;  %v713_v39 = vrot.slane %v711_v18, 1  ;;  %v4522_v44 = vsel %vm6599_vm1, %v763_v13, %v764_v26  ;;  %v769_v22 = vrot.slane %v4314_v12, 1 }
  0x33   : > { %v4512_v32 = vsel %vm6602_vm0, %v721_v16, %v725_v7  ;;  %v770_v51 = vrot.slane %v4317_v14, 1  ;;  %v4529_v56 = vsel %vm6599_vm1, %v760_v41, %v761_v50  ;;  %v766_v6 = vrot.slane %v4296_v0, 1 }
  0x34   : > { %753 = vrot.lane.b32.xlu1 %v4492_v48, %s4217_s12  ;;  %6613 = vst [vmem:[#allocation11_spill] sm:$0xff] %v4512_v32  ;;  %v4519_v55 = vsel %vm6602_vm0, %v709_v31, %v713_v39  ;;  %6615 = vst [vmem:[#allocation13_spill] sm:$0xff] %v4529_v56  ;;  %v767_v57 = vrot.slane %v4299_v1, 1  ;;  %v775_v59 = vrot.slane %v4334_v27, 1  ;;  %v776_v7 = vrot.slane %v4345_v33, 1 }
  0x35   : > { %751 = vrot.lane.b32.xlu0 %v4504_v4, %s4217_s12  ;;  %6614 = vst [vmem:[#allocation12_spill] sm:$0xff] %v4519_v55  ;;  %v4536_v58 = vsel %vm6599_vm1, %v769_v22, %v770_v51  ;;  %v772_v13 = vrot.slane %v4350_v37, 1  ;;  %v773_v16 = vrot.slane %v4359_v42, 1  ;;  %v781_v26 = vrot.slane %v4364_v45, 1 }
  0x36   : > { %v4543_v11 = vsel %vm6599_vm1, %v766_v6, %v767_v57  ;;  %v4550_v18 = vsel %vm6599_vm1, %v775_v59, %v776_v7  ;;  %v782_v31 = vrot.slane %v4376_v52, 1  ;;  %v778_v41 = vrot.slane %v4370_v49, 1 }
  0x37   : > { %v4557_v39 = vsel %vm6599_vm1, %v772_v13, %v773_v16  ;;  %v779_v50 = vrot.slane %v4392_v63, 1  ;;  %v787_v51 = vrot.slane %v4389_v61, 1  ;;  %v788_v6 = vrot.slane %v4401_v9, 1 }
  0x38   : > { %757 = vrot.lane.b32.xlu1 %v4512_v32, %s4217_s12  ;;  %v4564_v22 = vsel %vm6599_vm1, %v781_v26, %v782_v31  ;;  %v784_v59 = vrot.slane %v4410_v20, 1  ;;  %v785_v7 = vrot.slane %v4415_v21, 1  ;;  %v793_v16 = vrot.slane %v4418_v24, 1 }
  0x39   : > { %755 = vrot.lane.b32.xlu0 %v4519_v55, %s4217_s12  ;;  %6616 = vst [vmem:[#allocation14_spill] sm:$0xff] %v4564_v22  ;;  %v4571_v57 = vsel %vm6599_vm1, %v778_v41, %v779_v50  ;;  %v4578_v13 = vsel %vm6599_vm1, %v787_v51, %v788_v6  ;;  %v794_v26 = vrot.slane %v4429_v34, 1  ;;  %v790_v41 = vrot.slane %v4437_v40, 1 }
  0x3a   : > { %6617 = vst [vmem:[#allocation15_spill] sm:$0xff] %v4571_v57  ;;  %6618 = vst [vmem:[#allocation16_spill] sm:$0xff] %v4578_v13  ;;  %v4585_v31 = vsel %vm6599_vm1, %v784_v59, %v785_v7  ;;  %v791_v50 = vrot.slane %v4443_v47, 1  ;;  %v799_v6 = vrot.slane %v4448_v53, 1  ;;  %v796_v7 = vrot.slane %v4460_v8, 1 }
  0x3b   : > { %6619 = vst [vmem:[#allocation17_spill] sm:$0xff] %v4585_v31  ;;  %v4592_v51 = vsel %vm6599_vm1, %v793_v16, %v794_v26  ;;  %v797_v28 = vrot.slane %v4471_v17, 1  ;;  %v805_v26 = vrot.slane %v4476_v29, 1  ;;  %v806_v2 = vrot.slane %v4486_v43, 1 }
  0x3c   : > { %810 = vrot.lane.b32.xlu1 %v4522_v44, %s4218_s13  ;;  %6620 = vst [vmem:[#allocation18_spill] sm:$0xff] %v4592_v51  ;;  %v4599_v59 = vsel %vm6599_vm1, %v790_v41, %v791_v50  ;;  %v802_v50 = vrot.slane %v4482_v35, 1 }
  0x3d   : > { %808 = vrot.lane.b32.xlu0 %v4529_v56, %s4218_s13  ;;  %v800_v56 = vrot.slane %v4452_v60, 1  ;;  %6621 = vst [vmem:[#allocation19_spill] sm:$0xff] %v4599_v59  ;;  %v4613_v41 = vsel %vm6599_vm1, %v796_v7, %v797_v28  ;;  %v803_v60 = vrot.slane %v4501_v62, 1  ;;  %v4669_v7 = vld [vmem:[%s4293_s11 + $0xc8] ss:$0 sps:$4 sm:$0x11]  }
  0x3e   : > { %6623 = vst [vmem:[#allocation21_spill] sm:$0xff] %v4613_v41 }
  0x3f   : > { %v4606_v16 = vsel %vm6599_vm1, %v799_v6, %v800_v56  ;;  %v4620_v56 = vsel %vm6599_vm1, %v805_v26, %v806_v2  ;;  %v4625_v6 = vsel %vm6599_vm1, %v802_v50, %v803_v60  ;;  %v4645_v2 = vld [vmem:[%s4293_s11 + $0xc0] sm:$0xff]   ;;  %vm1764_vm1 = vcmask 490496  }
  0x40   : > { %814 = vrot.lane.b32.xlu1 %v4536_v58, %s4218_s13  ;;  %6622 = vst [vmem:[#allocation20_spill] sm:$0xff] %v4606_v16  ;;  %6624 = vst [vmem:[#allocation22_spill] sm:$0xff] %v4620_v56  ;;  %v883_v26 = vshll.u32 %v4645_v2, 16 }
  0x41   : > { %812 = vrot.lane.b32.xlu0 %v4543_v11, %s4218_s13  ;;  %6625 = vst [vmem:[#allocation23_spill] sm:$0xff] %v4625_v6 }
  0x44   : > { %818 = vrot.lane.b32.xlu1 %v4550_v18, %s4218_s13 }
  0x45   : > { %816 = vrot.lane.b32.xlu0 %v4557_v39, %s4218_s13 }
  0x48   : > { %822 = vrot.lane.b32.xlu1 %v4564_v22, %s4218_s13 }
  0x49   : > { %820 = vrot.lane.b32.xlu0 %v4571_v57, %s4218_s13 }
  0x4c   : > { %826 = vrot.lane.b32.xlu1 %v4578_v13, %s4218_s13 }
  0x4d   : > { %824 = vrot.lane.b32.xlu0 %v4585_v31, %s4218_s13 }
  0x50   : > { %830 = vrot.lane.b32.xlu1 %v4592_v51, %s4218_s13 }
  0x51   : > { %828 = vrot.lane.b32.xlu0 %v4599_v59, %s4218_s13 }
  0x54   : > { %834 = vrot.lane.b32.xlu1 %v4606_v16, %s4218_s13  ;;  %v888_v16 = vshll.u32 %v4669_v7, 16 }
  0x55   : > { %832 = vrot.lane.b32.xlu0 %v4613_v41, %s4218_s13 }
  0x58   : > { %838 = vrot.lane.b32.xlu1 %v4620_v56, %s4218_s13  ;;  %v881_v56 = vshrl.u32 %v4645_v2, 16 }
  0x59   : > { %836 = vrot.lane.b32.xlu0 %v4625_v6, %s4218_s13  ;;  %v885_v6 = vrot.slane %v883_v26, 1  ;;  %s4227_s13 = smov 40  }
  0x5c   : > { %847 = vrot.lane.b32.xlu1 %v4296_v0, %s4219_s14 }
  0x5d   : > { %845 = vrot.lane.b32.xlu0 %v4322_v19, %s4219_s14 }
  0x60   : > { %851 = vrot.lane.b32.xlu1 %v4350_v37, %s4219_s14 }
  0x61   : > { %849 = vrot.lane.b32.xlu0 %v4314_v12, %s4219_s14 }
  0x64   : > { %855 = vrot.lane.b32.xlu1 %v4370_v49, %s4219_s14 }
  0x65   : > { %853 = vrot.lane.b32.xlu0 %v4334_v27, %s4219_s14 }
  0x68   : > { %859 = vrot.lane.b32.xlu1 %v4410_v20, %s4219_s14 }
  0x69   : > { %857 = vrot.lane.b32.xlu0 %v4364_v45, %s4219_s14 }
  0x6c   : > { %863 = vrot.lane.b32.xlu1 %v4437_v40, %s4219_s14 }
  0x6d   : > { %861 = vrot.lane.b32.xlu0 %v4389_v61, %s4219_s14 }
  0x70   : > { %867 = vrot.lane.b32.xlu1 %v4460_v8, %s4219_s14 }
  0x71   : > { %865 = vrot.lane.b32.xlu0 %v4418_v24, %s4219_s14 }
  0x74   : > { %871 = vrot.lane.b32.xlu1 %v4482_v35, %s4219_s14 }
  0x75   : > { %869 = vrot.lane.b32.xlu0 %v4448_v53, %s4219_s14 }
  0x78   : > { %875 = vrot.lane.b32.xlu1 %v4645_v2, %s4219_s14 }
  0x79   : > { %873 = vrot.lane.b32.xlu0 %v4476_v29, %s4219_s14  ;;  %s4228_s14 = smov 44  }
  0x7c   : > { %894 = vrot.lane.b32.xlu1 %v4329_v23, %s4220_s15 }
  0x7d   : > { %892 = vrot.lane.b32.xlu0 %v4367_v46, %s4220_s15 }
  0x80   : > { %898 = vrot.lane.b32.xlu1 %v4395_v3, %s4220_s15 }
  0x81   : > { %896 = vrot.lane.b32.xlu0 %v4353_v38, %s4220_s15 }
  0x84   : > { %902 = vrot.lane.b32.xlu1 %v4421_v25, %s4220_s15 }
  0x85   : > { %900 = vrot.lane.b32.xlu0 %v4380_v54, %s4220_s15 }
  0x88   : > { %906 = vrot.lane.b32.xlu1 %v4457_v5, %s4220_s15  ;;  %v890_v5 = vrot.slane %v888_v16, 1 }
  0x89   : > { %904 = vrot.lane.b32.xlu0 %v4406_v15, %s4220_s15 }
  0x8c   : > { %910 = vrot.lane.b32.xlu1 %v4479_v30, %s4220_s15 }
  0x8d   : > { %908 = vrot.lane.b32.xlu0 %v4433_v36, %s4220_s15 }
  0x8e   : > { %v4664_v28 = vpop.permute.xlu1 %731 }
  0x8f   : > { %6626 = vst [vmem:[#allocation24_spill] sm:$0xff] %v4664_v28  ;;  %v4666_v60 = vpop.permute.xlu0 %727 }
  0x90   : > { %6627 = vst [vmem:[#allocation25_spill] sm:$0xff] %v4666_v60  ;;  %914 = vrot.lane.b32.xlu1 %v4504_v4, %s4220_s15  ;;  %v886_v60 = vor.u32 %v885_v6, %v881_v56 }
  0x91   : > { %912 = vrot.lane.b32.xlu0 %v4465_v10, %s4220_s15 }
  0x92   : > { %v4676_v50 = vpop.permute.xlu1 %733  ;;  %v4695_v26 = vsel %vm6602_vm0, %v886_v60, %v890_v5 }
  0x93   : > { %6628 = vst [vmem:[#allocation26_spill] sm:$0xff] %v4676_v50  ;;  %v4682_v41 = vpop.permute.xlu0 %729  ;;  %6630 = vst [vmem:[#allocation28_spill] sm:$0xff] %v4695_v26 }
  0x94   : > { %6629 = vst [vmem:[#allocation27_spill] sm:$0xff] %v4682_v41  ;;  %918 = vrot.lane.b32.xlu1 %v4519_v55, %s4220_s15 }
  0x95   : > { %916 = vrot.lane.b32.xlu0 %v4492_v48, %s4220_s15 }
  0x96   : > { %v4686_v28 = vpop.permute.xlu1 %737 }
  0x97   : > { %v4690_v50 = vpop.permute.xlu0 %735 }
  0x98   : > { %922 = vrot.lane.b32.xlu1 %v4695_v26, %s4220_s15 }
  0x99   : > { %920 = vrot.lane.b32.xlu0 %v4512_v32, %s4220_s15  ;;  %s4229_s15 = smov 48  }
  0x9a   : > { %v4699_v30 = vpop.permute.xlu1 %741 }
  0x9b   : > { %v4703_v16 = vpop.permute.xlu0 %739 }
  0x9c   : > { %929 = vrot.lane.b32.xlu1 %v4543_v11, %s4221_s16 }
  0x9d   : > { %927 = vrot.lane.b32.xlu0 %v4522_v44, %s4221_s16 }
  0x9e   : > { %v4707_v56 = vpop.permute.xlu1 %745 }
  0x9f   : > { %v4713_v5 = vpop.permute.xlu0 %743 }
  0xa0   : > { %933 = vrot.lane.b32.xlu1 %v4557_v39, %s4221_s16 }
  0xa1   : > { %931 = vrot.lane.b32.xlu0 %v4536_v58, %s4221_s16 }
  0xa2   : > { %v4717_v6 = vpop.permute.xlu1 %749 }
  0xa3   : > { %v4721_v60 = vpop.permute.xlu0 %747 }
  0xa4   : > { %937 = vrot.lane.b32.xlu1 %v4571_v57, %s4221_s16 }
  0xa5   : > { %935 = vrot.lane.b32.xlu0 %v4550_v18, %s4221_s16 }
  0xa6   : > { %v4725_v26 = vpop.permute.xlu1 %753 }
  0xa7   : > { %v4729_v32 = vpop.permute.xlu0 %751 }
  0xa8   : > { %941 = vrot.lane.b32.xlu1 %v4585_v31, %s4221_s16 }
  0xa9   : > { %939 = vrot.lane.b32.xlu0 %v4564_v22, %s4221_s16 }
  0xaa   : > { %v4735_v55 = vpop.permute.xlu1 %757 }
  0xab   : > { %v4737_v48 = vpop.permute.xlu0 %755 }
  0xac   : > { %945 = vrot.lane.b32.xlu1 %v4599_v59, %s4221_s16 }
  0xad   : > { %943 = vrot.lane.b32.xlu0 %v4578_v13, %s4221_s16 }
  0xae   : > { %v4743_v4 = vpop.permute.xlu1 %810 }
  0xaf   : > { %6631 = vst [vmem:[#allocation29_spill] sm:$0xff] %v4743_v4  ;;  %v4745_v10 = vpop.permute.xlu0 %808 }
  0xb0   : > { %6632 = vst [vmem:[#allocation30_spill] sm:$0xff] %v4745_v10  ;;  %1797 = vrot.lane.b32.xlu1 %v4296_v0, %s4222_s17 }
  0xb1   : > { %947 = vrot.lane.b32.xlu0 %v4592_v51, %s4221_s16 }
  0xb2   : > { %v4751_v41 = vpop.permute.xlu1 %814 }
  0xb3   : > { %6633 = vst [vmem:[#allocation31_spill] sm:$0xff] %v4751_v41  ;;  %v4753_v31 = vpop.permute.xlu0 %812 }
  0xb4   : > { %6634 = vst [vmem:[#allocation32_spill] sm:$0xff] %v4753_v31  ;;  %1799 = vrot.lane.b32.xlu1 %v4299_v1, %s4222_s17 }
  0xb5   : > { %1801 = vrot.lane.b32.xlu0 %v4314_v12, %s4222_s17 }
  0xb6   : > { %v819_v59 = vpop.permute.xlu1 %818 }
  0xb7   : > { %v817_v4 = vpop.permute.xlu0 %816 }
  0xb8   : > { %1805 = vrot.lane.b32.xlu1 %v4350_v37, %s4222_s17 }
  0xb9   : > { %1803 = vrot.lane.b32.xlu0 %v4317_v14, %s4222_s17 }
  0xba   : > { %v823_v10 = vpop.permute.xlu1 %822 }
  0xbb   : > { %v821_v51 = vpop.permute.xlu0 %820 }
  0xbc   : > { %1807 = vrot.lane.b32.xlu1 %v4359_v42, %s4222_s17 }
  0xbd   : > { %1809 = vrot.lane.b32.xlu0 %v4334_v27, %s4222_s17 }
  0xbe   : > { %v827_v1 = vpop.permute.xlu1 %826 }
  0xbf   : > { %v825_v41 = vpop.permute.xlu0 %824 }
  0xc0   : > { %1813 = vrot.lane.b32.xlu1 %v4370_v49, %s4222_s17 }
  0xc1   : > { %1811 = vrot.lane.b32.xlu0 %v4345_v33, %s4222_s17 }
  0xc2   : > { %v831_v31 = vpop.permute.xlu1 %830 }
  0xc3   : > { %v829_v13 = vpop.permute.xlu0 %828 }
  0xc4   : > { %1815 = vrot.lane.b32.xlu1 %v4392_v63, %s4222_s17 }
  0xc5   : > { %1817 = vrot.lane.b32.xlu0 %v4364_v45, %s4222_s17 }
  0xc6   : > { %v835_v14 = vpop.permute.xlu1 %834 }
  0xc7   : > { %v4775_v42 = vpop.permute.xlu0 %832 }
  0xc8   : > { %1821 = vrot.lane.b32.xlu1 %v4410_v20, %s4222_s17 }
  0xc9   : > { %1819 = vrot.lane.b32.xlu0 %v4376_v52, %s4222_s17 }
  0xca   : > { %v4781_v36 = vpop.permute.xlu1 %838 }
  0xcb   : > { %v4783_v33 = vpop.permute.xlu0 %836 }
  0xcc   : > { %1823 = vrot.lane.b32.xlu1 %v4415_v21, %s4222_s17  ;;  %v1314_v21 = vsel %vm1302_vm2, %v4334_v27, %v4686_v28  ;;  %v1318_v27 = vsel %vm1302_vm2, %v4364_v45, %v4699_v30  ;;  %v1322_v45 = vsel %vm1302_vm2, %v4389_v61, %v4707_v56  ;;  %v1320_v30 = vsel %vm1302_vm2, %v4410_v20, %v4713_v5  ;;  %v6639_v20 = vld [vmem:[#allocation5_spill] sm:$0xff] }
  0xcd   : > { %1825 = vrot.lane.b32.xlu0 %v4389_v61, %s4222_s17  ;;  %v1351_v28 = vsel %vm1335_vm3, %v1318_v27, %v823_v10  ;;  %v1355_v10 = vsel %vm1335_vm3, %v1322_v45, %v827_v1  ;;  %v1326_v61 = vsel %vm1302_vm2, %v4418_v24, %v4717_v6  ;;  %v3872_v27 = vld [vmem:[%s4939_s25 + $0x30] sm:$0xff]  }
  0xce   : > { %v4789_v63 = vpop.permute.xlu1 %847  ;;  %v1359_v56 = vsel %vm1335_vm3, %v1326_v61, %v831_v31 }
  0xcf   : > { %6635 = vst [vmem:[#allocation33_spill] sm:$0xff] %v4789_v63  ;;  %v4791_v22 = vpop.permute.xlu0 %845  ;;  %v1347_v63 = vsel %vm1335_vm3, %v1314_v21, %v819_v59 }
  0xd0   : > { %6636 = vst [vmem:[#allocation34_spill] sm:$0xff] %v4791_v22  ;;  %1829 = vrot.lane.b32.xlu1 %v4437_v40, %s4222_s17 }
  0xd1   : > { %1827 = vrot.lane.b32.xlu0 %v4401_v9, %s4222_s17 }
  0xd2   : > { %v4797_v52 = vpop.permute.xlu1 %851 }
  0xd3   : > { %6637 = vst [vmem:[#allocation35_spill] sm:$0xff] %v4797_v52  ;;  %v4799_v57 = vpop.permute.xlu0 %849  ;;  %v1312_v52 = vsel %vm1302_vm2, %v4350_v37, %v4690_v50 }
  0xd4   : > { %6638 = vst [vmem:[#allocation36_spill] sm:$0xff] %v4799_v57  ;;  %1831 = vrot.lane.b32.xlu1 %v4443_v47, %s4222_s17  ;;  %v1345_v47 = vsel %vm1335_vm3, %v1312_v52, %v817_v4  ;;  %v1316_v4 = vsel %vm1302_vm2, %v4370_v49, %v4703_v16 }
  0xd5   : > { %1833 = vrot.lane.b32.xlu0 %v4418_v24, %s4222_s17  ;;  %v1330_v24 = vsel %vm1302_vm2, %v4448_v53, %v4725_v26 }
  0xd6   : > { %v856_v9 = vpop.permute.xlu1 %855  ;;  %v1363_v6 = vsel %vm1335_vm3, %v1330_v24, %v835_v14 }
  0xd7   : > { %v4813_v57 = vsel %vm1368_vm4, %v1347_v63, %v856_v9  ;;  %v854_v22 = vpop.permute.xlu0 %853  ;;  %v1349_v63 = vsel %vm1335_vm3, %v1316_v4, %v821_v51  ;;  %v4166_v4 = vld [vmem:[%s4293_s11 + $0xd4] ss:$0 sps:$4 sm:$0x11]  }
  0xd8   : > { %1837 = vrot.lane.b32.xlu1 %v4460_v8, %s4222_s17  ;;  %v4822_v59 = vsel %vm1368_vm4, %v1345_v47, %v854_v22  ;;  %v4165_v47 = vld [vmem:[%s4293_s11 + $0xcc] sm:$0xff]  }
  0xd9   : > { %1835 = vrot.lane.b32.xlu0 %v4429_v34, %s4222_s17 }
  0xda   : > { %v860_v37 = vpop.permute.xlu1 %859 }
  0xdb   : > { %v4831_v50 = vsel %vm1368_vm4, %v1351_v28, %v860_v37  ;;  %v858_v52 = vpop.permute.xlu0 %857  ;;  %v3887_v28 = vld [vmem:[%s4945_s29 + $0x30] sm:$0xff]  }
  0xdc   : > { %1839 = vrot.lane.b32.xlu1 %v4471_v17, %s4222_s17  ;;  %v4840_v34 = vsel %vm1368_vm4, %v1349_v63, %v858_v52  ;;  %v1353_v17 = vsel %vm1335_vm3, %v1320_v30, %v825_v41  ;;  %v1324_v41 = vsel %vm1302_vm2, %v4437_v40, %v4721_v60  ;;  %v1334_v60 = vsel %vm1302_vm2, %v4476_v29, %v4735_v55  ;;  %v3888_v30 = vld [vmem:[%s4945_s29 + $0x38] sm:$0xff]  }
  0xdd   : > { %1841 = vrot.lane.b32.xlu0 %v4448_v53, %s4222_s17  ;;  %v1357_v21 = vsel %vm1335_vm3, %v1324_v41, %v829_v13  ;;  %v1328_v13 = vsel %vm1302_vm2, %v4460_v8, %v4729_v32  ;;  %v1367_v8 = vsel %vm1335_vm3, %v1334_v60, %v4781_v36  ;;  %v3765_v63 = vunpack.c.l.bf16 %v3872_v27 }
  0xde   : > { %v864_v49 = vpop.permute.xlu1 %863  ;;  %v1361_v53 = vsel %vm1335_vm3, %v1328_v13, %v4775_v42  ;;  %v1332_v42 = vsel %vm1302_vm2, %v4482_v35, %v4737_v48  ;;  %v3766_v52 = vunpack.c.h.bf16 %v3872_v27  ;;  %v3829_v45 = vunpack.c.l.bf16 %v3887_v28  ;;  %v3875_v27 = vld [vmem:[%s4939_s25 + $0x48] sm:$0xff]  }
  0xdf   : > { %v4849_v22 = vsel %vm1368_vm4, %v1355_v10, %v864_v49  ;;  %v862_v51 = vpop.permute.xlu0 %861  ;;  %v3830_v10 = vunpack.c.h.bf16 %v3887_v28  ;;  %v3873_v49 = vld [vmem:[%s4939_s25 + $0x38] sm:$0xff]   ;;  %v3833_v41 = vunpack.c.l.bf16 %v3888_v30  ;;  %v3890_v28 = vld [vmem:[%s4945_s29 + $0x48] sm:$0xff]  }
  0xe0   : > { %1845 = vrot.lane.b32.xlu1 %v4482_v35, %s4222_s17  ;;  %v4858_v16 = vsel %vm1368_vm4, %v1353_v17, %v862_v51  ;;  %v3769_v51 = vunpack.c.l.bf16 %v3873_v49  ;;  %v3770_v61 = vunpack.c.h.bf16 %v3873_v49  ;;  %v3842_v49 = vunpack.c.h.bf16 %v3890_v28 }
  0xe1   : > { %1843 = vrot.lane.b32.xlu0 %v6639_v20, %s4222_s17  ;;  %v2588_v20 = vadd.f32 %v3829_v45, %v3765_v63  ;;  %v3841_v63 = vunpack.c.l.bf16 %v3890_v28 }
  0xe2   : > { %v868_v5 = vpop.permute.xlu1 %867 }
  0xe3   : > { %v4867_v1 = vsel %vm1368_vm4, %v1359_v56, %v868_v5  ;;  %v866_v9 = vpop.permute.xlu0 %865  ;;  %v2589_v5 = vadd.f32 %v3830_v10, %v3766_v52 }
  0xe4   : > { %1847 = vrot.lane.b32.xlu1 %v4501_v62, %s4222_s17  ;;  %v4876_v31 = vsel %vm1368_vm4, %v1357_v21, %v866_v9 }
  0xe5   : > { %1849 = vrot.lane.b32.xlu0 %v4476_v29, %s4222_s17  ;;  %v1365_v29 = vsel %vm1335_vm3, %v1332_v42, %v4783_v33 }
  0xe6   : > { %v872_v40 = vpop.permute.xlu1 %871 }
  0xe7   : > { %v4885_v62 = vsel %vm1368_vm4, %v1363_v6, %v872_v40  ;;  %v870_v26 = vpop.permute.xlu0 %869  ;;  %v2590_v6 = vadd.f32 %v3833_v41, %v3769_v51 }
  0xe8   : > { %964 = vrot.lane.b32.xlu1 %v4296_v0, %s4223_s18  ;;  %v4895_v14 = vsel %vm1368_vm4, %v1361_v53, %v870_v26 }
  0xe9   : > { %1851 = vrot.lane.b32.xlu0 %v4486_v43, %s4222_s17 }
  0xea   : > { %v876_v32 = vpop.permute.xlu1 %875 }
  0xeb   : > { %v4905_v0 = vsel %vm1368_vm4, %v1367_v8, %v876_v32  ;;  %v874_v55 = vpop.permute.xlu0 %873  ;;  %v3874_v8 = vld [vmem:[%s4939_s25 + $0x40] sm:$0xff]  }
  0xec   : > { %966 = vrot.lane.b32.xlu1 %v4314_v12, %s4223_s18  ;;  %v4913_v36 = vsel %vm1368_vm4, %v1365_v29, %v874_v55  ;;  %v3889_v32 = vld [vmem:[%s4945_s29 + $0x40] sm:$0xff]   ;;  %v3773_v29 = vunpack.c.l.bf16 %v3874_v8  ;;  %v3774_v55 = vunpack.c.h.bf16 %v3874_v8  ;;  %v3892_v8 = vld [vmem:[%s4945_s29 + $0x58] sm:$0xff]  }
  0xed   : > { %1853 = vrot.lane.b32.xlu0 %v4645_v2, %s4222_s17 }
  0xee   : > { %v4917_v43 = vpop.permute.xlu1 %894 }
  0xef   : > { %v4919_v35 = vpop.permute.xlu0 %892 }
  0xf0   : > { %1857 = vrot.lane.b32.xlu1 %v4165_v47, %s4222_s17  ;;  %v3837_v47 = vunpack.c.l.bf16 %v3889_v32 }
  0xf1   : > { %1011 = vrot.lane.b32.xlu0 %v4329_v23, %s4224_s20 }
  0xf2   : > { %v4925_v12 = vpop.permute.xlu1 %898  ;;  %v2592_v45 = vadd.f32 %v3837_v47, %v3773_v29 }
  0xf3   : > { %v4927_v48 = vpop.permute.xlu0 %896 }
  0xf4   : > { %1046 = vrot.lane.b32.xlu1 %v4543_v11, %s4225_s21 }
  0xf5   : > { %1013 = vrot.lane.b32.xlu0 %v4353_v38, %s4224_s20 }
  0xf6   : > { %v903_v2 = vpop.permute.xlu1 %902 }
  0xf7   : > { %v4949_v33 = vsel %vm1401_vm5, %v4813_v57, %v903_v2  ;;  %v901_v37 = vpop.permute.xlu0 %900  ;;  %v4965_v57 = vld [vmem:[%s6552_s5] sm:$0x1]  ;;  %v3838_v2 = vunpack.c.h.bf16 %v3889_v32 }
  0xf8   : > { %1048 = vrot.lane.b32.xlu1 %v4536_v58, %s4225_s21  ;;  %v4960_v17 = vsel %vm1401_vm5, %v4822_v59, %v901_v37  ;;  %4104 = vmatprep.subr.msk.bf16.mxu1 %vm2679_vm6, %v4965_v57  ;;  %v3834_v59 = vunpack.c.h.bf16 %v3888_v30  ;;  %v4977_v9 = vsel %vm2679_vm6, %v4965_v57, 0 }
  0xf9   : > { %1855 = vrot.lane.b32.xlu0 %v4669_v7, %s4222_s17  ;;  %4069 = vmatpush3.bf16.msra.mxu1 %v4977_v9  ;;  %v2614_v7 = vpack.c.bf16 %v2589_v5, %v2588_v20  ;;  %v2593_v10 = vadd.f32 %v3838_v2, %v3774_v55  ;;  %v3850_v2 = vunpack.c.h.bf16 %v3892_v8 }
  0xfa   : > { %v907_v56 = vpop.permute.xlu1 %906  ;;  %v2591_v40 = vadd.f32 %v3834_v59, %v3770_v61  ;;  %v6647_v61 = vld [vmem:[#allocation13_spill] sm:$0xff]  ;;  %v3876_v59 = vld [vmem:[%s4939_s25 + $0x50] sm:$0xff]  }
  0xfb   : > { %v4973_v21 = vsel %vm1401_vm5, %v4831_v50, %v907_v56  ;;  %v905_v24 = vpop.permute.xlu0 %904  ;;  %v6642_v50 = vld [vmem:[#allocation2_spill] sm:$0xff]  ;;  %4010 = vmatprep.mubr.msk.bf16.mxu1 %vm6598_vm7, %v2614_v7  ;;  %v2616_v56 = vpack.c.bf16 %v2593_v10, %v2592_v45 }
  0xfc   : > { %6640 = vst [vmem:[#allocation5_spill] sm:$0xff] %v4973_v21  ;;  %1859 = vrot.lane.b32.xlu1 %v4166_v4, %s4222_s17  ;;  %v4983_v13 = vsel %vm1401_vm5, %v4840_v34, %v905_v24  ;;  %v2615_v26 = vpack.c.bf16 %v2591_v40, %v2590_v6  ;;  %v6644_v34 = vld [vmem:[#allocation3_spill] sm:$0xff]  ;;  %v3778_v4 = vunpack.c.h.bf16 %v3875_v27  ;;  %v3891_v24 = vld [vmem:[%s4945_s29 + $0x50] sm:$0xff]   ;;  %v3782_v40 = vunpack.c.h.bf16 %v3876_v59  ;;  %v3893_v10 = vld [vmem:[%s4945_s29 + $0x60] sm:$0xff]  }
  0xfd   : > { %6641 = vst [vmem:[#allocation37_spill] sm:$0xff] %v4983_v13  ;;  %1078 = vrot.lane.b32.xlu0 %v6642_v50, %s4225_s21  ;;  %v5025_v6 = vld [vmem:[%s4293_s11 + $0xc] sm:$0xff]   ;;  %v3845_v50 = vunpack.c.l.bf16 %v3891_v24 }
  0xfe   : > { %v911_v53 = vpop.permute.xlu1 %910  ;;  %4011 = vmatmul.mubr.msk.bf16.vlgmr.msra.gmra.mrb[0].mxu1 %vm6598_vm7, %v2615_v26  ;;  %v2595_v20 = vadd.f32 %v3842_v49, %v3778_v4  ;;  %v3877_v26 = vld [vmem:[%s4939_s25 + $0x58] sm:$0xff]  }
  0xff   : > { %v4990_v60 = vsel %vm1401_vm5, %v4849_v22, %v911_v53  ;;  %v909_v42 = vpop.permute.xlu0 %908  ;;  %v3777_v22 = vunpack.c.l.bf16 %v3875_v27  ;;  %4014 = vmatprep.mubr.msk.bf16.mxu1 %vm6598_vm7, %v2616_v56  ;;  %v3846_v53 = vunpack.c.h.bf16 %v3891_v24  ;;  %v3785_v32 = vunpack.c.l.bf16 %v3877_v26  ;;  %v3879_v56 = vld [vmem:[%s4939_s25 + $0x68] sm:$0xff]  }
 0x100   : > { %6643 = vst [vmem:[#allocation2_spill] sm:$0xff] %v4990_v60  ;;  %1110 = vrot.lane.b32.xlu1 %v6644_v34, %s4226_s10  ;;  %v5001_v37 = vsel %vm1401_vm5, %v4858_v16, %v909_v42  ;;  %v3786_v42 = vunpack.c.h.bf16 %v3877_v26  ;;  %v3849_v34 = vunpack.c.l.bf16 %v3892_v8 }
 0x101   : > { %6645 = vst [vmem:[#allocation3_spill] sm:$0xff] %v5001_v37  ;;  %1080 = vrot.lane.b32.xlu0 %v4322_v19, %s4225_s21  ;;  %v2594_v51 = vadd.f32 %v3841_v63, %v3777_v22  ;;  %v2597_v47 = vadd.f32 %v3846_v53, %v3782_v40 }
 0x102   : > { %v915_v52 = vpop.permute.xlu1 %914  ;;  %v2598_v28 = vadd.f32 %v3849_v34, %v3785_v32  ;;  %v2599_v4 = vadd.f32 %v3850_v2, %v3786_v42  ;;  %v5078_v32 = vld [vmem:[%s4293_s11 + $0x3c] sm:$0xff]   ;;  %v4169_v2 = vld [vmem:[%s6550_s3 + $0x10] sm:$0xff]  }
 0x103   : > { %v5007_v30 = vsel %vm1401_vm5, %v4867_v1, %v915_v52  ;;  %v913_v16 = vpop.permute.xlu0 %912  ;;  %v2617_v1 = vpack.c.bf16 %v2595_v20, %v2594_v51  ;;  %v5049_v52 = vld [vmem:[%s4293_s11 + $0x18] sm:$0xff]   ;;  %v3894_v20 = vld [vmem:[%s4945_s29 + $0x68] sm:$0xff]  }
 0x104   : > { %6646 = vst [vmem:[#allocation38_spill] sm:$0xff] %v5007_v30  ;;  %1142 = vrot.lane.b32.xlu1 %v6647_v61, %s4227_s13  ;;  %v5013_v19 = vsel %vm1401_vm5, %v4876_v31, %v913_v16  ;;  %v3781_v31 = vunpack.c.l.bf16 %v3876_v59  ;;  %v2619_v45 = vpack.c.bf16 %v2599_v4, %v2598_v28  ;;  %v3853_v16 = vunpack.c.l.bf16 %v3893_v10  ;;  %v4170_v28 = vld [vmem:[%s6551_s4] sm:$0xff]  }
 0x105   : > { %6648 = vst [vmem:[#allocation13_spill] sm:$0xff] %v5013_v19  ;;  %1112 = vrot.lane.b32.xlu0 %v4367_v46, %s4226_s10  ;;  %v3854_v61 = vunpack.c.h.bf16 %v3893_v10  ;;  %v3794_v59 = vunpack.c.h.bf16 %v3879_v56  ;;  %v3857_v24 = vunpack.c.l.bf16 %v3894_v20  ;;  %v3858_v53 = vunpack.c.h.bf16 %v3894_v20  ;;  %v3896_v10 = vld [vmem:[%s4945_s29 + $0x78] sm:$0xff]   ;;  %4030 = vmatprep.subr.bf16.mxu1 %v4170_v28 }
 0x106   : > { %v919_v5 = vpop.permute.xlu1 %918  ;;  %4015 = vmatmul.mubr.msk.bf16.gmra.mrb[4].mxu1 %vm6598_vm7, %v2617_v1  ;;  %v2596_v55 = vadd.f32 %v3845_v50, %v3781_v31  ;;  %v3793_v1 = vunpack.c.l.bf16 %v3879_v56  ;;  %v3865_v20 = vunpack.c.l.bf16 %v3896_v10 }
 0x107   : > { %v5020_v41 = vsel %vm1401_vm5, %v4885_v62, %v919_v5  ;;  %v917_v7 = vpop.permute.xlu0 %916  ;;  %v4167_v5 = vld [vmem:[%s6550_s3] sm:$0xff]   ;;  %v2603_v34 = vadd.f32 %v3858_v53, %v3794_v59  ;;  %4031 = vmatpush3.bf16.msra.mxu1 %v4170_v28 }
 0x108   : > { %6649 = vst [vmem:[#allocation39_spill] sm:$0xff] %v5020_v41  ;;  %1174 = vrot.lane.b32.xlu1 %v5025_v6, %s4228_s14  ;;  %v5034_v62 = vsel %vm1401_vm5, %v4895_v14, %v917_v7  ;;  %v2618_v22 = vpack.c.bf16 %v2597_v47, %v2596_v55  ;;  %v5069_v7 = vld [vmem:[%s4293_s11 + $0x30] sm:$0xff]   ;;  %3954 = vmatprep.subr.bf16.mxu0 %v4167_v5 }
 0x109   : > { %6650 = vst [vmem:[#allocation40_spill] sm:$0xff] %v5034_v62  ;;  %1144 = vrot.lane.b32.xlu0 %v4522_v44, %s4227_s13  ;;  %v2602_v26 = vadd.f32 %v3857_v24, %v3793_v1  ;;  %3955 = vmatpush3.bf16.msra.mxu0 %v4167_v5  ;;  %v3866_v5 = vunpack.c.h.bf16 %v3896_v10  ;;  %v4171_v24 = vld [vmem:[%s6550_s3 + $0x18] sm:$0xff]  }
 0x10a   : > { %v923_v29 = vpop.permute.xlu1 %922  ;;  %4018 = vmatprep.mubr.msk.bf16.mxu1 %vm6598_vm7, %v2618_v22 }
 0x10b   : > { %v5040_v27 = vsel %vm1401_vm5, %v4905_v0, %v923_v29  ;;  %v921_v14 = vpop.permute.xlu0 %920  ;;  %v4168_v29 = vld [vmem:[%s6550_s3 + $0x8] sm:$0xff]   ;;  %v2621_v47 = vpack.c.bf16 %v2603_v34, %v2602_v26 }
 0x10c   : > { %6651 = vst [vmem:[#allocation41_spill] sm:$0xff] %v5040_v27  ;;  %1206 = vrot.lane.b32.xlu1 %v4367_v46, %s4229_s15  ;;  %v5046_v63 = vsel %vm1401_vm5, %v4913_v36, %v921_v14  ;;  %v3878_v46 = vld [vmem:[%s4939_s25 + $0x60] sm:$0xff]   ;;  %3956 = vmatprep.subr.bf16.mxu0 %v4168_v29  ;;  %v3880_v14 = vld [vmem:[%s4939_s25 + $0x70] sm:$0xff]  }
 0x10d   : > { %6652 = vst [vmem:[#allocation42_spill] sm:$0xff] %v5046_v63  ;;  %1176 = vrot.lane.b32.xlu0 %v5049_v52, %s4228_s14  ;;  %v3789_v36 = vunpack.c.l.bf16 %v3878_v46  ;;  %v3790_v51 = vunpack.c.h.bf16 %v3878_v46  ;;  %v3798_v4 = vunpack.c.h.bf16 %v3880_v14  ;;  %v3881_v46 = vld [vmem:[%s4939_s25 + $0x78] sm:$0xff]   ;;  %3957 = vmatpush3.bf16.msra.mxu0 %v4168_v29 }
 0x10e   : > { %v5053_v0 = vpop.permute.xlu1 %929  ;;  %4019 = vmatmul.mubr.msk.bf16.gmra.mrb[8].mxu1 %vm6598_vm7, %v2619_v45  ;;  %v3895_v45 = vld [vmem:[%s4945_s29 + $0x70] sm:$0xff]   ;;  %3958 = vmatprep.subr.bf16.mxu0 %v4169_v2  ;;  %v3802_v56 = vunpack.c.h.bf16 %v3881_v46 }
 0x10f   : > { %v5058_v49 = vpop.permute.xlu0 %927  ;;  %v2600_v40 = vadd.f32 %v3853_v16, %v3789_v36  ;;  %v2601_v50 = vadd.f32 %v3854_v61, %v3790_v51  ;;  %v3861_v36 = vunpack.c.l.bf16 %v3895_v45  ;;  %v3862_v51 = vunpack.c.h.bf16 %v3895_v45  ;;  %v4180_v45 = vld [vmem:[%s4293_s11 + $0x20] ss:$0 sps:$4 sm:$0x11]  }
 0x110   : > { %1208 = vrot.lane.b32.xlu1 %v4329_v23, %s4229_s15  ;;  %v3801_v16 = vunpack.c.l.bf16 %v3881_v46  ;;  %v2607_v26 = vadd.f32 %v3866_v5, %v3802_v56  ;;  %v1861_v46 = vshrl.u32 %v4180_v45, 16 }
 0x111   : > { %968 = vrot.lane.b32.xlu0 %v5069_v7, %s4223_s18  ;;  %v2620_v42 = vpack.c.bf16 %v2601_v50, %v2600_v40  ;;  %v2605_v59 = vadd.f32 %v3862_v51, %v3798_v4  ;;  %v4172_v40 = vld [vmem:[%s6551_s4 + $0x8] sm:$0xff]   ;;  %3959 = vmatpush3.bf16.msra.mxu0 %v4169_v2  ;;  %v4174_v2 = vld [vmem:[%s6551_s4 + $0x10] ss:$0 sps:$4 sm:$0x33]  }
 0x112   : > { %v5073_v31 = vpop.permute.xlu1 %933  ;;  %v2606_v53 = vadd.f32 %v3865_v20, %v3801_v16  ;;  %4032 = vmatprep.subr.bf16.mxu1 %v4172_v40  ;;  %3960 = vmatprep.subr.bf16.mxu0 %v4171_v24 }
 0x113   : > { %v5075_v8 = vpop.permute.xlu0 %931  ;;  %4022 = vmatprep.mubr.msk.bf16.mxu1 %vm6598_vm7, %v2620_v42  ;;  %4033 = vmatpush3.bf16.msra.mxu1 %v4172_v40 }
 0x114   : > { %970 = vrot.lane.b32.xlu1 %v5078_v32, %s4223_s18  ;;  %v2623_v29 = vpack.c.bf16 %v2607_v26, %v2606_v53  ;;  %4105 = vmatprep.subr.msk.bf16.mxu1 %vm2891_vm9, %v4174_v2  ;;  %v4181_v53 = vld [vmem:[%s4293_s11 + $0x2c] ss:$0 sps:$4 sm:$0x11]  }
 0x115   : > { %1238 = vrot.lane.b32.xlu0 %v4522_v44, %s4230_s26  ;;  %v3797_v44 = vunpack.c.l.bf16 %v3880_v14  ;;  %v5133_v14 = vld [vmem:[%s4293_s11 + $0x24] sm:$0xff]   ;;  %3961 = vmatpush3.bf16.msra.mxu0 %v4171_v24  ;;  %v1863_v26 = vshrl.u32 %v4181_v53, 16 }
 0x116   : > { %v5087_v55 = vpop.permute.xlu1 %937  ;;  %4023 = vmatmul.mubr.msk.bf16.gmra.mrb[12].mxu1 %vm6598_vm7, %v2621_v47  ;;  %v4173_v47 = vld [vmem:[%s6550_s3 + $0x20] ss:$0 sps:$4 sm:$0xff]  }
 0x117   : > { %v5097_v22 = vpop.permute.xlu0 %935  ;;  %v2604_v1 = vadd.f32 %v3861_v36, %v3797_v44  ;;  %4102 = vmatprep.subr.msk.bf16.mxu0 %vm2283_vm8, %v4173_v47  ;;  %v2285_v10 = vsel %vm2283_vm8, %v4173_v47, 0  ;;  %v2893_v36 = vsel %vm2891_vm9, %v4174_v2, 0  ;;  %vm1665_vm8 = vcmask 392192  }
 0x118   : > { %1240 = vrot.lane.b32.xlu1 %v4543_v11, %s4230_s26  ;;  %4035 = vmatpush3.bf16.msra.mxu1 %v2893_v36  ;;  %vm1698_vm9 = vcmask 424960  }
 0x119   : > { %1015 = vrot.lane.b32.xlu0 %v4395_v3, %s4224_s20  ;;  %v2622_v42 = vpack.c.bf16 %v2605_v59, %v2604_v1  ;;  %3963 = vmatpush3.bf16.msra.mxu0 %v2285_v10 }
 0x11a   : > { %v5107_v61 = vpop.permute.xlu1 %941  ;;  %4103 = vmatprep.subr.msk.bf16.mxu0 %vm2679_vm6, %v4965_v57  ;;  %vm1632_vm6 = vcmask 359424  }
 0x11b   : > { %6653 = vst [vmem:[#allocation43_spill] sm:$0xff] %v5107_v61  ;;  %v5115_v50 = vpop.permute.xlu0 %939  ;;  %4026 = vmatprep.mubr.msk.bf16.mxu1 %vm6598_vm7, %v2622_v42 }
 0x11c   : > { %6654 = vst [vmem:[#allocation44_spill] sm:$0xff] %v5115_v50  ;;  %1017 = vrot.lane.b32.xlu1 %v4380_v54, %s4224_s20 }
 0x11d   : > { %1270 = vrot.lane.b32.xlu0 %v5049_v52, %s4231_s30 }
 0x11e   : > { %v5121_v34 = vpop.permute.xlu1 %945  ;;  %4027 = vmatmul.mubr.msk.bf16.gmra.mrb[16].mxu1 %vm6598_vm7, %v2623_v29  ;;  %vm1731_vm7 = vcmask 457728  }
 0x11f   : > { %6655 = vst [vmem:[#allocation45_spill] sm:$0xff] %v5121_v34  ;;  %v5130_v28 = vpop.permute.xlu0 %943 }
 0x120   : > { %6656 = vst [vmem:[#allocation46_spill] sm:$0xff] %v5130_v28  ;;  %1272 = vrot.lane.b32.xlu1 %v5133_v14, %s4231_s30 }
 0x121   : > { %1050 = vrot.lane.b32.xlu0 %v4557_v39, %s4225_s21 }
 0x122   : > { %v1798_v44 = vpop.permute.xlu1 %1797 }
 0x123   : > { %v1895_v4 = vsel %vm1302_vm2, %v1798_v44, %v4329_v23  ;;  %v5143_v16 = vpop.permute.xlu0 %947 }
 0x124   : > { %v1991_v51 = vshll.u32 %v1895_v4, 16  ;;  %6657 = vst [vmem:[#allocation47_spill] sm:$0xff] %v5143_v16  ;;  %1052 = vrot.lane.b32.xlu1 %v4550_v18, %s4225_s21  ;;  %v1989_v1 = vshrl.u32 %v1895_v4, 16 }
 0x126   : > { %v1993_v56 = vrot.slane %v1991_v51, 1  ;;  %v1800_v20 = vpop.permute.xlu1 %1799 }
 0x127   : > { %v1898_v5 = vsel %vm1302_vm2, %v1800_v20, %v1861_v46  ;;  %v1802_v24 = vpop.permute.xlu0 %1801 }
 0x128   : > { %v1995_v59 = vshll.u32 %v1898_v5, 16  ;;  %v1901_v40 = vsel %vm1302_vm2, %v1802_v24, %v4353_v38  ;;  %v1994_v42 = vor.u32 %v1993_v56, %v1989_v1 }
 0x129   : > { %v2001_v47 = vshll.u32 %v1901_v40, 16  ;;  %v1999_v44 = vshrl.u32 %v1901_v40, 16 }
 0x12a   : > { %v1997_v29 = vrot.slane %v1995_v59, 1  ;;  %v1806_v2 = vpop.permute.xlu1 %1805 }
 0x12b   : > { %v2003_v45 = vrot.slane %v2001_v47, 1  ;;  %v1804_v10 = vpop.permute.xlu0 %1803  ;;  %v5195_v47 = vld [vmem:[%s4293_s11 + $0x48] sm:$0xff]  }
 0x12c   : > { %v1998_v36 = vsel %vm6602_vm0, %v1994_v42, %v1997_v29  ;;  %v1904_v57 = vsel %vm1302_vm2, %v1804_v10, %v1863_v26  ;;  %v1907_v10 = vsel %vm1302_vm2, %v1806_v2, %v4395_v3 }
 0x12d   : > { %2149 = vrot.lane.b32.xlu0 %v1998_v36, %s4232_s24  ;;  %v2005_v4 = vshll.u32 %v1904_v57, 16  ;;  %v2004_v51 = vor.u32 %v2003_v45, %v1999_v44  ;;  %v4183_v36 = vld [vmem:[%s4293_s11 + $0x38] ss:$0 sps:$4 sm:$0x11]   ;;  %v2009_v27 = vshrl.u32 %v1907_v10, 16 }
 0x12e   : > { %v1808_v46 = vpop.permute.xlu1 %1807 }
 0x12f   : > { %v2007_v20 = vrot.slane %v2005_v4, 1  ;;  %v1810_v5 = vpop.permute.xlu0 %1809  ;;  %v5213_v4 = vld [vmem:[%s4293_s11 + $0x54] sm:$0xff]  }
 0x131   : > { %1082 = vrot.lane.b32.xlu0 %v5049_v52, %s4225_s21  ;;  %v2008_v56 = vsel %vm6602_vm0, %v2004_v51, %v2007_v20  ;;  %v2011_v51 = vshll.u32 %v1907_v10, 16  ;;  %v6663_v10 = vld [vmem:[#allocation15_spill] sm:$0xff] }
 0x132   : > { %v5159_v1 = vpop.permute.xlu1 %1813  ;;  %2151 = vrot.lane.b32.xlu1 %v2008_v56, %s4232_s24 }
 0x133   : > { %v1812_v59 = vpop.permute.xlu0 %1811  ;;  %v2013_v30 = vrot.slane %v2011_v51, 1 }
 0x135   : > { %1084 = vrot.lane.b32.xlu0 %v5133_v14, %s4225_s21 }
 0x136   : > { %v5164_v24 = vpop.permute.xlu1 %1815  ;;  %1114 = vrot.lane.b32.xlu1 %v4329_v23, %s4226_s10 }
 0x137   : > { %v5168_v40 = vpop.permute.xlu0 %1817 }
 0x139   : > { %1116 = vrot.lane.b32.xlu0 %v4353_v38, %s4226_s10 }
 0x13a   : > { %v5172_v53 = vpop.permute.xlu1 %1821  ;;  %1146 = vrot.lane.b32.xlu1 %v4543_v11, %s4227_s13 }
 0x13b   : > { %v5176_v26 = vpop.permute.xlu0 %1819 }
 0x13d   : > { %1148 = vrot.lane.b32.xlu0 %v4536_v58, %s4227_s13 }
 0x13e   : > { %v5180_v42 = vpop.permute.xlu1 %1823  ;;  %1178 = vrot.lane.b32.xlu1 %v5133_v14, %s4228_s14 }
 0x13f   : > { %v5184_v23 = vpop.permute.xlu0 %1825 }
 0x141   : > { %1180 = vrot.lane.b32.xlu0 %v5069_v7, %s4228_s14 }
 0x142   : > { %v5188_v29 = vpop.permute.xlu1 %1829  ;;  %1210 = vrot.lane.b32.xlu1 %v4353_v38, %s4229_s15  ;;  %v1865_v38 = vshrl.u32 %v4183_v36, 16  ;;  %v4185_v36 = vld [vmem:[%s4293_s11 + $0x44] ss:$0 sps:$4 sm:$0x11]  }
 0x143   : > { %v5192_v11 = vpop.permute.xlu0 %1827  ;;  %v1867_v63 = vshrl.u32 %v4185_v36, 16 }
 0x144   : > { %v1910_v56 = vsel %vm1302_vm2, %v1808_v46, %v1865_v38 }
 0x145   : > { %972 = vrot.lane.b32.xlu0 %v5195_v47, %s4223_s18  ;;  %v2015_v19 = vshll.u32 %v1910_v56, 16  ;;  %v1916_v41 = vsel %vm1302_vm2, %v1812_v59, %v1867_v63  ;;  %v6666_v59 = vld [vmem:[#allocation14_spill] sm:$0xff] }
 0x146   : > { %v5199_v44 = vpop.permute.xlu1 %1831  ;;  %1212 = vrot.lane.b32.xlu1 %v4395_v3, %s4229_s15  ;;  %v2025_v60 = vshll.u32 %v1916_v41, 16 }
 0x147   : > { %v5203_v45 = vpop.permute.xlu0 %1833  ;;  %v2017_v36 = vrot.slane %v2015_v19, 1 }
 0x148   : > { %v2027_v19 = vrot.slane %v2025_v60, 1 }
 0x149   : > { %1242 = vrot.lane.b32.xlu0 %v4536_v58, %s4230_s26  ;;  %v1913_v58 = vsel %vm1302_vm2, %v1810_v5, %v4380_v54  ;;  %v2014_v5 = vor.u32 %v2013_v30, %v2009_v27 }
 0x14a   : > { %v5210_v57 = vpop.permute.xlu1 %1837  ;;  %974 = vrot.lane.b32.xlu1 %v5213_v4, %s4223_s18  ;;  %v2021_v46 = vshll.u32 %v1913_v58, 16  ;;  %v2019_v51 = vshrl.u32 %v1913_v58, 16 }
 0x14b   : > { %6658 = vst [vmem:[#allocation48_spill] sm:$0xff] %v5210_v57  ;;  %v5217_v20 = vpop.permute.xlu0 %1835  ;;  %v2018_v63 = vsel %vm6602_vm0, %v2014_v5, %v2017_v36 }
 0x14c   : > { %v2023_v56 = vrot.slane %v2021_v46, 1 }
 0x14d   : > { %1019 = vrot.lane.b32.xlu0 %v4421_v25, %s4224_s20 }
 0x14e   : > { %v5222_v2 = vpop.permute.xlu1 %1839  ;;  %1244 = vrot.lane.b32.xlu1 %v4557_v39, %s4230_s26  ;;  %v2024_v30 = vor.u32 %v2023_v56, %v2019_v51 }
 0x14f   : > { %6659 = vst [vmem:[#allocation49_spill] sm:$0xff] %v5222_v2  ;;  %v5229_v16 = vpop.permute.xlu0 %1841 }
 0x150   : > { %6660 = vst [vmem:[#allocation50_spill] sm:$0xff] %v5229_v16  ;;  %v2028_v41 = vsel %vm6602_vm0, %v2024_v30, %v2027_v19  ;;  %v5297_v30 = vld [vmem:[%s4293_s11 + $0x60] sm:$0xff]  }
 0x151   : > { %1274 = vrot.lane.b32.xlu0 %v5069_v7, %s4231_s30 }
 0x152   : > { %v5233_v38 = vpop.permute.xlu1 %1845  ;;  %1021 = vrot.lane.b32.xlu1 %v4406_v15, %s4224_s20 }
 0x153   : > { %6661 = vst [vmem:[#allocation51_spill] sm:$0xff] %v5233_v38  ;;  %v5238_v62 = vpop.permute.xlu0 %1843 }
 0x154   : > { %6662 = vst [vmem:[#allocation52_spill] sm:$0xff] %v5238_v62 }
 0x155   : > { %1054 = vrot.lane.b32.xlu0 %v6663_v10, %s4225_s21 }
 0x156   : > { %v5242_v34 = vpop.permute.xlu1 %1847  ;;  %1276 = vrot.lane.b32.xlu1 %v5078_v32, %s4231_s30 }
 0x157   : > { %6664 = vst [vmem:[#allocation15_spill] sm:$0xff] %v5242_v34  ;;  %v5246_v37 = vpop.permute.xlu0 %1849 }
 0x158   : > { %6665 = vst [vmem:[#allocation53_spill] sm:$0xff] %v5246_v37  ;;  %v4189_v37 = vld [vmem:[%s4293_s11 + $0x5c] ss:$0 sps:$4 sm:$0x11]  }
 0x159   : > { %2153 = vrot.lane.b32.xlu0 %v2018_v63, %s4232_s24  ;;  %v1871_v34 = vshrl.u32 %v4189_v37, 16 }
 0x15a   : > { %v5250_v27 = vpop.permute.xlu1 %964  ;;  %1056 = vrot.lane.b32.xlu1 %v6666_v59, %s4225_s21 }
 0x15b   : > { %v5254_v58 = vpop.permute.xlu0 %1851  ;;  %v1928_v50 = vsel %vm1302_vm2, %v5176_v26, %v1871_v34 }
 0x15c   : > { %6667 = vst [vmem:[#allocation14_spill] sm:$0xff] %v5254_v58  ;;  %v2045_v2 = vshll.u32 %v1928_v50, 16 }
 0x15d   : > { %1086 = vrot.lane.b32.xlu0 %v5069_v7, %s4225_s21 }
 0x15e   : > { %v5259_v46 = vpop.permute.xlu1 %966  ;;  %2155 = vrot.lane.b32.xlu1 %v2028_v41, %s4232_s24  ;;  %v1919_v41 = vsel %vm1302_vm2, %v5159_v1, %v4421_v25  ;;  %v6672_v1 = vld [vmem:[#allocation6_spill] sm:$0xff] }
 0x15f   : > { %v5262_v5 = vpop.permute.xlu0 %1853  ;;  %v2029_v38 = vshrl.u32 %v1919_v41, 16 }
 0x160   : > { %6668 = vst [vmem:[#allocation54_spill] sm:$0xff] %v5262_v5  ;;  %v2031_v5 = vshll.u32 %v1919_v41, 16 }
 0x161   : > { %1088 = vrot.lane.b32.xlu0 %v5078_v32, %s4225_s21 }
 0x162   : > { %v5266_v60 = vpop.permute.xlu1 %1857  ;;  %1118 = vrot.lane.b32.xlu1 %v4395_v3, %s4226_s10  ;;  %v2033_v21 = vrot.slane %v2031_v5, 1 }
 0x163   : > { %6669 = vst [vmem:[#allocation55_spill] sm:$0xff] %v5266_v60  ;;  %v5270_v36 = vpop.permute.xlu0 %1011  ;;  %v5316_v60 = vld [vmem:[%s4293_s11 + $0x6c] sm:$0xff]  }
 0x164   : > { %v2034_v37 = vor.u32 %v2033_v21, %v2029_v38  ;;  %v6675_v38 = vld [vmem:[#allocation16_spill] sm:$0xff] }
 0x165   : > { %1120 = vrot.lane.b32.xlu0 %v4380_v54, %s4226_s10 }
 0x166   : > { %v5274_v7 = vpop.permute.xlu1 %1046  ;;  %1150 = vrot.lane.b32.xlu1 %v4557_v39, %s4227_s13 }
 0x167   : > { %v5278_v51 = vpop.permute.xlu0 %1013 }
 0x169   : > { %1152 = vrot.lane.b32.xlu0 %v4550_v18, %s4227_s13 }
 0x16a   : > { %v5282_v56 = vpop.permute.xlu1 %1048  ;;  %1182 = vrot.lane.b32.xlu1 %v5078_v32, %s4228_s14 }
 0x16b   : > { %v5286_v3 = vpop.permute.xlu0 %1855 }
 0x16c   : > { %6670 = vst [vmem:[#allocation56_spill] sm:$0xff] %v5286_v3 }
 0x16d   : > { %1184 = vrot.lane.b32.xlu0 %v5195_v47, %s4228_s14 }
 0x16e   : > { %v5290_v63 = vpop.permute.xlu1 %1859  ;;  %1214 = vrot.lane.b32.xlu1 %v4380_v54, %s4229_s15  ;;  %v4187_v54 = vld [vmem:[%s4293_s11 + $0x50] ss:$0 sps:$4 sm:$0x11]  }
 0x16f   : > { %6671 = vst [vmem:[#allocation57_spill] sm:$0xff] %v5290_v63  ;;  %v5294_v39 = vpop.permute.xlu0 %1078  ;;  %v1869_v63 = vshrl.u32 %v4187_v54, 16 }
 0x171   : > { %976 = vrot.lane.b32.xlu0 %v5297_v30, %s4223_s18  ;;  %v1922_v58 = vsel %vm1302_vm2, %v5164_v24, %v1869_v63 }
 0x172   : > { %v5301_v19 = vpop.permute.xlu1 %1110  ;;  %1216 = vrot.lane.b32.xlu1 %v4421_v25, %s4229_s15  ;;  %v2035_v61 = vshll.u32 %v1922_v58, 16  ;;  %v6674_v58 = vld [vmem:[#allocation17_spill] sm:$0xff] }
 0x173   : > { %v5305_v32 = vpop.permute.xlu0 %1080 }
 0x174   : > { %v2037_v62 = vrot.slane %v2035_v61, 1  ;;  %v2047_v61 = vrot.slane %v2045_v2, 1  ;;  %v4190_v2 = vld [vmem:[%s4293_s11] sm:$0xff]  }
 0x175   : > { %1246 = vrot.lane.b32.xlu0 %v4550_v18, %s4230_s26  ;;  %v1925_v18 = vsel %vm1302_vm2, %v5168_v40, %v4406_v15  ;;  %v6673_v40 = vld [vmem:[#allocation4_spill] sm:$0xff] }
 0x176   : > { %v5313_v3 = vpop.permute.xlu1 %1142  ;;  %978 = vrot.lane.b32.xlu1 %v5316_v60, %s4223_s18  ;;  %v2041_v24 = vshll.u32 %v1925_v18, 16  ;;  %v2039_v5 = vshrl.u32 %v1925_v18, 16  ;;  %v2038_v26 = vsel %vm6602_vm0, %v2034_v37, %v2037_v62 }
 0x177   : > { %v5320_v28 = vpop.permute.xlu0 %1112 }
 0x178   : > { %v2043_v41 = vrot.slane %v2041_v24, 1 }
 0x179   : > { %1023 = vrot.lane.b32.xlu0 %v6672_v1, %s4224_s20 }
 0x17a   : > { %v5326_v54 = vpop.permute.xlu1 %1174  ;;  %1248 = vrot.lane.b32.xlu1 %v6663_v10, %s4230_s26  ;;  %v2044_v21 = vor.u32 %v2043_v41, %v2039_v5  ;;  %v6676_v5 = vld [vmem:[#allocation25_spill] sm:$0xff] }
 0x17b   : > { %v5334_v13 = vpop.permute.xlu0 %1144  ;;  %v1304_v41 = vsel %vm1302_vm2, %v4190_v2, %v6676_v5 }
 0x17c   : > { %v2048_v24 = vsel %vm6602_vm0, %v2044_v21, %v2047_v61  ;;  %v6678_v21 = vld [vmem:[#allocation34_spill] sm:$0xff] }
 0x17d   : > { %1278 = vrot.lane.b32.xlu0 %v5195_v47, %s4231_s30 }
 0x17e   : > { %v5338_v63 = vpop.permute.xlu1 %1206  ;;  %1025 = vrot.lane.b32.xlu1 %v6673_v40, %s4224_s20 }
 0x17f   : > { %v5344_v16 = vpop.permute.xlu0 %1176 }
 0x181   : > { %1058 = vrot.lane.b32.xlu0 %v6674_v58, %s4225_s21 }
 0x182   : > { %1280 = vrot.lane.b32.xlu1 %v5213_v4, %s4231_s30  ;;  %v5350_v57 = vpop.permute.xlu1 %1208 }
 0x183   : > { %v5352_v34 = vpop.permute.xlu0 %968 }
 0x185   : > { %2157 = vrot.lane.b32.xlu0 %v2038_v26, %s4232_s24 }
 0x186   : > { %1060 = vrot.lane.b32.xlu1 %v6675_v38, %s4225_s21  ;;  %v5358_v18 = vpop.permute.xlu1 %970 }
 0x187   : > { %v1239_v50 = vpop.permute.xlu0 %1238 }
 0x189   : > { %1090 = vrot.lane.b32.xlu0 %v5195_v47, %s4225_s21  ;;  %v6677_v47 = vld [vmem:[#allocation30_spill] sm:$0xff] }
 0x18a   : > { %2159 = vrot.lane.b32.xlu1 %v2048_v24, %s4232_s24  ;;  %v5366_v62 = vpop.permute.xlu1 %1240  ;;  %v1337_v26 = vsel %vm1335_vm3, %v1304_v41, %v6677_v47  ;;  %v6679_v47 = vld [vmem:[#allocation27_spill] sm:$0xff] }
 0x18b   : > { %v5368_v37 = vpop.permute.xlu0 %1015  ;;  %v1370_v61 = vsel %vm1368_vm4, %v1337_v26, %v6678_v21 }
 0x18d   : > { %1092 = vrot.lane.b32.xlu0 %v5213_v4, %s4225_s21 }
 0x18e   : > { %1122 = vrot.lane.b32.xlu1 %v4421_v25, %s4226_s10  ;;  %v1403_v25 = vsel %vm1401_vm5, %v1370_v61, %v4919_v35  ;;  %v5387_v2 = vpop.permute.xlu1 %1017 }
 0x18f   : > { %v1436_v24 = vsel %vm6600_vm10, %v1403_v25, %v5058_v49  ;;  %v1271_v5 = vpop.permute.xlu0 %1270  ;;  %v6680_v49 = vld [vmem:[#allocation29_spill] sm:$0xff] }
 0x190   : > { %v1469_v41 = vsel %vm6601_vm11, %v1436_v24, %v5250_v27  ;;  %v6681_v27 = vld [vmem:[#allocation33_spill] sm:$0xff] }
 0x191   : > { %1124 = vrot.lane.b32.xlu0 %v4406_v15, %s4226_s10  ;;  %v1502_v35 = vsel %vm1500_vm12, %v1469_v41, %v5270_v36  ;;  %v5431_v41 = vld [vmem:[%s4293_s11 + $0x78] sm:$0xff]  }
 0x192   : > { %1154 = vrot.lane.b32.xlu1 %v6663_v10, %s4227_s13  ;;  %v1306_v10 = vsel %vm1302_vm2, %v5025_v6, %v6679_v47  ;;  %v1535_v21 = vsel %vm1533_vm13, %v1502_v35, %v5274_v7 }
 0x193   : > { %v1339_v26 = vsel %vm1335_vm3, %v1306_v10, %v6680_v49  ;;  %v1568_v6 = vsel %vm1566_vm14, %v1535_v21, %v5294_v39  ;;  %v1273_v39 = vpop.permute.xlu1 %1272  ;;  %v5418_v24 = vpop.permute.xlu0 %1050 }
 0x194   : > { %v1372_v61 = vsel %vm1368_vm4, %v1339_v26, %v6681_v27  ;;  %v1601_v36 = vsel %vm1599_vm15, %v1568_v6, %v5301_v19  ;;  %v1937_v6 = vsel %vm1302_vm2, %v5184_v23, %v6673_v40 }
 0x195   : > { %1156 = vrot.lane.b32.xlu0 %v6666_v59, %s4227_s13  ;;  %v1634_v25 = vsel %vm1632_vm6, %v1601_v36, %v5313_v3  ;;  %v2061_v23 = vshll.u32 %v1937_v6, 16 }
 0x196   : > { %1186 = vrot.lane.b32.xlu1 %v5213_v4, %s4228_s14  ;;  %v1405_v4 = vsel %vm1401_vm5, %v1372_v61, %v4917_v43  ;;  %v1667_v19 = vsel %vm1665_vm8, %v1634_v25, %v5326_v54  ;;  %v6682_v61 = vld [vmem:[#allocation8_spill] sm:$0xff] }
 0x197   : > { %v1438_v7 = vsel %vm6600_vm10, %v1405_v4, %v5053_v0  ;;  %v1700_v3 = vsel %vm1698_vm9, %v1667_v19, %v5338_v63  ;;  %vm2181_vm10 = vcmask 523264   ;;  %v5452_v49 = vpop.permute.xlu1 %1052  ;;  %v4194_v4 = vld [vmem:[%s4293_s11 + $0x74] ss:$0 sps:$4 sm:$0x11]   ;;  %v6683_v19 = vld [vmem:[#allocation7_spill] sm:$0xff] }
 0x198   : > { %v1471_v43 = vsel %vm6601_vm11, %v1438_v7, %v5259_v46  ;;  %v1733_v46 = vsel %vm1731_vm7, %v1700_v3, %v1239_v50  ;;  %vm6603_vm11 = vcmask 588800   ;;  %v4192_v50 = vld [vmem:[%s4293_s11 + $0x68] ss:$0 sps:$4 sm:$0x11]   ;;  %v1875_v36 = vshrl.u32 %v4194_v4, 16  ;;  %v6688_v4 = vld [vmem:[#allocation36_spill] sm:$0xff] }
 0x199   : > { %1188 = vrot.lane.b32.xlu0 %v5297_v30, %s4228_s14  ;;  %v1504_v0 = vsel %vm1500_vm12, %v1471_v43, %v5278_v51  ;;  %v1766_v51 = vsel %vm1764_vm1, %v1733_v46, %v1271_v5  ;;  %v1873_v35 = vshrl.u32 %v4192_v50, 16  ;;  %v5463_v5 = vld [vmem:[%s4293_s11 + $0x84] sm:$0xff]  }
 0x19a   : > { %1218 = vrot.lane.b32.xlu1 %v4406_v15, %s4229_s15  ;;  %v1537_v15 = vsel %vm1533_vm13, %v1504_v0, %v5282_v56  ;;  %v1931_v56 = vsel %vm1302_vm2, %v5172_v53, %v6672_v1  ;;  %v1940_v43 = vsel %vm1302_vm2, %v5192_v11, %v1875_v36 }
 0x19b   : > { %v1570_v54 = vsel %vm1566_vm14, %v1537_v15, %v5305_v32  ;;  %v2051_v26 = vshll.u32 %v1931_v56, 16  ;;  %v1934_v21 = vsel %vm1302_vm2, %v5180_v42, %v1873_v35  ;;  %v6685_v35 = vld [vmem:[#allocation18_spill] sm:$0xff] }
 0x19c   : > { %v1603_v47 = vsel %vm1599_vm15, %v1570_v54, %v5320_v28  ;;  %v2055_v25 = vshll.u32 %v1934_v21, 16  ;;  %v6684_v54 = vld [vmem:[#allocation19_spill] sm:$0xff] }
 0x19d   : > { %980 = vrot.lane.b32.xlu0 %v5431_v41, %s4223_s18  ;;  %v1636_v32 = vsel %vm1632_vm6, %v1603_v47, %v5334_v13  ;;  %v2053_v7 = vrot.slane %v2051_v26, 1 }
 0x19e   : > { %1220 = vrot.lane.b32.xlu1 %v6672_v1, %s4229_s15  ;;  %v1669_v28 = vsel %vm1665_vm8, %v1636_v32, %v5344_v16  ;;  %v2057_v15 = vrot.slane %v2055_v25, 1 }
 0x19f   : > { %v2150_v63 = vpop.permute.xlu0 %2149  ;;  %v1702_v53 = vsel %vm1698_vm9, %v1669_v28, %v5350_v57 }
 0x1a0   : > { %v2183_v10 = vsel %vm2181_vm10, %v1766_v51, %v2150_v63  ;;  %v2063_v51 = vrot.slane %v2061_v23, 1  ;;  %v2065_v63 = vshll.u32 %v1940_v43, 16  ;;  %v6691_v23 = vld [vmem:[#allocation26_spill] sm:$0xff] }
 0x1a1   : > { %1250 = vrot.lane.b32.xlu0 %v6666_v59, %s4230_s26  ;;  %3964 = vmatprep.mubr.msk.bf16.mxu0 %vm6603_vm11, %v2183_v10  ;;  %v1735_v59 = vsel %vm1731_vm7, %v1702_v53, %v5366_v62  ;;  %v2049_v62 = vshrl.u32 %v1931_v56, 16  ;;  %v1310_v43 = vsel %vm1302_vm2, %v5133_v14, %v6691_v23  ;;  %v4198_v23 = vld [vmem:[%s4293_s11 + $0x8c] ss:$0 sps:$4 sm:$0x11]  }
 0x1a2   : > { %4036 = vmatprep.mubr.msk.bf16.mxu1 %vm1566_vm14, %v2183_v10  ;;  %982 = vrot.lane.b32.xlu1 %v5463_v5, %s4223_s18  ;;  %v1768_v16 = vsel %vm1764_vm1, %v1735_v59, %v1273_v39  ;;  %v2067_v50 = vrot.slane %v2065_v63, 1 }
 0x1a3   : > { %v5467_v13 = vpop.permute.xlu0 %1082  ;;  %v2054_v3 = vor.u32 %v2053_v7, %v2049_v62 }
 0x1a4   : > { %v2152_v27 = vpop.permute.xlu1 %2151 }
 0x1a5   : > { %1027 = vrot.lane.b32.xlu0 %v6682_v61, %s4224_s20  ;;  %v2185_v57 = vsel %vm2181_vm10, %v1768_v16, %v2152_v27  ;;  %v2058_v11 = vsel %vm6602_vm0, %v2054_v3, %v2057_v15  ;;  %v6686_v16 = vld [vmem:[#allocation24_spill] sm:$0xff]  ;;  %v6692_v3 = vld [vmem:[#allocation31_spill] sm:$0xff] }
 0x1a6   : > { %1252 = vrot.lane.b32.xlu1 %v6674_v58, %s4230_s26  ;;  %3965 = vmatmul.mubr.msk.bf16.vlgmr.msra.gmra.mrb[0].mxu0 %vm6603_vm11, %v2185_v57  ;;  %v1308_v27 = vsel %vm1302_vm2, %v5049_v52, %v6686_v16  ;;  %vm6690_vm11 = vcmask 195584  }
 0x1a7   : > { %v5484_v42 = vpop.permute.xlu0 %1084  ;;  %4037 = vmatmul.mubr.msk.bf16.vlgmr.msra.gmra.mrb[20].mxu1 %vm1566_vm14, %v2185_v57  ;;  %3997 = vmatpush3.bf16.msra.mxu0 %v4977_v9  ;;  %v2059_v9 = vshrl.u32 %v1937_v6, 16 }
 0x1a8   : > { %v1115_v39 = vpop.permute.xlu1 %1114 }
 0x1a9   : > { %1282 = vrot.lane.b32.xlu0 %v5297_v30, %s4231_s30  ;;  %v2064_v56 = vor.u32 %v2063_v51, %v2059_v9  ;;  %v6693_v9 = vld [vmem:[#allocation35_spill] sm:$0xff] }
 0x1aa   : > { %1029 = vrot.lane.b32.xlu1 %v6683_v19, %s4224_s20 }
 0x1ab   : > { %v5494_v0 = vpop.permute.xlu0 %1116  ;;  %v2068_v53 = vsel %vm6602_vm0, %v2064_v56, %v2067_v50  ;;  %vm6689_vm0 = vcmask 162816  }
 0x1ac   : > { %v1147_v46 = vpop.permute.xlu1 %1146 }
 0x1ad   : > { %1062 = vrot.lane.b32.xlu0 %v6684_v54, %s4225_s21 }
 0x1ae   : > { %1284 = vrot.lane.b32.xlu1 %v5316_v60, %s4231_s30 }
 0x1af   : > { %v1149_v47 = vpop.permute.xlu0 %1148 }
 0x1b0   : > { %v1179_v10 = vpop.permute.xlu1 %1178 }
 0x1b1   : > { %2161 = vrot.lane.b32.xlu0 %v2058_v11, %s4232_s24 }
 0x1b2   : > { %1064 = vrot.lane.b32.xlu1 %v6685_v35, %s4225_s21 }
 0x1b3   : > { %v1181_v32 = vpop.permute.xlu0 %1180 }
 0x1b4   : > { %v1211_v28 = vpop.permute.xlu1 %1210 }
 0x1b5   : > { %1094 = vrot.lane.b32.xlu0 %v5297_v30, %s4225_s21  ;;  %v6687_v30 = vld [vmem:[#allocation32_spill] sm:$0xff] }
 0x1b6   : > { %2163 = vrot.lane.b32.xlu1 %v2068_v53, %s4232_s24  ;;  %v1341_v6 = vsel %vm1335_vm3, %v1308_v27, %v6687_v30  ;;  %v5581_v53 = vld [vmem:[%s4293_s11 + $0x90] sm:$0xff]   ;;  %v4196_v27 = vld [vmem:[%s4293_s11 + $0x80] ss:$0 sps:$4 sm:$0x11]  }
 0x1b7   : > { %v5508_v26 = vpop.permute.xlu0 %972  ;;  %v1374_v36 = vsel %vm1368_vm4, %v1341_v6, %v6688_v4  ;;  %v1877_v30 = vshrl.u32 %v4196_v27, 16 }
 0x1b8   : > { %v1213_v59 = vpop.permute.xlu1 %1212  ;;  %v1407_v62 = vsel %vm1401_vm5, %v1374_v36, %v4927_v48 }
 0x1b9   : > { %1096 = vrot.lane.b32.xlu0 %v5316_v60, %s4225_s21  ;;  %v1440_v52 = vsel %vm6689_vm0, %v1407_v62, %v5075_v8  ;;  %v1343_v8 = vsel %vm1335_vm3, %v1310_v43, %v6692_v3  ;;  %vm6694_vm3 = vmmov %vm6690_vm11  ;;  %v5608_v62 = vld [vmem:[%s4293_s11 + $0x9c] sm:$0xff]   ;;  %v1879_v43 = vshrl.u32 %v4198_v23, 16  ;;  %v5713_v23 = vld [vmem:[%s4293_s11 + $0xa8] sm:$0xff]  }
 0x1ba   : > { %1126 = vrot.lane.b32.xlu1 %v6672_v1, %s4226_s10  ;;  %v1473_v25 = vsel %vm6690_vm11, %v1440_v52, %v5352_v34  ;;  %v1376_v34 = vsel %vm1368_vm4, %v1343_v8, %v6693_v9  ;;  %vm6696_vm4 = vcmask 588800   ;;  %vm6700_vm11 = vsmask.f32 7424 }
 0x1bb   : > { %v1243_v21 = vpop.permute.xlu0 %1242  ;;  %v1952_v9 = vsel %vm1302_vm2, %v5217_v20, %v1879_v43 }
 0x1bc   : > { %v5517_v57 = vpop.permute.xlu1 %974 }
 0x1bd   : > { %1128 = vrot.lane.b32.xlu0 %v6673_v40, %s4226_s10 }
 0x1be   : > { %1158 = vrot.lane.b32.xlu1 %v6674_v58, %s4227_s13  ;;  %v1506_v58 = vsel %vm1500_vm12, %v1473_v25, %v5368_v37  ;;  %v1949_v25 = vsel %vm1302_vm2, %v5203_v45, %v6683_v19  ;;  %v6699_v45 = vld [vmem:[#allocation9_spill] sm:$0xff] }
 0x1bf   : > { %v5527_v1 = vpop.permute.xlu0 %1019  ;;  %v1539_v15 = vsel %vm1533_vm13, %v1506_v58, %v5418_v24 }
 0x1c0   : > { %v1245_v7 = vpop.permute.xlu1 %1244  ;;  %v1572_v51 = vsel %vm1566_vm14, %v1539_v15, %v5467_v13  ;;  %v2081_v15 = vshll.u32 %v1949_v25, 16 }
 0x1c1   : > { %1160 = vrot.lane.b32.xlu0 %v6675_v38, %s4227_s13  ;;  %v1605_v37 = vsel %vm1599_vm15, %v1572_v51, %v1115_v39 }
 0x1c2   : > { %1190 = vrot.lane.b32.xlu1 %v5316_v60, %s4228_s14  ;;  %v1409_v60 = vsel %vm1401_vm5, %v1376_v34, %v4925_v12  ;;  %v1638_v63 = vsel %vm1632_vm6, %v1605_v37, %v1147_v46  ;;  %vm6698_vm5 = vmmov %vm6696_vm4 }
 0x1c3   : > { %v1275_v48 = vpop.permute.xlu0 %1274  ;;  %v1442_v24 = vsel %vm6689_vm0, %v1409_v60, %v5073_v31  ;;  %v1671_v56 = vsel %vm1665_vm8, %v1638_v63, %v1179_v10  ;;  %v6695_v31 = vld [vmem:[#allocation21_spill] sm:$0xff]  ;;  %v2083_v63 = vrot.slane %v2081_v15, 1  ;;  %vm6702_vm0 = vmmov %vm6700_vm11 }
 0x1c4   : > { %v5552_v14 = vpop.permute.xlu1 %1021  ;;  %v1475_v11 = vsel %vm6694_vm3, %v1442_v24, %v5358_v18  ;;  %v1704_v39 = vsel %vm1698_vm9, %v1671_v56, %v1211_v28  ;;  %v2079_v24 = vshrl.u32 %v1949_v25, 16  ;;  %vm6703_vm3 = vcmask 162816  }
 0x1c5   : > { %1192 = vrot.lane.b32.xlu0 %v5431_v41, %s4228_s14  ;;  %v1508_v12 = vsel %vm1500_vm12, %v1475_v11, %v5387_v2  ;;  %v2085_v11 = vshll.u32 %v1952_v9, 16  ;;  %v4200_v9 = vld [vmem:[%s4293_s11 + $0x98] ss:$0 sps:$4 sm:$0x11]  }
 0x1c6   : > { %1222 = vrot.lane.b32.xlu1 %v6673_v40, %s4229_s15  ;;  %v1541_v46 = vsel %vm1533_vm13, %v1508_v12, %v5452_v49  ;;  %v1737_v40 = vsel %vm1731_vm7, %v1704_v39, %v1243_v21  ;;  %v2084_v39 = vor.u32 %v2083_v63, %v2079_v24  ;;  %v6711_v63 = vld [vmem:[#allocation49_spill] sm:$0xff] }
 0x1c7   : > { %v5564_v13 = vpop.permute.xlu0 %1054  ;;  %v1574_v18 = vsel %vm1566_vm14, %v1541_v46, %v5484_v42  ;;  %v1770_v10 = vsel %vm1764_vm1, %v1737_v40, %v1275_v48  ;;  %v6701_v40 = vld [vmem:[#allocation20_spill] sm:$0xff] }
 0x1c8   : > { %v1277_v50 = vpop.permute.xlu1 %1276  ;;  %v1607_v28 = vsel %vm1599_vm15, %v1574_v18, %v5494_v0  ;;  %v1943_v0 = vsel %vm1302_vm2, %v5188_v29, %v6682_v61 }
 0x1c9   : > { %949 = vrot.lane.b32.xlu0 %v6695_v31, %s4221_s16  ;;  %v1640_v49 = vsel %vm1632_vm6, %v1607_v28, %v1149_v47  ;;  %v2071_v29 = vshll.u32 %v1943_v0, 16 }
 0x1ca   : > { %984 = vrot.lane.b32.xlu1 %v5581_v53, %s4223_s18  ;;  %v1673_v42 = vsel %vm1665_vm8, %v1640_v49, %v1181_v32  ;;  %v1444_v49 = vsel %vm6703_vm3, %v4960_v17, %v5097_v22 }
 0x1cb   : > { %v2154_v2 = vpop.permute.xlu0 %2153  ;;  %v1706_v6 = vsel %vm1698_vm9, %v1673_v42, %v1213_v59  ;;  %v1946_v59 = vsel %vm1302_vm2, %v5199_v44, %v1877_v30  ;;  %v2069_v44 = vshrl.u32 %v1943_v0, 16  ;;  %v2073_v48 = vrot.slane %v2071_v29, 1 }
 0x1cc   : > { %v2187_v16 = vsel %vm2181_vm10, %v1770_v10, %v2154_v2  ;;  %v5589_v21 = vpop.permute.xlu1 %1056  ;;  %v1739_v4 = vsel %vm1731_vm7, %v1706_v6, %v1245_v7  ;;  %v2075_v3 = vshll.u32 %v1946_v59, 16 }
 0x1cd   : > { %1224 = vrot.lane.b32.xlu0 %v6682_v61, %s4229_s15  ;;  %3968 = vmatprep.mubr.msk.bf16.mxu0 %vm6696_vm4, %v2187_v16  ;;  %v1772_v32 = vsel %vm1764_vm1, %v1739_v4, %v1277_v50  ;;  %v2074_v51 = vor.u32 %v2073_v48, %v2069_v44  ;;  %v2087_v50 = vrot.slane %v2085_v11, 1  ;;  %vm6704_vm4 = vcmask 195584  }
 0x1ce   : > { %4040 = vmatprep.mubr.msk.bf16.mxu1 %vm1566_vm14, %v2187_v16  ;;  %1254 = vrot.lane.b32.xlu1 %v6675_v38, %s4230_s26  ;;  %v6697_v38 = vld [vmem:[#allocation10_spill] sm:$0xff]  ;;  %v2077_v60 = vrot.slane %v2075_v3, 1  ;;  %v1477_v0 = vsel %vm6704_vm4, %v1444_v49, %v5508_v26 }
 0x1cf   : > { %v5603_v47 = vpop.permute.xlu0 %1086  ;;  %v2088_v10 = vsel %vm6702_vm0, %v2084_v39, %v2087_v50  ;;  %v1510_v27 = vsel %vm1500_vm12, %v1477_v0, %v5527_v1  ;;  %vm6708_vm0 = vcmask 588800   ;;  %v4202_v39 = vld [vmem:[%s4293_s11 + $0xa4] ss:$0 sps:$4 sm:$0x11]   ;;  %v6714_v0 = vld [vmem:[#allocation52_spill] sm:$0xff] }
 0x1d0   : > { %v2156_v36 = vpop.permute.xlu1 %2155  ;;  %v2078_v12 = vsel %vm6700_vm11, %v2074_v51, %v2077_v60  ;;  %v1543_v30 = vsel %vm1533_vm13, %v1510_v27, %v5564_v13  ;;  %vm6706_vm11 = vmmov %vm6704_vm4  ;;  %v1883_v50 = vshrl.u32 %v4202_v39, 16  ;;  %vm6716_vm4 = vsmask.f32 7424  ;;  %v5819_v39 = vld [vmem:[%s4293_s11 + $0xc0] sm:$0xff]  }
 0x1d1   : > { %986 = vrot.lane.b32.xlu0 %v5608_v62, %s4223_s18  ;;  %v2189_v52 = vsel %vm2181_vm10, %v1772_v32, %v2156_v36  ;;  %v1576_v17 = vsel %vm1566_vm14, %v1543_v30, %v5603_v47  ;;  %v6715_v30 = vld [vmem:[#allocation11_spill] sm:$0xff] }
 0x1d2   : > { %1031 = vrot.lane.b32.xlu1 %v6697_v38, %s4224_s20  ;;  %3969 = vmatmul.mubr.msk.bf16.gmra.mrb[4].mxu0 %vm6698_vm5, %v2189_v52  ;;  %vm6705_vm5 = vmmov %vm6703_vm3  ;;  %v1964_v27 = vsel %vm1302_vm2, %v6714_v0, %v1883_v50  ;;  %v5823_v50 = vld [vmem:[%s4293_s11 + $0xc8] ss:$0 sps:$4 sm:$0x11]  }
 0x1d3   : > { %v5618_v7 = vpop.permute.xlu0 %1088  ;;  %4041 = vmatmul.mubr.msk.bf16.gmra.mrb[24].mxu1 %vm1566_vm14, %v2189_v52  ;;  %v1446_v26 = vsel %vm6705_vm5, %v4949_v33, %v5087_v55  ;;  %vm6710_vm3 = vmmov %vm6708_vm0 }
 0x1d4   : > { %v1119_v58 = vpop.permute.xlu1 %1118  ;;  %v1479_v6 = vsel %vm6706_vm11, %v1446_v26, %v5517_v57  ;;  %vm6718_vm5 = vmmov %vm6716_vm4  ;;  %vm6721_vm11 = vcmask 162816  }
 0x1d5   : > { %1256 = vrot.lane.b32.xlu0 %v6684_v54, %s4230_s26 }
 0x1d6   : > { %1286 = vrot.lane.b32.xlu1 %v5431_v41, %s4231_s30 }
 0x1d7   : > { %v1121_v8 = vpop.permute.xlu0 %1120 }
 0x1d8   : > { %v1151_v34 = vpop.permute.xlu1 %1150 }
 0x1d9   : > { %1033 = vrot.lane.b32.xlu0 %v6699_v45, %s4224_s20 }
 0x1da   : > { %1066 = vrot.lane.b32.xlu1 %v6695_v31, %s4225_s21 }
 0x1db   : > { %v1153_v37 = vpop.permute.xlu0 %1152 }
 0x1dc   : > { %v1183_v56 = vpop.permute.xlu1 %1182 }
 0x1dd   : > { %1288 = vrot.lane.b32.xlu0 %v5463_v5, %s4231_s30 }
 0x1de   : > { %2165 = vrot.lane.b32.xlu1 %v2078_v12, %s4232_s24  ;;  %v6713_v12 = vld [vmem:[#allocation50_spill] sm:$0xff] }
 0x1df   : > { %v1185_v20 = vpop.permute.xlu0 %1184 }
 0x1e0   : > { %v1215_v46 = vpop.permute.xlu1 %1214 }
 0x1e1   : > { %1068 = vrot.lane.b32.xlu0 %v6701_v40, %s4225_s21 }
 0x1e2   : > { %1098 = vrot.lane.b32.xlu1 %v5431_v41, %s4225_s21 }
 0x1e3   : > { %v5643_v18 = vpop.permute.xlu0 %976 }
 0x1e4   : > { %v1217_v2 = vpop.permute.xlu1 %1216 }
 0x1e5   : > { %2167 = vrot.lane.b32.xlu0 %v2088_v10, %s4232_s24 }
 0x1e6   : > { %1100 = vrot.lane.b32.xlu1 %v5463_v5, %s4225_s21 }
 0x1e7   : > { %v1247_v28 = vpop.permute.xlu0 %1246 }
 0x1e8   : > { %v5649_v16 = vpop.permute.xlu1 %978 }
 0x1e9   : > { %1130 = vrot.lane.b32.xlu0 %v6682_v61, %s4226_s10 }
 0x1ea   : > { %1132 = vrot.lane.b32.xlu1 %v6683_v19, %s4226_s10 }
 0x1eb   : > { %v5655_v41 = vpop.permute.xlu0 %1023 }
 0x1ec   : > { %v1249_v42 = vpop.permute.xlu1 %1248 }
 0x1ed   : > { %1162 = vrot.lane.b32.xlu0 %v6684_v54, %s4227_s13  ;;  %v1609_v54 = vsel %vm1599_vm15, %v1576_v17, %v1119_v58 }
 0x1ee   : > { %1164 = vrot.lane.b32.xlu1 %v6685_v35, %s4227_s13  ;;  %v1642_v1 = vsel %vm1632_vm6, %v1609_v54, %v1151_v34  ;;  %v1881_v34 = vshrl.u32 %v4200_v9, 16 }
 0x1ef   : > { %v1279_v61 = vpop.permute.xlu0 %1278  ;;  %v1675_v47 = vsel %vm1665_vm8, %v1642_v1, %v1183_v56  ;;  %v6712_v56 = vld [vmem:[#allocation12_spill] sm:$0xff] }
 0x1f0   : > { %v5672_v22 = vpop.permute.xlu1 %1025  ;;  %v1708_v4 = vsel %vm1698_vm9, %v1675_v47, %v1215_v46  ;;  %v1958_v11 = vsel %vm1302_vm2, %v6711_v63, %v1881_v34  ;;  %v2105_v47 = vshll.u32 %v1964_v27, 16 }
 0x1f1   : > { %1194 = vrot.lane.b32.xlu0 %v5463_v5, %s4228_s14  ;;  %v1512_v5 = vsel %vm1500_vm12, %v1479_v6, %v5552_v14  ;;  %v1741_v55 = vsel %vm1731_vm7, %v1708_v4, %v1247_v28  ;;  %v2095_v28 = vshll.u32 %v1958_v11, 16 }
 0x1f2   : > { %951 = vrot.lane.b32.xlu1 %v6701_v40, %s4221_s16  ;;  %v1545_v33 = vsel %vm1533_vm13, %v1512_v5, %v5589_v21  ;;  %v1774_v36 = vsel %vm1764_vm1, %v1741_v55, %v1279_v61  ;;  %v6707_v21 = vld [vmem:[#allocation23_spill] sm:$0xff]  ;;  %v2107_v55 = vrot.slane %v2105_v47, 1 }
 0x1f3   : > { %v5683_v13 = vpop.permute.xlu0 %1058  ;;  %v1578_v57 = vsel %vm1566_vm14, %v1545_v33, %v5618_v7  ;;  %v2097_v54 = vrot.slane %v2095_v28, 1  ;;  %v6730_v47 = vld [vmem:[#allocation51_spill] sm:$0xff] }
 0x1f4   : > { %v1281_v32 = vpop.permute.xlu1 %1280  ;;  %v1611_v29 = vsel %vm1599_vm15, %v1578_v57, %v1121_v8  ;;  %v6709_v8 = vld [vmem:[#allocation48_spill] sm:$0xff] }
 0x1f5   : > { %1196 = vrot.lane.b32.xlu0 %v5581_v53, %s4228_s14  ;;  %v1644_v59 = vsel %vm1632_vm6, %v1611_v29, %v1153_v37  ;;  %v1955_v15 = vsel %vm1302_vm2, %v6709_v8, %v6697_v38  ;;  %v5735_v37 = vld [vmem:[%s4293_s11 + $0xb4] sm:$0xff]  }
 0x1f6   : > { %1226 = vrot.lane.b32.xlu1 %v6683_v19, %s4229_s15  ;;  %v1677_v7 = vsel %vm1665_vm8, %v1644_v59, %v1185_v20  ;;  %v2091_v24 = vshll.u32 %v1955_v15, 16  ;;  %v1961_v20 = vsel %vm1302_vm2, %v6713_v12, %v6699_v45  ;;  %v2089_v10 = vshrl.u32 %v1955_v15, 16 }
 0x1f7   : > { %v2158_v14 = vpop.permute.xlu0 %2157  ;;  %v1710_v19 = vsel %vm1698_vm9, %v1677_v7, %v1217_v2  ;;  %v2099_v1 = vshrl.u32 %v1961_v20, 16  ;;  %v6719_v7 = vld [vmem:[#allocation44_spill] sm:$0xff] }
 0x1f8   : > { %v2191_v52 = vsel %vm2181_vm10, %v1774_v36, %v2158_v14  ;;  %v5704_v25 = vpop.permute.xlu1 %1060  ;;  %v1743_v58 = vsel %vm1731_vm7, %v1710_v19, %v1249_v42  ;;  %v2093_v2 = vrot.slane %v2091_v24, 1  ;;  %v2101_v42 = vshll.u32 %v1961_v20, 16  ;;  %v6717_v36 = vld [vmem:[#allocation22_spill] sm:$0xff]  ;;  %v6720_v19 = vld [vmem:[#allocation37_spill] sm:$0xff] }
 0x1f9   : > { %953 = vrot.lane.b32.xlu0 %v6707_v21, %s4221_s16  ;;  %3972 = vmatprep.mubr.msk.bf16.mxu0 %vm6708_vm0, %v2191_v52  ;;  %v1776_v44 = vsel %vm1764_vm1, %v1743_v58, %v1281_v32  ;;  %v1448_v58 = vsel %vm6721_vm11, %v6720_v19, %v6719_v7  ;;  %vm6722_vm0 = vcmask 195584  }
 0x1fa   : > { %4044 = vmatprep.mubr.msk.bf16.mxu1 %vm1566_vm14, %v2191_v52  ;;  %988 = vrot.lane.b32.xlu1 %v5713_v23, %s4223_s18  ;;  %v2094_v17 = vor.u32 %v2093_v2, %v2089_v10  ;;  %v2103_v6 = vrot.slane %v2101_v42, 1 }
 0x1fb   : > { %v5717_v43 = vpop.permute.xlu0 %1090 }
 0x1fc   : > { %v2160_v48 = vpop.permute.xlu1 %2159  ;;  %v2098_v4 = vsel %vm6716_vm4, %v2094_v17, %v2097_v54  ;;  %v2104_v33 = vor.u32 %v2103_v6, %v2099_v1  ;;  %vm6726_vm4 = vmmov %vm6722_vm0 }
 0x1fd   : > { %1228 = vrot.lane.b32.xlu0 %v6697_v38, %s4229_s15  ;;  %v2193_v3 = vsel %vm2181_vm10, %v1776_v44, %v2160_v48 }
 0x1fe   : > { %1258 = vrot.lane.b32.xlu1 %v6685_v35, %s4230_s26  ;;  %3973 = vmatmul.mubr.msk.bf16.gmra.mrb[8].mxu0 %vm6710_vm3, %v2193_v3  ;;  %v2108_v29 = vsel %vm6718_vm5, %v2104_v33, %v2107_v55  ;;  %vm6725_vm3 = vmmov %vm6721_vm11  ;;  %vm6727_vm5 = vcmask 588800   ;;  %vm6728_vm11 = vcmask 1046528  }
 0x1ff   : > { %v5731_v51 = vpop.permute.xlu0 %1092  ;;  %4045 = vmatmul.mubr.msk.bf16.gmra.mrb[28].mxu1 %vm1566_vm14, %v2193_v3 }
 0x200   : > { %v1123_v60 = vpop.permute.xlu1 %1122 }
 0x201   : > { %990 = vrot.lane.b32.xlu0 %v5735_v37, %s4223_s18 }
 0x202   : > { %1035 = vrot.lane.b32.xlu1 %v6712_v56, %s4224_s20 }
 0x203   : > { %v5743_v35 = vpop.permute.xlu0 %1124 }
 0x204   : > { %v1155_v46 = vpop.permute.xlu1 %1154 }
 0x205   : > { %1260 = vrot.lane.b32.xlu0 %v6695_v31, %s4230_s26 }
 0x206   : > { %1290 = vrot.lane.b32.xlu1 %v5581_v53, %s4231_s30 }
 0x207   : > { %v5753_v49 = vpop.permute.xlu0 %1156 }
 0x208   : > { %v1187_v61 = vpop.permute.xlu1 %1186 }
 0x209   : > { %1037 = vrot.lane.b32.xlu0 %v6715_v30, %s4224_s20 }
 0x20a   : > { %1070 = vrot.lane.b32.xlu1 %v6707_v21, %s4225_s21 }
 0x20b   : > { %v1189_v26 = vpop.permute.xlu0 %1188 }
 0x20c   : > { %v1219_v5 = vpop.permute.xlu1 %1218 }
 0x20d   : > { %1292 = vrot.lane.b32.xlu0 %v5608_v62, %s4231_s30 }
 0x20e   : > { %2169 = vrot.lane.b32.xlu1 %v2098_v4, %s4232_s24  ;;  %v4206_v4 = vld [vmem:[%s4293_s11 + $0xb0] ss:$0 sps:$4 sm:$0x11]  }
 0x20f   : > { %v5765_v32 = vpop.permute.xlu0 %980  ;;  %v1885_v33 = vshrl.u32 %v4206_v4, 16 }
 0x210   : > { %v1221_v57 = vpop.permute.xlu1 %1220 }
 0x211   : > { %1072 = vrot.lane.b32.xlu0 %v6717_v36, %s4225_s21 }
 0x212   : > { %1102 = vrot.lane.b32.xlu1 %v5581_v53, %s4225_s21  ;;  %v1481_v53 = vsel %vm6722_vm0, %v1448_v58, %v5643_v18  ;;  %v6723_v18 = vld [vmem:[#allocation43_spill] sm:$0xff]  ;;  %vm6729_vm0 = vmmov %vm6727_vm5 }
 0x213   : > { %v1251_v14 = vpop.permute.xlu0 %1250  ;;  %v1514_v48 = vsel %vm1500_vm12, %v1481_v53, %v5655_v41  ;;  %v6724_v41 = vld [vmem:[#allocation5_spill] sm:$0xff] }
 0x214   : > { %v5772_v52 = vpop.permute.xlu1 %982  ;;  %v1547_v8 = vsel %vm1533_vm13, %v1514_v48, %v5683_v13  ;;  %v1450_v34 = vsel %vm6725_vm3, %v6724_v41, %v6723_v18  ;;  %v6732_v48 = vld [vmem:[#allocation28_spill] sm:$0xff]  ;;  %v4208_v18 = vld [vmem:[%s4293_s11 + $0xbc] ss:$0 sps:$4 sm:$0x11]   ;;  %vm6734_vm3 = vsmask.f32 7424 }
 0x215   : > { %2171 = vrot.lane.b32.xlu0 %v2108_v29, %s4232_s24  ;;  %v1580_v15 = vsel %vm1566_vm14, %v1547_v8, %v5717_v43  ;;  %v1483_v43 = vsel %vm6726_vm4, %v1450_v34, %v5649_v16  ;;  %v924_v16 = vrot.slane %v5819_v39, 1  ;;  %v5880_v29 = vld [vmem:[%s4293_s11 + $0xd4] ss:$0 sps:$4 sm:$0x11]   ;;  %v1887_v41 = vshrl.u32 %v4208_v18, 16  ;;  %vm6736_vm4 = vmmov %vm6734_vm3 }
 0x216   : > { %1104 = vrot.lane.b32.xlu1 %v5608_v62, %s4225_s21  ;;  %v1007_v7 = vshll.u32 %v5880_v29, 16 }
 0x217   : > { %v5777_v59 = vpop.permute.xlu0 %1027 }
 0x218   : > { %v1253_v44 = vpop.permute.xlu1 %1252  ;;  %v1009_v8 = vrot.slane %v1007_v7, 1 }
 0x219   : > { %1134 = vrot.lane.b32.xlu0 %v6697_v38, %s4226_s10  ;;  %v1613_v38 = vsel %vm1599_vm15, %v1580_v15, %v1123_v60  ;;  %v6733_v15 = vld [vmem:[#allocation53_spill] sm:$0xff] }
 0x21a   : > { %1136 = vrot.lane.b32.xlu1 %v6699_v45, %s4226_s10  ;;  %v1646_v24 = vsel %vm1632_vm6, %v1613_v38, %v1155_v46  ;;  %v925_v46 = vrot.slane %v5823_v50, 1  ;;  %v1973_v38 = vsel %vm1302_vm2, %v6733_v15, %v6715_v30 }
 0x21b   : > { %v1283_v3 = vpop.permute.xlu0 %1282  ;;  %v1679_v63 = vsel %vm1665_vm8, %v1646_v24, %v1187_v61 }
 0x21c   : > { %v5794_v9 = vpop.permute.xlu1 %1029  ;;  %v1712_v60 = vsel %vm1698_vm9, %v1679_v63, %v1219_v5  ;;  %v5844_v0 = vsel %vm6728_vm11, %v924_v16, %v925_v46  ;;  %v1967_v5 = vsel %vm1302_vm2, %v6730_v47, %v6712_v56 }
 0x21d   : > { %1166 = vrot.lane.b32.xlu0 %v6695_v31, %s4227_s13  ;;  %v1516_v31 = vsel %vm1500_vm12, %v1483_v43, %v5672_v22  ;;  %v1745_v20 = vsel %vm1731_vm7, %v1712_v60, %v1251_v14  ;;  %v2111_v58 = vshll.u32 %v1967_v5, 16  ;;  %v2109_v24 = vshrl.u32 %v1967_v5, 16 }
 0x21e   : > { %1168 = vrot.lane.b32.xlu1 %v6701_v40, %s4227_s13  ;;  %v1549_v12 = vsel %vm1533_vm13, %v1516_v31, %v5704_v25  ;;  %v1778_v10 = vsel %vm1764_vm1, %v1745_v20, %v1283_v3  ;;  %v2121_v60 = vshll.u32 %v1973_v38, 16 }
 0x21f   : > { %v5805_v13 = vpop.permute.xlu0 %1062  ;;  %v1582_v22 = vsel %vm1566_vm14, %v1549_v12, %v5731_v51  ;;  %v2113_v43 = vrot.slane %v2111_v58, 1  ;;  %v6735_v12 = vld [vmem:[#allocation14_spill] sm:$0xff] }
 0x220   : > { %v1285_v11 = vpop.permute.xlu1 %1284  ;;  %v1615_v25 = vsel %vm1599_vm15, %v1582_v22, %v5743_v35  ;;  %v1976_v20 = vsel %vm1302_vm2, %v6735_v12, %v1887_v41 }
 0x221   : > { %1198 = vrot.lane.b32.xlu0 %v5608_v62, %s4228_s14  ;;  %v1648_v28 = vsel %vm1632_vm6, %v1615_v25, %v5753_v49  ;;  %v2114_v46 = vor.u32 %v2113_v43, %v2109_v24 }
 0x222   : > { %955 = vrot.lane.b32.xlu1 %v6717_v36, %s4221_s16  ;;  %v1681_v51 = vsel %vm1665_vm8, %v1648_v28, %v1189_v26  ;;  %v5862_v26 = vld [vmem:[%s4293_s11 + $0xcc] sm:$0xff]   ;;  %v2123_v28 = vrot.slane %v2121_v60, 1 }
 0x223   : > { %v2162_v62 = vpop.permute.xlu0 %2161  ;;  %v1714_v35 = vsel %vm1698_vm9, %v1681_v51, %v1221_v57  ;;  %v1002_v1 = vshll.u32 %v5862_v26, 16  ;;  %v1000_v57 = vshrl.u32 %v5862_v26, 16  ;;  %v2125_v51 = vshll.u32 %v1976_v20, 16 }
 0x224   : > { %v2195_v2 = vsel %vm2181_vm10, %v1778_v10, %v2162_v62  ;;  %v5836_v42 = vpop.permute.xlu1 %1064  ;;  %v1747_v27 = vsel %vm1731_vm7, %v1714_v35, %v1253_v44  ;;  %v6731_v44 = vld [vmem:[#allocation15_spill] sm:$0xff]  ;;  %v1043_v10 = vrot.slane %v5862_v26, 1  ;;  %v1044_v62 = vrot.slane %v5880_v29, 1 }
 0x225   : > { %1200 = vrot.lane.b32.xlu0 %v5713_v23, %s4228_s14  ;;  %3976 = vmatprep.mubr.msk.bf16.mxu0 %vm6727_vm5, %v2195_v2  ;;  %v1780_v61 = vsel %vm1764_vm1, %v1747_v27, %v1285_v11  ;;  %v1004_v14 = vrot.slane %v1002_v1, 1  ;;  %v1970_v53 = vsel %vm1302_vm2, %v6731_v44, %v1885_v33  ;;  %vm6737_vm5 = vmmov %vm6728_vm11  ;;  %v2127_v1 = vrot.slane %v2125_v51, 1 }
 0x226   : > { %4048 = vmatprep.mubr.msk.bf16.mxu1 %vm1566_vm14, %v2195_v2  ;;  %1230 = vrot.lane.b32.xlu1 %v6699_v45, %s4229_s15  ;;  %v2115_v63 = vshll.u32 %v1970_v53, 16  ;;  %v2119_v2 = vshrl.u32 %v1973_v38, 16  ;;  %vm6738_vm11 = vmmov %vm6734_vm3  ;;  %v6743_v38 = vld [vmem:[#allocation45_spill] sm:$0xff] }
 0x227   : > { %v5849_v49 = vpop.permute.xlu0 %1094  ;;  %v1005_v3 = vor.u32 %v1004_v14, %v1000_v57  ;;  %v6739_v57 = vld [vmem:[#allocation46_spill] sm:$0xff]  ;;  %v6740_v14 = vld [vmem:[#allocation3_spill] sm:$0xff] }
 0x228   : > { %v2164_v17 = vpop.permute.xlu1 %2163  ;;  %v2117_v22 = vrot.slane %v2115_v63, 1 }
 0x229   : > { %957 = vrot.lane.b32.xlu0 %v5844_v0, %s4221_s16  ;;  %v2197_v54 = vsel %vm2181_vm10, %v1780_v61, %v2164_v17  ;;  %v5902_v11 = vsel %vm6734_vm3, %v1005_v3, %v1009_v8  ;;  %v1045_v61 = vsel %vm6737_vm5, %v1043_v10, %v1044_v62  ;;  %vm6742_vm3 = vcmask 195584  }
 0x22a   : > { %992 = vrot.lane.b32.xlu1 %v5819_v39, %s4223_s18  ;;  %3977 = vmatmul.mubr.msk.bf16.gmra.mrb[12].mxu0 %vm6729_vm0, %v2197_v54  ;;  %v2118_v27 = vsel %vm6736_vm4, %v2114_v46, %v2117_v22  ;;  %vm6741_vm0 = vcmask 162816   ;;  %vm6746_vm5 = vmmov %vm6742_vm3 }
 0x22b   : > { %v5859_v45 = vpop.permute.xlu0 %1096  ;;  %4049 = vmatmul.mubr.msk.bf16.gmra.mrb[0].mxu1 %vm1566_vm14, %v2197_v54  ;;  %v2124_v54 = vor.u32 %v2123_v28, %v2119_v2  ;;  %v1452_v7 = vsel %vm6741_vm0, %v6740_v14, %v6739_v57  ;;  %vm6745_vm4 = vmmov %vm6741_vm0  ;;  %v6751_v28 = vld [vmem:[#allocation57_spill] sm:$0xff] }
 0x22c   : > { %v5866_v6 = vpop.permute.xlu1 %1126  ;;  %v1485_v44 = vsel %vm6742_vm3, %v1452_v7, %v5765_v32  ;;  %vm6753_vm3 = vsmask.f32 7424 }
 0x22d   : > { %1232 = vrot.lane.b32.xlu0 %v6712_v56, %s4229_s15  ;;  %v2128_v4 = vsel %vm6738_vm11, %v2124_v54, %v2127_v1  ;;  %vm6748_vm11 = vcmask 588800  }
 0x22e   : > { %1262 = vrot.lane.b32.xlu1 %v6701_v40, %s4230_s26  ;;  %vm6752_vm0 = vmmov %vm6748_vm11 }
 0x22f   : > { %v5876_v55 = vpop.permute.xlu0 %1128 }
 0x230   : > { %v1159_v19 = vpop.permute.xlu1 %1158 }
 0x231   : > { %994 = vrot.lane.b32.xlu0 %v5862_v26, %s4223_s18 }
 0x232   : > { %1039 = vrot.lane.b32.xlu1 %v6732_v48, %s4224_s20 }
 0x233   : > { %v5889_v40 = vpop.permute.xlu0 %1160 }
 0x234   : > { %v1191_v34 = vpop.permute.xlu1 %1190 }
 0x235   : > { %1264 = vrot.lane.b32.xlu0 %v6707_v21, %s4230_s26 }
 0x236   : > { %1294 = vrot.lane.b32.xlu1 %v5713_v23, %s4231_s30 }
 0x237   : > { %v5899_v31 = vpop.permute.xlu0 %1192 }
 0x238   : > { %v1223_v16 = vpop.permute.xlu1 %1222 }
 0x239   : > { %1041 = vrot.lane.b32.xlu0 %v5902_v11, %s4224_s20 }
 0x23a   : > { %1074 = vrot.lane.b32.xlu1 %v5844_v0, %s4225_s21 }
 0x23b   : > { %v5912_v25 = vpop.permute.xlu0 %949 }
 0x23c   : > { %v5914_v35 = vpop.permute.xlu1 %984 }
 0x23d   : > { %1296 = vrot.lane.b32.xlu0 %v5735_v37, %s4231_s30 }
 0x23e   : > { %2173 = vrot.lane.b32.xlu1 %v2118_v27, %s4232_s24 }
 0x23f   : > { %v1225_v17 = vpop.permute.xlu0 %1224 }
 0x240   : > { %v1255_v47 = vpop.permute.xlu1 %1254 }
 0x241   : > { %1076 = vrot.lane.b32.xlu0 %v1045_v61, %s4225_s21 }
 0x242   : > { %1106 = vrot.lane.b32.xlu1 %v5713_v23, %s4225_s21  ;;  %v1518_v23 = vsel %vm1500_vm12, %v1485_v44, %v5777_v59  ;;  %v6744_v59 = vld [vmem:[#allocation2_spill] sm:$0xff] }
 0x243   : > { %v5924_v5 = vpop.permute.xlu0 %986  ;;  %v1551_v3 = vsel %vm1533_vm13, %v1518_v23, %v5805_v13  ;;  %v1454_v18 = vsel %vm6745_vm4, %v6744_v59, %v6743_v38  ;;  %vm6754_vm4 = vmmov %vm6753_vm3  ;;  %v6755_v38 = vld [vmem:[#allocation40_spill] sm:$0xff] }
 0x244   : > { %v5927_v33 = vpop.permute.xlu1 %1031  ;;  %v1584_v8 = vsel %vm1566_vm14, %v1551_v3, %v5849_v49  ;;  %v1487_v13 = vsel %vm6746_vm5, %v1454_v18, %v5772_v52  ;;  %vm6756_vm5 = vcmask 162816  }
 0x245   : > { %2175 = vrot.lane.b32.xlu0 %v2128_v4, %s4232_s24  ;;  %v1617_v32 = vsel %vm1599_vm15, %v1584_v8, %v5866_v6  ;;  %v1520_v24 = vsel %vm1500_vm12, %v1487_v13, %v5794_v9 }
 0x246   : > { %1108 = vrot.lane.b32.xlu1 %v5735_v37, %s4225_s21 }
 0x247   : > { %v1257_v58 = vpop.permute.xlu0 %1256 }
 0x248   : > { %v1287_v53 = vpop.permute.xlu1 %1286 }
 0x249   : > { %1138 = vrot.lane.b32.xlu0 %v6712_v56, %s4226_s10  ;;  %v1650_v56 = vsel %vm1632_vm6, %v1617_v32, %v1159_v19  ;;  %v1553_v19 = vsel %vm1533_vm13, %v1520_v24, %v5836_v42  ;;  %v6747_v42 = vld [vmem:[#allocation54_spill] sm:$0xff] }
 0x24a   : > { %1140 = vrot.lane.b32.xlu1 %v6715_v30, %s4226_s10  ;;  %v1683_v49 = vsel %vm1665_vm8, %v1650_v56, %v1191_v34  ;;  %v1586_v52 = vsel %vm1566_vm14, %v1553_v19, %v5859_v45  ;;  %v1979_v20 = vsel %vm1302_vm2, %v6747_v42, %v6732_v48  ;;  %v6757_v56 = vld [vmem:[#allocation39_spill] sm:$0xff] }
 0x24b   : > { %v5947_v15 = vpop.permute.xlu0 %1033  ;;  %v1716_v6 = vsel %vm1698_vm9, %v1683_v49, %v1223_v16  ;;  %v1619_v9 = vsel %vm1599_vm15, %v1586_v52, %v5876_v55  ;;  %v6749_v16 = vld [vmem:[#allocation55_spill] sm:$0xff]  ;;  %v2131_v62 = vshll.u32 %v1979_v20, 16 }
 0x24c   : > { %v5955_v41 = vpop.permute.xlu1 %1066  ;;  %v1749_v63 = vsel %vm1731_vm7, %v1716_v6, %v1255_v47  ;;  %v1652_v45 = vsel %vm1632_vm6, %v1619_v9, %v5889_v40  ;;  %v1985_v46 = vsel %vm1302_vm2, %v6749_v16, %v5902_v11 }
 0x24d   : > { %1170 = vrot.lane.b32.xlu0 %v6707_v21, %s4227_s13  ;;  %v1889_v21 = vshrl.u32 %v5823_v50, 16  ;;  %v1782_v34 = vsel %vm1764_vm1, %v1749_v63, %v1287_v53  ;;  %v1891_v50 = vshrl.u32 %v5880_v29, 16  ;;  %v1685_v55 = vsel %vm1665_vm8, %v1652_v45, %v5899_v31  ;;  %v6750_v29 = vld [vmem:[#allocation56_spill] sm:$0xff]  ;;  %v6759_v63 = vld [vmem:[#allocation47_spill] sm:$0xff] }
 0x24e   : > { %1172 = vrot.lane.b32.xlu1 %v6717_v36, %s4227_s13  ;;  %v1718_v40 = vsel %vm1698_vm9, %v1685_v55, %v1225_v17  ;;  %v2141_v27 = vshll.u32 %v1985_v46, 16  ;;  %v2133_v1 = vrot.slane %v2131_v62, 1  ;;  %v2139_v4 = vshrl.u32 %v1985_v46, 16 }
 0x24f   : > { %v1289_v43 = vpop.permute.xlu0 %1288  ;;  %v1982_v22 = vsel %vm1302_vm2, %v6750_v29, %v1889_v21  ;;  %v1751_v2 = vsel %vm1731_vm7, %v1718_v40, %v1257_v58  ;;  %v1988_v31 = vsel %vm1302_vm2, %v6751_v28, %v1891_v50  ;;  %v6760_v21 = vld [vmem:[#allocation13_spill] sm:$0xff] }
 0x250   : > { %v2166_v60 = vpop.permute.xlu1 %2165  ;;  %v1784_v51 = vsel %vm1764_vm1, %v1751_v2, %v1289_v43  ;;  %v2135_v61 = vshll.u32 %v1982_v22, 16  ;;  %v2145_v47 = vshll.u32 %v1988_v31, 16  ;;  %v2143_v57 = vrot.slane %v2141_v27, 1  ;;  %v6763_v31 = vld [vmem:[#allocation38_spill] sm:$0xff] }
 0x251   : > { %1202 = vrot.lane.b32.xlu0 %v5735_v37, %s4228_s14  ;;  %v2199_v12 = vsel %vm2181_vm10, %v1782_v34, %v2166_v60 }
 0x252   : > { %1204 = vrot.lane.b32.xlu1 %v5819_v39, %s4228_s14  ;;  %3980 = vmatprep.mubr.msk.bf16.mxu0 %vm6748_vm11, %v2199_v12  ;;  %v2137_v14 = vrot.slane %v2135_v61, 1  ;;  %v2144_v23 = vor.u32 %v2143_v57, %v2139_v4  ;;  %vm6758_vm11 = vmmov %vm6756_vm5 }
 0x253   : > { %v5988_v37 = vpop.permute.xlu0 %1068  ;;  %4052 = vmatprep.mubr.msk.bf16.mxu1 %vm1566_vm14, %v2199_v12 }
 0x254   : > { %v1099_v10 = vpop.permute.xlu1 %1098 }
 0x255   : > { %1234 = vrot.lane.b32.xlu0 %v6715_v30, %s4229_s15  ;;  %v2129_v30 = vshrl.u32 %v1979_v20, 16 }
 0x256   : > { %1236 = vrot.lane.b32.xlu1 %v6732_v48, %s4229_s15 }
 0x257   : > { %v2168_v11 = vpop.permute.xlu0 %2167  ;;  %v2134_v58 = vor.u32 %v2133_v1, %v2129_v30 }
 0x258   : > { %v2201_v17 = vsel %vm2181_vm10, %v1784_v51, %v2168_v11  ;;  %v6008_v54 = vpop.permute.xlu1 %1100 }
 0x259   : > { %1266 = vrot.lane.b32.xlu0 %v6717_v36, %s4230_s26  ;;  %3981 = vmatmul.mubr.msk.bf16.gmra.mrb[16].mxu0 %vm6752_vm0, %v2201_v17  ;;  %v2147_v36 = vrot.slane %v2145_v47, 1  ;;  %v2138_v53 = vsel %vm6753_vm3, %v2134_v58, %v2137_v14  ;;  %vm6761_vm0 = vmmov %vm6756_vm5  ;;  %vm6762_vm3 = vcmask 195584  }
 0x25a   : > { %4053 = vmatmul.mubr.msk.bf16.gmra.mrb[4].mxu1 %vm1566_vm14, %v2201_v17  ;;  %1268 = vrot.lane.b32.xlu1 %v5844_v0, %s4230_s26  ;;  %v1456_v52 = vsel %vm6761_vm0, %v6760_v21, %v6759_v63 }
 0x25b   : > { %v1131_v48 = vpop.permute.xlu0 %1130  ;;  %v2148_v0 = vsel %vm6754_vm4, %v2144_v23, %v2147_v36  ;;  %v1489_v34 = vsel %vm6762_vm3, %v1456_v52, %v5914_v35  ;;  %vm6764_vm4 = vmmov %vm6761_vm0 }
 0x25c   : > { %v1133_v7 = vpop.permute.xlu1 %1132  ;;  %v1522_v60 = vsel %vm1500_vm12, %v1489_v34, %v5927_v33  ;;  %v1458_v51 = vsel %vm6764_vm4, %v6763_v31, %v5912_v25  ;;  %vm6768_vm4 = vmmov %vm6762_vm3 }
 0x25d   : > { %1298 = vrot.lane.b32.xlu0 %v5819_v39, %s4231_s30  ;;  %v1555_v42 = vsel %vm1533_vm13, %v1522_v60, %v5955_v41 }
 0x25e   : > { %1300 = vrot.lane.b32.xlu1 %v5862_v26, %s4231_s30  ;;  %v1588_v50 = vsel %vm1566_vm14, %v1555_v42, %v1099_v10 }
 0x25f   : > { %v1163_v44 = vpop.permute.xlu0 %1162  ;;  %v1621_v16 = vsel %vm1599_vm15, %v1588_v50, %v1131_v48 }
 0x260   : > { %v1165_v3 = vpop.permute.xlu1 %1164  ;;  %v1654_v33 = vsel %vm1632_vm6, %v1621_v16, %v1163_v44 }
 0x261   : > { %2177 = vrot.lane.b32.xlu0 %v2138_v53, %s4232_s24 }
 0x262   : > { %2179 = vrot.lane.b32.xlu1 %v2148_v0, %s4232_s24 }
 0x263   : > { %v1195_v8 = vpop.permute.xlu0 %1194 }
 0x264   : > { %v952_v32 = vpop.permute.xlu1 %951  ;;  %v1687_v41 = vsel %vm1665_vm8, %v1654_v33, %v1195_v8 }
 0x265   : > { %v6026_v39 = vsel %vm6756_vm5, %v6755_v38, %v952_v32  ;;  %vm6765_vm5 = vmmov %vm6762_vm3 }
 0x266   : > { %v1491_v61 = vsel %vm6765_vm5, %v1458_v51, %v5924_v5 }
 0x267   : > { %v1197_v59 = vpop.permute.xlu0 %1196  ;;  %v1524_v30 = vsel %vm1500_vm12, %v1491_v61, %v5947_v15 }
 0x268   : > { %v1227_v18 = vpop.permute.xlu1 %1226  ;;  %v1557_v47 = vsel %vm1533_vm13, %v1524_v30, %v5988_v37 }
 0x269   : > { %v1720_v62 = vsel %vm1698_vm9, %v1687_v41, %v1227_v18  ;;  %v1590_v25 = vsel %vm1566_vm14, %v1557_v47, %v6008_v54 }
 0x26a   : > { %v1623_v4 = vsel %vm1599_vm15, %v1590_v25, %v1133_v7 }
 0x26b   : > { %v954_v26 = vpop.permute.xlu0 %953  ;;  %v1656_v5 = vsel %vm1632_vm6, %v1623_v4, %v1165_v3 }
 0x26c   : > { %v6030_v13 = vsel %vm6758_vm11, %v6757_v56, %v954_v26  ;;  %v6032_v49 = vpop.permute.xlu1 %988  ;;  %vm6766_vm11 = vcmask 588800   ;;  %v1689_v14 = vsel %vm1665_vm8, %v1656_v5, %v1197_v59 }
 0x26d   : > { %vm6767_vm0 = vmmov %vm6766_vm11  ;;  %v1493_v60 = vsel %vm6762_vm3, %v6026_v39, %v6032_v49 }
 0x26e   : > { %vm6769_vm5 = vmmov %vm6767_vm0 }
 0x26f   : > { %v1229_v24 = vpop.permute.xlu0 %1228 }
 0x270   : > { %v1259_v6 = vpop.permute.xlu1 %1258  ;;  %v1722_v15 = vsel %vm1698_vm9, %v1689_v14, %v1229_v24 }
 0x271   : > { %v1753_v28 = vsel %vm1731_vm7, %v1720_v62, %v1259_v6 }
 0x273   : > { %v6034_v43 = vpop.permute.xlu0 %990 }
 0x274   : > { %v6036_v19 = vpop.permute.xlu1 %1035 }
 0x275   : > { %v1526_v42 = vsel %vm1500_vm12, %v1493_v60, %v6036_v19  ;;  %v3804_v60 = vld [vmem:[%s4945_s29] sm:$0xff]  }
 0x277   : > { %v1261_v12 = vpop.permute.xlu0 %1260 }
 0x278   : > { %v1291_v9 = vpop.permute.xlu1 %1290  ;;  %v1755_v36 = vsel %vm1731_vm7, %v1722_v15, %v1261_v12 }
 0x279   : > { %v6047_v20 = vpop.f32.mrb[0].mxu0  ;;  %v1786_v11 = vsel %vm1764_vm1, %v1753_v28, %v1291_v9 }
 0x27a   : > { %v6050_v45 = vpop.f32.mrb[20].mxu1  ;;  %v6052_v55 = vpop.f32.mrb[1].mxu0 }
 0x27b   : > { %v6055_v46 = vpop.f32.mrb[21].mxu1  ;;  %v6057_v35 = vpop.f32.mrb[2].mxu0 }
 0x27c   : > { %v6060_v29 = vpop.f32.mrb[22].mxu1  ;;  %v1071_v22 = vpop.permute.xlu1 %1070 }
 0x27d   : > { %v6063_v40 = vpop.f32.mrb[3].mxu0  ;;  %v6065_v10 = vpop.f32.mrb[23].mxu1  ;;  %v1559_v33 = vsel %vm1533_vm13, %v1526_v42, %v1071_v22  ;;  %v1495_v22 = vsel %vm6768_vm4, %v6030_v13, %v6034_v43  ;;  %v6773_v42 = vld [vmem:[#allocation42_spill] sm:$0xff] }
 0x27e   : > { %v6068_v2 = vpop.permute.xlu0 %1037 }
 0x27f   : > { %v1528_v30 = vsel %vm1500_vm12, %v1495_v22, %v6068_v2  ;;  %v3805_v22 = vunpack.c.l.bf16 %v3804_v60 }
 0x280   : > { %v2170_v27 = vpop.permute.xlu1 %2169 }
 0x281   : > { %v2203_v17 = vsel %vm2181_vm10, %v1786_v11, %v2170_v27 }
 0x282   : > { %v1293_v1 = vpop.permute.xlu0 %1292  ;;  %3984 = vmatprep.mubr.msk.bf16.mxu0 %vm6766_vm11, %v2203_v17  ;;  %4056 = vmatprep.mubr.msk.bf16.mxu1 %vm1566_vm14, %v2203_v17  ;;  %vm6770_vm11 = vmmov %vm6767_vm0 }
 0x283   : > { %v1788_v44 = vsel %vm1764_vm1, %v1755_v36, %v1293_v1 }
 0x284   : > { %v1103_v48 = vpop.permute.xlu1 %1102 }
 0x285   : > { %v1592_v28 = vsel %vm1566_vm14, %v1559_v33, %v1103_v48 }
 0x286   : > { %v1073_v57 = vpop.permute.xlu0 %1072 }
 0x287   : > { %v1561_v25 = vsel %vm1533_vm13, %v1528_v30, %v1073_v57  ;;  %v3882_v30 = vld [vmem:[%s4945_s29 + $0x8] sm:$0xff]  }
 0x288   : > { %v1105_v58 = vpop.permute.xlu1 %1104 }
 0x289   : > { %v1594_v48 = vsel %vm1566_vm14, %v1561_v25, %v1105_v58 }
 0x28a   : > { %v2172_v23 = vpop.permute.xlu0 %2171 }
 0x28b   : > { %v2205_v37 = vsel %vm2181_vm10, %v1788_v44, %v2172_v23 }
 0x28c   : > { %3985 = vmatmul.mubr.msk.bf16.gmra.mrb[20].mxu0 %vm6767_vm0, %v2205_v37  ;;  %4057 = vmatmul.mubr.msk.bf16.gmra.mrb[8].mxu1 %vm1566_vm14, %v2205_v37  ;;  %v1137_v54 = vpop.permute.xlu1 %1136  ;;  %vm6772_vm0 = vcmask 162816  }
 0x28d   : > { %v1627_v4 = vsel %vm1599_vm15, %v1594_v48, %v1137_v54  ;;  %vm6774_vm3 = vmmov %vm6772_vm0 }
 0x28e   : > { %v1135_v7 = vpop.permute.xlu0 %1134 }
 0x28f   : > { %v1625_v31 = vsel %vm1599_vm15, %v1592_v28, %v1135_v7 }
 0x290   : > { %v1169_v53 = vpop.permute.xlu1 %1168 }
 0x291   : > { %v1660_v43 = vsel %vm1632_vm6, %v1627_v4, %v1169_v53 }
 0x292   : > { %v1167_v3 = vpop.permute.xlu0 %1166 }
 0x293   : > { %v1658_v39 = vsel %vm1632_vm6, %v1625_v31, %v1167_v3 }
 0x294   : > { %v6095_v0 = vpop.permute.xlu1 %955 }
 0x296   : > { %v1199_v8 = vpop.permute.xlu0 %1198 }
 0x297   : > { %v1691_v51 = vsel %vm1665_vm8, %v1658_v39, %v1199_v8 }
 0x298   : > { %v1231_v32 = vpop.permute.xlu1 %1230 }
 0x299   : > { %v1724_v19 = vsel %vm1698_vm9, %v1691_v51, %v1231_v32 }
 0x29a   : > { %v1201_v38 = vpop.permute.xlu0 %1200 }
 0x29b   : > { %v1693_v14 = vsel %vm1665_vm8, %v1660_v43, %v1201_v38  ;;  %v3740_v38 = vld [vmem:[%s4939_s25] sm:$0xff]   ;;  %v3868_v43 = vld [vmem:[%s4939_s25 + $0x10] sm:$0xff]  }
 0x29c   : > { %v6097_v59 = vpop.permute.xlu1 %992  ;;  %v3741_v39 = vunpack.c.l.bf16 %v3740_v38  ;;  %v3742_v51 = vunpack.c.h.bf16 %v3740_v38 }
 0x29e   : > { %v958_v18 = vpop.permute.xlu0 %957 }
 0x2a0   : > { %v1263_v26 = vpop.permute.xlu1 %1262 }
 0x2a1   : > { %v1757_v27 = vsel %vm1731_vm7, %v1724_v19, %v1263_v26  ;;  %v6771_v26 = vld [vmem:[#allocation41_spill] sm:$0xff] }
 0x2a2   : > { %v1233_v56 = vpop.permute.xlu0 %1232 }
 0x2a3   : > { %v1726_v2 = vsel %vm1698_vm9, %v1693_v14, %v1233_v56  ;;  %v1466_v56 = vsel %vm6772_vm0, %v6771_v26, %v958_v18 }
 0x2a4   : > { %v6099_v24 = vpop.permute.xlu1 %1039 }
 0x2a5   : > { %v6101_v6 = vpop.f32.mrb[4].mxu0 }
 0x2a6   : > { %v995_v63 = vpop.permute.xlu0 %994  ;;  %v6103_v21 = vpop.f32.mrb[24].mxu1 }
 0x2a7   : > { %v6105_v52 = vpop.f32.mrb[5].mxu0  ;;  %v6107_v34 = vpop.f32.mrb[25].mxu1  ;;  %v1499_v33 = vsel %vm6768_vm4, %v1466_v56, %v995_v63  ;;  %v3749_v56 = vunpack.c.l.bf16 %v3868_v43 }
 0x2a8   : > { %v6112_v9 = vpop.f32.mrb[6].mxu0  ;;  %v6114_v12 = vpop.f32.mrb[26].mxu1 }
 0x2a9   : > { %v1295_v50 = vpop.permute.xlu1 %1294  ;;  %v6118_v16 = vpop.f32.mrb[7].mxu0 }
 0x2aa   : > { %v6121_v41 = vpop.f32.mrb[27].mxu1  ;;  %v1265_v62 = vpop.permute.xlu0 %1264  ;;  %v1790_v61 = vsel %vm1764_vm1, %v1757_v27, %v1295_v50  ;;  %v1464_v50 = vsel %vm6774_vm3, %v6773_v42, %v6095_v0  ;;  %v3806_v0 = vunpack.c.h.bf16 %v3804_v60  ;;  %v3750_v60 = vunpack.c.h.bf16 %v3868_v43 }
 0x2ab   : > { %v1759_v15 = vsel %vm1731_vm7, %v1726_v2, %v1265_v62  ;;  %v2576_v2 = vadd.f32 %v3805_v22, %v3741_v39 }
 0x2ad   : > { %v1075_v49 = vpop.permute.xlu1 %1074 }
 0x2ae   : > { %v1042_v11 = vpop.permute.xlu0 %1041 }
 0x2af   : > { %v1532_v28 = vsel %vm1500_vm12, %v1499_v33, %v1042_v11 }
 0x2b1   : > { %v2174_v17 = vpop.permute.xlu1 %2173 }
 0x2b2   : > { %v2207_v1 = vsel %vm2181_vm10, %v1790_v61, %v2174_v17  ;;  %v1297_v47 = vpop.permute.xlu0 %1296  ;;  %v3867_v61 = vld [vmem:[%s4939_s25 + $0x8] sm:$0xff]  }
 0x2b3   : > { %3988 = vmatprep.mubr.msk.bf16.mxu0 %vm6769_vm5, %v2207_v1  ;;  %4060 = vmatprep.mubr.msk.bf16.mxu1 %vm1566_vm14, %v2207_v1  ;;  %v1792_v36 = vsel %vm1764_vm1, %v1759_v15, %v1297_v47  ;;  %vm6775_vm5 = vmmov %vm6768_vm4  ;;  %v3745_v48 = vunpack.c.l.bf16 %v3867_v61  ;;  %v3746_v4 = vunpack.c.h.bf16 %v3867_v61  ;;  %v2577_v15 = vadd.f32 %v3806_v0, %v3742_v51  ;;  %v3869_v61 = vld [vmem:[%s4939_s25 + $0x18] sm:$0xff]  }
 0x2b4   : > { %v1497_v62 = vsel %vm6775_vm5, %v1464_v50, %v6097_v59 }
 0x2b5   : > { %v1107_v13 = vpop.permute.xlu1 %1106  ;;  %v1530_v19 = vsel %vm1500_vm12, %v1497_v62, %v6099_v24  ;;  %v2608_v51 = vpack.c.bf16 %v2577_v15, %v2576_v2 }
 0x2b6   : > { %v1077_v5 = vpop.permute.xlu0 %1076  ;;  %v1563_v63 = vsel %vm1533_vm13, %v1530_v19, %v1075_v49 }
 0x2b7   : > { %v1565_v18 = vsel %vm1533_vm13, %v1532_v28, %v1077_v5  ;;  %v1596_v59 = vsel %vm1566_vm14, %v1563_v63, %v1107_v13  ;;  %v3884_v63 = vld [vmem:[%s4945_s29 + $0x18] sm:$0xff]  }
 0x2b9   : > { %v1109_v57 = vpop.permute.xlu1 %1108 }
 0x2ba   : > { %v2176_v44 = vpop.permute.xlu0 %2175  ;;  %v1598_v17 = vsel %vm1566_vm14, %v1565_v18, %v1109_v57  ;;  %v3883_v57 = vld [vmem:[%s4945_s29 + $0x10] sm:$0xff]  }
 0x2bb   : > { %v2209_v58 = vsel %vm2181_vm10, %v1792_v36, %v2176_v44  ;;  %v3813_v33 = vunpack.c.l.bf16 %v3883_v57  ;;  %v3814_v62 = vunpack.c.h.bf16 %v3883_v57 }
 0x2bc   : > { %3989 = vmatmul.mubr.msk.bf16.gmra.mrb[24].mxu0 %vm6770_vm11, %v2209_v58  ;;  %4061 = vmatmul.mubr.msk.bf16.gmra.mrb[12].mxu1 %vm1566_vm14, %v2209_v58 }
 0x2bd   : > { %v1141_v23 = vpop.permute.xlu1 %1140  ;;  %v2580_v22 = vadd.f32 %v3813_v33, %v3749_v56  ;;  %v2581_v0 = vadd.f32 %v3814_v62, %v3750_v60 }
 0x2be   : > { %v1139_v37 = vpop.permute.xlu0 %1138  ;;  %v1631_v11 = vsel %vm1599_vm15, %v1598_v17, %v1141_v23  ;;  %v3870_v17 = vld [vmem:[%s4939_s25 + $0x20] sm:$0xff]  }
 0x2bf   : > { %v1629_v1 = vsel %vm1599_vm15, %v1596_v59, %v1139_v37  ;;  %v3809_v37 = vunpack.c.l.bf16 %v3882_v30  ;;  %v3885_v59 = vld [vmem:[%s4945_s29 + $0x20] sm:$0xff]   ;;  %v3757_v43 = vunpack.c.l.bf16 %v3870_v17 }
 0x2c1   : > { %v1173_v54 = vpop.permute.xlu1 %1172  ;;  %v2578_v18 = vadd.f32 %v3809_v37, %v3745_v48  ;;  %v2610_v48 = vpack.c.bf16 %v2581_v0, %v2580_v22 }
 0x2c2   : > { %v1171_v7 = vpop.permute.xlu0 %1170  ;;  %v1664_v24 = vsel %vm1632_vm6, %v1631_v11, %v1173_v54  ;;  %v3810_v54 = vunpack.c.h.bf16 %v3882_v30  ;;  %v3753_v11 = vunpack.c.l.bf16 %v3869_v61  ;;  %v3754_v30 = vunpack.c.h.bf16 %v3869_v61 }
 0x2c3   : > { %v1662_v49 = vsel %vm1632_vm6, %v1629_v1, %v1171_v7  ;;  %v3817_v1 = vunpack.c.l.bf16 %v3884_v63 }
 0x2c5   : > { %v1205_v53 = vpop.permute.xlu1 %1204 }
 0x2c6   : > { %v1203_v3 = vpop.permute.xlu0 %1202  ;;  %v1697_v5 = vsel %vm1665_vm8, %v1664_v24, %v1205_v53  ;;  %v3818_v24 = vunpack.c.h.bf16 %v3884_v63 }
 0x2c7   : > { %v1695_v36 = vsel %vm1665_vm8, %v1662_v49, %v1203_v3  ;;  %v3758_v49 = vunpack.c.h.bf16 %v3870_v17  ;;  %vm3454_vm8 = vcmask 60416  }
 0x2c8   : > { %v2583_v2 = vadd.f32 %v3818_v24, %v3754_v30 }
 0x2c9   : > { %v1237_v8 = vpop.permute.xlu1 %1236 }
 0x2ca   : > { %v1235_v32 = vpop.permute.xlu0 %1234  ;;  %v1730_v44 = vsel %vm1698_vm9, %v1697_v5, %v1237_v8  ;;  %v3821_v5 = vunpack.c.l.bf16 %v3885_v59 }
 0x2cb   : > { %v1728_v7 = vsel %vm1698_vm9, %v1695_v36, %v1235_v32  ;;  %v3871_v36 = vld [vmem:[%s4939_s25 + $0x28] sm:$0xff]   ;;  %s6361_s25 = scalar_lea.vmem %s6555_s8, %s4931_s22 }
 0x2cc   : > { %v2584_v15 = vadd.f32 %v3821_v5, %v3757_v43 }
 0x2cd   : > { %v1269_v31 = vpop.permute.xlu1 %1268 }
 0x2ce   : > { %v1267_v27 = vpop.permute.xlu0 %1266  ;;  %v1763_v53 = vsel %vm1731_vm7, %v1730_v44, %v1269_v31  ;;  %v3886_v44 = vld [vmem:[%s4945_s29 + $0x28] sm:$0xff]  }
 0x2cf   : > { %v1761_v3 = vsel %vm1731_vm7, %v1728_v7, %v1267_v27  ;;  %vm6776_vm7 = vmmov %vm6770_vm11  ;;  %v2579_v27 = vadd.f32 %v3810_v54, %v3746_v4  ;;  %v3822_v4 = vunpack.c.h.bf16 %v3885_v59  ;;  %v3761_v54 = vunpack.c.l.bf16 %v3871_v36 }
 0x2d0   : > { %vm6777_vm12 = vmmov %vm6776_vm7  ;;  %v3762_v7 = vunpack.c.h.bf16 %v3871_v36  ;;  %v3826_v56 = vunpack.c.h.bf16 %v3886_v44 }
 0x2d1   : > { %v1301_v47 = vpop.permute.xlu1 %1300  ;;  %v6171_v25 = vpop.f32.mrb[8].mxu0  ;;  %v2585_v57 = vadd.f32 %v3822_v4, %v3758_v49 }
 0x2d2   : > { %v1299_v14 = vpop.permute.xlu0 %1298  ;;  %v6176_v13 = vpop.f32.mrb[28].mxu1  ;;  %v1796_v8 = vsel %vm1764_vm1, %v1763_v53, %v1301_v47  ;;  %v2609_v47 = vpack.c.bf16 %v2579_v27, %v2578_v18  ;;  %v3825_v53 = vunpack.c.l.bf16 %v3886_v44 }
 0x2d3   : > { %v6181_v58 = vpop.f32.mrb[9].mxu0  ;;  %v6183_v23 = vpop.f32.mrb[29].mxu1  ;;  %v1794_v32 = vsel %vm1764_vm1, %v1761_v3, %v1299_v14  ;;  %vm6778_vm1 = vcmask 15360   ;;  %v2582_v14 = vadd.f32 %v3817_v1, %v3753_v11  ;;  %v2612_v60 = vpack.c.bf16 %v2585_v57, %v2584_v15 }
 0x2d4   : > { %v6187_v38 = vpop.f32.mrb[10].mxu0  ;;  %v6189_v26 = vpop.f32.mrb[30].mxu1  ;;  %vm6780_vm13 = vmmov %vm6778_vm1  ;;  %v2586_v3 = vadd.f32 %v3825_v53, %v3761_v54 }
 0x2d5   : > { %v2180_v42 = vpop.permute.xlu1 %2179  ;;  %v6193_v50 = vpop.f32.mrb[11].mxu0  ;;  %v2611_v37 = vpack.c.bf16 %v2583_v2, %v2582_v14  ;;  %vm6782_vm15 = vmmov %vm6778_vm1 }
 0x2d6   : > { %v2213_v28 = vsel %vm2181_vm10, %v1796_v8, %v2180_v42  ;;  %v6197_v31 = vpop.f32.mrb[31].mxu1  ;;  %v2178_v39 = vpop.permute.xlu0 %2177  ;;  %v2587_v8 = vadd.f32 %v3826_v56, %v3762_v7  ;;  %vm6783_vm6 = vmmov %vm6778_vm1 }
 0x2d7   : > { %v2211_v19 = vsel %vm2181_vm10, %v1794_v32, %v2178_v39  ;;  %vm6779_vm10 = vmmov %vm6778_vm1 }
 0x2d8   : > { %3992 = vmatprep.mubr.msk.bf16.mxu0 %vm6776_vm7, %v2211_v19  ;;  %4064 = vmatprep.mubr.msk.bf16.mxu1 %vm1566_vm14, %v2211_v19  ;;  %v2613_v42 = vpack.c.bf16 %v2587_v8, %v2586_v3 }
 0x2d9   : > { %3993 = vmatmul.mubr.msk.bf16.gmra.mrb[28].mxu0 %vm6777_vm12, %v2213_v28  ;;  %4065 = vmatmul.mubr.msk.bf16.gmra.mrb[16].mxu1 %vm1566_vm14, %v2213_v28  ;;  %vm6781_vm14 = vmmov %vm6778_vm1 }
 0x2da   : > { %3998 = vmatprep.mubr.msk.bf16.mxu0 %vm6778_vm1, %v2608_v51 }
 0x2e1   : > { %3999 = vmatmul.mubr.msk.bf16.vlgmr.msra.gmra.mrb[32].mxu0 %vm6779_vm10, %v2609_v47 }
 0x2e2   : > { %4002 = vmatprep.mubr.msk.bf16.mxu0 %vm6780_vm13, %v2610_v48 }
 0x2e9   : > { %4003 = vmatmul.mubr.msk.bf16.gmra.mrb[36].mxu0 %vm6781_vm14, %v2611_v37 }
 0x2ea   : > { %4006 = vmatprep.mubr.msk.bf16.mxu0 %vm6782_vm15, %v2612_v60 }
 0x2f1   : > { %4007 = vmatmul.mubr.msk.bf16.gmra.mrb[40].mxu0 %vm6783_vm6, %v2613_v42 }
 0x2fd   : > { %v6216_v33 = vpop.f32.mrb[12].mxu0 }
 0x2fe   : > { %v6218_v62 = vpop.f32.mrb[0].mxu1  ;;  %v6220_v32 = vpop.f32.mrb[13].mxu0 }
 0x2ff   : > { %v6222_v28 = vpop.f32.mrb[1].mxu1  ;;  %v6224_v39 = vpop.f32.mrb[14].mxu0 }
 0x300   : > { %v6226_v51 = vpop.f32.mrb[2].mxu1  ;;  %v6228_v19 = vpop.f32.mrb[15].mxu0 }
 0x301   : > { %v6230_v18 = vpop.f32.mrb[3].mxu1 }
 0x32c   : > { %v6232_v27 = vpop.f32.mrb[16].mxu0 }
 0x32d   : > { %v6234_v22 = vpop.f32.mrb[4].mxu1  ;;  %v6236_v0 = vpop.f32.mrb[17].mxu0 }
 0x32e   : > { %v6238_v61 = vpop.f32.mrb[5].mxu1  ;;  %v6240_v63 = vpop.f32.mrb[18].mxu0 }
 0x32f   : > { %v6242_v17 = vpop.f32.mrb[6].mxu1  ;;  %v6244_v59 = vpop.f32.mrb[19].mxu0 }
 0x330   : > { %v6246_v11 = vpop.f32.mrb[7].mxu1 }
 0x35f   : > { %v6248_v30 = vpop.f32.mrb[20].mxu0  ;;  %v6250_v1 = vpop.f32.mrb[8].mxu1 }
 0x360   : > { %6784 = vst [vmem:[#allocation6_spill] sm:$0xff] %v6248_v30  ;;  %v6252_v24 = vpop.f32.mrb[21].mxu0  ;;  %v6254_v47 = vpop.f32.mrb[9].mxu1 }
 0x361   : > { %v6256_v48 = vpop.f32.mrb[22].mxu0  ;;  %v6258_v43 = vpop.f32.mrb[10].mxu1 }
 0x362   : > { %6785 = vst [vmem:[#allocation4_spill] sm:$0xff] %v6256_v48  ;;  %v6260_v49 = vpop.f32.mrb[23].mxu0  ;;  %v3012_v5 = vpop.f32.mrb[11].mxu1 }
 0x363   : > { %6786 = vst [vmem:[#allocation17_spill] sm:$0xff] %v6260_v49 }
 0x38f   : > { %v6262_v4 = vpop.f32.mrb[24].mxu0  ;;  %v6264_v14 = vpop.f32.mrb[12].mxu1 }
 0x390   : > { %6787 = vst [vmem:[#allocation16_spill] sm:$0xff] %v6262_v4  ;;  %v6266_v2 = vpop.f32.mrb[25].mxu0  ;;  %v3025_v15 = vpop.f32.mrb[13].mxu1 }
 0x391   : > { %6788 = vst [vmem:[#allocation25_spill] sm:$0xff] %v6266_v2  ;;  %v6268_v57 = vpop.f32.mrb[26].mxu0  ;;  %v4063_v36 = vpop.f32.mrb[14].mxu1 }
 0x392   : > { %6789 = vst [vmem:[#allocation30_spill] sm:$0xff] %v6268_v57  ;;  %v6270_v44 = vpop.f32.mrb[27].mxu0  ;;  %v3028_v37 = vpop.f32.mrb[15].mxu1 }
 0x393   : > { %6790 = vst [vmem:[#allocation34_spill] sm:$0xff] %v6270_v44 }
 0x3ac   : > { %v6272_v54 = vpop.f32.mrb[28].mxu0  ;;  %v4066_v7 = vpop.f32.mrb[16].mxu1 }
 0x3ad   : > { %6791 = vst [vmem:[#allocation27_spill] sm:$0xff] %v6272_v54  ;;  %v6274_v53 = vpop.f32.mrb[29].mxu0  ;;  %v3041_v56 = vpop.f32.mrb[17].mxu1 }
 0x3ae   : > { %6792 = vst [vmem:[#allocation29_spill] sm:$0xff] %v6274_v53  ;;  %v6276_v60 = vpop.f32.mrb[30].mxu0  ;;  %v4067_v3 = vpop.f32.mrb[18].mxu1 }
 0x3af   : > { %6793 = vst [vmem:[#allocation33_spill] sm:$0xff] %v6276_v60  ;;  %v6278_v8 = vpop.f32.mrb[31].mxu0  ;;  %v3044_v42 = vpop.f32.mrb[19].mxu1 }
 0x3b0   : > { %6794 = vst [vmem:[#allocation8_spill] sm:$0xff] %v6278_v8 }
 0x3b4   : > { %v4000_v4 = vpop.f32.mrb[32].mxu0 }
 0x3b5   : > { %v2938_v2 = vadd.f32 %v6050_v45, %v4000_v4  ;;  %v2717_v57 = vpop.f32.mrb[33].mxu0 }
 0x3b6   : > { %v2930_v48 = vadd.f32 %v6055_v46, %v2717_v57  ;;  %v4001_v44 = vpop.f32.mrb[34].mxu0 }
 0x3b7   : > { %v2941_v30 = vadd.f32 %v6060_v29, %v4001_v44  ;;  %v2720_v54 = vpop.f32.mrb[35].mxu0 }
 0x3b8   : > { %v2933_v49 = vadd.f32 %v6065_v10, %v2720_v54  ;;  %3088 = vrot.lane.b32.xlu0 %v2930_v48, %s4217_s12 }
 0x3ba   : > { %3090 = vrot.lane.b32.xlu1 %v2933_v49, %s4217_s12 }
 0x3bc   : > { %3092 = vrot.lane.b32.xlu0 %v2938_v2, %s4217_s12  ;;  %v4004_v60 = vpop.f32.mrb[36].mxu0 }
 0x3bd   : > { %v2954_v8 = vadd.f32 %v6103_v21, %v4004_v60  ;;  %v2733_v53 = vpop.f32.mrb[37].mxu0 }
 0x3be   : > { %v2946_v45 = vadd.f32 %v6107_v34, %v2733_v53  ;;  %3094 = vrot.lane.b32.xlu1 %v2941_v30, %s4217_s12  ;;  %v4005_v46 = vpop.f32.mrb[38].mxu0 }
 0x3bf   : > { %v2957_v29 = vadd.f32 %v6114_v12, %v4005_v46  ;;  %v2736_v4 = vpop.f32.mrb[39].mxu0 }
 0x3c0   : > { %v2949_v10 = vadd.f32 %v6121_v41, %v2736_v4  ;;  %3096 = vrot.lane.b32.xlu0 %v2946_v45, %s4217_s12 }
 0x3c2   : > { %3098 = vrot.lane.b32.xlu1 %v2949_v10, %s4217_s12 }
 0x3c4   : > { %3100 = vrot.lane.b32.xlu0 %v2954_v8, %s4217_s12  ;;  %v4008_v48 = vpop.f32.mrb[40].mxu0 }
 0x3c5   : > { %v2970_v21 = vadd.f32 %v6176_v13, %v4008_v48  ;;  %v2749_v49 = vpop.f32.mrb[41].mxu0  ;;  %v6339_v13 = vld [vmem:[%s6553_s6] ss:$0 sm:$0xff] }
 0x3c6   : > { %v2962_v34 = vadd.f32 %v6183_v23, %v2749_v49  ;;  %3102 = vrot.lane.b32.xlu1 %v2957_v29, %s4217_s12  ;;  %v4009_v30 = vpop.f32.mrb[42].mxu0 }
 0x3c7   : > { %v2973_v12 = vadd.f32 %v6189_v26, %v4009_v30  ;;  %v2752_v2 = vpop.f32.mrb[43].mxu0  ;;  %v6344_v26 = vld [vmem:[%s6554_s7] ss:$0 sm:$0xff] }
 0x3c8   : > { %v2965_v41 = vadd.f32 %v6197_v31, %v2752_v2  ;;  %3104 = vrot.lane.b32.xlu0 %v2962_v34, %s4217_s12 }
 0x3ca   : > { %3106 = vrot.lane.b32.xlu1 %v2965_v41, %s4217_s12 }
 0x3cc   : > { %3108 = vrot.lane.b32.xlu0 %v2970_v21, %s4217_s12 }
 0x3ce   : > { %3110 = vrot.lane.b32.xlu1 %v2973_v12, %s4217_s12 }
 0x3d0   : > { %3112 = vrot.lane.b32.xlu0 %v6222_v28, %s4217_s12 }
 0x3d2   : > { %3114 = vrot.lane.b32.xlu1 %v6230_v18, %s4217_s12 }
 0x3d4   : > { %3116 = vrot.lane.b32.xlu0 %v6218_v62, %s4217_s12 }
 0x3d6   : > { %3118 = vrot.lane.b32.xlu1 %v6226_v51, %s4217_s12 }
 0x3d8   : > { %3120 = vrot.lane.b32.xlu0 %v6238_v61, %s4217_s12 }
 0x3da   : > { %3122 = vrot.lane.b32.xlu1 %v6246_v11, %s4217_s12 }
 0x3dc   : > { %3124 = vrot.lane.b32.xlu0 %v6234_v22, %s4217_s12 }
 0x3de   : > { %3126 = vrot.lane.b32.xlu1 %v6242_v17, %s4217_s12 }
 0x3e0   : > { %3128 = vrot.lane.b32.xlu0 %v6254_v47, %s4217_s12 }
 0x3e2   : > { %3130 = vrot.lane.b32.xlu1 %v3012_v5, %s4217_s12 }
 0x3e4   : > { %3132 = vrot.lane.b32.xlu0 %v6250_v1, %s4217_s12 }
 0x3e6   : > { %3134 = vrot.lane.b32.xlu1 %v6258_v43, %s4217_s12 }
 0x3e8   : > { %3136 = vrot.lane.b32.xlu0 %v3025_v15, %s4217_s12 }
 0x3ea   : > { %3138 = vrot.lane.b32.xlu1 %v3028_v37, %s4217_s12 }
 0x3ec   : > { %3140 = vrot.lane.b32.xlu0 %v6264_v14, %s4217_s12 }
 0x3ee   : > { %3142 = vrot.lane.b32.xlu1 %v4063_v36, %s4217_s12 }
 0x3f0   : > { %3144 = vrot.lane.b32.xlu0 %v3041_v56, %s4217_s12 }
 0x3f2   : > { %3146 = vrot.lane.b32.xlu1 %v3044_v42, %s4217_s12 }
 0x3f4   : > { %3148 = vrot.lane.b32.xlu0 %v4066_v7, %s4217_s12 }
 0x3f6   : > { %3150 = vrot.lane.b32.xlu1 %v4067_v3, %s4217_s12 }
 0x42a   : > { %v3089_v23 = vpop.permute.xlu0 %3088 }
 0x42b   : > { %v3184_v31 = vsel %vm1302_vm2, %v6052_v55, %v3089_v23 }
 0x42c   : > { %v3223_v62 = vmul.f32 %v6339_v13, %v3184_v31  ;;  %v3091_v28 = vpop.permute.xlu1 %3090 }
 0x42d   : > { %v3185_v51 = vsel %vm1302_vm2, %v6063_v40, %v3091_v28 }
 0x42e   : > { %v3262_v18 = vadd.f32 %v6344_v26, %v3223_v62  ;;  %v3224_v22 = vmul.f32 %v6339_v13, %v3185_v51  ;;  %v3093_v61 = vpop.permute.xlu0 %3092 }
 0x42f   : > { %v3186_v17 = vsel %vm1302_vm2, %v6047_v20, %v3093_v61 }
 0x430   : > { %v3294_v11 = vmax.f32 %v3262_v18, 0.0  ;;  %v3263_v1 = vadd.f32 %v6344_v26, %v3224_v22  ;;  %v3225_v47 = vmul.f32 %v6339_v13, %v3186_v17  ;;  %v3095_v55 = vpop.permute.xlu1 %3094 }
 0x431   : > { %v3187_v40 = vsel %vm1302_vm2, %v6057_v35, %v3095_v55 }
 0x432   : > { %v3707_v43 = vpack.c.bf16 %v3294_v11, %v3294_v11  ;;  %v3295_v5 = vmax.f32 %v3263_v1, 0.0  ;;  %v3264_v20 = vadd.f32 %v6344_v26, %v3225_v47  ;;  %v3226_v14 = vmul.f32 %v6339_v13, %v3187_v40  ;;  %v3097_v15 = vpop.permute.xlu0 %3096 }
 0x433   : > { %v3188_v57 = vsel %vm1302_vm2, %v6105_v52, %v3097_v15 }
 0x434   : > { %3455 = vst.msk [vmem:[%s6361_s25] sm:$0xf] %vm3454_vm8, %v3707_v43  ;;  %v3708_v36 = vpack.c.bf16 %v3295_v5, %v3295_v5  ;;  %v3296_v44 = vmax.f32 %v3264_v20, 0.0  ;;  %v3265_v37 = vadd.f32 %v6344_v26, %v3226_v14  ;;  %v3227_v54 = vmul.f32 %v6339_v13, %v3188_v57  ;;  %v3099_v35 = vpop.permute.xlu1 %3098 }
 0x435   : > { %v3189_v7 = vsel %vm1302_vm2, %v6118_v16, %v3099_v35 }
 0x436   : > { %3456 = vst.msk [vmem:[%s6361_s25 + $0x4] sm:$0xf] %vm3454_vm8, %v3708_v36  ;;  %v3709_v53 = vpack.c.bf16 %v3296_v44, %v3296_v44  ;;  %v3297_v56 = vmax.f32 %v3265_v37, 0.0  ;;  %v3266_v60 = vadd.f32 %v6344_v26, %v3227_v54  ;;  %v3228_v52 = vmul.f32 %v6339_v13, %v3189_v7  ;;  %v3101_v3 = vpop.permute.xlu0 %3100 }
 0x437   : > { %v3190_v8 = vsel %vm1302_vm2, %v6101_v6, %v3101_v3 }
 0x438   : > { %3457 = vst.msk [vmem:[%s6361_s25 + $0x8] sm:$0xf] %vm3454_vm8, %v3709_v53  ;;  %v3710_v42 = vpack.c.bf16 %v3297_v56, %v3297_v56  ;;  %v3298_v45 = vmax.f32 %v3266_v60, 0.0  ;;  %v3267_v46 = vadd.f32 %v6344_v26, %v3228_v52  ;;  %v3229_v16 = vmul.f32 %v6339_v13, %v3190_v8  ;;  %v3103_v29 = vpop.permute.xlu1 %3102 }
 0x439   : > { %v3191_v4 = vsel %vm1302_vm2, %v6112_v9, %v3103_v29 }
 0x43a   : > { %3458 = vst.msk [vmem:[%s6361_s25 + $0xc] sm:$0xf] %vm3454_vm8, %v3710_v42  ;;  %v3711_v10 = vpack.c.bf16 %v3298_v45, %v3298_v45  ;;  %v3299_v48 = vmax.f32 %v3267_v46, 0.0  ;;  %v3268_v21 = vadd.f32 %v6344_v26, %v3229_v16  ;;  %v3230_v6 = vmul.f32 %v6339_v13, %v3191_v4  ;;  %v3105_v49 = vpop.permute.xlu0 %3104 }
 0x43b   : > { %v3192_v34 = vsel %vm1302_vm2, %v6181_v58, %v3105_v49 }
 0x43c   : > { %3459 = vst.msk [vmem:[%s6361_s25 + $0x10] sm:$0xf] %vm3454_vm8, %v3711_v10  ;;  %v3712_v30 = vpack.c.bf16 %v3299_v48, %v3299_v48  ;;  %v3300_v12 = vmax.f32 %v3268_v21, 0.0  ;;  %v3269_v2 = vadd.f32 %v6344_v26, %v3230_v6  ;;  %v3231_v9 = vmul.f32 %v6339_v13, %v3192_v34  ;;  %v3107_v41 = vpop.permute.xlu1 %3106 }
 0x43d   : > { %v3193_v23 = vsel %vm1302_vm2, %v6193_v50, %v3107_v41 }
 0x43e   : > { %3460 = vst.msk [vmem:[%s6361_s25 + $0x14] sm:$0xf] %vm3454_vm8, %v3712_v30  ;;  %v3713_v31 = vpack.c.bf16 %v3300_v12, %v3300_v12  ;;  %v3301_v62 = vmax.f32 %v3269_v2, 0.0  ;;  %v3270_v28 = vadd.f32 %v6344_v26, %v3231_v9  ;;  %v3232_v58 = vmul.f32 %v6339_v13, %v3193_v23  ;;  %v3109_v51 = vpop.permute.xlu0 %3108 }
 0x43f   : > { %v3194_v18 = vsel %vm1302_vm2, %v6171_v25, %v3109_v51 }
 0x440   : > { %3461 = vst.msk [vmem:[%s6361_s25 + $0x18] sm:$0xf] %vm3454_vm8, %v3713_v31  ;;  %v3714_v22 = vpack.c.bf16 %v3301_v62, %v3301_v62  ;;  %v3302_v61 = vmax.f32 %v3270_v28, 0.0  ;;  %v3271_v17 = vadd.f32 %v6344_v26, %v3232_v58  ;;  %v3233_v50 = vmul.f32 %v6339_v13, %v3194_v18  ;;  %v3111_v11 = vpop.permute.xlu1 %3110 }
 0x441   : > { %v3195_v1 = vsel %vm1302_vm2, %v6187_v38, %v3111_v11  ;;  %v6795_v11 = vld [vmem:[#allocation17_spill] sm:$0xff] }
 0x442   : > { %3462 = vst.msk [vmem:[%s6361_s25 + $0x1c] sm:$0xf] %vm3454_vm8, %v3714_v22  ;;  %v3715_v47 = vpack.c.bf16 %v3302_v61, %v3302_v61  ;;  %v3303_v55 = vmax.f32 %v3271_v17, 0.0  ;;  %v3272_v40 = vadd.f32 %v6344_v26, %v3233_v50  ;;  %v3234_v25 = vmul.f32 %v6339_v13, %v3195_v1  ;;  %v3113_v43 = vpop.permute.xlu0 %3112 }
 0x443   : > { %v3196_v5 = vsel %vm1302_vm2, %v6220_v32, %v3113_v43  ;;  %v6796_v43 = vld [vmem:[#allocation6_spill] sm:$0xff] }
 0x444   : > { %3463 = vst.msk [vmem:[%s6361_s25 + $0x20] sm:$0xf] %vm3454_vm8, %v3715_v47  ;;  %v3716_v20 = vpack.c.bf16 %v3303_v55, %v3303_v55  ;;  %v3304_v14 = vmax.f32 %v3272_v40, 0.0  ;;  %v3273_v15 = vadd.f32 %v6344_v26, %v3234_v25  ;;  %v3235_v38 = vmul.f32 %v6339_v13, %v3196_v5  ;;  %v3115_v57 = vpop.permute.xlu1 %3114 }
 0x445   : > { %v3197_v36 = vsel %vm1302_vm2, %v6228_v19, %v3115_v57 }
 0x446   : > { %3464 = vst.msk [vmem:[%s6361_s25 + $0x24] sm:$0xf] %vm3454_vm8, %v3716_v20  ;;  %v3717_v44 = vpack.c.bf16 %v3304_v14, %v3304_v14  ;;  %v3305_v37 = vmax.f32 %v3273_v15, 0.0  ;;  %v3274_v54 = vadd.f32 %v6344_v26, %v3235_v38  ;;  %v3236_v32 = vmul.f32 %v6339_v13, %v3197_v36  ;;  %v3117_v35 = vpop.permute.xlu0 %3116  ;;  %v6797_v36 = vld [vmem:[#allocation4_spill] sm:$0xff] }
 0x447   : > { %v3198_v7 = vsel %vm1302_vm2, %v6216_v33, %v3117_v35 }
 0x448   : > { %3465 = vst.msk [vmem:[%s6361_s25 + $0x28] sm:$0xf] %vm3454_vm8, %v3717_v44  ;;  %v3718_v53 = vpack.c.bf16 %v3305_v37, %v3305_v37  ;;  %v3306_v56 = vmax.f32 %v3274_v54, 0.0  ;;  %v3275_v60 = vadd.f32 %v6344_v26, %v3236_v32  ;;  %v3237_v19 = vmul.f32 %v6339_v13, %v3198_v7  ;;  %v3119_v52 = vpop.permute.xlu1 %3118 }
 0x449   : > { %v3199_v3 = vsel %vm1302_vm2, %v6224_v39, %v3119_v52 }
 0x44a   : > { %3466 = vst.msk [vmem:[%s6361_s25 + $0x2c] sm:$0xf] %vm3454_vm8, %v3718_v53  ;;  %v3719_v8 = vpack.c.bf16 %v3306_v56, %v3306_v56  ;;  %v3307_v42 = vmax.f32 %v3275_v60, 0.0  ;;  %v3276_v45 = vadd.f32 %v6344_v26, %v3237_v19  ;;  %v3238_v33 = vmul.f32 %v6339_v13, %v3199_v3  ;;  %v3121_v46 = vpop.permute.xlu0 %3120  ;;  %v6798_v53 = vld [vmem:[#allocation25_spill] sm:$0xff] }
 0x44b   : > { %v3200_v16 = vsel %vm1302_vm2, %v6236_v0, %v3121_v46 }
 0x44c   : > { %3467 = vst.msk [vmem:[%s6361_s25 + $0x30] sm:$0xf] %vm3454_vm8, %v3719_v8  ;;  %v3720_v29 = vpack.c.bf16 %v3307_v42, %v3307_v42  ;;  %v3308_v4 = vmax.f32 %v3276_v45, 0.0  ;;  %v3277_v10 = vadd.f32 %v6344_v26, %v3238_v33  ;;  %v3239_v39 = vmul.f32 %v6339_v13, %v3200_v16  ;;  %v3123_v48 = vpop.permute.xlu1 %3122  ;;  %v6799_v42 = vld [vmem:[#allocation34_spill] sm:$0xff] }
 0x44d   : > { %v3201_v21 = vsel %vm1302_vm2, %v6244_v59, %v3123_v48 }
 0x44e   : > { %3468 = vst.msk [vmem:[%s6361_s25 + $0x34] sm:$0xf] %vm3454_vm8, %v3720_v29  ;;  %v3721_v6 = vpack.c.bf16 %v3308_v4, %v3308_v4  ;;  %v3309_v49 = vmax.f32 %v3277_v10, 0.0  ;;  %v3278_v34 = vadd.f32 %v6344_v26, %v3239_v39  ;;  %v3240_v0 = vmul.f32 %v6339_v13, %v3201_v21  ;;  %v3125_v30 = vpop.permute.xlu0 %3124  ;;  %v6800_v10 = vld [vmem:[#allocation16_spill] sm:$0xff] }
 0x44f   : > { %v3202_v12 = vsel %vm1302_vm2, %v6232_v27, %v3125_v30 }
 0x450   : > { %3469 = vst.msk [vmem:[%s6361_s25 + $0x38] sm:$0xf] %vm3454_vm8, %v3721_v6  ;;  %v3722_v2 = vpack.c.bf16 %v3309_v49, %v3309_v49  ;;  %v3310_v9 = vmax.f32 %v3278_v34, 0.0  ;;  %v3279_v41 = vadd.f32 %v6344_v26, %v3240_v0  ;;  %v3241_v59 = vmul.f32 %v6339_v13, %v3202_v12  ;;  %v3127_v23 = vpop.permute.xlu1 %3126  ;;  %v6801_v0 = vld [vmem:[#allocation30_spill] sm:$0xff] }
 0x451   : > { %v3203_v31 = vsel %vm1302_vm2, %v6240_v63, %v3127_v23  ;;  %v6802_v23 = vld [vmem:[#allocation29_spill] sm:$0xff] }
 0x452   : > { %3470 = vst.msk [vmem:[%s6361_s25 + $0x3c] sm:$0xf] %vm3454_vm8, %v3722_v2  ;;  %v3723_v62 = vpack.c.bf16 %v3310_v9, %v3310_v9  ;;  %v3311_v28 = vmax.f32 %v3279_v41, 0.0  ;;  %v3280_v58 = vadd.f32 %v6344_v26, %v3241_v59  ;;  %v3242_v27 = vmul.f32 %v6339_v13, %v3203_v31  ;;  %v3129_v51 = vpop.permute.xlu0 %3128 }
 0x453   : > { %v3204_v18 = vsel %vm1302_vm2, %v6252_v24, %v3129_v51 }
 0x454   : > { %3471 = vst.msk [vmem:[%s6361_s25 + $0x40] sm:$0xf] %vm3454_vm8, %v3723_v62  ;;  %v3724_v22 = vpack.c.bf16 %v3311_v28, %v3311_v28  ;;  %v3312_v61 = vmax.f32 %v3280_v58, 0.0  ;;  %v3281_v17 = vadd.f32 %v6344_v26, %v3242_v27  ;;  %v3243_v63 = vmul.f32 %v6339_v13, %v3204_v18  ;;  %v3131_v50 = vpop.permute.xlu1 %3130  ;;  %v6803_v18 = vld [vmem:[#allocation8_spill] sm:$0xff] }
 0x455   : > { %v3205_v1 = vsel %vm1302_vm2, %v6795_v11, %v3131_v50 }
 0x456   : > { %3472 = vst.msk [vmem:[%s6361_s25 + $0x44] sm:$0xf] %vm3454_vm8, %v3724_v22  ;;  %v3725_v47 = vpack.c.bf16 %v3312_v61, %v3312_v61  ;;  %v3313_v55 = vmax.f32 %v3281_v17, 0.0  ;;  %v3282_v40 = vadd.f32 %v6344_v26, %v3243_v63  ;;  %v3244_v24 = vmul.f32 %v6339_v13, %v3205_v1  ;;  %v3133_v25 = vpop.permute.xlu0 %3132  ;;  %v6804_v1 = vld [vmem:[#allocation27_spill] sm:$0xff] }
 0x457   : > { %v3206_v5 = vsel %vm1302_vm2, %v6796_v43, %v3133_v25 }
 0x458   : > { %3473 = vst.msk [vmem:[%s6361_s25 + $0x48] sm:$0xf] %vm3454_vm8, %v3725_v47  ;;  %v3726_v20 = vpack.c.bf16 %v3313_v55, %v3313_v55  ;;  %v3314_v14 = vmax.f32 %v3282_v40, 0.0  ;;  %v3283_v15 = vadd.f32 %v6344_v26, %v3244_v24  ;;  %v3245_v38 = vmul.f32 %v6339_v13, %v3206_v5  ;;  %v3135_v57 = vpop.permute.xlu1 %3134  ;;  %v6805_v5 = vld [vmem:[#allocation33_spill] sm:$0xff] }
 0x459   : > { %v3207_v44 = vsel %vm1302_vm2, %v6797_v36, %v3135_v57 }
 0x45a   : > { %3474 = vst.msk [vmem:[%s6361_s25 + $0x4c] sm:$0xf] %vm3454_vm8, %v3726_v20  ;;  %v3727_v37 = vpack.c.bf16 %v3314_v14, %v3314_v14  ;;  %v3315_v54 = vmax.f32 %v3283_v15, 0.0  ;;  %v3284_v32 = vadd.f32 %v6344_v26, %v3245_v38  ;;  %v3246_v35 = vmul.f32 %v6339_v13, %v3207_v44  ;;  %v3137_v7 = vpop.permute.xlu0 %3136 }
 0x45b   : > { %v3208_v56 = vsel %vm1302_vm2, %v6798_v53, %v3137_v7 }
 0x45c   : > { %3475 = vst.msk [vmem:[%s6361_s25 + $0x50] sm:$0xf] %vm3454_vm8, %v3727_v37  ;;  %v3728_v60 = vpack.c.bf16 %v3315_v54, %v3315_v54  ;;  %v3316_v19 = vmax.f32 %v3284_v32, 0.0  ;;  %v3285_v52 = vadd.f32 %v6344_v26, %v3246_v35  ;;  %v3247_v3 = vmul.f32 %v6339_v13, %v3208_v56  ;;  %v3139_v8 = vpop.permute.xlu1 %3138 }
 0x45d   : > { %v3209_v45 = vsel %vm1302_vm2, %v6799_v42, %v3139_v8 }
 0x45e   : > { %3476 = vst.msk [vmem:[%s6361_s25 + $0x54] sm:$0xf] %vm3454_vm8, %v3728_v60  ;;  %v3729_v33 = vpack.c.bf16 %v3316_v19, %v3316_v19  ;;  %v3317_v46 = vmax.f32 %v3285_v52, 0.0  ;;  %v3286_v16 = vadd.f32 %v6344_v26, %v3247_v3  ;;  %v3248_v29 = vmul.f32 %v6339_v13, %v3209_v45  ;;  %v3141_v4 = vpop.permute.xlu0 %3140 }
 0x45f   : > { %v3210_v39 = vsel %vm1302_vm2, %v6800_v10, %v3141_v4 }
 0x460   : > { %3477 = vst.msk [vmem:[%s6361_s25 + $0x58] sm:$0xf] %vm3454_vm8, %v3729_v33  ;;  %v3730_v48 = vpack.c.bf16 %v3317_v46, %v3317_v46  ;;  %v3318_v21 = vmax.f32 %v3286_v16, 0.0  ;;  %v3287_v6 = vadd.f32 %v6344_v26, %v3248_v29  ;;  %v3249_v49 = vmul.f32 %v6339_v13, %v3210_v39  ;;  %v3143_v34 = vpop.permute.xlu1 %3142 }
 0x461   : > { %v3211_v30 = vsel %vm1302_vm2, %v6801_v0, %v3143_v34 }
 0x462   : > { %3478 = vst.msk [vmem:[%s6361_s25 + $0x5c] sm:$0xf] %vm3454_vm8, %v3730_v48  ;;  %v3731_v12 = vpack.c.bf16 %v3318_v21, %v3318_v21  ;;  %v3319_v2 = vmax.f32 %v3287_v6, 0.0  ;;  %v3288_v9 = vadd.f32 %v6344_v26, %v3249_v49  ;;  %v3250_v41 = vmul.f32 %v6339_v13, %v3211_v30  ;;  %v3145_v59 = vpop.permute.xlu0 %3144 }
 0x463   : > { %v3212_v31 = vsel %vm1302_vm2, %v6802_v23, %v3145_v59 }
 0x464   : > { %3479 = vst.msk [vmem:[%s6361_s25 + $0x60] sm:$0xf] %vm3454_vm8, %v3731_v12  ;;  %v3732_v62 = vpack.c.bf16 %v3319_v2, %v3319_v2  ;;  %v3320_v28 = vmax.f32 %v3288_v9, 0.0  ;;  %v3289_v58 = vadd.f32 %v6344_v26, %v3250_v41  ;;  %v3251_v27 = vmul.f32 %v6339_v13, %v3212_v31  ;;  %v3147_v51 = vpop.permute.xlu1 %3146 }
 0x465   : > { %v3213_v22 = vsel %vm1302_vm2, %v6803_v18, %v3147_v51 }
 0x466   : > { %3480 = vst.msk [vmem:[%s6361_s25 + $0x64] sm:$0xf] %vm3454_vm8, %v3732_v62  ;;  %v3733_v61 = vpack.c.bf16 %v3320_v28, %v3320_v28  ;;  %v3321_v17 = vmax.f32 %v3289_v58, 0.0  ;;  %v3290_v63 = vadd.f32 %v6344_v26, %v3251_v27  ;;  %v3252_v50 = vmul.f32 %v6339_v13, %v3213_v22  ;;  %v3149_v11 = vpop.permute.xlu0 %3148 }
 0x467   : > { %v3214_v47 = vsel %vm1302_vm2, %v6804_v1, %v3149_v11 }
 0x468   : > { %3481 = vst.msk [vmem:[%s6361_s25 + $0x68] sm:$0xf] %vm3454_vm8, %v3733_v61  ;;  %v3734_v55 = vpack.c.bf16 %v3321_v17, %v3321_v17  ;;  %v3322_v40 = vmax.f32 %v3290_v63, 0.0  ;;  %v3291_v24 = vadd.f32 %v6344_v26, %v3252_v50  ;;  %v3253_v25 = vmul.f32 %v6339_v13, %v3214_v47  ;;  %v3151_v43 = vpop.permute.xlu1 %3150 }
 0x469   : > { %v3215_v20 = vsel %vm1302_vm2, %v6805_v5, %v3151_v43 }
 0x46a   : > { %3482 = vst.msk [vmem:[%s6361_s25 + $0x6c] sm:$0xf] %vm3454_vm8, %v3734_v55  ;;  %v3735_v14 = vpack.c.bf16 %v3322_v40, %v3322_v40  ;;  %v3323_v15 = vmax.f32 %v3291_v24, 0.0  ;;  %v3292_v38 = vadd.f32 %v6344_v26, %v3253_v25  ;;  %v3254_v57 = vmul.f32 %v6339_v13, %v3215_v20 }
 0x46c   : > { %3483 = vst.msk [vmem:[%s6361_s25 + $0x70] sm:$0xf] %vm3454_vm8, %v3735_v14  ;;  %v3736_v36 = vpack.c.bf16 %v3323_v15, %v3323_v15  ;;  %v3324_v44 = vmax.f32 %v3292_v38, 0.0  ;;  %v3293_v37 = vadd.f32 %v6344_v26, %v3254_v57 }
 0x46e   : > { %3484 = vst.msk [vmem:[%s6361_s25 + $0x74] sm:$0xf] %vm3454_vm8, %v3736_v36  ;;  %v3737_v54 = vpack.c.bf16 %v3324_v44, %v3324_v44  ;;  %v3325_v32 = vmax.f32 %v3293_v37, 0.0 }
 0x470   : > { %3485 = vst.msk [vmem:[%s6361_s25 + $0x78] sm:$0xf] %vm3454_vm8, %v3737_v54  ;;  %v3738_v35 = vpack.c.bf16 %v3325_v32, %v3325_v32 }
 0x472   : > { %3486 = vst.msk [vmem:[%s6361_s25 + $0x7c] sm:$0xf] %vm3454_vm8, %v3738_v35 }
 0x473 PF: > { %s18_s27 = sadd.s32 1, %s4215_s27  }
 0x474   : > { %p15_p5 = scmp.ge.s32.totalorder %s18_s27, 4  }
 0x476   :  { %17 = sbr.rel (!%p15_p5) target bundleno = 1 (0x1), region = 88 }

</bundles_post_ra>
